<compile_context>
chip_gen: v6e
topology: v6e:2x2x1
jax: 0.10.0
libtpu: 0.0.40
codegen_flags: <defaults>
</compile_context>

<pallas_src>
import math
from functools import partial

import jax
import jax.numpy as jnp
from jax.experimental import pallas as pl
from jax.experimental.pallas import tpu as pltpu

EPS = 1e-5                      # nn.LayerNorm default eps
_SQRT1_2 = 0.7071067811865476   # 1/sqrt(2)


# --------------------------- in-kernel helpers ---------------------------------

def _layernorm_cn(v, g, b):
    """LayerNorm over the channel axis for channel-major (C, N) activations."""
    mu = jnp.mean(v, axis=0, keepdims=True)
    var = jnp.mean((v - mu) ** 2, axis=0, keepdims=True)
    return (v - mu) * jax.lax.rsqrt(var + EPS) * g + b


def _erf_approx(z):
    """Abramowitz & Stegun 7.1.26 erf approximation (|err| <= 1.5e-7).

    Uses only exp / div / mul / add / select, all of which lower cleanly in
    Mosaic (avoids relying on a lax.erf lowering inside the kernel).
    """
    a1, a2, a3, a4, a5 = 0.254829592, -0.284496736, 1.421413741, -1.453152027, 1.061405429
    pcoef = 0.3275911
    az = jnp.abs(z)
    t = 1.0 / (1.0 + pcoef * az)
    poly = ((((a5 * t + a4) * t + a3) * t + a2) * t + a1) * t
    e = 1.0 - poly * jnp.exp(-az * az)
    return jnp.where(z >= 0, e, -e)


def _gelu(v):
    """Exact (erf-based) GELU, matching torch.nn.functional.gelu default."""
    return 0.5 * v * (1.0 + _erf_approx(v * _SQRT1_2))


# ------------------------------- the kernel ------------------------------------

def _transformer_kernel(n_heads,
                        x_ref, pos_ref,
                        wqkv_ref, wproj_ref, w1_ref, w2_ref, par_ref,
                        out_ref):
    """One (batch b, layer d) grid step.  All activations are (C, N)."""
    d_idx = pl.program_id(1)

    # First layer of this batch element: seed the resident activation from x.
    @pl.when(d_idx == 0)
    def _():
        out_ref[...] = x_ref[...]

    c = out_ref.shape[1]
    n = out_ref.shape[2]
    mlp = w1_ref.shape[1]
    dh = c // n_heads
    scale = dh ** -0.5

    # Packed per-layer vectors, stored column-wise: shape (P, 8) f32.
    pp = par_ref[0]
    ln1_g, ln1_b = pp[:c, 0:1], pp[:c, 1:2]
    bproj = pp[:c, 2:3]
    ln2_g, ln2_b = pp[:c, 3:4], pp[:c, 4:5]
    b1 = pp[:mlp, 5:6]
    b2 = pp[:c, 6:7]

    # x = x + pos (pos re-added every layer, as in the PyTorch module)
    x = out_ref[0].astype(jnp.float32) + pos_ref[0].astype(jnp.float32)   # (C, N)

    # ---- Residual(PreNormDrop(SelfAttention)); dropout = identity (eval) -----
    h = _layernorm_cn(x, ln1_g, ln1_b)                                    # f32 (C, N)

    # Single 2-D QKV matmul: (3C, C) @ (C, N) -> (3C, N), bf16 operands, f32 acc.
    qkv = jnp.dot(wqkv_ref[0], h.astype(jnp.bfloat16),
                  preferred_element_type=jnp.float32)                     # (3C, N)
    q = qkv[:c] * scale          # scale applied in f32 after the matmul
    k = qkv[c:2 * c]
    v = qkv[2 * c:]

    # Per-head operands for the attention contractions: (heads, N, dh) bf16.
    qh = jnp.swapaxes(q.reshape(n_heads, dh, n), 1, 2).astype(jnp.bfloat16)
    kh = jnp.swapaxes(k.reshape(n_heads, dh, n), 1, 2).astype(jnp.bfloat16)
    vh = jnp.swapaxes(v.reshape(n_heads, dh, n), 1, 2).astype(jnp.bfloat16)

    # Scores (heads, N, N) in f32; softmax in f32 with exact division.
    s = jnp.einsum('hqd,hkd->hqk', qh, kh,
                   preferred_element_type=jnp.float32)
    s = s - jnp.max(s, axis=-1, keepdims=True)
    e = jnp.exp(s)
    p = e * (1.0 / jnp.sum(e, axis=-1, keepdims=True))

    # PV contraction with bf16 operands, f32 accumulation: (heads, N, dh).
    o = jnp.einsum('hqk,hkd->hqd', p.astype(jnp.bfloat16), vh,
                   preferred_element_type=jnp.float32)

    # Merge heads back to channel-major (C, N) and apply a single (C, C) proj.
    o_cn = jnp.swapaxes(o, 1, 2).reshape(c, n)                            # (C, N)
    attn = jnp.dot(wproj_ref[0], o_cn.astype(jnp.bfloat16),
                   preferred_element_type=jnp.float32) + bproj
    x = x + attn

    # ---- Residual(PreNorm(FeedForward)) --------------------------------------
    h2 = _layernorm_cn(x, ln2_g, ln2_b)
    f = jnp.dot(w1_ref[0], h2.astype(jnp.bfloat16),
                preferred_element_type=jnp.float32) + b1                  # (mlp, N)
    f = _gelu(f)
    f = jnp.dot(w2_ref[0], f.astype(jnp.bfloat16),
                preferred_element_type=jnp.float32) + b2                  # (C, N)
    x = x + f

    out_ref[0] = x.astype(out_ref.dtype)


# ------------------------------- the wrapper ------------------------------------

def transformer_forward(x, pos, params, n_heads):
    """x: (B, N, C) f32, pos: (1, N, C) f32; params from prepare_params()."""
    wqkv_s, wproj_s, w1_s, w2_s, par_s = params
    B, N, C = x.shape
    depth = wqkv_s.shape[0]
    mlp = w1_s.shape[1]
    P = par_s.shape[1]

    # Channel-major layout so N=128 is the lane (minor) dimension in-kernel.
    x_t = jnp.swapaxes(x, 1, 2)       # (B, C, N)
    pos_t = jnp.swapaxes(pos, 1, 2)   # (1, C, N)

    seq_spec = pl.BlockSpec((1, C, N), lambda b, d: (b, 0, 0))
    pos_spec = pl.BlockSpec((1, C, N), lambda b, d: (0, 0, 0))
    wqkv_spec = pl.BlockSpec((1, 3 * C, C), lambda b, d: (d, 0, 0))
    wproj_spec = pl.BlockSpec((1, C, C), lambda b, d: (d, 0, 0))
    w1_spec = pl.BlockSpec((1, mlp, C), lambda b, d: (d, 0, 0))
    w2_spec = pl.BlockSpec((1, C, mlp), lambda b, d: (d, 0, 0))
    par_spec = pl.BlockSpec((1, P, 8), lambda b, d: (d, 0, 0))

    out_t = pl.pallas_call(
        partial(_transformer_kernel, n_heads),
        out_shape=jax.ShapeDtypeStruct((B, C, N), x.dtype),
        grid_spec=pltpu.PrefetchScalarGridSpec(
            num_scalar_prefetch=0,
            grid=(B, depth),                       # batch outer, depth inner
            in_specs=[seq_spec, pos_spec, wqkv_spec, wproj_spec,
                      w1_spec, w2_spec, par_spec],
            out_specs=pl.BlockSpec((1, C, N), lambda b, d: (b, 0, 0)),
        ),
        compiler_params=pltpu.CompilerParams(
            dimension_semantics=("parallel", "arbitrary"),
            vmem_limit_bytes=32 * 1024 * 1024,     # working set << limit
        ),
    )(x_t, pos_t, wqkv_s, wproj_s, w1_s, w2_s, par_s)

    return jnp.swapaxes(out_t, 1, 2)               # back to (B, N, C)


# --------------------------- parameter handling ---------------------------------

def init_layer_params(key, C, mlp_dim):
    """Per-layer parameters in PyTorch (out, in) layout; biases / LN are 1-D."""
    ks = jax.random.split(key, 11)

    def lin_w(k, fan_out, fan_in):
        bound = 1.0 / math.sqrt(fan_in)
        return jax.random.uniform(k, (fan_out, fan_in), jnp.float32, -bound, bound)

    def lin_b(k, fan_in, n):
        bound = 1.0 / math.sqrt(fan_in)
        return jax.random.uniform(k, (n,), jnp.float32, -bound, bound)

    ln1_g = 1.0 + 0.1 * jax.random.normal(ks[0], (C,), jnp.float32)
    ln1_b = 0.1 * jax.random.normal(ks[1], (C,), jnp.float32)
    wqkv = lin_w(ks[2], 3 * C, C)           # qkv_bias=False
    wproj = lin_w(ks[3], C, C)
    bproj = lin_b(ks[4], C, C)
    ln2_g = 1.0 + 0.1 * jax.random.normal(ks[5], (C,), jnp.float32)
    ln2_b = 0.1 * jax.random.normal(ks[6], (C,), jnp.float32)
    w1 = lin_w(ks[7], mlp_dim, C)
    b1 = lin_b(ks[8], C, mlp_dim)
    w2 = lin_w(ks[9], C, mlp_dim)
    b2 = lin_b(ks[10], mlp_dim, C)
    return (ln1_g, ln1_b, wqkv, wproj, bproj, ln2_g, ln2_b, w1, b1, w2, b2)


def prepare_params(layers_params, weight_dtype=jnp.bfloat16):
    """Stack per-layer torch-layout params for the fused kernel.

    * weight matrices keep the torch (out, in) layout (used directly in the
      channel-major kernel as y^T = W @ x^T), cast to bf16, leading depth axis
    * the 7 small 1-D vectors are packed column-wise into one (depth, P, 8)
      f32 array: columns [ln1_g, ln1_b, bproj, ln2_g, ln2_b, b1, b2, pad]
    """
    wqkv_l, wproj_l, w1_l, w2_l, par_l = [], [], [], [], []
    for (ln1_g, ln1_b, wqkv, wproj, bproj,
         ln2_g, ln2_b, w1, b1, w2, b2) in layers_params:
        C = wqkv.shape[1]
        mlp = w1.shape[0]
        P = max(C, mlp)

        def col(v, _P=P):
            return jnp.pad(v.astype(jnp.float32), (0, _P - v.shape[0]))

        packed = jnp.stack([col(ln1_g), col(ln1_b), col(bproj), col(ln2_g),
                            col(ln2_b), col(b1), col(b2),
                            jnp.zeros((P,), jnp.float32)], axis=1)        # (P, 8)
        wqkv_l.append(wqkv.astype(weight_dtype))
        wproj_l.append(wproj.astype(weight_dtype))
        w1_l.append(w1.astype(weight_dtype))
        w2_l.append(w2.astype(weight_dtype))
        par_l.append(packed)
    return (jnp.stack(wqkv_l), jnp.stack(wproj_l),
            jnp.stack(w1_l), jnp.stack(w2_l), jnp.stack(par_l))


# --------------------------- pure-JAX reference ----------------------------------

def _layernorm_ref(v, g, b):
    mu = jnp.mean(v, axis=-1, keepdims=True)
    var = jnp.mean((v - mu) ** 2, axis=-1, keepdims=True)
    return (v - mu) * jax.lax.rsqrt(var + EPS) * g + b


def reference_forward(x, pos, layers_params, n_heads):
    """Pure-JAX f32 mirror of Transformer.forward (eval mode, torch layout)."""
    for (ln1_g, ln1_b, wqkv, wproj, bproj,
         ln2_g, ln2_b, w1, b1, w2, b2) in layers_params:
        x = x + pos
        B, N, C = x.shape
        dh = C // n_heads
        h = _layernorm_ref(x, ln1_g, ln1_b)
        qkv = h @ wqkv.T
        qkv = qkv.reshape(B, N, 3, n_heads, dh).transpose(2, 0, 3, 1, 4)
        q, k, v = qkv[0], qkv[1], qkv[2]
        attn = jnp.einsum('bhqd,bhkd->bhqk', q, k) * (dh ** -0.5)
        attn = jax.nn.softmax(attn, axis=-1)
        o = jnp.einsum('bhqk,bhkd->bhqd', attn, v)
        o = o.transpose(0, 2, 1, 3).reshape(B, N, C)
        o = o @ wproj.T + bproj
        x = x + o
        h2 = _layernorm_ref(x, ln2_g, ln2_b)
        f = h2 @ w1.T + b1
        f = 0.5 * f * (1.0 + jax.lax.erf(f * _SQRT1_2))   # exact GELU
        f = f @ w2.T + b2
        x = x + f
    return x


# ----------------------------------- main -----------------------------------------

if __name__ == "__main__":
    # Shapes implied by the module: embedding_dim = basic_dims = 16, heads = 8,
    # mlp_dim = 16, depth = 1, sequence length = transformer_basic_dims = 128.
    B, N, C = 2, 128, 16
    HEADS = 8
    MLP_DIM = 16
    DEPTH = 1

    key = jax.random.PRNGKey(0)
    kx, kp, kw = jax.random.split(key, 3)
    x = jax.random.normal(kx, (B, N, C), jnp.float32)
    pos = jax.random.normal(kp, (1, N, C), jnp.float32)

    layer_keys = jax.random.split(kw, DEPTH)
    layers_params = [init_layer_params(k, C, MLP_DIM) for k in layer_keys]
    params = prepare_params(layers_params)

    out = transformer_forward(x, pos, params, HEADS)
    out = jax.block_until_ready(out)

    ref = reference_forward(x, pos, layers_params, HEADS)
    assert out.shape == (B, N, C)
    err = float(jnp.max(jnp.abs(out - ref)))
    # Tolerance covers bf16 weight / attention-operand storage (f32 accumulation,
    # f32 LayerNorm/softmax, exact softmax division, f32 attention scale).
    assert jnp.allclose(out, ref, rtol=2e-2, atol=2e-2), f"max abs err {err}"
    print("KERNEL_OK")
</pallas_src>

<mosaic_0001>
module attributes {stable_mosaic.version = 11 : i64} {
  func.func @_transformer_kernel(%arg0: i32, %arg1: i32, %arg2: memref<1x16x128xf32, #tpu.memory_space<vmem>>, %arg3: memref<1x16x128xf32, #tpu.memory_space<vmem>>, %arg4: memref<1x48x16xbf16, #tpu.memory_space<vmem>>, %arg5: memref<1x16x16xbf16, #tpu.memory_space<vmem>>, %arg6: memref<1x16x16xbf16, #tpu.memory_space<vmem>>, %arg7: memref<1x16x16xbf16, #tpu.memory_space<vmem>>, %arg8: memref<1x16x8xf32, #tpu.memory_space<vmem>>, %arg9: memref<1x16x128xf32, #tpu.memory_space<vmem>>) attributes {dimension_semantics = [#tpu.dimension_semantics<parallel>, #tpu.dimension_semantics<arbitrary>], iteration_bounds = array<i64: 2, 1>, scalar_prefetch = 0 : i64, scratch_operands = 0 : i64, tpu.core_type = #tpu.core_type<tc>, window_params = [{transform_indices = @transform_0, window_bounds = array<i64: 1, 16, 128>}, {pipeline_mode = #tpu.pipeline_mode<synchronous>, transform_indices = @transform_1, window_bounds = array<i64: 1, 16, 128>}, {transform_indices = @transform_2, window_bounds = array<i64: 1, 48, 16>}, {transform_indices = @transform_3, window_bounds = array<i64: 1, 16, 16>}, {transform_indices = @transform_4, window_bounds = array<i64: 1, 16, 16>}, {transform_indices = @transform_5, window_bounds = array<i64: 1, 16, 16>}, {transform_indices = @transform_6, window_bounds = array<i64: 1, 16, 8>}, {transform_indices = @transform_7, window_bounds = array<i64: 1, 16, 128>}]} {
    %c0_i32 = arith.constant 0 : i32
    %0 = arith.cmpi eq, %arg1, %c0_i32 : i32
    %1 = arith.extui %0 : i1 to i32
    %c0_i32_0 = arith.constant 0 : i32
    %2 = arith.cmpi ne, %1, %c0_i32_0 : i32
    scf.if %2 {
      %c0_58 = arith.constant 0 : index
      %c0_59 = arith.constant 0 : index
      %c0_60 = arith.constant 0 : index
      %158 = vector.load %arg2[%c0_58, %c0_59, %c0_60] : memref<1x16x128xf32, #tpu.memory_space<vmem>>, vector<1x16x128xf32>
      %c0_61 = arith.constant 0 : index
      %c0_62 = arith.constant 0 : index
      %c0_63 = arith.constant 0 : index
      %159 = vector.load %arg9[%c0_61, %c0_62, %c0_63] : memref<1x16x128xf32, #tpu.memory_space<vmem>>, vector<1x16x128xf32>
      tpu.vector_store %arg9[%c0_61, %c0_62, %c0_63], %158 {strides = array<i32>} : memref<1x16x128xf32, #tpu.memory_space<vmem>>, vector<1x16x128xf32>,
    } else {
    }
    %c0 = arith.constant 0 : index
    %c0_1 = arith.constant 0 : index
    %c0_2 = arith.constant 0 : index
    %3 = vector.load %arg8[%c0, %c0_1, %c0_2] : memref<1x16x8xf32, #tpu.memory_space<vmem>>, vector<1x16x8xf32>
    %4 = vector.shape_cast %3 : vector<1x16x8xf32> to vector<16x8xf32>
    %5 = vector.extract_strided_slice %4 {offsets = [0, 0], sizes = [16, 1], strides = [1, 1]} : vector<16x8xf32> to vector<16x1xf32>
    %6 = vector.extract_strided_slice %4 {offsets = [0, 1], sizes = [16, 1], strides = [1, 1]} : vector<16x8xf32> to vector<16x1xf32>
    %7 = vector.extract_strided_slice %4 {offsets = [0, 2], sizes = [16, 1], strides = [1, 1]} : vector<16x8xf32> to vector<16x1xf32>
    %8 = vector.extract_strided_slice %4 {offsets = [0, 3], sizes = [16, 1], strides = [1, 1]} : vector<16x8xf32> to vector<16x1xf32>
    %9 = vector.extract_strided_slice %4 {offsets = [0, 4], sizes = [16, 1], strides = [1, 1]} : vector<16x8xf32> to vector<16x1xf32>
    %10 = vector.extract_strided_slice %4 {offsets = [0, 5], sizes = [16, 1], strides = [1, 1]} : vector<16x8xf32> to vector<16x1xf32>
    %11 = vector.extract_strided_slice %4 {offsets = [0, 6], sizes = [16, 1], strides = [1, 1]} : vector<16x8xf32> to vector<16x1xf32>
    %c0_3 = arith.constant 0 : index
    %c0_4 = arith.constant 0 : index
    %c0_5 = arith.constant 0 : index
    %12 = vector.load %arg9[%c0_3, %c0_4, %c0_5] : memref<1x16x128xf32, #tpu.memory_space<vmem>>, vector<1x16x128xf32>
    %13 = vector.shape_cast %12 : vector<1x16x128xf32> to vector<16x128xf32>
    %c0_6 = arith.constant 0 : index
    %c0_7 = arith.constant 0 : index
    %c0_8 = arith.constant 0 : index
    %14 = vector.load %arg3[%c0_6, %c0_7, %c0_8] : memref<1x16x128xf32, #tpu.memory_space<vmem>>, vector<1x16x128xf32>
    %15 = vector.shape_cast %14 : vector<1x16x128xf32> to vector<16x128xf32>
    %16 = arith.addf %13, %15 : vector<16x128xf32>
    %cst = arith.constant dense<0.000000e+00> : vector<128xf32>
    %17 = vector.multi_reduction <add>, %16, %cst [0] : vector<16x128xf32> to vector<128xf32>
    %18 = vector.shape_cast %17 : vector<128xf32> to vector<1x128xf32>
    %cst_9 = arith.constant 1.600000e+01 : f32
    %19 = vector.broadcast %cst_9 : f32 to vector<1x128xf32>
    %20 = arith.divf %18, %19 : vector<1x128xf32>
    %21 = vector.broadcast %20 : vector<1x128xf32> to vector<16x128xf32>
    %22 = arith.subf %16, %21 : vector<16x128xf32>
    %23 = arith.mulf %22, %22 : vector<16x128xf32>
    %cst_10 = arith.constant dense<0.000000e+00> : vector<128xf32>
    %24 = vector.multi_reduction <add>, %23, %cst_10 [0] : vector<16x128xf32> to vector<128xf32>
    %25 = vector.shape_cast %24 : vector<128xf32> to vector<1x128xf32>
    %cst_11 = arith.constant 1.600000e+01 : f32
    %26 = vector.broadcast %cst_11 : f32 to vector<1x128xf32>
    %27 = arith.divf %25, %26 : vector<1x128xf32>
    %28 = vector.broadcast %20 : vector<1x128xf32> to vector<16x128xf32>
    %29 = arith.subf %16, %28 : vector<16x128xf32>
    %cst_12 = arith.constant 9.99999974E-6 : f32
    %30 = vector.broadcast %cst_12 : f32 to vector<1x128xf32>
    %31 = arith.addf %27, %30 : vector<1x128xf32>
    %32 = math.rsqrt %31 : vector<1x128xf32>
    %33 = vector.broadcast %32 : vector<1x128xf32> to vector<16x128xf32>
    %34 = arith.mulf %29, %33 : vector<16x128xf32>
    %35 = vector.broadcast %5 : vector<16x1xf32> to vector<16x128xf32>
    %36 = arith.mulf %34, %35 : vector<16x128xf32>
    %37 = vector.broadcast %6 : vector<16x1xf32> to vector<16x128xf32>
    %38 = arith.addf %36, %37 : vector<16x128xf32>
    %c0_13 = arith.constant 0 : index
    %c0_14 = arith.constant 0 : index
    %c0_15 = arith.constant 0 : index
    %39 = vector.load %arg4[%c0_13, %c0_14, %c0_15] : memref<1x48x16xbf16, #tpu.memory_space<vmem>>, vector<1x48x16xbf16>
    %40 = vector.shape_cast %39 : vector<1x48x16xbf16> to vector<48x16xbf16>
    %41 = arith.truncf %38 : vector<16x128xf32> to vector<16x128xbf16>
    %cst_16 = arith.constant dense<0.000000e+00> : vector<48x128xf32>
    %42 = tpu.matmul %40, %41, %cst_16 {dimension_numbers = #tpu.dot_dimension_numbers<[1], [0], [0], [1], [0, 0, 1, 1], [], []>} : vector<48x16xbf16>, vector<16x128xbf16>, vector<48x128xf32> -> vector<48x128xf32>
    %43 = vector.extract_strided_slice %42 {offsets = [0, 0], sizes = [16, 128], strides = [1, 1]} : vector<48x128xf32> to vector<16x128xf32>
    %cst_17 = arith.constant 0.707106769 : f32
    %44 = vector.broadcast %cst_17 : f32 to vector<16x128xf32>
    %45 = arith.mulf %43, %44 : vector<16x128xf32>
    %46 = vector.extract_strided_slice %42 {offsets = [16, 0], sizes = [16, 128], strides = [1, 1]} : vector<48x128xf32> to vector<16x128xf32>
    %47 = vector.extract_strided_slice %42 {offsets = [32, 0], sizes = [16, 128], strides = [1, 1]} : vector<48x128xf32> to vector<16x128xf32>
    %48 = vector.shape_cast %45 : vector<16x128xf32> to vector<8x2x128xf32>
    %49 = tpu.transpose %48, [0, 2, 1] : vector<8x2x128xf32> -> vector<8x128x2xf32>
    %50 = arith.truncf %49 : vector<8x128x2xf32> to vector<8x128x2xbf16>
    %51 = vector.shape_cast %46 : vector<16x128xf32> to vector<8x2x128xf32>
    %52 = tpu.transpose %51, [0, 2, 1] : vector<8x2x128xf32> -> vector<8x128x2xf32>
    %53 = arith.truncf %52 : vector<8x128x2xf32> to vector<8x128x2xbf16>
    %54 = vector.shape_cast %47 : vector<16x128xf32> to vector<8x2x128xf32>
    %55 = tpu.transpose %54, [0, 2, 1] : vector<8x2x128xf32> -> vector<8x128x2xf32>
    %56 = arith.truncf %55 : vector<8x128x2xf32> to vector<8x128x2xbf16>
    "tpu.trace_start"() <{level = 10 : i32, message = "hqd,hkd->hqk"}> : () -> ()
    %cst_18 = arith.constant dense<0.000000e+00> : vector<8x128x128xf32>
    %57 = tpu.matmul %50, %53, %cst_18 {dimension_numbers = #tpu.dot_dimension_numbers<[2], [2], [1], [1], [0, 0, 0, 1, 1, 1], [0], [0]>} : vector<8x128x2xbf16>, vector<8x128x2xbf16>, vector<8x128x128xf32> -> vector<8x128x128xf32>
    "tpu.trace_stop"() : () -> ()
    %cst_19 = arith.constant dense<0xFF800000> : vector<8x128xf32>
    %58 = vector.multi_reduction <maximumf>, %57, %cst_19 [2] : vector<8x128x128xf32> to vector<8x128xf32>
    %59 = vector.shape_cast %58 : vector<8x128xf32> to vector<8x128x1xf32>
    %60 = vector.broadcast %59 : vector<8x128x1xf32> to vector<8x128x128xf32>
    %61 = arith.subf %57, %60 : vector<8x128x128xf32>
    %62 = math.exp %61 : vector<8x128x128xf32>
    %cst_20 = arith.constant dense<0.000000e+00> : vector<8x128xf32>
    %63 = vector.multi_reduction <add>, %62, %cst_20 [2] : vector<8x128x128xf32> to vector<8x128xf32>
    %64 = vector.shape_cast %63 : vector<8x128xf32> to vector<8x128x1xf32>
    %cst_21 = arith.constant 1.000000e+00 : f32
    %65 = vector.broadcast %cst_21 : f32 to vector<8x128x1xf32>
    %66 = arith.divf %65, %64 : vector<8x128x1xf32>
    %67 = vector.broadcast %66 : vector<8x128x1xf32> to vector<8x128x128xf32>
    %68 = arith.mulf %62, %67 : vector<8x128x128xf32>
    %69 = arith.truncf %68 : vector<8x128x128xf32> to vector<8x128x128xbf16>
    "tpu.trace_start"() <{level = 10 : i32, message = "hqk,hkd->hqd"}> : () -> ()
    %cst_22 = arith.constant dense<0.000000e+00> : vector<8x128x2xf32>
    %70 = tpu.matmul %69, %56, %cst_22 {dimension_numbers = #tpu.dot_dimension_numbers<[2], [1], [1], [2], [0, 0, 0, 1, 1, 2], [0], [0]>} : vector<8x128x128xbf16>, vector<8x128x2xbf16>, vector<8x128x2xf32> -> vector<8x128x2xf32>
    "tpu.trace_stop"() : () -> ()
    %71 = tpu.transpose %70, [0, 2, 1] : vector<8x128x2xf32> -> vector<8x2x128xf32>
    %72 = vector.shape_cast %71 : vector<8x2x128xf32> to vector<16x128xf32>
    %c0_23 = arith.constant 0 : index
    %c0_24 = arith.constant 0 : index
    %c0_25 = arith.constant 0 : index
    %73 = vector.load %arg5[%c0_23, %c0_24, %c0_25] : memref<1x16x16xbf16, #tpu.memory_space<vmem>>, vector<1x16x16xbf16>
    %74 = vector.shape_cast %73 : vector<1x16x16xbf16> to vector<16x16xbf16>
    %75 = arith.truncf %72 : vector<16x128xf32> to vector<16x128xbf16>
    %cst_26 = arith.constant dense<0.000000e+00> : vector<16x128xf32>
    %76 = tpu.matmul %74, %75, %cst_26 {dimension_numbers = #tpu.dot_dimension_numbers<[1], [0], [0], [1], [0, 0, 1, 1], [], []>} : vector<16x16xbf16>, vector<16x128xbf16>, vector<16x128xf32> -> vector<16x128xf32>
    %77 = vector.broadcast %7 : vector<16x1xf32> to vector<16x128xf32>
    %78 = arith.addf %76, %77 : vector<16x128xf32>
    %79 = arith.addf %16, %78 : vector<16x128xf32>
    %cst_27 = arith.constant dense<0.000000e+00> : vector<128xf32>
    %80 = vector.multi_reduction <add>, %79, %cst_27 [0] : vector<16x128xf32> to vector<128xf32>
    %81 = vector.shape_cast %80 : vector<128xf32> to vector<1x128xf32>
    %cst_28 = arith.constant 1.600000e+01 : f32
    %82 = vector.broadcast %cst_28 : f32 to vector<1x128xf32>
    %83 = arith.divf %81, %82 : vector<1x128xf32>
    %84 = vector.broadcast %83 : vector<1x128xf32> to vector<16x128xf32>
    %85 = arith.subf %79, %84 : vector<16x128xf32>
    %86 = arith.mulf %85, %85 : vector<16x128xf32>
    %cst_29 = arith.constant dense<0.000000e+00> : vector<128xf32>
    %87 = vector.multi_reduction <add>, %86, %cst_29 [0] : vector<16x128xf32> to vector<128xf32>
    %88 = vector.shape_cast %87 : vector<128xf32> to vector<1x128xf32>
    %cst_30 = arith.constant 1.600000e+01 : f32
    %89 = vector.broadcast %cst_30 : f32 to vector<1x128xf32>
    %90 = arith.divf %88, %89 : vector<1x128xf32>
    %91 = vector.broadcast %83 : vector<1x128xf32> to vector<16x128xf32>
    %92 = arith.subf %79, %91 : vector<16x128xf32>
    %cst_31 = arith.constant 9.99999974E-6 : f32
    %93 = vector.broadcast %cst_31 : f32 to vector<1x128xf32>
    %94 = arith.addf %90, %93 : vector<1x128xf32>
    %95 = math.rsqrt %94 : vector<1x128xf32>
    %96 = vector.broadcast %95 : vector<1x128xf32> to vector<16x128xf32>
    %97 = arith.mulf %92, %96 : vector<16x128xf32>
    %98 = vector.broadcast %8 : vector<16x1xf32> to vector<16x128xf32>
    %99 = arith.mulf %97, %98 : vector<16x128xf32>
    %100 = vector.broadcast %9 : vector<16x1xf32> to vector<16x128xf32>
    %101 = arith.addf %99, %100 : vector<16x128xf32>
    %c0_32 = arith.constant 0 : index
    %c0_33 = arith.constant 0 : index
    %c0_34 = arith.constant 0 : index
    %102 = vector.load %arg6[%c0_32, %c0_33, %c0_34] : memref<1x16x16xbf16, #tpu.memory_space<vmem>>, vector<1x16x16xbf16>
    %103 = vector.shape_cast %102 : vector<1x16x16xbf16> to vector<16x16xbf16>
    %104 = arith.truncf %101 : vector<16x128xf32> to vector<16x128xbf16>
    %cst_35 = arith.constant dense<0.000000e+00> : vector<16x128xf32>
    %105 = tpu.matmul %103, %104, %cst_35 {dimension_numbers = #tpu.dot_dimension_numbers<[1], [0], [0], [1], [0, 0, 1, 1], [], []>} : vector<16x16xbf16>, vector<16x128xbf16>, vector<16x128xf32> -> vector<16x128xf32>
    %106 = vector.broadcast %10 : vector<16x1xf32> to vector<16x128xf32>
    %107 = arith.addf %105, %106 : vector<16x128xf32>
    %cst_36 = arith.constant 5.000000e-01 : f32
    %108 = vector.broadcast %cst_36 : f32 to vector<16x128xf32>
    %109 = arith.mulf %108, %107 : vector<16x128xf32>
    %cst_37 = arith.constant 0.707106769 : f32
    %110 = vector.broadcast %cst_37 : f32 to vector<16x128xf32>
    %111 = arith.mulf %107, %110 : vector<16x128xf32>
    %112 = math.absf %111 : vector<16x128xf32>
    %cst_38 = arith.constant 0.327591091 : f32
    %113 = vector.broadcast %cst_38 : f32 to vector<16x128xf32>
    %114 = arith.mulf %113, %112 : vector<16x128xf32>
    %cst_39 = arith.constant 1.000000e+00 : f32
    %115 = vector.broadcast %cst_39 : f32 to vector<16x128xf32>
    %116 = arith.addf %115, %114 : vector<16x128xf32>
    %cst_40 = arith.constant 1.000000e+00 : f32
    %117 = vector.broadcast %cst_40 : f32 to vector<16x128xf32>
    %118 = arith.divf %117, %116 : vector<16x128xf32>
    %cst_41 = arith.constant 1.06140542 : f32
    %119 = vector.broadcast %cst_41 : f32 to vector<16x128xf32>
    %120 = arith.mulf %119, %118 : vector<16x128xf32>
    %cst_42 = arith.constant -1.45315206 : f32
    %121 = vector.broadcast %cst_42 : f32 to vector<16x128xf32>
    %122 = arith.addf %120, %121 : vector<16x128xf32>
    %123 = arith.mulf %122, %118 : vector<16x128xf32>
    %cst_43 = arith.constant 1.42141378 : f32
    %124 = vector.broadcast %cst_43 : f32 to vector<16x128xf32>
    %125 = arith.addf %123, %124 : vector<16x128xf32>
    %126 = arith.mulf %125, %118 : vector<16x128xf32>
    %cst_44 = arith.constant -0.284496725 : f32
    %127 = vector.broadcast %cst_44 : f32 to vector<16x128xf32>
    %128 = arith.addf %126, %127 : vector<16x128xf32>
    %129 = arith.mulf %128, %118 : vector<16x128xf32>
    %cst_45 = arith.constant 0.254829586 : f32
    %130 = vector.broadcast %cst_45 : f32 to vector<16x128xf32>
    %131 = arith.addf %129, %130 : vector<16x128xf32>
    %132 = arith.mulf %131, %118 : vector<16x128xf32>
    %cst_46 = arith.constant 0.000000e+00 : f32
    %133 = vector.broadcast %cst_46 : f32 to vector<16x128xf32>
    %134 = arith.subf %133, %112 : vector<16x128xf32>
    %135 = arith.mulf %134, %112 : vector<16x128xf32>
    %136 = math.exp %135 : vector<16x128xf32>
    %137 = arith.mulf %132, %136 : vector<16x128xf32>
    %cst_47 = arith.constant 1.000000e+00 : f32
    %138 = vector.broadcast %cst_47 : f32 to vector<16x128xf32>
    %139 = arith.subf %138, %137 : vector<16x128xf32>
    %cst_48 = arith.constant 0.000000e+00 : f32
    %140 = vector.broadcast %cst_48 : f32 to vector<16x128xf32>
    %141 = arith.cmpf oge, %111, %140 : vector<16x128xf32>
    %cst_49 = arith.constant 0.000000e+00 : f32
    %142 = vector.broadcast %cst_49 : f32 to vector<16x128xf32>
    %143 = arith.subf %142, %139 : vector<16x128xf32>
    %144 = arith.select %141, %139, %143 : vector<16x128xi1>, vector<16x128xf32>
    %cst_50 = arith.constant 1.000000e+00 : f32
    %145 = vector.broadcast %cst_50 : f32 to vector<16x128xf32>
    %146 = arith.addf %145, %144 : vector<16x128xf32>
    %147 = arith.mulf %109, %146 : vector<16x128xf32>
    %c0_51 = arith.constant 0 : index
    %c0_52 = arith.constant 0 : index
    %c0_53 = arith.constant 0 : index
    %148 = vector.load %arg7[%c0_51, %c0_52, %c0_53] : memref<1x16x16xbf16, #tpu.memory_space<vmem>>, vector<1x16x16xbf16>
    %149 = vector.shape_cast %148 : vector<1x16x16xbf16> to vector<16x16xbf16>
    %150 = arith.truncf %147 : vector<16x128xf32> to vector<16x128xbf16>
    %cst_54 = arith.constant dense<0.000000e+00> : vector<16x128xf32>
    %151 = tpu.matmul %149, %150, %cst_54 {dimension_numbers = #tpu.dot_dimension_numbers<[1], [0], [0], [1], [0, 0, 1, 1], [], []>} : vector<16x16xbf16>, vector<16x128xbf16>, vector<16x128xf32> -> vector<16x128xf32>
    %152 = vector.broadcast %11 : vector<16x1xf32> to vector<16x128xf32>
    %153 = arith.addf %151, %152 : vector<16x128xf32>
    %154 = arith.addf %79, %153 : vector<16x128xf32>
    %c0_55 = arith.constant 0 : index
    %c0_56 = arith.constant 0 : index
    %c0_57 = arith.constant 0 : index
    %155 = vector.load %arg9[%c0_55, %c0_56, %c0_57] : memref<1x16x128xf32, #tpu.memory_space<vmem>>, vector<1x16x128xf32>
    %156 = vector.shape_cast %155 : vector<1x16x128xf32> to vector<16x128xf32>
    %157 = vector.shape_cast %154 : vector<16x128xf32> to vector<1x16x128xf32>
    tpu.vector_store %arg9[%c0_55, %c0_56, %c0_57], %157 {strides = array<i32>} : memref<1x16x128xf32, #tpu.memory_space<vmem>>, vector<1x16x128xf32>,
    return
  }
  func.func @transform_0(%arg0: i32, %arg1: i32) -> (i32, i32, i32) {
    %c0_i32 = arith.constant 0 : i32
    %c0_i32_0 = arith.constant 0 : i32
    %c0_i32_1 = arith.constant 0 : i32
    return %arg0, %c0_i32, %c0_i32_0 : i32, i32, i32
  }
  func.func @transform_1(%arg0: i32, %arg1: i32) -> (i32, i32, i32) {
    %c0_i32 = arith.constant 0 : i32
    %c0_i32_0 = arith.constant 0 : i32
    %c0_i32_1 = arith.constant 0 : i32
    %c0_i32_2 = arith.constant 0 : i32
    return %c0_i32, %c0_i32_0, %c0_i32_1 : i32, i32, i32
  }
  func.func @transform_2(%arg0: i32, %arg1: i32) -> (i32, i32, i32) {
    %c0_i32 = arith.constant 0 : i32
    %c0_i32_0 = arith.constant 0 : i32
    %c0_i32_1 = arith.constant 0 : i32
    return %arg1, %c0_i32, %c0_i32_0 : i32, i32, i32
  }
  func.func @transform_3(%arg0: i32, %arg1: i32) -> (i32, i32, i32) {
    %c0_i32 = arith.constant 0 : i32
    %c0_i32_0 = arith.constant 0 : i32
    %c0_i32_1 = arith.constant 0 : i32
    return %arg1, %c0_i32, %c0_i32_0 : i32, i32, i32
  }
  func.func @transform_4(%arg0: i32, %arg1: i32) -> (i32, i32, i32) {
    %c0_i32 = arith.constant 0 : i32
    %c0_i32_0 = arith.constant 0 : i32
    %c0_i32_1 = arith.constant 0 : i32
    return %arg1, %c0_i32, %c0_i32_0 : i32, i32, i32
  }
  func.func @transform_5(%arg0: i32, %arg1: i32) -> (i32, i32, i32) {
    %c0_i32 = arith.constant 0 : i32
    %c0_i32_0 = arith.constant 0 : i32
    %c0_i32_1 = arith.constant 0 : i32
    return %arg1, %c0_i32, %c0_i32_0 : i32, i32, i32
  }
  func.func @transform_6(%arg0: i32, %arg1: i32) -> (i32, i32, i32) {
    %c0_i32 = arith.constant 0 : i32
    %c0_i32_0 = arith.constant 0 : i32
    %c0_i32_1 = arith.constant 0 : i32
    return %arg1, %c0_i32, %c0_i32_0 : i32, i32, i32
  }
  func.func @transform_7(%arg0: i32, %arg1: i32) -> (i32, i32, i32) {
    %c0_i32 = arith.constant 0 : i32
    %c0_i32_0 = arith.constant 0 : i32
    %c0_i32_1 = arith.constant 0 : i32
    return %arg0, %c0_i32, %c0_i32_0 : i32, i32, i32
  }
}

</mosaic_0001>

<bundles_post_ra>
// kernel: tpu_custom_call.1
= control target key start
LH: loop header
LB: loop body
LE: loop exit
PB: predicated region body
PF: predicated region fallthrough
CT: control target
= control target key end

     0   :  { %12 = vsyncpa [#allocation3], 0  ;;  %s11249_s0 = inlined_call_operand.vmem [shape: f32[2,16,128], index: 0, kind: input, shape index: {}]   ;;  %s11250_s1 = inlined_call_operand.vmem [shape: f32[1,16,128], index: 1, kind: input, shape index: {}]   ;;  %s11251_s2 = inlined_call_operand.vmem [shape: bf16[1,48,16], index: 2, kind: input, shape index: {}]   ;;  %s11252_s3 = inlined_call_operand.hbm [shape: bf16[1,16,16], index: 3, kind: input, shape index: {}]   ;;  %s11253_s4 = inlined_call_operand.hbm [shape: bf16[1,16,16], index: 4, kind: input, shape index: {}]   ;;  %s11254_s5 = inlined_call_operand.hbm [shape: bf16[1,16,16], index: 5, kind: input, shape index: {}]   ;;  %s11255_s6 = inlined_call_operand.vmem [shape: f32[1,16,8], index: 6, kind: input, shape index: {}]   ;;  %s11256_s7 = inlined_call_operand.hbm [shape: f32[2,16,128], index: 7, kind: output, shape index: {}]  }
   0x1   :  { %13 = vsyncpa [#allocation6], 0 }
   0x2   :  { %14 = vsyncpa [#allocation4], 0 }
   0x3   :  { %16 = vsyncpa [#allocation4 + $0x1], 0  ;;  %s8482_s24 = smov 0   ;;  %s8484_s25 = smov 0  }
   0x4   :  { %s8486_s26 = smov 0   ;;  %s8488_s27 = smov 0  }
   0x5   :  { %s8490_s28 = smov 0   ;;  %s8492_s29 = smov 0  }
   0x6 LB: > { %s5660_s30 = sadd.s32 4294967295, %s8422_s29   ;;  %s5661_s8 = sadd.s32 4294967294, %s8422_s29   ;;  %s8422_s29 = sphi %s8492_s29, %s22_s29   ;;  %s8418_s28 = sphi %s8490_s28, %s12194_s28   ;;  %s8414_s27 = sphi %s8488_s27, %s12193_s27   ;;  %s8410_s26 = sphi %s8486_s26, %s12192_s26   ;;  %s8406_s25 = sphi %s8484_s25, %s12191_s25   ;;  %s8402_s24 = sphi %s8482_s24, %s12190_s24  }
   0x7   : > { %s34_s9 = sadd.s32 1, %s8418_s28  ;;  %s218_s10 = sadd.s32 1, %s8410_s26 }
   0x8   : > { %p36_p0 = scmp.ge.s32.totalorder %s34_s9, 2  ;;  %p228_p1 = scmp.ne.s32.totalorder %s8410_s26, %s8406_s25 }
   0x9   : > { %p229_p2 = scmp.eq.s32.totalorder %s5660_s30, 1  ;;  %p234_p3 = scmp.ne.s32.totalorder %s8406_s25, %s8402_s24 }
   0xa   : > { %s12196_s9 = smov (%p36_p0, %s34_s9), 0  ;;  %p235_p5 = scmp.eq.s32.totalorder %s5661_s8, 1 }
   0xb   : > { %p8522_p4 = por %p229_p2, %p228_p1  ;;  %s215_s12 = ssub.s32 %s8418_s28, %s12196_s9 }
   0xc   : > { %p5662_p6 = scmp.ge.s32.totalorder %s8422_s29, 1  ;;  %p216_p7 = scmp.eq.s32.totalorder %s215_s12, 0 }
   0xd   : > { %p8529_p8 = por %p235_p5, %p234_p3  ;;  %p242_p9 = scmp.lt.s32.totalorder %s8422_s29, 3 }
   0xe   : > { %s8535_s14 = scalar_select %p216_p7, %s8410_s26, %s218_s10  }
   0xf   : > { %s11517_s13 = scalar_select %p8529_p8, 1, 0 }
  0x10   : > { %p8537_p10 = pnand %p5662_p6, %p242_p9  ;;  %p8541_p11 = scmp.eq.s32.totalorder %s5660_s30, 0 }
  0x11   : > { %s8424_s17 = smov [#allocation5]   ;;  %s8425_s20 = smov [#allocation2]  }
  0x12   : > { %p6647_p12 = pneg %p8537_p10  ;;  %s284_s18 = sshll.u32 %s8424_s17, 4  ;;  %s285_s18 = int_to_ptr.vmem [resolvable:$true] %s284_s18 }
  0x13   : > { %s268_s21 = sshll.u32 %s8425_s20, 4  ;;  %s8271_s22 = scalar_lea.vmem %s285_s18, 128  ;;  %s269_s21 = int_to_ptr.vmem [resolvable:$true] %s268_s21 }
  0x14   : > { %p8549_p13 = pnand %p8541_p11, %p6647_p12  ;;  %p8272_p1 = scmp.ne.s32.totalorder %s285_s18, %s8271_s22 }
  0x15   : > { %p8279_p5 = scmp.lt.s32.totalorder %s285_s18, %s285_s18  ;;  %p8280_p6 = scmp.lt.s32.totalorder %s8271_s22, %s8271_s22 }
  0x16   : > { %p8262_p0 = pneg %p8549_p13 }
  0x17   : > { %p8281_p7 = por %p8280_p6, %p8279_p5 }
  0x18   : > { %p8274_p2 = pnand %p8272_p1, %p8262_p0 }
  0x1a   : > { %p8275_p3 = pneg %p8274_p2 }
  0x1c   : > { %p8282_p9 = pnand %p8281_p7, %p8275_p3 }
  0x1e   : > { %8285 = shalt.err (!%p8282_p9)
}
  0x1f   : > { %s8426_s23 = smov 64   ;;  %s8427_s30 = smov 4  }
  0x20   : > { %6653 = dma.hbm_to_vmem [thread:$0]  (!%p8549_p13), %s11253_s4, 128, %s285_s18, [#allocation6], %s8426_s23, %s8426_s23, %s8427_s30  }
  0x21   : > { %s8297_s12 = scalar_lea.vmem %s269_s21, 128  ;;  %p8305_p8 = scmp.lt.s32.totalorder %s269_s21, %s269_s21 }
  0x22   : > { %p8298_p12 = scmp.ne.s32.totalorder %s269_s21, %s8297_s12  ;;  %p8306_p5 = scmp.lt.s32.totalorder %s8297_s12, %s8297_s12 }
  0x24   : > { %p8300_p1 = pnand %p8298_p12, %p8262_p0  ;;  %p8307_p3 = por %p8306_p5, %p8305_p8 }
  0x26   : > { %p8301_p2 = pneg %p8300_p1 }
  0x28   : > { %p8308_p6 = pnand %p8307_p3, %p8301_p2 }
  0x2a   : > { %8311 = shalt.err (!%p8308_p6)
}
  0x2b   : > { %6650 = dma.hbm_to_vmem [thread:$0]  (!%p8549_p13), %s11252_s3, 128, %s269_s21, [#allocation3], %s8426_s23, %s8426_s23, %s8427_s30  }
  0x2c   : > { %s8428_s18 = smov [#allocation7]  }
  0x2d   : > { %s300_s22 = sshll.u32 %s8428_s18, 4  ;;  %s301_s22 = int_to_ptr.vmem [resolvable:$true] %s300_s22 }
  0x2e   : > { %s8323_s8 = scalar_lea.vmem %s301_s22, 128  ;;  %p8331_p1 = scmp.lt.s32.totalorder %s301_s22, %s301_s22 }
  0x2f   : > { %p8324_p7 = scmp.ne.s32.totalorder %s301_s22, %s8323_s8  ;;  %p8332_p8 = scmp.lt.s32.totalorder %s8323_s8, %s8323_s8 }
  0x31   : > { %p8326_p9 = pnand %p8324_p7, %p8262_p0  ;;  %p8333_p2 = por %p8332_p8, %p8331_p1 }
  0x33   : > { %p8327_p12 = pneg %p8326_p9 }
  0x35   : > { %p8334_p5 = pnand %p8333_p2, %p8327_p12 }
  0x37   : > { %8337 = shalt.err (!%p8334_p5)
}
  0x38   : > { %6656 = dma.hbm_to_vmem [thread:$0]  (!%p8549_p13), %s11254_s5, 128, %s301_s22, [#allocation6], %s8426_s23, %s8426_s23, %s8427_s30  }
  0x39   : > { %332 = sbr.rel (%p8537_p10) target bundleno = 2877 (0xb3d), region = 48 }
  0x3e   : > { %8389 = dma.done.wait (%p8541_p11), [#allocation3], 128  }
  0x3f   : > { %8391 = vsyncadd (%p8541_p11), [#allocation3], 4294967168 }
  0x40   : > { %8393 = dma.done.wait (%p8541_p11), [#allocation6], 256  }
  0x41   : > { %8395 = vsyncadd (%p8541_p11), [#allocation6], 4294967040  ;;  %v8429_v0 = vmov 1   ;;  %v8430_v1 = vmov 0   ;;  %v406_v2 = vld [vmem:[%s11255_s6] sm:$0xff]  ;;  %v407_v3 = vld [vmem:[%s11255_s6 + $0x8] sm:$0xff]  ;;  %v558_v48 = vlaneseq }
  0x42   : > { %6734 = vset.pattern.permute.xlu1 %v8429_v0  ;;  %6733 = vset.pattern.permute.xlu0 %v8430_v1  ;;  %v11257_v4 = vmov 0.0   ;;  %vm8432_vm0 = vmmov 0   ;;  %p382_p10 = scmp.lt.s32.totalorder %s8414_s27, 1  ;;  %v410_v5 = vld [vmem:[%s11250_s1] sm:$0xff]  ;;  %v411_v6 = vld [vmem:[%s11250_s1 + $0x8] sm:$0xff]  ;;  %vm483_vm1 = vcmask 130048  }
  0x43   : > { %452 = vperm.xlu1 %6734, %v406_v2   ;;  %441 = vperm.xlu0 %6733, %v406_v2   ;;  %v7728_v44 = vld [vmem:[%s11251_s2] sm:$0xff]   ;;  %v7729_v45 = vld [vmem:[%s11251_s2 + $0x8] sm:$0xff]   ;;  %v8433_v46 = vmov 1983009808   ;;  %v559_v50 = vshrl.u32 %v558_v48, 7  ;;  %v7730_v1 = vld [vmem:[%s11251_s2 + $0x10] sm:$0xff]  }
  0x44   : > { %6025 = vmatprep.subr.bf16.mxu0 %v11257_v4  ;;  %6027 = vmatprep.mubr.msk.bf16.mxu0 %vm8432_vm0, %v11257_v4  ;;  %s383_s16 = scalar_select %p382_p10, %s8414_s27, 1  ;;  %v556_v47 = vunpack.c.l.s4 %v8433_v46  ;;  %vm1644_vm2 = vcmask 15360  }
  0x45   : > { %s379_s8 = sand.u32 1, %s8406_s25   ;;  %s5758_s12 = sshll.u32 %s8414_s27, 8 }
  0x46   : > { %s5757_s30 = sshll.u32 %s383_s16, 4  ;;  %v557_v49 = vunpack.c.0.s8 %v556_v47  ;;  %s5673_s10 = sshll.u32 %s379_s8, 4 }
  0x47   : > { %456 = vperm.xlu1 %6734, %v407_v3   ;;  %446 = vperm.xlu0 %6733, %v407_v3   ;;  %s386_s18 = scalar_lea.vmem %s11249_s0, %s5757_s30  ;;  %s381_s15 = scalar_lea.vmem [#allocation8], %s5673_s10 }
  0x48   : > { %v402_v7 = vld [vmem:[%s386_s18] sm:$0xff]  ;;  %v403_v8 = vld [vmem:[%s386_s18 + $0x8] sm:$0xff]  ;;  %v8629_v51 = vsub.s32 %v557_v49, %v559_v50  ;;  %s5523_s19 = sshll.u32 %s381_s15, 4  ;;  %s11199_s16 = scalar_lea.hbm %s11256_s7, %s5758_s12  ;;  %s11201_s19 = int_to_ptr.vmem [resolvable:$true] %s5523_s19 }
  0x49   : > { %v8609_v9 = vadd.f32 %v410_v5, %v402_v7  ;;  %v8611_v10 = vadd.f32 %v411_v6, %v403_v8  ;;  %s11204_s27 = scalar_lea.sflag [#allocation4], %s379_s8  ;;  %s8338_s30 = scalar_lea.vmem %s11201_s19, 256 }
  0x4a   : > { %11523 = vst [vmem:[#allocation14_spill] sm:$0xff] %v8629_v51  ;;  %p8339_p11 = scmp.ne.s32.totalorder %s11201_s19, %s8338_s30  ;;  %s8439_s17 = smov [#allocation8]  }
  0x4b   : > { %11521 = vst [vmem:[#allocation12_spill] sm:$0xff] %v8609_v9  ;;  %11522 = vst [vmem:[#allocation13_spill] sm:$0xff] %v8611_v10  ;;  %v414_v11 = vadd.f32 %v8611_v10, %v8609_v9  ;;  %s8342_s20 = sshll.u32 %s8439_s17, 4  ;;  %s8343_s20 = int_to_ptr.vmem [resolvable:$false] %s8342_s20 }
  0x4c   : > { %p8340_p13 = pnand %p8339_p11, %p8522_p4  ;;  %s8344_s18 = scalar_lea.vmem %s8343_s20, 512 }
  0x4d   : > { %v415_v12 = vrot.slane %v414_v11, 4  ;;  %p8345_p3 = scmp.lt.s32.totalorder %s11201_s19, %s8343_s20  ;;  %p8346_p6 = scmp.lt.s32.totalorder %s8344_s18, %s8338_s30 }
  0x4e   : > { %p8341_p0 = pneg %p8340_p13 }
  0x4f   : > { %v416_v13 = vadd.f32 %v415_v12, %v414_v11  ;;  %p8347_p7 = por %p8346_p6, %p8345_p3 }
  0x51   : > { %v417_v14 = vrot.slane %v416_v13, 2  ;;  %p8348_p9 = pnand %p8347_p7, %p8341_p0 }
  0x53   : > { %v418_v15 = vadd.f32 %v417_v14, %v416_v13 }
  0x55   : > { %v419_v16 = vrot.slane %v418_v15, 1 }
  0x57   : > { %v420_v17 = vadd.f32 %v419_v16, %v418_v15 }
  0x59   : > { %v422_v18 = vmul.f32 0.0625, %v420_v17 }
  0x5b   : > { %v423_v19 = vsub.f32 %v8609_v9, %v422_v18  ;;  %v424_v20 = vsub.f32 %v8611_v10, %v422_v18 }
  0x5d   : > { %v425_v21 = vmul.f32 %v423_v19, %v423_v19  ;;  %v426_v22 = vmul.f32 %v424_v20, %v424_v20 }
  0x5f   : > { %v427_v23 = vadd.f32 %v426_v22, %v425_v21 }
  0x61   : > { %v428_v24 = vrot.slane %v427_v23, 4 }
  0x63   : > { %v429_v25 = vadd.f32 %v428_v24, %v427_v23 }
  0x65   : > { %v430_v26 = vrot.slane %v429_v25, 2 }
  0x67   : > { %v431_v27 = vadd.f32 %v430_v26, %v429_v25 }
  0x69   : > { %v432_v28 = vrot.slane %v431_v27, 1 }
  0x6b   : > { %v433_v29 = vadd.f32 %v432_v28, %v431_v27 }
  0x6d   : > { %v434_v30 = vmul.f32 0.0625, %v433_v29 }
  0x6f   : > { %v435_v31 = vadd.f32 1e-05, %v434_v30 }
  0x71   : > { %7734 = vrsqrt.f32 %v435_v31 }
  0x7e   : > { %v7735_v32 = vpop.eup %7734 }
  0x7f   : > { %v437_v33 = vmul.f32 %v7735_v32, %v423_v19  ;;  %v438_v36 = vmul.f32 %v7735_v32, %v424_v20 }
  0xbe   : > { %v453_v34 = vpop.permute.xlu1 %452  ;;  %v442_v35 = vpop.permute.xlu0 %441 }
  0xbf   : > { %v449_v37 = vmul.f32 %v442_v35, %v437_v33 }
  0xc1   : > { %v459_v42 = vadd.f32 %v453_v34, %v449_v37 }
  0xc2   : > { %v447_v38 = vpop.permute.xlu0 %446  ;;  %v457_v40 = vpop.permute.xlu1 %456 }
  0xc3   : > { %v450_v39 = vmul.f32 %v447_v38, %v438_v36 }
  0xc5   : > { %v460_v41 = vadd.f32 %v457_v40, %v450_v39 }
  0xc7   : > { %v467_v43 = vpack.c.bf16 %v460_v41, %v459_v42 }
  0xc9   : > { %6026 = vmatpush3.bf16.msra.mxu0 %v467_v43 }
  0xcc   : > { %6028 = vmatmul.mubr.msk.bf16.vlgmr.msra.gmra.mxu0 %vm483_vm1, %v7728_v44 }
  0xcd   : > { %6031 = vmatprep.mubr.msk.bf16.mxu0 %vm8432_vm0, %v11257_v4 }
  0xd4   : > { %6032 = vmatmul.mubr.msk.bf16.gmra.mxu0 %vm483_vm1, %v7729_v45 }
  0xd5   : > { %6035 = vmatprep.mubr.msk.bf16.mxu0 %vm8432_vm0, %v11257_v4 }
  0xdc   : > { %6036 = vmatmul.mubr.msk.bf16.gmra.mxu0 %vm483_vm1, %v7730_v1 }
 0x18c   : > { %v527_v52 = vpop.f32.mrf.mxu0 }
 0x18d   : > { %v550_v53 = vmul.f32 0.70710677, %v527_v52 }
 0x18e   : > { %v6029_v54 = vpop.f32.mrf.mxu0 }
 0x18f   : > { %v561_v55 = vrot.slane %v550_v53, %v8629_v51  ;;  %v554_v7 = vcombine.high %v550_v53, %v550_v53 }
 0x190   : > { %v530_v56 = vpop.f32.mrf.mxu0 }
 0x191   : > { %v569_v57 = vcombine.high %v561_v55, %v561_v55  ;;  %v551_v58 = vmul.f32 0.70710677, %v530_v56  ;;  %v568_v8 = vrot.slane %v554_v7, %v8629_v51 }
 0x192   : > { %v6030_v59 = vpop.f32.mrf.mxu0 }
 0x193   : > { %v571_v60 = vcombine.high %v551_v58, %v551_v58  ;;  %v6735_v61 = vpack.i.bf16 %v569_v57, %v561_v55  ;;  %v570_v12 = vcombine.high %v568_v8, %v568_v8  ;;  %v578_v17 = vrot.slane %v551_v58, %v8629_v51 }
 0x194   : > { %v8632_v62 = vpop.f32.mrf.mxu0 }
 0x195   : > { %v585_v63 = vrot.slane %v571_v60, %v8629_v51  ;;  %6736 = vxpose.xlu0.b32.start.end [1/1] (short) %v6735_v61, 128  ;;  %v918_v11 = vcombine.high %v8632_v62, %v8632_v62  ;;  %v6817_v14 = vpack.i.bf16 %v570_v12, %v568_v8  ;;  %v586_v18 = vcombine.high %v578_v17, %v578_v17 }
 0x196   : > { %v6033_v0 = vpop.f32.mrf.mxu0 }
 0x197   : > { %v587_v2 = vcombine.high %v585_v63, %v585_v63  ;;  %v932_v13 = vrot.slane %v918_v11, %v8629_v51  ;;  %v6899_v20 = vpack.i.bf16 %v586_v18, %v578_v17 }
 0x198   : > { %v8638_v3 = vpop.f32.mrf.mxu0 }
 0x199   : > { %v7063_v5 = vpack.i.bf16 %v587_v2, %v585_v63  ;;  %v934_v15 = vcombine.high %v932_v13, %v932_v13  ;;  %v942_v19 = vrot.slane %v8638_v3, %v8629_v51 }
 0x19a   : > { %v6034_v6 = vpop.f32.mrf.mxu0 }
 0x19b   : > { %7064 = vxpose.xlu1.b32.start.end [1/1] (short) %v7063_v5, 128  ;;  %v7145_v16 = vpack.i.bf16 %v934_v15, %v932_v13  ;;  %v950_v21 = vcombine.high %v942_v19, %v942_v19 }
 0x19d   : > { %v7227_v23 = vpack.i.bf16 %v950_v21, %v942_v19 }
 0x1d2   : > { %6818 = vxpose.xlu0.b32.start.end [1/1] (short) %v6817_v14, 128 }
 0x1d8   : > { %7146 = vxpose.xlu1.b32.start.end [1/1] (short) %v7145_v16, 128 }
 0x20f   : > { %6900 = vxpose.xlu0.b32.start.end [1/1] (short) %v6899_v20, 128 }
 0x211   : > { %v6737_v22 = vpop.trf.xlu0 }
 0x212   : > { %v6741_v24 = vunpack.i.h.bf16 %v6737_v22  ;;  %v6738_v26 = vunpack.i.l.bf16 %v6737_v22 }
 0x215   : > { %v6742_v25 = vpop.trf.xlu0  ;;  %7228 = vxpose.xlu1.b32.start.end [1/1] (short) %v7227_v23, 128 }
 0x216   : > { %v6746_v27 = vunpack.i.h.bf16 %v6742_v25  ;;  %v6743_v28 = vunpack.i.l.bf16 %v6742_v25 }
 0x217   : > { %v8648_v29 = vpop.trf.xlu1 }
 0x218   : > { %v852_v30 = vpack.c.bf16 %v6743_v28, %v6738_v26  ;;  %v860_v31 = vpack.c.bf16 %v6746_v27, %v6741_v24  ;;  %v925_v28 = vrot.slane %v8632_v62, %v8629_v51 }
 0x219   : > { %v6747_v32 = vpop.trf.xlu0 }
 0x21a   : > { %6055 = vmatprep.mubr.msk.bf16.mxu1 %vm1644_vm2, %v852_v30  ;;  %6087 = vmatprep.mubr.msk.bf16.mxu0 %vm1644_vm2, %v860_v31  ;;  %v6751_v34 = vunpack.i.h.bf16 %v6747_v32  ;;  %v6748_v38 = vunpack.i.l.bf16 %v6747_v32  ;;  %v935_v30 = vcombine.high %v8638_v3, %v8638_v3 }
 0x21b   : > { %v8652_v33 = vpop.trf.xlu1 }
 0x21d   : > { %v6752_v35 = vpop.trf.xlu0 }
 0x21e   : > { %v6756_v36 = vunpack.i.h.bf16 %v6752_v35  ;;  %v6753_v37 = vunpack.i.l.bf16 %v6752_v35 }
 0x21f   : > { %v7075_v39 = vpop.trf.xlu1 }
 0x220   : > { %v8654_v40 = vpack.c.bf16 %v6756_v36, %v6751_v34  ;;  %v8656_v42 = vpack.c.bf16 %v6753_v37, %v6748_v38  ;;  %v7079_v43 = vunpack.i.h.bf16 %v7075_v39  ;;  %v7076_v44 = vunpack.i.l.bf16 %v7075_v39 }
 0x221   : > { %v6757_v41 = vpop.trf.xlu0  ;;  %v933_v36 = vcombine.high %v925_v28, %v925_v28  ;;  %v949_v37 = vrot.slane %v935_v30, %v8629_v51 }
 0x222   : > { %v6761_v52 = vunpack.i.h.bf16 %v6757_v41  ;;  %v6758_v53 = vunpack.i.l.bf16 %v6757_v41 }
 0x223   : > { %v7080_v45 = vpop.trf.xlu1  ;;  %v6981_v62 = vpack.i.bf16 %v933_v36, %v925_v28 }
 0x224   : > { %v7084_v46 = vunpack.i.h.bf16 %v7080_v45  ;;  %v7081_v47 = vunpack.i.l.bf16 %v7080_v45 }
 0x225   : > { %v6762_v48 = vpop.trf.xlu0 }
 0x226   : > { %v6766_v49 = vunpack.i.h.bf16 %v6762_v48  ;;  %v6763_v50 = vunpack.i.l.bf16 %v6762_v48  ;;  %v8658_v54 = vpack.c.bf16 %v7081_v47, %v7076_v44  ;;  %v8660_v55 = vpack.c.bf16 %v7084_v46, %v7079_v43 }
 0x227   : > { %v8662_v56 = vpop.trf.xlu1  ;;  %v951_v46 = vcombine.high %v949_v37, %v949_v37 }
 0x228   : > { %11524 = vst [vmem:[#allocation15_spill] sm:$0xff] %v8658_v54  ;;  %11525 = vst [vmem:[#allocation16_spill] sm:$0xff] %v8660_v55  ;;  %v8664_v58 = vpack.c.bf16 %v6763_v50, %v6758_v53  ;;  %v8666_v59 = vpack.c.bf16 %v6766_v49, %v6761_v52 }
 0x229   : > { %v6767_v57 = vpop.trf.xlu0  ;;  %v7309_v50 = vpack.i.bf16 %v951_v46, %v949_v37 }
 0x22a   : > { %v6771_v1 = vunpack.i.h.bf16 %v6767_v57  ;;  %v6768_v2 = vunpack.i.l.bf16 %v6767_v57 }
 0x22b   : > { %v8668_v60 = vpop.trf.xlu1 }
 0x22c   : > { %v7094_v46 = vunpack.i.h.bf16 %v8668_v60 }
 0x22d   : > { %v6772_v61 = vpop.trf.xlu0 }
 0x22e   : > { %v6776_v63 = vunpack.i.h.bf16 %v6772_v61  ;;  %v6773_v0 = vunpack.i.l.bf16 %v6772_v61 }
 0x22f   : > { %v8670_v5 = vpop.trf.xlu1 }
 0x230   : > { %v8672_v7 = vpack.c.bf16 %v6773_v0, %v6768_v2  ;;  %v8674_v8 = vpack.c.bf16 %v6776_v63, %v6771_v1 }
 0x231   : > { %v6777_v6 = vpop.trf.xlu0 }
 0x232   : > { %v6781_v15 = vunpack.i.h.bf16 %v6777_v6  ;;  %v6778_v16 = vunpack.i.l.bf16 %v6777_v6 }
 0x233   : > { %v8676_v11 = vpop.trf.xlu1 }
 0x235   : > { %v6782_v12 = vpop.trf.xlu0 }
 0x236   : > { %v6786_v13 = vunpack.i.h.bf16 %v6782_v12  ;;  %v6783_v14 = vunpack.i.l.bf16 %v6782_v12  ;;  %v7069_v12 = vunpack.i.h.bf16 %v8648_v29 }
 0x237   : > { %v8678_v17 = vpop.trf.xlu1 }
 0x238   : > { %v8680_v19 = vpack.c.bf16 %v6783_v14, %v6778_v16  ;;  %v8682_v20 = vpack.c.bf16 %v6786_v13, %v6781_v15  ;;  %v7066_v13 = vunpack.i.l.bf16 %v8648_v29  ;;  %v7074_v14 = vunpack.i.h.bf16 %v8652_v33 }
 0x239   : > { %v6787_v18 = vpop.trf.xlu0  ;;  %v7071_v15 = vunpack.i.l.bf16 %v8652_v33 }
 0x23a   : > { %v6791_v25 = vunpack.i.h.bf16 %v6787_v18  ;;  %v6788_v26 = vunpack.i.l.bf16 %v6787_v18 }
 0x23b   : > { %v8684_v21 = vpop.trf.xlu1  ;;  %v8721_v30 = vpack.c.bf16 %v7071_v15, %v7066_v13  ;;  %v7096_v15 = vunpack.i.l.bf16 %v8670_v5 }
 0x23d   : > { %v6792_v22 = vpop.trf.xlu0  ;;  %11526 = vst [vmem:[#allocation17_spill] sm:$0xff] %v8721_v30 }
 0x23e   : > { %v6796_v23 = vunpack.i.h.bf16 %v6792_v22  ;;  %v6793_v24 = vunpack.i.l.bf16 %v6792_v22 }
 0x23f   : > { %v8686_v27 = vpop.trf.xlu1 }
 0x240   : > { %v8692_v32 = vpack.c.bf16 %v6793_v24, %v6788_v26  ;;  %v8694_v34 = vpack.c.bf16 %v6796_v23, %v6791_v25 }
 0x241   : > { %v6797_v31 = vpop.trf.xlu0 }
 0x242   : > { %v6801_v43 = vunpack.i.h.bf16 %v6797_v31  ;;  %v6798_v44 = vunpack.i.l.bf16 %v6797_v31  ;;  %v8723_v31 = vpack.c.bf16 %v7074_v14, %v7069_v12 }
 0x243   : > { %v8696_v35 = vpop.trf.xlu1 }
 0x244   : > { %11527 = vst [vmem:[#allocation18_spill] sm:$0xff] %v8723_v31 }
 0x245   : > { %v6802_v38 = vpop.trf.xlu0 }
 0x246   : > { %v6806_v39 = vunpack.i.h.bf16 %v6802_v38  ;;  %v6803_v41 = vunpack.i.l.bf16 %v6802_v38 }
 0x247   : > { %v8699_v45 = vpop.trf.xlu1 }
 0x248   : > { %v8701_v47 = vpack.c.bf16 %v6803_v41, %v6798_v44  ;;  %v8703_v48 = vpack.c.bf16 %v6806_v39, %v6801_v43  ;;  %v7089_v44 = vunpack.i.h.bf16 %v8662_v56 }
 0x249   : > { %v6807_v3 = vpop.trf.xlu0 }
 0x24a   : > { %v6811_v61 = vunpack.i.h.bf16 %v6807_v3  ;;  %v6808_v63 = vunpack.i.l.bf16 %v6807_v3  ;;  %v7091_v3 = vunpack.i.l.bf16 %v8668_v60  ;;  %v8739_v14 = vpack.c.bf16 %v7094_v46, %v7089_v44 }
 0x24b   : > { %v8705_v49 = vpop.trf.xlu1  ;;  %v7104_v60 = vunpack.i.h.bf16 %v8676_v11  ;;  %v7111_v44 = vunpack.i.l.bf16 %v8684_v21 }
 0x24c   : > { %6982 = vxpose.xlu0.b32.start.end [1/1] (short) %v6981_v62, 128  ;;  %v7086_v62 = vunpack.i.l.bf16 %v8662_v56  ;;  %11533 = vst [vmem:[#allocation24_spill] sm:$0xff] %v8739_v14  ;;  %v7099_v56 = vunpack.i.h.bf16 %v8670_v5  ;;  %v7109_v5 = vunpack.i.h.bf16 %v8678_v17 }
 0x24d   : > { %v6812_v52 = vpop.trf.xlu0 }
 0x24e   : > { %v6816_v53 = vunpack.i.h.bf16 %v6812_v52  ;;  %v6813_v57 = vunpack.i.l.bf16 %v6812_v52  ;;  %v8737_v13 = vpack.c.bf16 %v7091_v3, %v7086_v62 }
 0x24f   : > { %v8707_v0 = vpop.trf.xlu1 }
 0x250   : > { %v8709_v2 = vpack.c.bf16 %v6813_v57, %v6808_v63  ;;  %v8711_v6 = vpack.c.bf16 %v6816_v53, %v6811_v61  ;;  %11532 = vst [vmem:[#allocation23_spill] sm:$0xff] %v8737_v13 }
 0x251   : > { %v6819_v1 = vpop.trf.xlu0 }
 0x252   : > { %7310 = vxpose.xlu1.b32.start.end [1/1] (short) %v7309_v50, 128  ;;  %v6823_v16 = vunpack.i.h.bf16 %v6819_v1  ;;  %v6820_v18 = vunpack.i.l.bf16 %v6819_v1 }
 0x255   : > { %v6824_v22 = vpop.trf.xlu0 }
 0x256   : > { %v6828_v23 = vunpack.i.h.bf16 %v6824_v22  ;;  %v6825_v24 = vunpack.i.l.bf16 %v6824_v22 }
 0x258   : > { %v8717_v25 = vpack.c.bf16 %v6825_v24, %v6820_v18  ;;  %v8719_v26 = vpack.c.bf16 %v6828_v23, %v6823_v16  ;;  %v7101_v16 = vunpack.i.l.bf16 %v8676_v11  ;;  %v7114_v11 = vunpack.i.h.bf16 %v8684_v21 }
 0x259   : > { %v6829_v28 = vpop.trf.xlu0  ;;  %v7124_v21 = vunpack.i.h.bf16 %v8696_v35 }
 0x25a   : > { %v6833_v36 = vunpack.i.h.bf16 %v6829_v28  ;;  %v6830_v29 = vunpack.i.l.bf16 %v6829_v28 }
 0x25d   : > { %v6834_v37 = vpop.trf.xlu0 }
 0x25e   : > { %v6838_v38 = vunpack.i.h.bf16 %v6834_v37  ;;  %v6835_v39 = vunpack.i.l.bf16 %v6834_v37 }
 0x260   : > { %v8725_v33 = vpack.c.bf16 %v6835_v39, %v6830_v29  ;;  %v8727_v41 = vpack.c.bf16 %v6838_v38, %v6833_v36  ;;  %v8749_v38 = vpack.c.bf16 %v7101_v16, %v7096_v15  ;;  %v8751_v39 = vpack.c.bf16 %v7104_v60, %v7099_v56 }
 0x261   : > { %v6839_v43 = vpop.trf.xlu0  ;;  %v8763_v56 = vpack.c.bf16 %v7114_v11, %v7109_v5  ;;  %v7116_v15 = vunpack.i.l.bf16 %v8686_v27  ;;  %v7121_v60 = vunpack.i.l.bf16 %v8696_v35  ;;  %v7134_v35 = vunpack.i.h.bf16 %v8705_v49 }
 0x262   : > { %11528 = vst [vmem:[#allocation19_spill] sm:$0xff] %v8725_v33  ;;  %11529 = vst [vmem:[#allocation20_spill] sm:$0xff] %v8727_v41  ;;  %v6843_v50 = vunpack.i.h.bf16 %v6839_v43  ;;  %v6840_v52 = vunpack.i.l.bf16 %v6839_v43  ;;  %v7106_v43 = vunpack.i.l.bf16 %v8678_v17  ;;  %v7119_v17 = vunpack.i.h.bf16 %v8686_v27 }
 0x263   : > { %11536 = vst [vmem:[#allocation27_spill] sm:$0xff] %v8749_v38  ;;  %11537 = vst [vmem:[#allocation28_spill] sm:$0xff] %v8751_v39  ;;  %v8773_v5 = vpack.c.bf16 %v7121_v60, %v7116_v15  ;;  %v7129_v27 = vunpack.i.h.bf16 %v8699_v45  ;;  %v7139_v60 = vunpack.i.h.bf16 %v8707_v0 }
 0x264   : > { %11541 = vst [vmem:[#allocation32_spill] sm:$0xff] %v8763_v56  ;;  %v8775_v11 = vpack.c.bf16 %v7124_v21, %v7119_v17 }
 0x265   : > { %v6844_v53 = vpop.trf.xlu0  ;;  %11544 = vst [vmem:[#allocation35_spill] sm:$0xff] %v8773_v5  ;;  %v8789_v21 = vpack.c.bf16 %v7134_v35, %v7129_v27 }
 0x266   : > { %v6848_v57 = vunpack.i.h.bf16 %v6844_v53  ;;  %v6845_v61 = vunpack.i.l.bf16 %v6844_v53  ;;  %11545 = vst [vmem:[#allocation36_spill] sm:$0xff] %v8775_v11 }
 0x267   : > { %11550 = vst [vmem:[#allocation41_spill] sm:$0xff] %v8789_v21 }
 0x268   : > { %v8733_v63 = vpack.c.bf16 %v6845_v61, %v6840_v52  ;;  %v8735_v1 = vpack.c.bf16 %v6848_v57, %v6843_v50 }
 0x269   : > { %v6849_v12 = vpop.trf.xlu0 }
 0x26a   : > { %11530 = vst [vmem:[#allocation21_spill] sm:$0xff] %v8733_v63  ;;  %11531 = vst [vmem:[#allocation22_spill] sm:$0xff] %v8735_v1  ;;  %v6853_v18 = vunpack.i.h.bf16 %v6849_v12  ;;  %v6850_v22 = vunpack.i.l.bf16 %v6849_v12  ;;  %v8761_v12 = vpack.c.bf16 %v7111_v44, %v7106_v43  ;;  %v7126_v44 = vunpack.i.l.bf16 %v8699_v45  ;;  %v7140_v45 = vpop.trf.xlu1 }
 0x26c   : > { %11540 = vst [vmem:[#allocation31_spill] sm:$0xff] %v8761_v12 }
 0x26d   : > { %v6854_v23 = vpop.trf.xlu0 }
 0x26e   : > { %v6858_v24 = vunpack.i.h.bf16 %v6854_v23  ;;  %v6855_v28 = vunpack.i.l.bf16 %v6854_v23 }
 0x270   : > { %v8745_v36 = vpack.c.bf16 %v6855_v28, %v6850_v22  ;;  %v8747_v29 = vpack.c.bf16 %v6858_v24, %v6853_v18 }
 0x271   : > { %v6859_v37 = vpop.trf.xlu0 }
 0x272   : > { %11534 = vst [vmem:[#allocation25_spill] sm:$0xff] %v8745_v36  ;;  %11535 = vst [vmem:[#allocation26_spill] sm:$0xff] %v8747_v29  ;;  %v6863_v62 = vunpack.i.h.bf16 %v6859_v37  ;;  %v6860_v46 = vunpack.i.l.bf16 %v6859_v37 }
 0x275   : > { %v6864_v3 = vpop.trf.xlu0 }
 0x276   : > { %v6868_v50 = vunpack.i.h.bf16 %v6864_v3  ;;  %v6865_v52 = vunpack.i.l.bf16 %v6864_v3 }
 0x278   : > { %v8757_v53 = vpack.c.bf16 %v6865_v52, %v6860_v46  ;;  %v8759_v57 = vpack.c.bf16 %v6868_v50, %v6863_v62  ;;  %v7131_v62 = vunpack.i.l.bf16 %v8705_v49  ;;  %v7136_v49 = vunpack.i.l.bf16 %v8707_v0 }
 0x279   : > { %v6869_v61 = vpop.trf.xlu0 }
 0x27a   : > { %11538 = vst [vmem:[#allocation29_spill] sm:$0xff] %v8757_v53  ;;  %11539 = vst [vmem:[#allocation30_spill] sm:$0xff] %v8759_v57  ;;  %v6873_v16 = vunpack.i.h.bf16 %v6869_v61  ;;  %v6870_v18 = vunpack.i.l.bf16 %v6869_v61  ;;  %v8787_v17 = vpack.c.bf16 %v7131_v62, %v7126_v44 }
 0x27c   : > { %11549 = vst [vmem:[#allocation40_spill] sm:$0xff] %v8787_v17 }
 0x27d   : > { %v6874_v22 = vpop.trf.xlu0 }
 0x27e   : > { %v6878_v23 = vunpack.i.h.bf16 %v6874_v22  ;;  %v6875_v24 = vunpack.i.l.bf16 %v6874_v22 }
 0x280   : > { %v8769_v28 = vpack.c.bf16 %v6875_v24, %v6870_v18  ;;  %v8771_v37 = vpack.c.bf16 %v6878_v23, %v6873_v16  ;;  %v7144_v23 = vunpack.i.h.bf16 %v7140_v45  ;;  %v7141_v24 = vunpack.i.l.bf16 %v7140_v45 }
 0x281   : > { %v6879_v43 = vpop.trf.xlu0 }
 0x282   : > { %11542 = vst [vmem:[#allocation33_spill] sm:$0xff] %v8769_v28  ;;  %11543 = vst [vmem:[#allocation34_spill] sm:$0xff] %v8771_v37  ;;  %v6883_v46 = vunpack.i.h.bf16 %v6879_v43  ;;  %v6880_v3 = vunpack.i.l.bf16 %v6879_v43  ;;  %v7147_v43 = vpop.trf.xlu1 }
 0x283   : > { %v7151_v44 = vunpack.i.h.bf16 %v7147_v43  ;;  %v7148_v62 = vunpack.i.l.bf16 %v7147_v43 }
 0x285   : > { %v6884_v50 = vpop.trf.xlu0 }
 0x286   : > { %v6888_v52 = vunpack.i.h.bf16 %v6884_v50  ;;  %v6885_v61 = vunpack.i.l.bf16 %v6884_v50  ;;  %v8799_v50 = vpack.c.bf16 %v7144_v23, %v7139_v60  ;;  %v7152_v27 = vpop.trf.xlu1 }
 0x287   : > { %v7156_v35 = vunpack.i.h.bf16 %v7152_v27 }
 0x288   : > { %v8781_v16 = vpack.c.bf16 %v6885_v61, %v6880_v3  ;;  %v8783_v18 = vpack.c.bf16 %v6888_v52, %v6883_v46  ;;  %v8797_v46 = vpack.c.bf16 %v7141_v24, %v7136_v49  ;;  %11554 = vst [vmem:[#allocation45_spill] sm:$0xff] %v8799_v50  ;;  %v7153_v52 = vunpack.i.l.bf16 %v7152_v27 }
 0x289   : > { %v8785_v15 = vpop.trf.xlu0  ;;  %v8805_v10 = vpack.c.bf16 %v7156_v35, %v7151_v44 }
 0x28a   : > { %11546 = vst [vmem:[#allocation37_spill] sm:$0xff] %v8781_v16  ;;  %11547 = vst [vmem:[#allocation38_spill] sm:$0xff] %v8783_v18  ;;  %v7157_v4 = vpop.trf.xlu1  ;;  %v8803_v0 = vpack.c.bf16 %v7153_v52, %v7148_v62 }
 0x28b   : > { %11548 = vst [vmem:[#allocation39_spill] sm:$0xff] %v8785_v15  ;;  %11553 = vst [vmem:[#allocation44_spill] sm:$0xff] %v8797_v46  ;;  %v7161_v9 = vunpack.i.h.bf16 %v7157_v4  ;;  %v7158_v21 = vunpack.i.l.bf16 %v7157_v4 }
 0x28c   : > { %11556 = vst [vmem:[#allocation47_spill] sm:$0xff] %v8803_v0  ;;  %11557 = vst [vmem:[#allocation48_spill] sm:$0xff] %v8805_v10 }
 0x28d   : > { %v8793_v22 = vpop.trf.xlu0 }
 0x28e   : > { %11551 = vst [vmem:[#allocation42_spill] sm:$0xff] %v8793_v22  ;;  %v7162_v49 = vpop.trf.xlu1 }
 0x28f   : > { %v7166_v24 = vunpack.i.h.bf16 %v7162_v49  ;;  %v7163_v60 = vunpack.i.l.bf16 %v7162_v49 }
 0x291   : > { %v8795_v3 = vpop.trf.xlu0  ;;  %v8811_v50 = vpack.c.bf16 %v7163_v60, %v7158_v21  ;;  %v8813_v27 = vpack.c.bf16 %v7166_v24, %v7161_v9 }
 0x292   : > { %11552 = vst [vmem:[#allocation43_spill] sm:$0xff] %v8795_v3  ;;  %v7167_v43 = vpop.trf.xlu1 }
 0x293   : > { %11560 = vst [vmem:[#allocation51_spill] sm:$0xff] %v8811_v50  ;;  %11561 = vst [vmem:[#allocation52_spill] sm:$0xff] %v8813_v27  ;;  %v7171_v62 = vunpack.i.h.bf16 %v7167_v43  ;;  %v7168_v52 = vunpack.i.l.bf16 %v7167_v43 }
 0x295   : > { %v8801_v61 = vpop.trf.xlu0 }
 0x296   : > { %11555 = vst [vmem:[#allocation46_spill] sm:$0xff] %v8801_v61  ;;  %v7172_v44 = vpop.trf.xlu1 }
 0x297   : > { %v7176_v35 = vunpack.i.h.bf16 %v7172_v44  ;;  %v7173_v17 = vunpack.i.l.bf16 %v7172_v44 }
 0x299   : > { %v8807_v45 = vpop.trf.xlu0  ;;  %v8819_v5 = vpack.c.bf16 %v7173_v17, %v7168_v52  ;;  %v8821_v49 = vpack.c.bf16 %v7176_v35, %v7171_v62 }
 0x29a   : > { %11558 = vst [vmem:[#allocation49_spill] sm:$0xff] %v8807_v45  ;;  %v7177_v4 = vpop.trf.xlu1 }
 0x29b   : > { %11564 = vst [vmem:[#allocation55_spill] sm:$0xff] %v8821_v49  ;;  %v7181_v21 = vunpack.i.h.bf16 %v7177_v4  ;;  %v7178_v60 = vunpack.i.l.bf16 %v7177_v4 }
 0x29d   : > { %v8809_v23 = vpop.trf.xlu0 }
 0x29e   : > { %11559 = vst [vmem:[#allocation50_spill] sm:$0xff] %v8809_v23  ;;  %v7182_v9 = vpop.trf.xlu1 }
 0x29f   : > { %v7186_v24 = vunpack.i.h.bf16 %v7182_v9  ;;  %v7183_v12 = vunpack.i.l.bf16 %v7182_v9 }
 0x2a1   : > { %v8815_v46 = vpop.trf.xlu0  ;;  %v8827_v38 = vpack.c.bf16 %v7183_v12, %v7178_v60  ;;  %v8829_v44 = vpack.c.bf16 %v7186_v24, %v7181_v21 }
 0x2a2   : > { %11562 = vst [vmem:[#allocation53_spill] sm:$0xff] %v8815_v46  ;;  %v7187_v43 = vpop.trf.xlu1 }
 0x2a3   : > { %v7191_v17 = vunpack.i.h.bf16 %v7187_v43  ;;  %v7188_v52 = vunpack.i.l.bf16 %v7187_v43 }
 0x2a5   : > { %v8817_v11 = vpop.trf.xlu0 }
 0x2a6   : > { %11563 = vst [vmem:[#allocation54_spill] sm:$0xff] %v8817_v11  ;;  %v7192_v62 = vpop.trf.xlu1 }
 0x2a7   : > { %v7196_v35 = vunpack.i.h.bf16 %v7192_v62  ;;  %v7193_v13 = vunpack.i.l.bf16 %v7192_v62 }
 0x2a9   : > { %v8823_v56 = vpop.trf.xlu0  ;;  %v8835_v54 = vpack.c.bf16 %v7193_v13, %v7188_v52  ;;  %v8837_v9 = vpack.c.bf16 %v7196_v35, %v7191_v17 }
 0x2aa   : > { %11565 = vst [vmem:[#allocation56_spill] sm:$0xff] %v8823_v56  ;;  %v7197_v4 = vpop.trf.xlu1 }
 0x2ab   : > { %v7201_v12 = vunpack.i.h.bf16 %v7197_v4  ;;  %v7198_v60 = vunpack.i.l.bf16 %v7197_v4 }
 0x2ad   : > { %v8825_v39 = vpop.trf.xlu0 }
 0x2ae   : > { %11566 = vst [vmem:[#allocation57_spill] sm:$0xff] %v8825_v39  ;;  %v7202_v21 = vpop.trf.xlu1 }
 0x2af   : > { %v7206_v24 = vunpack.i.h.bf16 %v7202_v21  ;;  %v7203_v30 = vunpack.i.l.bf16 %v7202_v21 }
 0x2b1   : > { %v8831_v14 = vpop.trf.xlu0  ;;  %v8843_v56 = vpack.c.bf16 %v7203_v30, %v7198_v60  ;;  %v8845_v62 = vpack.c.bf16 %v7206_v24, %v7201_v12 }
 0x2b2   : > { %11567 = vst [vmem:[#allocation58_spill] sm:$0xff] %v8831_v14  ;;  %v7207_v43 = vpop.trf.xlu1 }
 0x2b3   : > { %v7211_v13 = vunpack.i.h.bf16 %v7207_v43  ;;  %v7208_v52 = vunpack.i.l.bf16 %v7207_v43 }
 0x2b5   : > { %v8833_v55 = vpop.trf.xlu0 }
 0x2b6   : > { %11568 = vst [vmem:[#allocation59_spill] sm:$0xff] %v8833_v55  ;;  %v7212_v17 = vpop.trf.xlu1 }
 0x2b7   : > { %v7216_v35 = vunpack.i.h.bf16 %v7212_v17  ;;  %v7213_v39 = vunpack.i.l.bf16 %v7212_v17 }
 0x2b9   : > { %v8839_v31 = vpop.trf.xlu0  ;;  %v8851_v46 = vpack.c.bf16 %v7213_v39, %v7208_v52  ;;  %v8853_v21 = vpack.c.bf16 %v7216_v35, %v7211_v13 }
 0x2ba   : > { %11569 = vst [vmem:[#allocation60_spill] sm:$0xff] %v8839_v31  ;;  %v7217_v4 = vpop.trf.xlu1 }
 0x2bb   : > { %v7221_v30 = vunpack.i.h.bf16 %v7217_v4  ;;  %v7218_v60 = vunpack.i.l.bf16 %v7217_v4 }
 0x2bd   : > { %v8841_v14 = vpop.trf.xlu0 }
 0x2be   : > { %11570 = vst [vmem:[#allocation61_spill] sm:$0xff] %v8841_v14  ;;  %v7222_v12 = vpop.trf.xlu1 }
 0x2bf   : > { %v7226_v24 = vunpack.i.h.bf16 %v7222_v12  ;;  %v7223_v45 = vunpack.i.l.bf16 %v7222_v12 }
 0x2c1   : > { %v8847_v55 = vpop.trf.xlu0  ;;  %v8859_v11 = vpack.c.bf16 %v7223_v45, %v7218_v60  ;;  %v8861_v17 = vpack.c.bf16 %v7226_v24, %v7221_v30 }
 0x2c2   : > { %11571 = vst [vmem:[#allocation62_spill] sm:$0xff] %v8847_v55  ;;  %v7229_v43 = vpop.trf.xlu1 }
 0x2c3   : > { %v7233_v39 = vunpack.i.h.bf16 %v7229_v43  ;;  %v7230_v52 = vunpack.i.l.bf16 %v7229_v43 }
 0x2c5   : > { %v8849_v31 = vpop.trf.xlu0 }
 0x2c6   : > { %11572 = vst [vmem:[#allocation63_spill] sm:$0xff] %v8849_v31  ;;  %v7234_v13 = vpop.trf.xlu1 }
 0x2c7   : > { %v7235_v23 = vunpack.i.l.bf16 %v7234_v13 }
 0x2c9   : > { %v8855_v14 = vpop.trf.xlu0  ;;  %v8867_v3 = vpack.c.bf16 %v7235_v23, %v7230_v52 }
 0x2ca   : > { %11573 = vst [vmem:[#allocation64_spill] sm:$0xff] %v8855_v14  ;;  %v7238_v14 = vunpack.i.h.bf16 %v7234_v13  ;;  %v7239_v4 = vpop.trf.xlu1 }
 0x2cb   : > { %11575 = vst [vmem:[#allocation66_spill] sm:$0xff] %v8867_v3  ;;  %v7243_v45 = vunpack.i.h.bf16 %v7239_v4  ;;  %v7240_v60 = vunpack.i.l.bf16 %v7239_v4 }
 0x2cc   : > { %v8869_v12 = vpack.c.bf16 %v7238_v14, %v7233_v39  ;;  %v8881_v39 = vpop.f32.mrf.mxu0 }
 0x2cd   : > { %v8857_v55 = vpop.trf.xlu0 }
 0x2ce   : > { %11574 = vst [vmem:[#allocation65_spill] sm:$0xff] %v8857_v55  ;;  %11576 = vst [vmem:[#allocation67_spill] sm:$0xff] %v8869_v12  ;;  %v7244_v30 = vpop.trf.xlu1  ;;  %v6037_v16 = vpop.f32.mrf.mxu0 }
 0x2cf   : > { %v7248_v15 = vunpack.i.h.bf16 %v7244_v30  ;;  %v7245_v61 = vunpack.i.l.bf16 %v7244_v30  ;;  %v1289_v30 = vrot.slane %v8881_v39, %v8629_v51 }
 0x2d1   : > { %v8863_v31 = vpop.trf.xlu0  ;;  %v8875_v22 = vpack.c.bf16 %v7245_v61, %v7240_v60  ;;  %v8877_v18 = vpack.c.bf16 %v7248_v15, %v7243_v45  ;;  %v1297_v60 = vcombine.high %v1289_v30, %v1289_v30 }
 0x2d2   : > { %v7249_v43 = vpop.trf.xlu1 }
 0x2d3   : > { %11577 = vst [vmem:[#allocation68_spill] sm:$0xff] %v8875_v22  ;;  %11578 = vst [vmem:[#allocation69_spill] sm:$0xff] %v8877_v18  ;;  %v7253_v23 = vunpack.i.h.bf16 %v7249_v43  ;;  %v7250_v52 = vunpack.i.l.bf16 %v7249_v43  ;;  %v7391_v43 = vpack.i.bf16 %v1297_v60, %v1289_v30 }
 0x2d5   : > { %v8865_v35 = vpop.trf.xlu0  ;;  %7392 = vxpose.xlu1.b32.start.end [1/1] (short) %v7391_v43, 128 }
 0x2d6   : > { %v7254_v14 = vpop.trf.xlu1 }
 0x2d7   : > { %v7258_v4 = vunpack.i.h.bf16 %v7254_v14  ;;  %v7255_v3 = vunpack.i.l.bf16 %v7254_v14 }
 0x2d9   : > { %v8871_v55 = vpop.trf.xlu0  ;;  %v8887_v61 = vpack.c.bf16 %v7255_v3, %v7250_v52  ;;  %v8889_v15 = vpack.c.bf16 %v7258_v4, %v7253_v23 }
 0x2da   : > { %v7259_v37 = vpop.trf.xlu1 }
 0x2db   : > { %11579 = vst [vmem:[#allocation70_spill] sm:$0xff] %v8887_v61  ;;  %11580 = vst [vmem:[#allocation71_spill] sm:$0xff] %v8889_v15  ;;  %v7263_v18 = vunpack.i.h.bf16 %v7259_v37  ;;  %v7260_v14 = vunpack.i.l.bf16 %v7259_v37 }
 0x2dd   : > { %v8873_v24 = vpop.trf.xlu0 }
 0x2de   : > { %v7264_v22 = vpop.trf.xlu1 }
 0x2df   : > { %v7268_v57 = vunpack.i.h.bf16 %v7264_v22  ;;  %v7265_v16 = vunpack.i.l.bf16 %v7264_v22 }
 0x2e1   : > { %v8879_v13 = vpop.trf.xlu0  ;;  %v8895_v29 = vpack.c.bf16 %v7268_v57, %v7263_v18  ;;  %v8899_v3 = vpack.c.bf16 %v7265_v16, %v7260_v14 }
 0x2e2   : > { %v7269_v53 = vpop.trf.xlu1 }
 0x2e3   : > { %11581 = vst [vmem:[#allocation72_spill] sm:$0xff] %v8895_v29  ;;  %11582 = vst [vmem:[#allocation73_spill] sm:$0xff] %v8899_v3  ;;  %v7273_v23 = vunpack.i.h.bf16 %v7269_v53  ;;  %v7270_v52 = vunpack.i.l.bf16 %v7269_v53 }
 0x2e5   : > { %v8883_v12 = vpop.trf.xlu0 }
 0x2e6   : > { %v7274_v4 = vpop.trf.xlu1 }
 0x2e7   : > { %v7278_v30 = vunpack.i.h.bf16 %v7274_v4  ;;  %v7275_v60 = vunpack.i.l.bf16 %v7274_v4 }
 0x2e9   : > { %v8891_v45 = vpop.trf.xlu0  ;;  %v8903_v1 = vpack.c.bf16 %v7275_v60, %v7270_v52  ;;  %v8905_v43 = vpack.c.bf16 %v7278_v30, %v7273_v23 }
 0x2ea   : > { %v7279_v61 = vpop.trf.xlu1 }
 0x2eb   : > { %11583 = vst [vmem:[#allocation74_spill] sm:$0xff] %v8903_v1  ;;  %11584 = vst [vmem:[#allocation75_spill] sm:$0xff] %v8905_v43  ;;  %v7283_v22 = vunpack.i.h.bf16 %v7279_v61  ;;  %v7280_v57 = vunpack.i.l.bf16 %v7279_v61 }
 0x2ed   : > { %v8893_v28 = vpop.trf.xlu0 }
 0x2ee   : > { %v7284_v18 = vpop.trf.xlu1 }
 0x2ef   : > { %v7288_v63 = vunpack.i.h.bf16 %v7284_v18  ;;  %v7285_v14 = vunpack.i.l.bf16 %v7284_v18 }
 0x2f1   : > { %v8897_v36 = vpop.trf.xlu0  ;;  %v8907_v3 = vpack.c.bf16 %v7285_v14, %v7280_v57  ;;  %v8909_v53 = vpack.c.bf16 %v7288_v63, %v7283_v22 }
 0x2f2   : > { %v7289_v16 = vpop.trf.xlu1 }
 0x2f3   : > { %11585 = vst [vmem:[#allocation76_spill] sm:$0xff] %v8907_v3  ;;  %11586 = vst [vmem:[#allocation77_spill] sm:$0xff] %v8909_v53  ;;  %v7293_v33 = vunpack.i.h.bf16 %v7289_v16  ;;  %v7290_v4 = vunpack.i.l.bf16 %v7289_v16 }
 0x2f5   : > { %v8901_v15 = vpop.trf.xlu0 }
 0x2f6   : > { %v7294_v10 = vpop.trf.xlu1 }
 0x2f7   : > { %v7298_v60 = vunpack.i.h.bf16 %v7294_v10  ;;  %v7295_v23 = vunpack.i.l.bf16 %v7294_v10 }
 0x2f9   : > { %v7033_v37 = vpop.trf.xlu0  ;;  %v8913_v43 = vpack.c.bf16 %v7295_v23, %v7290_v4  ;;  %v8915_v61 = vpack.c.bf16 %v7298_v60, %v7293_v33 }
 0x2fa   : > { %v8911_v30 = vpop.trf.xlu1  ;;  %v7037_v23 = vunpack.i.h.bf16 %v7033_v37 }
 0x2fd   : > { %v7038_v29 = vpop.trf.xlu0 }
 0x2fe   : > { %v8917_v57 = vpop.trf.xlu1 }
 0x301   : > { %v7043_v41 = vpop.trf.xlu0 }
 0x302   : > { %v7047_v3 = vunpack.i.h.bf16 %v7043_v41  ;;  %v7044_v27 = vunpack.i.l.bf16 %v7043_v41  ;;  %v8919_v49 = vpop.trf.xlu1  ;;  %v7042_v41 = vunpack.i.h.bf16 %v7038_v29 }
 0x305   : > { %v7048_v52 = vpop.trf.xlu0 }
 0x306   : > { %v7052_v18 = vunpack.i.h.bf16 %v7048_v52  ;;  %v7049_v0 = vunpack.i.l.bf16 %v7048_v52 }
 0x308   : > { %v1222_v52 = vpack.c.bf16 %v7049_v0, %v7044_v27  ;;  %v1230_v60 = vpack.c.bf16 %v7052_v18, %v7047_v3  ;;  %v1229_v3 = vpack.c.bf16 %v7042_v41, %v7037_v23 }
 0x309   : > { %v7053_v1 = vpop.trf.xlu0 }
 0x30a   : > { %v7057_v63 = vunpack.i.h.bf16 %v7053_v1  ;;  %v7054_v14 = vunpack.i.l.bf16 %v7053_v1  ;;  %v7039_v1 = vunpack.i.l.bf16 %v7038_v29  ;;  %v1833_v0 = vsel %vm1644_vm2, %v1230_v60, 0 }
 0x30b   : > { %v7029_v29 = vunpack.i.l.bf16 %v8901_v15  ;;  %v1830_v23 = vsel %vm1644_vm2, %v1229_v3, 0 }
 0x30d   : > { %v7058_v22 = vpop.trf.xlu0 }
 0x30e   : > { %v7062_v53 = vunpack.i.h.bf16 %v7058_v22  ;;  %v7059_v16 = vunpack.i.l.bf16 %v7058_v22  ;;  %v1282_v22 = vcombine.high %v8881_v39, %v8881_v39  ;;  %v7032_v39 = vunpack.i.h.bf16 %v8901_v15 }
 0x310   : > { %v1223_v50 = vpack.c.bf16 %v7059_v16, %v7054_v14  ;;  %v1231_v10 = vpack.c.bf16 %v7062_v53, %v7057_v63  ;;  %v8927_v53 = vpop.trf.xlu1  ;;  %v7034_v63 = vunpack.i.l.bf16 %v7033_v37  ;;  %v1296_v37 = vrot.slane %v1282_v22, %v8629_v51  ;;  %v8942_v16 = vpop.f32.mrf.mxu0 }
 0x311   : > { %11587 = vst [vmem:[#allocation78_spill] sm:$0xff] %v8942_v16 }
 0x312   : > { %6569 = vmatprep.subr.msk.bf16.mxu1 %vm1644_vm2, %v1223_v50  ;;  %6577 = vmatprep.subr.msk.bf16.mxu0 %vm1644_vm2, %v1231_v10  ;;  %v1691_v33 = vsel %vm1644_vm2, %v1223_v50, 0  ;;  %v1836_v4 = vsel %vm1644_vm2, %v1231_v10, 0  ;;  %v1688_v50 = vsel %vm1644_vm2, %v1222_v52, 0  ;;  %v1221_v27 = vpack.c.bf16 %v7039_v1, %v7034_v63 }
 0x313   : > { %6040 = vmatpush3.bf16.xpose.msra.mxu1 %v1691_v33  ;;  %6072 = vmatpush3.bf16.xpose.msra.mxu0 %v1836_v4  ;;  %v7024_v10 = vunpack.i.l.bf16 %v8897_v36  ;;  %v7027_v33 = vunpack.i.h.bf16 %v8897_v36  ;;  %v1306_v4 = vrot.slane %v8942_v16, %v8629_v51  ;;  %v1298_v41 = vcombine.high %v1296_v37, %v1296_v37 }
 0x314   : > { %6570 = vmatprep.subr.msk.bf16.mxu1 %vm1644_vm2, %v1222_v52  ;;  %6578 = vmatprep.subr.msk.bf16.mxu0 %vm1644_vm2, %v1230_v60  ;;  %v8933_v18 = vpop.trf.xlu1  ;;  %v6038_v52 = vpop.f32.mrf.mxu0  ;;  %v1685_v1 = vsel %vm1644_vm2, %v1221_v27, 0 }
 0x315   : > { %v1220_v60 = vpack.c.bf16 %v7029_v29, %v7024_v10  ;;  %v1228_v63 = vpack.c.bf16 %v7032_v39, %v7027_v33  ;;  %v1314_v15 = vcombine.high %v1306_v4, %v1306_v4  ;;  %v7473_v29 = vpack.i.bf16 %v1298_v41, %v1296_v37 }
 0x316   : > { %v7009_v37 = vunpack.i.l.bf16 %v8883_v12  ;;  %v7004_v41 = vunpack.i.l.bf16 %v8879_v13 }
 0x317   : > { %v7555_v36 = vpack.i.bf16 %v1314_v15, %v1306_v4  ;;  %v1682_v39 = vsel %vm1644_vm2, %v1220_v60, 0  ;;  %v1827_v33 = vsel %vm1644_vm2, %v1228_v63, 0  ;;  %7474 = vxpose.xlu1.b32.start.end [1/1] (short) %v7473_v29, 128 }
 0x318   : > { %v8940_v14 = vpop.trf.xlu1  ;;  %v1218_v15 = vpack.c.bf16 %v7009_v37, %v7004_v41 }
 0x319   : > { %7556 = vxpose.xlu0.b32.start.end [1/1] (short) %v7555_v36, 128 }
 0x31b   : > { %6042 = vmatpush3.bf16.xpose.msra.mxu1 %v1688_v50  ;;  %6074 = vmatpush3.bf16.xpose.msra.mxu0 %v1833_v0  ;;  %v7022_v50 = vunpack.i.h.bf16 %v8893_v28  ;;  %v7019_v0 = vunpack.i.l.bf16 %v8893_v28  ;;  %v7012_v28 = vunpack.i.h.bf16 %v8883_v12  ;;  %v7002_v12 = vunpack.i.h.bf16 %v8873_v24 }
 0x31c   : > { %6571 = vmatprep.subr.msk.bf16.mxu1 %vm1644_vm2, %v1221_v27  ;;  %6579 = vmatprep.subr.msk.bf16.mxu0 %vm1644_vm2, %v1229_v3  ;;  %v8950_v22 = vpop.trf.xlu1  ;;  %v7017_v27 = vunpack.i.h.bf16 %v8891_v45  ;;  %v7014_v3 = vunpack.i.l.bf16 %v8891_v45 }
 0x31e   : > { %v1219_v52 = vpack.c.bf16 %v7019_v0, %v7014_v3  ;;  %v6999_v0 = vunpack.i.l.bf16 %v8873_v24  ;;  %v1676_v3 = vsel %vm1644_vm2, %v1218_v15, 0  ;;  %v6992_v24 = vunpack.i.h.bf16 %v8865_v35 }
 0x320   : > { %v8956_v10 = vpop.trf.xlu1 }
 0x323   : > { %6044 = vmatpush3.bf16.xpose.msra.mxu1 %v1685_v1  ;;  %6076 = vmatpush3.bf16.xpose.msra.mxu0 %v1830_v23  ;;  %v1227_v1 = vpack.c.bf16 %v7022_v50, %v7017_v27  ;;  %v1679_v23 = vsel %vm1644_vm2, %v1219_v52, 0  ;;  %v6994_v27 = vunpack.i.l.bf16 %v8871_v55 }
 0x324   : > { %6572 = vmatprep.subr.msk.bf16.mxu1 %vm1644_vm2, %v1220_v60  ;;  %6580 = vmatprep.subr.msk.bf16.mxu0 %vm1644_vm2, %v1228_v63  ;;  %v8962_v4 = vpop.trf.xlu1  ;;  %v7007_v60 = vunpack.i.h.bf16 %v8879_v13  ;;  %v6997_v13 = vunpack.i.h.bf16 %v8871_v55  ;;  %v6987_v55 = vunpack.i.h.bf16 %v8863_v31 }
 0x325   : > { %v1824_v63 = vsel %vm1644_vm2, %v1227_v1, 0 }
 0x326   : > { %v1226_v36 = vpack.c.bf16 %v7012_v28, %v7007_v60  ;;  %v6989_v28 = vunpack.i.l.bf16 %v8865_v35  ;;  %v6984_v60 = vunpack.i.l.bf16 %v8863_v31 }
 0x328   : > { %v8968_v45 = vpop.trf.xlu1 }
 0x32b   : > { %6046 = vmatpush3.bf16.xpose.msra.mxu1 %v1682_v39  ;;  %6078 = vmatpush3.bf16.xpose.msra.mxu0 %v1827_v33  ;;  %v1821_v39 = vsel %vm1644_vm2, %v1226_v36, 0  ;;  %v1217_v33 = vpack.c.bf16 %v6999_v0, %v6994_v27  ;;  %v1981_v27 = vsel %vm1644_vm2, %v8859_v11, 0 }
 0x32c   : > { %6573 = vmatprep.subr.msk.bf16.mxu1 %vm1644_vm2, %v1219_v52  ;;  %6581 = vmatprep.subr.msk.bf16.mxu0 %vm1644_vm2, %v1227_v1  ;;  %v8974_v50 = vpop.trf.xlu1  ;;  %v1225_v52 = vpack.c.bf16 %v7002_v12, %v6997_v13 }
 0x32d   : > { %v1673_v41 = vsel %vm1644_vm2, %v1217_v33, 0 }
 0x330   : > { %v8980_v29 = vpop.trf.xlu1 }
 0x333   : > { %6048 = vmatpush3.bf16.xpose.msra.mxu1 %v1679_v23  ;;  %6080 = vmatpush3.bf16.xpose.msra.mxu0 %v1824_v63  ;;  %v1818_v23 = vsel %vm1644_vm2, %v1225_v52, 0  ;;  %v1216_v63 = vpack.c.bf16 %v6989_v28, %v6984_v60  ;;  %v11596_v28 = vld [vmem:[#allocation22_spill] sm:$0xff] }
 0x334   : > { %6574 = vmatprep.subr.msk.bf16.mxu1 %vm1644_vm2, %v1218_v15  ;;  %6582 = vmatprep.subr.msk.bf16.mxu0 %vm1644_vm2, %v1226_v36  ;;  %v8986_v1 = vpop.trf.xlu1  ;;  %v1224_v15 = vpack.c.bf16 %v6992_v24, %v6987_v55  ;;  %v11595_v24 = vld [vmem:[#allocation21_spill] sm:$0xff] }
 0x335   : > { %v1670_v12 = vsel %vm1644_vm2, %v1216_v63, 0 }
 0x336   : > { %v1815_v31 = vsel %vm1644_vm2, %v1224_v15, 0 }
 0x338   : > { %v8992_v37 = vpop.trf.xlu1 }
 0x33b   : > { %6050 = vmatpush3.bf16.xpose.msra.mxu1 %v1676_v3  ;;  %6082 = vmatpush3.bf16.xpose.msra.mxu0 %v1821_v39  ;;  %v2126_v3 = vsel %vm1644_vm2, %v8861_v17, 0 }
 0x33c   : > { %6575 = vmatprep.subr.msk.bf16.mxu1 %vm1644_vm2, %v1217_v33  ;;  %6583 = vmatprep.subr.msk.bf16.mxu0 %vm1644_vm2, %v1225_v52  ;;  %v8998_v36 = vpop.trf.xlu1  ;;  %v11594_v33 = vld [vmem:[#allocation20_spill] sm:$0xff] }
 0x340   : > { %v9002_v35 = vpop.trf.xlu1 }
 0x343   : > { %6052 = vmatpush3.bf16.xpose.msra.mxu1 %v1673_v41  ;;  %6084 = vmatpush3.bf16.xpose.msra.mxu0 %v1818_v23  ;;  %v11597_v23 = vld [vmem:[#allocation25_spill] sm:$0xff] }
 0x344   : > { %6576 = vmatprep.subr.msk.bf16.mxu1 %vm1644_vm2, %v1216_v63  ;;  %6584 = vmatprep.subr.msk.bf16.mxu0 %vm1644_vm2, %v1224_v15  ;;  %v9006_v0 = vpop.trf.xlu1  ;;  %v11598_v63 = vld [vmem:[#allocation26_spill] sm:$0xff] }
 0x348   : > { %v9012_v13 = vpop.trf.xlu1 }
 0x34b   : > { %6054 = vmatpush3.bf16.xpose.msra.mxu1 %v1670_v12  ;;  %6086 = vmatpush3.bf16.xpose.msra.mxu0 %v1815_v31  ;;  %v11599_v12 = vld [vmem:[#allocation29_spill] sm:$0xff]  ;;  %v11600_v31 = vld [vmem:[#allocation30_spill] sm:$0xff] }
 0x34c   : > { %6585 = vmatprep.subr.msk.bf16.mxu1 %vm1644_vm2, %v8859_v11  ;;  %6593 = vmatprep.subr.msk.bf16.mxu0 %vm1644_vm2, %v8861_v17  ;;  %v7308_v11 = vunpack.i.h.bf16 %v8917_v57 }
 0x352   : > { %6056 = vmatmul.mubr.msk.bf16.vlgmr.msra.gmra.mxu1 %vm1644_vm2, %v8656_v42  ;;  %6088 = vmatmul.mubr.msk.bf16.vlgmr.msra.gmra.mxu0 %vm1644_vm2, %v8654_v40  ;;  %v1978_v40 = vsel %vm1644_vm2, %v8851_v46, 0  ;;  %v2123_v42 = vsel %vm1644_vm2, %v8853_v21, 0 }
 0x353   : > { %6059 = vmatprep.mubr.msk.bf16.mxu1 %vm1644_vm2, %v8664_v58  ;;  %6091 = vmatprep.mubr.msk.bf16.mxu0 %vm1644_vm2, %v8666_v59  ;;  %v1975_v58 = vsel %vm1644_vm2, %v8843_v56, 0  ;;  %v2120_v59 = vsel %vm1644_vm2, %v8845_v62, 0 }
 0x354   : > { %6104 = vmatpush3.bf16.xpose.msra.mxu1 %v1981_v27  ;;  %6136 = vmatpush3.bf16.xpose.msra.mxu0 %v2126_v3  ;;  %v2268_v27 = vsel %vm1644_vm2, %v8913_v43, 0  ;;  %v2413_v3 = vsel %vm1644_vm2, %v8915_v61, 0 }
 0x355   : > { %6586 = vmatprep.subr.msk.bf16.mxu1 %vm1644_vm2, %v8851_v46  ;;  %6594 = vmatprep.subr.msk.bf16.mxu0 %vm1644_vm2, %v8853_v21  ;;  %v7305_v46 = vunpack.i.l.bf16 %v8917_v57  ;;  %v11593_v57 = vld [vmem:[#allocation19_spill] sm:$0xff] }
 0x35a   : > { %6060 = vmatmul.mubr.msk.bf16.gmra.mxu1 %vm1644_vm2, %v8672_v7  ;;  %6092 = vmatmul.mubr.msk.bf16.gmra.mxu0 %vm1644_vm2, %v8674_v8  ;;  %v1972_v7 = vsel %vm1644_vm2, %v8835_v54, 0  ;;  %v2117_v8 = vsel %vm1644_vm2, %v8837_v9, 0 }
 0x35b   : > { %6063 = vmatprep.mubr.msk.bf16.mxu1 %vm1644_vm2, %v8680_v19  ;;  %6095 = vmatprep.mubr.msk.bf16.mxu0 %vm1644_vm2, %v8682_v20  ;;  %v2114_v19 = vsel %vm1644_vm2, %v8829_v44, 0  ;;  %v11588_v20 = vld [vmem:[#allocation55_spill] sm:$0xff] }
 0x35c   : > { %6106 = vmatpush3.bf16.xpose.msra.mxu1 %v1978_v40  ;;  %6138 = vmatpush3.bf16.xpose.msra.mxu0 %v2123_v42  ;;  %v11601_v40 = vld [vmem:[#allocation76_spill] sm:$0xff]  ;;  %v11602_v42 = vld [vmem:[#allocation77_spill] sm:$0xff] }
 0x35d   : > { %6587 = vmatprep.subr.msk.bf16.mxu1 %vm1644_vm2, %v8843_v56  ;;  %6595 = vmatprep.subr.msk.bf16.mxu0 %vm1644_vm2, %v8845_v62  ;;  %v7303_v56 = vunpack.i.h.bf16 %v8911_v30 }
 0x35f   : > { %v1263_v62 = vpack.c.bf16 %v7308_v11, %v7303_v56 }
 0x361   : > { %v2416_v60 = vsel %vm1644_vm2, %v1263_v62, 0 }
 0x362   : > { %6064 = vmatmul.mubr.msk.bf16.gmra.mxu1 %vm1644_vm2, %v8692_v32  ;;  %6096 = vmatmul.mubr.msk.bf16.gmra.mxu0 %vm1644_vm2, %v8694_v34  ;;  %v1966_v32 = vsel %vm1644_vm2, %v8819_v5, 0  ;;  %v2111_v34 = vsel %vm1644_vm2, %v11588_v20, 0 }
 0x363   : > { %6067 = vmatprep.mubr.msk.bf16.mxu1 %vm1644_vm2, %v8701_v47  ;;  %6099 = vmatprep.mubr.msk.bf16.mxu0 %vm1644_vm2, %v8703_v48  ;;  %v11589_v47 = vld [vmem:[#allocation51_spill] sm:$0xff]  ;;  %v11590_v48 = vld [vmem:[#allocation52_spill] sm:$0xff] }
 0x364   : > { %6108 = vmatpush3.bf16.xpose.msra.mxu1 %v1975_v58  ;;  %6140 = vmatpush3.bf16.xpose.msra.mxu0 %v2120_v59  ;;  %v11603_v59 = vld [vmem:[#allocation33_spill] sm:$0xff] }
 0x365   : > { %6588 = vmatprep.subr.msk.bf16.mxu1 %vm1644_vm2, %v8835_v54  ;;  %6596 = vmatprep.subr.msk.bf16.mxu0 %vm1644_vm2, %v8837_v9  ;;  %v1969_v54 = vsel %vm1644_vm2, %v8827_v38, 0 }
 0x36a   : > { %6068 = vmatmul.mubr.msk.bf16.gmra.mxu1 %vm1644_vm2, %v8709_v2  ;;  %6100 = vmatmul.mubr.msk.bf16.gmra.mxu0 %vm1644_vm2, %v8711_v6  ;;  %v9094_v2 = vpop.trf.xlu1  ;;  %v1963_v6 = vsel %vm1644_vm2, %v11589_v47, 0 }
 0x36b   : > { %6119 = vmatprep.mubr.msk.bf16.mxu1 %vm1644_vm2, %v8717_v25  ;;  %6151 = vmatprep.mubr.msk.bf16.mxu0 %vm1644_vm2, %v8719_v26  ;;  %v2108_v25 = vsel %vm1644_vm2, %v11590_v48, 0  ;;  %v11591_v26 = vld [vmem:[#allocation47_spill] sm:$0xff] }
 0x36c   : > { %6110 = vmatpush3.bf16.xpose.msra.mxu1 %v1972_v7  ;;  %6142 = vmatpush3.bf16.xpose.msra.mxu0 %v2117_v8  ;;  %v1960_v21 = vsel %vm1644_vm2, %v11591_v26, 0  ;;  %v11604_v7 = vld [vmem:[#allocation34_spill] sm:$0xff]  ;;  %v11605_v8 = vld [vmem:[#allocation37_spill] sm:$0xff] }
 0x36d   : > { %6589 = vmatprep.subr.msk.bf16.mxu1 %vm1644_vm2, %v8827_v38  ;;  %6597 = vmatprep.subr.msk.bf16.mxu0 %vm1644_vm2, %v8829_v44  ;;  %v11592_v38 = vld [vmem:[#allocation48_spill] sm:$0xff] }
 0x36e   : > { %v9108_v44 = vpop.trf.xlu1  ;;  %v2105_v17 = vsel %vm1644_vm2, %v11592_v38, 0 }
 0x372   : > { %v9114_v39 = vpop.trf.xlu1 }
 0x374   : > { %6112 = vmatpush3.bf16.xpose.msra.mxu1 %v1969_v54  ;;  %6144 = vmatpush3.bf16.xpose.msra.mxu0 %v2114_v19  ;;  %v2265_v54 = vsel %vm1644_vm2, %v11601_v40, 0  ;;  %v2410_v19 = vsel %vm1644_vm2, %v11602_v42, 0 }
 0x375   : > { %6590 = vmatprep.subr.msk.bf16.mxu1 %vm1644_vm2, %v8819_v5  ;;  %6598 = vmatprep.subr.msk.bf16.mxu0 %vm1644_vm2, %v11588_v20  ;;  %v7300_v5 = vunpack.i.l.bf16 %v8911_v30  ;;  %v11607_v20 = vld [vmem:[#allocation42_spill] sm:$0xff] }
 0x376   : > { %v9118_v30 = vpop.trf.xlu1 }
 0x377   : > { %v1255_v9 = vpack.c.bf16 %v7305_v46, %v7300_v5  ;;  %v11612_v46 = vld [vmem:[#allocation43_spill] sm:$0xff] }
 0x379   : > { %v2271_v55 = vsel %vm1644_vm2, %v1255_v9, 0 }
 0x37a   : > { %v9124_v52 = vpop.trf.xlu1 }
 0x37c   : > { %6114 = vmatpush3.bf16.xpose.msra.mxu1 %v1966_v32  ;;  %6146 = vmatpush3.bf16.xpose.msra.mxu0 %v2111_v34  ;;  %v6898_v32 = vunpack.i.h.bf16 %v11607_v20  ;;  %v6895_v34 = vunpack.i.l.bf16 %v11607_v20 }
 0x37d   : > { %6591 = vmatprep.subr.msk.bf16.mxu1 %vm1644_vm2, %v11589_v47  ;;  %6599 = vmatprep.subr.msk.bf16.mxu0 %vm1644_vm2, %v11590_v48  ;;  %v11608_v47 = vld [vmem:[#allocation46_spill] sm:$0xff] }
 0x37e   : > { %v9136_v41 = vpop.trf.xlu1  ;;  %v6910_v48 = vunpack.i.h.bf16 %v11608_v47 }
 0x382   : > { %v9142_v15 = vpop.trf.xlu1 }
 0x384   : > { %6116 = vmatpush3.bf16.xpose.msra.mxu1 %v1963_v6  ;;  %6148 = vmatpush3.bf16.xpose.msra.mxu0 %v2108_v25  ;;  %v6907_v6 = vunpack.i.l.bf16 %v11608_v47  ;;  %v11609_v25 = vld [vmem:[#allocation74_spill] sm:$0xff]  ;;  %v11620_v47 = vld [vmem:[#allocation67_spill] sm:$0xff] }
 0x385   : > { %6592 = vmatprep.subr.msk.bf16.mxu1 %vm1644_vm2, %v11591_v26  ;;  %6600 = vmatprep.subr.msk.bf16.mxu0 %vm1644_vm2, %v11592_v38  ;;  %v11610_v26 = vld [vmem:[#allocation75_spill] sm:$0xff] }
 0x386   : > { %v9156_v58 = vpop.trf.xlu1  ;;  %v11611_v38 = vld [vmem:[#allocation39_spill] sm:$0xff] }
 0x387   : > { %v6893_v56 = vunpack.i.h.bf16 %v11611_v38  ;;  %v6890_v5 = vunpack.i.l.bf16 %v11611_v38 }
 0x38c   : > { %6118 = vmatpush3.bf16.xpose.msra.mxu1 %v1960_v21  ;;  %6150 = vmatpush3.bf16.xpose.msra.mxu0 %v2105_v17  ;;  %v875_v21 = vpack.c.bf16 %v6895_v34, %v6890_v5  ;;  %v883_v17 = vpack.c.bf16 %v6898_v32, %v6893_v56  ;;  %v11619_v34 = vld [vmem:[#allocation66_spill] sm:$0xff] }
 0x38d   : > { %6601 = vmatprep.subr.msk.bf16.mxu1 %vm1644_vm2, %v1255_v9  ;;  %6609 = vmatprep.subr.msk.bf16.mxu0 %vm1644_vm2, %v1263_v62  ;;  %v6905_v9 = vunpack.i.h.bf16 %v11612_v46  ;;  %v6902_v62 = vunpack.i.l.bf16 %v11612_v46  ;;  %v2250_v5 = vsel %vm1644_vm2, %v11619_v34, 0  ;;  %v2395_v46 = vsel %vm1644_vm2, %v11620_v47, 0 }
 0x393   : > { %6120 = vmatmul.mubr.msk.bf16.vlgmr.msra.gmra.mxu1 %vm1644_vm2, %v11593_v57  ;;  %6152 = vmatmul.mubr.msk.bf16.vlgmr.msra.gmra.mxu0 %vm1644_vm2, %v11594_v33  ;;  %v884_v57 = vpack.c.bf16 %v6907_v6, %v6902_v62  ;;  %v892_v33 = vpack.c.bf16 %v6910_v48, %v6905_v9  ;;  %v7385_v48 = vunpack.i.h.bf16 %v9006_v0  ;;  %v7382_v6 = vunpack.i.l.bf16 %v9006_v0  ;;  %v11621_v9 = vld [vmem:[#allocation50_spill] sm:$0xff] }
 0x394   : > { %6123 = vmatprep.mubr.msk.bf16.mxu1 %vm1644_vm2, %v11595_v24  ;;  %6155 = vmatprep.mubr.msk.bf16.mxu0 %vm1644_vm2, %v11596_v28  ;;  %v2262_v28 = vsel %vm1644_vm2, %v11609_v25, 0  ;;  %v6920_v62 = vunpack.i.h.bf16 %v11621_v9 }
 0x395   : > { %6168 = vmatpush3.bf16.xpose.msra.mxu1 %v2271_v55  ;;  %6200 = vmatpush3.bf16.xpose.msra.mxu0 %v2416_v60  ;;  %v2407_v55 = vsel %vm1644_vm2, %v11610_v26, 0  ;;  %v11613_v60 = vld [vmem:[#allocation73_spill] sm:$0xff] }
 0x396   : > { %6602 = vmatprep.subr.msk.bf16.mxu1 %vm1644_vm2, %v8913_v43  ;;  %6610 = vmatprep.subr.msk.bf16.mxu0 %vm1644_vm2, %v8915_v61  ;;  %v9162_v43 = vpop.trf.xlu1  ;;  %v11606_v61 = vld [vmem:[#allocation38_spill] sm:$0xff] }
 0x39a   : > { %v9182_v11 = vpop.trf.xlu1 }
 0x39b   : > { %6124 = vmatmul.mubr.msk.bf16.gmra.mxu1 %vm1644_vm2, %v11597_v23  ;;  %6156 = vmatmul.mubr.msk.bf16.gmra.mxu0 %vm1644_vm2, %v11598_v63  ;;  %v11614_v23 = vld [vmem:[#allocation72_spill] sm:$0xff] }
 0x39c   : > { %6127 = vmatprep.mubr.msk.bf16.mxu1 %vm1644_vm2, %v11599_v12  ;;  %6159 = vmatprep.mubr.msk.bf16.mxu0 %vm1644_vm2, %v11600_v31  ;;  %v2259_v31 = vsel %vm1644_vm2, %v11613_v60, 0 }
 0x39d   : > { %6170 = vmatpush3.bf16.xpose.msra.mxu1 %v2268_v27  ;;  %6202 = vmatpush3.bf16.xpose.msra.mxu0 %v2413_v3  ;;  %v2404_v27 = vsel %vm1644_vm2, %v11614_v23, 0  ;;  %v11615_v3 = vld [vmem:[#allocation70_spill] sm:$0xff] }
 0x39e   : > { %6603 = vmatprep.subr.msk.bf16.mxu1 %vm1644_vm2, %v11601_v40  ;;  %6611 = vmatprep.subr.msk.bf16.mxu0 %vm1644_vm2, %v11602_v42  ;;  %v9188_v24 = vpop.trf.xlu1  ;;  %v11616_v40 = vld [vmem:[#allocation71_spill] sm:$0xff] }
 0x3a2   : > { %v9200_v63 = vpop.trf.xlu1 }
 0x3a3   : > { %6128 = vmatmul.mubr.msk.bf16.gmra.mxu1 %vm1644_vm2, %v11603_v59  ;;  %6160 = vmatmul.mubr.msk.bf16.gmra.mxu0 %vm1644_vm2, %v11604_v7  ;;  %v2256_v7 = vsel %vm1644_vm2, %v11615_v3, 0 }
 0x3a4   : > { %6131 = vmatprep.mubr.msk.bf16.mxu1 %vm1644_vm2, %v11605_v8  ;;  %6163 = vmatprep.mubr.msk.bf16.mxu0 %vm1644_vm2, %v11606_v61  ;;  %v2401_v8 = vsel %vm1644_vm2, %v11616_v40, 0  ;;  %v11617_v61 = vld [vmem:[#allocation68_spill] sm:$0xff] }
 0x3a5   : > { %6172 = vmatpush3.bf16.xpose.msra.mxu1 %v2265_v54  ;;  %6204 = vmatpush3.bf16.xpose.msra.mxu0 %v2410_v19  ;;  %v11618_v54 = vld [vmem:[#allocation69_spill] sm:$0xff]  ;;  %v2253_v20 = vsel %vm1644_vm2, %v11617_v61, 0 }
 0x3a6   : > { %6604 = vmatprep.subr.msk.bf16.mxu1 %vm1644_vm2, %v11609_v25  ;;  %6612 = vmatprep.subr.msk.bf16.mxu0 %vm1644_vm2, %v11610_v26  ;;  %v9202_v12 = vpop.trf.xlu1  ;;  %v2398_v32 = vsel %vm1644_vm2, %v11618_v54, 0  ;;  %v7390_v25 = vunpack.i.h.bf16 %v9012_v13  ;;  %v7387_v26 = vunpack.i.l.bf16 %v9012_v13  ;;  %v7375_v13 = vunpack.i.h.bf16 %v8998_v36 }
 0x3a8   : > { %v1271_v38 = vpack.c.bf16 %v7387_v26, %v7382_v6  ;;  %v1279_v56 = vpack.c.bf16 %v7390_v25, %v7385_v48  ;;  %v11626_v6 = vld [vmem:[#allocation59_spill] sm:$0xff] }
 0x3a9   : > { %v6950_v25 = vunpack.i.h.bf16 %v11626_v6  ;;  %v6947_v26 = vunpack.i.l.bf16 %v11626_v6 }
 0x3aa   : > { %v9212_v42 = vpop.trf.xlu1 }
 0x3ab   : > { %6132 = vmatmul.mubr.msk.bf16.gmra.mxu1 %vm1644_vm2, %v875_v21  ;;  %6164 = vmatmul.mubr.msk.bf16.gmra.mxu0 %vm1644_vm2, %v883_v17  ;;  %v6917_v21 = vunpack.i.l.bf16 %v11621_v9  ;;  %v11622_v17 = vld [vmem:[#allocation54_spill] sm:$0xff]  ;;  %v11627_v9 = vld [vmem:[#allocation56_spill] sm:$0xff] }
 0x3ac   : > { %6183 = vmatprep.mubr.msk.bf16.mxu1 %vm1644_vm2, %v884_v57  ;;  %6215 = vmatprep.mubr.msk.bf16.mxu0 %vm1644_vm2, %v892_v33  ;;  %v6930_v0 = vunpack.i.h.bf16 %v11622_v17  ;;  %v6927_v57 = vunpack.i.l.bf16 %v11622_v17  ;;  %v7372_v33 = vunpack.i.l.bf16 %v8998_v36  ;;  %v2706_v36 = vsel %vm1644_vm2, %v1279_v56, 0  ;;  %v11628_v17 = vld [vmem:[#allocation58_spill] sm:$0xff] }
 0x3ad   : > { %6174 = vmatpush3.bf16.xpose.msra.mxu1 %v2262_v28  ;;  %6206 = vmatpush3.bf16.xpose.msra.mxu0 %v2407_v55  ;;  %v7380_v28 = vunpack.i.h.bf16 %v9002_v35  ;;  %v7377_v55 = vunpack.i.l.bf16 %v9002_v35  ;;  %v11625_v35 = vld [vmem:[#allocation57_spill] sm:$0xff] }
 0x3ae   : > { %6605 = vmatprep.subr.msk.bf16.mxu1 %vm1644_vm2, %v11613_v60  ;;  %6613 = vmatprep.subr.msk.bf16.mxu0 %vm1644_vm2, %v11614_v23  ;;  %v9214_v59 = vpop.trf.xlu1  ;;  %v11623_v60 = vld [vmem:[#allocation49_spill] sm:$0xff]  ;;  %v6937_v48 = vunpack.i.l.bf16 %v11625_v35 }
 0x3af   : > { %v6915_v23 = vunpack.i.h.bf16 %v11623_v60 }
 0x3b2   : > { %v9224_v19 = vpop.trf.xlu1 }
 0x3b5   : > { %6176 = vmatpush3.bf16.xpose.msra.mxu1 %v2259_v31  ;;  %6208 = vmatpush3.bf16.xpose.msra.mxu0 %v2404_v27  ;;  %v6912_v31 = vunpack.i.l.bf16 %v11623_v60  ;;  %v11624_v27 = vld [vmem:[#allocation53_spill] sm:$0xff] }
 0x3b6   : > { %6606 = vmatprep.subr.msk.bf16.mxu1 %vm1644_vm2, %v11615_v3  ;;  %6614 = vmatprep.subr.msk.bf16.mxu0 %vm1644_vm2, %v11616_v40  ;;  %v6925_v3 = vunpack.i.h.bf16 %v11624_v27  ;;  %v6922_v40 = vunpack.i.l.bf16 %v11624_v27  ;;  %v11630_v27 = vld [vmem:[#allocation60_spill] sm:$0xff] }
 0x3bd   : > { %6178 = vmatpush3.bf16.xpose.msra.mxu1 %v2256_v7  ;;  %6210 = vmatpush3.bf16.xpose.msra.mxu0 %v2401_v8  ;;  %v885_v7 = vpack.c.bf16 %v6917_v21, %v6912_v31  ;;  %v893_v8 = vpack.c.bf16 %v6920_v62, %v6915_v23  ;;  %v6935_v62 = vunpack.i.h.bf16 %v11627_v9  ;;  %v6932_v21 = vunpack.i.l.bf16 %v11627_v9  ;;  %v9278_v31 = vpop.trf.xlu0 }
 0x3be   : > { %6607 = vmatprep.subr.msk.bf16.mxu1 %vm1644_vm2, %v11617_v61  ;;  %6615 = vmatprep.subr.msk.bf16.mxu0 %vm1644_vm2, %v11618_v54  ;;  %v886_v61 = vpack.c.bf16 %v6927_v57, %v6922_v40  ;;  %v894_v54 = vpack.c.bf16 %v6930_v0, %v6925_v3  ;;  %v6945_v0 = vunpack.i.h.bf16 %v11628_v17  ;;  %v6942_v57 = vunpack.i.l.bf16 %v11628_v17  ;;  %11629 = vst [vmem:[#allocation55_spill] sm:$0xff] %v9278_v31 }
 0x3bf   : > { %v6955_v3 = vunpack.i.h.bf16 %v11630_v27  ;;  %v6952_v40 = vunpack.i.l.bf16 %v11630_v27  ;;  %v11641_v27 = vld [vmem:[#allocation64_spill] sm:$0xff] }
 0x3c1   : > { %v9298_v6 = vpop.trf.xlu0 }
 0x3c2   : > { %11634 = vst [vmem:[#allocation52_spill] sm:$0xff] %v9298_v6  ;;  %v11674_v6 = vld [vmem:[#allocation32_spill] sm:$0xff] }
 0x3c5   : > { %6180 = vmatpush3.bf16.xpose.msra.mxu1 %v2253_v20  ;;  %6212 = vmatpush3.bf16.xpose.msra.mxu0 %v2398_v32  ;;  %v2561_v20 = vsel %vm1644_vm2, %v1271_v38, 0  ;;  %v1270_v32 = vpack.c.bf16 %v7377_v55, %v7372_v33 }
 0x3c6   : > { %6608 = vmatprep.subr.msk.bf16.mxu1 %vm1644_vm2, %v11619_v34  ;;  %6616 = vmatprep.subr.msk.bf16.mxu0 %vm1644_vm2, %v11620_v47  ;;  %v1278_v34 = vpack.c.bf16 %v7380_v28, %v7375_v13  ;;  %v6940_v47 = vunpack.i.h.bf16 %v11625_v35  ;;  %v887_v13 = vpack.c.bf16 %v6937_v48, %v6932_v21  ;;  %v888_v28 = vpack.c.bf16 %v6947_v26, %v6942_v57 }
 0x3c7   : > { %v2558_v55 = vsel %vm1644_vm2, %v1270_v32, 0  ;;  %v7352_v35 = vunpack.i.l.bf16 %v8974_v50  ;;  %v7357_v48 = vunpack.i.l.bf16 %v8980_v29 }
 0x3c8   : > { %v895_v33 = vpack.c.bf16 %v6940_v47, %v6935_v62  ;;  %v7360_v47 = vunpack.i.h.bf16 %v8980_v29 }
 0x3c9   : > { %v1268_v21 = vpack.c.bf16 %v7357_v48, %v7352_v35  ;;  %v11645_v35 = vld [vmem:[#allocation18_spill] sm:$0xff]  ;;  %v7335_v48 = vunpack.i.h.bf16 %v8950_v22 }
 0x3cd   : > { %6182 = vmatpush3.bf16.xpose.msra.mxu1 %v2250_v5  ;;  %6214 = vmatpush3.bf16.xpose.msra.mxu0 %v2395_v46  ;;  %v7370_v5 = vunpack.i.h.bf16 %v8992_v37  ;;  %v7367_v46 = vunpack.i.l.bf16 %v8992_v37  ;;  %v2703_v37 = vsel %vm1644_vm2, %v1278_v34, 0 }
 0x3ce   : > { %6617 = vmatprep.subr.msk.bf16.mxu1 %vm1644_vm2, %v1271_v38  ;;  %6625 = vmatprep.subr.msk.bf16.mxu0 %vm1644_vm2, %v1279_v56  ;;  %v7365_v38 = vunpack.i.h.bf16 %v8986_v1  ;;  %v7362_v56 = vunpack.i.l.bf16 %v8986_v1  ;;  %v896_v1 = vpack.c.bf16 %v6950_v25, %v6945_v0  ;;  %v11635_v25 = vld [vmem:[#allocation62_spill] sm:$0xff]  ;;  %v9306_v0 = vpop.trf.xlu0 }
 0x3cf   : > { %v6965_v26 = vunpack.i.h.bf16 %v11635_v25  ;;  %11637 = vst [vmem:[#allocation48_spill] sm:$0xff] %v9306_v0  ;;  %v11679_v0 = vld [vmem:[#allocation44_spill] sm:$0xff] }
 0x3d0   : > { %v1269_v60 = vpack.c.bf16 %v7367_v46, %v7362_v56  ;;  %v1277_v23 = vpack.c.bf16 %v7370_v5, %v7365_v38  ;;  %v6962_v38 = vunpack.i.l.bf16 %v11635_v25  ;;  %v7332_v25 = vunpack.i.l.bf16 %v8950_v22 }
 0x3d2   : > { %v2555_v62 = vsel %vm1644_vm2, %v1269_v60, 0  ;;  %v2700_v29 = vsel %vm1644_vm2, %v1277_v23, 0 }
 0x3d4   : > { %6184 = vmatmul.mubr.msk.bf16.vlgmr.msra.gmra.mxu1 %vm1644_vm2, %v885_v7  ;;  %6216 = vmatmul.mubr.msk.bf16.vlgmr.msra.gmra.mxu0 %vm1644_vm2, %v893_v8  ;;  %v11631_v7 = vld [vmem:[#allocation61_spill] sm:$0xff] }
 0x3d5   : > { %6187 = vmatprep.mubr.msk.bf16.mxu1 %vm1644_vm2, %v886_v61  ;;  %6219 = vmatprep.mubr.msk.bf16.mxu0 %vm1644_vm2, %v894_v54  ;;  %v6960_v8 = vunpack.i.h.bf16 %v11631_v7  ;;  %v6957_v61 = vunpack.i.l.bf16 %v11631_v7  ;;  %v9288_v54 = vpop.trf.xlu1 }
 0x3d6   : > { %6232 = vmatpush3.bf16.xpose.msra.mxu1 %v2561_v20  ;;  %6264 = vmatpush3.bf16.xpose.msra.mxu0 %v2706_v36  ;;  %11632 = vst [vmem:[#allocation51_spill] sm:$0xff] %v9288_v54  ;;  %v11633_v20 = vld [vmem:[#allocation63_spill] sm:$0xff] }
 0x3d7   : > { %6618 = vmatprep.subr.msk.bf16.mxu1 %vm1644_vm2, %v1270_v32  ;;  %6626 = vmatprep.subr.msk.bf16.mxu0 %vm1644_vm2, %v1278_v34  ;;  %v6970_v36 = vunpack.i.h.bf16 %v11633_v20  ;;  %v6967_v32 = vunpack.i.l.bf16 %v11633_v20  ;;  %v7355_v34 = vunpack.i.h.bf16 %v8974_v50  ;;  %v889_v56 = vpack.c.bf16 %v6957_v61, %v6952_v40 }
 0x3d8   : > { %v897_v5 = vpack.c.bf16 %v6960_v8, %v6955_v3  ;;  %v6975_v3 = vunpack.i.h.bf16 %v11641_v27  ;;  %v6972_v40 = vunpack.i.l.bf16 %v11641_v27 }
 0x3d9   : > { %v9302_v46 = vpop.trf.xlu1  ;;  %v890_v9 = vpack.c.bf16 %v6967_v32, %v6962_v38  ;;  %v898_v50 = vpack.c.bf16 %v6970_v36, %v6965_v26  ;;  %v1276_v17 = vpack.c.bf16 %v7360_v47, %v7355_v34  ;;  %v11644_v34 = vld [vmem:[#allocation17_spill] sm:$0xff]  ;;  %v7340_v26 = vunpack.i.h.bf16 %v8956_v10 }
 0x3da   : > { %11636 = vst [vmem:[#allocation47_spill] sm:$0xff] %v9302_v46  ;;  %v7337_v38 = vunpack.i.l.bf16 %v8956_v10 }
 0x3db   : > { %v2697_v20 = vsel %vm1644_vm2, %v1276_v17, 0 }
 0x3dc   : > { %6188 = vmatmul.mubr.msk.bf16.gmra.mxu1 %vm1644_vm2, %v887_v13  ;;  %6220 = vmatmul.mubr.msk.bf16.gmra.mxu0 %vm1644_vm2, %v895_v33  ;;  %v11639_v13 = vld [vmem:[#allocation65_spill] sm:$0xff] }
 0x3dd   : > { %6191 = vmatprep.mubr.msk.bf16.mxu1 %vm1644_vm2, %v888_v28  ;;  %6223 = vmatprep.mubr.msk.bf16.mxu0 %vm1644_vm2, %v896_v1  ;;  %v9312_v57 = vpop.trf.xlu1  ;;  %v6980_v33 = vunpack.i.h.bf16 %v11639_v13  ;;  %v6977_v28 = vunpack.i.l.bf16 %v11639_v13  ;;  %v7345_v1 = vunpack.i.h.bf16 %v8962_v4  ;;  %v7322_v13 = vunpack.i.l.bf16 %v8933_v18 }
 0x3de   : > { %6234 = vmatpush3.bf16.xpose.msra.mxu1 %v2558_v55  ;;  %6266 = vmatpush3.bf16.xpose.msra.mxu0 %v2703_v37  ;;  %11638 = vst [vmem:[#allocation19_spill] sm:$0xff] %v9312_v57  ;;  %v7342_v55 = vunpack.i.l.bf16 %v8962_v4  ;;  %v7350_v37 = vunpack.i.h.bf16 %v8968_v45  ;;  %v2552_v4 = vsel %vm1644_vm2, %v1268_v21, 0 }
 0x3df   : > { %6619 = vmatprep.subr.msk.bf16.mxu1 %vm1644_vm2, %v1269_v60  ;;  %6627 = vmatprep.subr.msk.bf16.mxu0 %vm1644_vm2, %v1277_v23  ;;  %v7347_v60 = vunpack.i.l.bf16 %v8968_v45  ;;  %v9322_v23 = vpop.trf.xlu0  ;;  %v891_v8 = vpack.c.bf16 %v6977_v28, %v6972_v40  ;;  %v899_v61 = vpack.c.bf16 %v6980_v33, %v6975_v3  ;;  %v7330_v33 = vunpack.i.h.bf16 %v8940_v14 }
 0x3e0   : > { %11640 = vst [vmem:[#allocation20_spill] sm:$0xff] %v9322_v23  ;;  %v1275_v45 = vpack.c.bf16 %v7350_v37, %v7345_v1  ;;  %v7327_v28 = vunpack.i.l.bf16 %v8940_v14  ;;  %v7315_v14 = vunpack.i.h.bf16 %v8919_v49  ;;  %v7394_v23 = vunpack.i.l.bf16 %v9094_v2 }
 0x3e1   : > { %v9326_v7 = vpop.trf.xlu1  ;;  %v1267_v36 = vpack.c.bf16 %v7347_v60, %v7342_v55 }
 0x3e2   : > { %11642 = vst [vmem:[#allocation21_spill] sm:$0xff] %v9326_v7  ;;  %v1265_v27 = vpack.c.bf16 %v7327_v28, %v7322_v13 }
 0x3e3   : > { %v9330_v32 = vpop.trf.xlu0 }
 0x3e4   : > { %6192 = vmatmul.mubr.msk.bf16.gmra.mxu1 %vm1644_vm2, %v889_v56  ;;  %6224 = vmatmul.mubr.msk.bf16.gmra.mxu0 %vm1644_vm2, %v897_v5  ;;  %11643 = vst [vmem:[#allocation22_spill] sm:$0xff] %v9330_v32 }
 0x3e5   : > { %6195 = vmatprep.mubr.msk.bf16.mxu1 %vm1644_vm2, %v890_v9  ;;  %6227 = vmatprep.mubr.msk.bf16.mxu0 %vm1644_vm2, %v898_v50  ;;  %v9338_v47 = vpop.trf.xlu1  ;;  %v2549_v9 = vsel %vm1644_vm2, %v1267_v36, 0  ;;  %v2694_v50 = vsel %vm1644_vm2, %v1275_v45, 0 }
 0x3e6   : > { %6236 = vmatpush3.bf16.xpose.msra.mxu1 %v2555_v62  ;;  %6268 = vmatpush3.bf16.xpose.msra.mxu0 %v2700_v29  ;;  %11646 = vst [vmem:[#allocation25_spill] sm:$0xff] %v9338_v47  ;;  %v1266_v62 = vpack.c.bf16 %v7337_v38, %v7332_v25  ;;  %v1274_v29 = vpack.c.bf16 %v7340_v26, %v7335_v48  ;;  %v7472_v26 = vunpack.i.h.bf16 %v9224_v19  ;;  %v7467_v38 = vunpack.i.h.bf16 %v9214_v59 }
 0x3e7   : > { %6620 = vmatprep.subr.msk.bf16.mxu1 %vm1644_vm2, %v1268_v21  ;;  %6628 = vmatprep.subr.msk.bf16.mxu0 %vm1644_vm2, %v1276_v17  ;;  %v9346_v56 = vpop.trf.xlu0  ;;  %v7325_v17 = vunpack.i.h.bf16 %v8933_v18 }
 0x3e8   : > { %11647 = vst [vmem:[#allocation26_spill] sm:$0xff] %v9346_v56  ;;  %v2546_v55 = vsel %vm1644_vm2, %v1266_v62, 0  ;;  %v2691_v37 = vsel %vm1644_vm2, %v1274_v29, 0 }
 0x3e9   : > { %v9348_v5 = vpop.trf.xlu1  ;;  %v1273_v3 = vpack.c.bf16 %v7330_v33, %v7325_v17 }
 0x3ea   : > { %11648 = vst [vmem:[#allocation29_spill] sm:$0xff] %v9348_v5 }
 0x3eb   : > { %v9352_v21 = vpop.trf.xlu0 }
 0x3ec   : > { %6196 = vmatmul.mubr.msk.bf16.gmra.mxu1 %vm1644_vm2, %v891_v8  ;;  %6228 = vmatmul.mubr.msk.bf16.gmra.mxu0 %vm1644_vm2, %v899_v61  ;;  %11649 = vst [vmem:[#allocation30_spill] sm:$0xff] %v9352_v21  ;;  %v7312_v8 = vunpack.i.l.bf16 %v8919_v49  ;;  %v7320_v61 = vunpack.i.h.bf16 %v8927_v53  ;;  %v7469_v49 = vunpack.i.l.bf16 %v9224_v19 }
 0x3ed   : > { %6247 = vmatprep.mubr.msk.bf16.mxu1 %vm1644_vm2, %v11644_v34  ;;  %6279 = vmatprep.mubr.msk.bf16.mxu0 %vm1644_vm2, %v11645_v35  ;;  %v9354_v22 = vpop.trf.xlu1  ;;  %v2688_v34 = vsel %vm1644_vm2, %v1273_v3, 0 }
 0x3ee   : > { %6238 = vmatpush3.bf16.xpose.msra.mxu1 %v2552_v4  ;;  %6270 = vmatpush3.bf16.xpose.msra.mxu0 %v2697_v20  ;;  %11650 = vst [vmem:[#allocation76_spill] sm:$0xff] %v9354_v22  ;;  %v7317_v4 = vunpack.i.l.bf16 %v8927_v53  ;;  %v1272_v48 = vpack.c.bf16 %v7320_v61, %v7315_v14  ;;  %v7464_v53 = vunpack.i.l.bf16 %v9214_v59  ;;  %v7459_v59 = vunpack.i.l.bf16 %v9212_v42  ;;  %v11665_v61 = vld [vmem:[#allocation15_spill] sm:$0xff] }
 0x3ef   : > { %6621 = vmatprep.subr.msk.bf16.mxu1 %vm1644_vm2, %v1267_v36  ;;  %6629 = vmatprep.subr.msk.bf16.mxu0 %vm1644_vm2, %v1275_v45  ;;  %v9358_v10 = vpop.trf.xlu0  ;;  %v2543_v45 = vsel %vm1644_vm2, %v1265_v27, 0 }
 0x3f0   : > { %11651 = vst [vmem:[#allocation77_spill] sm:$0xff] %v9358_v10  ;;  %v1264_v35 = vpack.c.bf16 %v7317_v4, %v7312_v8  ;;  %v2685_v33 = vsel %vm1644_vm2, %v1272_v48, 0  ;;  %v11666_v4 = vld [vmem:[#allocation16_spill] sm:$0xff] }
 0x3f1   : > { %v9364_v1 = vpop.trf.xlu1 }
 0x3f2   : > { %11652 = vst [vmem:[#allocation33_spill] sm:$0xff] %v9364_v1  ;;  %v2540_v13 = vsel %vm1644_vm2, %v1264_v35, 0 }
 0x3f3   : > { %v9368_v60 = vpop.trf.xlu0 }
 0x3f4   : > { %11653 = vst [vmem:[#allocation34_spill] sm:$0xff] %v9368_v60 }
 0x3f5   : > { %v9370_v40 = vpop.trf.xlu1 }
 0x3f6   : > { %6240 = vmatpush3.bf16.xpose.msra.mxu1 %v2549_v9  ;;  %6272 = vmatpush3.bf16.xpose.msra.mxu0 %v2694_v50  ;;  %11654 = vst [vmem:[#allocation37_spill] sm:$0xff] %v9370_v40 }
 0x3f7   : > { %6622 = vmatprep.subr.msk.bf16.mxu1 %vm1644_vm2, %v1266_v62  ;;  %6630 = vmatprep.subr.msk.bf16.mxu0 %vm1644_vm2, %v1274_v29  ;;  %v9374_v18 = vpop.trf.xlu0  ;;  %v1587_v62 = vpack.c.bf16 %v7469_v49, %v7464_v53  ;;  %v1595_v29 = vpack.c.bf16 %v7472_v26, %v7467_v38  ;;  %v7449_v53 = vunpack.i.l.bf16 %v9200_v63  ;;  %v7444_v26 = vunpack.i.l.bf16 %v9188_v24 }
 0x3f8   : > { %11655 = vst [vmem:[#allocation38_spill] sm:$0xff] %v9374_v18 }
 0x3f9   : > { %v9380_v20 = vpop.trf.xlu1 }
 0x3fa   : > { %11656 = vst [vmem:[#allocation42_spill] sm:$0xff] %v9380_v20 }
 0x3fb   : > { %v9382_v36 = vpop.trf.xlu0 }
 0x3fc   : > { %11657 = vst [vmem:[#allocation46_spill] sm:$0xff] %v9382_v36 }
 0x3fd   : > { %v9386_v25 = vpop.trf.xlu1 }
 0x3fe   : > { %6242 = vmatpush3.bf16.xpose.msra.mxu1 %v2546_v55  ;;  %6274 = vmatpush3.bf16.xpose.msra.mxu0 %v2691_v37  ;;  %11658 = vst [vmem:[#allocation74_spill] sm:$0xff] %v9386_v25  ;;  %v7454_v55 = vunpack.i.l.bf16 %v9202_v12  ;;  %v7462_v37 = vunpack.i.h.bf16 %v9212_v42 }
 0x3ff   : > { %6623 = vmatprep.subr.msk.bf16.mxu1 %vm1644_vm2, %v1265_v27  ;;  %6631 = vmatprep.subr.msk.bf16.mxu0 %vm1644_vm2, %v1273_v3  ;;  %v9394_v9 = vpop.trf.xlu0  ;;  %v7457_v27 = vunpack.i.h.bf16 %v9202_v12  ;;  %v11668_v12 = vld [vmem:[#allocation23_spill] sm:$0xff] }
 0x400   : > { %11659 = vst [vmem:[#allocation75_spill] sm:$0xff] %v9394_v9 }
 0x401   : > { %v9396_v50 = vpop.trf.xlu1 }
 0x402   : > { %11660 = vst [vmem:[#allocation39_spill] sm:$0xff] %v9396_v50 }
 0x403   : > { %v9398_v17 = vpop.trf.xlu0 }
 0x404   : > { %11661 = vst [vmem:[#allocation43_spill] sm:$0xff] %v9398_v17 }
 0x405   : > { %v9402_v28 = vpop.trf.xlu1 }
 0x406   : > { %6244 = vmatpush3.bf16.xpose.msra.mxu1 %v2543_v45  ;;  %6276 = vmatpush3.bf16.xpose.msra.mxu0 %v2688_v34  ;;  %11662 = vst [vmem:[#allocation73_spill] sm:$0xff] %v9402_v28  ;;  %v1586_v45 = vpack.c.bf16 %v7459_v59, %v7454_v55  ;;  %v1594_v34 = vpack.c.bf16 %v7462_v37, %v7457_v27  ;;  %v7439_v59 = vunpack.i.l.bf16 %v9182_v11  ;;  %v7434_v55 = vunpack.i.l.bf16 %v9162_v43 }
 0x407   : > { %6624 = vmatprep.subr.msk.bf16.mxu1 %vm1644_vm2, %v1264_v35  ;;  %6632 = vmatprep.subr.msk.bf16.mxu0 %vm1644_vm2, %v1272_v48  ;;  %v9404_v19 = vpop.trf.xlu0  ;;  %v11669_v48 = vld [vmem:[#allocation24_spill] sm:$0xff] }
 0x408   : > { %11663 = vst [vmem:[#allocation72_spill] sm:$0xff] %v9404_v19 }
 0x409   : > { %v9410_v3 = vpop.trf.xlu1 }
 0x40a   : > { %11664 = vst [vmem:[#allocation70_spill] sm:$0xff] %v9410_v3 }
 0x40b   : > { %v9421_v35 = vpop.trf.xlu0 }
 0x40c   : > { %11667 = vst [vmem:[#allocation71_spill] sm:$0xff] %v9421_v35 }
 0x40d   : > { %v9435_v38 = vpop.trf.xlu1 }
 0x40e   : > { %6246 = vmatpush3.bf16.xpose.msra.mxu1 %v2540_v13  ;;  %6278 = vmatpush3.bf16.xpose.msra.mxu0 %v2685_v33  ;;  %v7452_v13 = vunpack.i.h.bf16 %v9200_v63  ;;  %v7447_v33 = vunpack.i.h.bf16 %v9188_v24  ;;  %v1585_v63 = vpack.c.bf16 %v7449_v53, %v7444_v26  ;;  %v7429_v53 = vunpack.i.l.bf16 %v9156_v58 }
 0x40f   : > { %6295 = vmatprep.subr.bf16.mxu1 %v1587_v62  ;;  %6327 = vmatprep.subr.bf16.mxu0 %v1595_v29  ;;  %v9441_v37 = vpop.trf.xlu0  ;;  %v7424_v26 = vunpack.i.l.bf16 %v9142_v15  ;;  %v7549_v56 = vunpack.i.h.bf16 %v9435_v38 }
 0x410   : > { %11670 = vst [vmem:[#allocation68_spill] sm:$0xff] %v9441_v37 }
 0x411   : > { %v9451_v24 = vpop.trf.xlu1 }
 0x412   : > { %v9412_v14 = vpop.f32.mrf.mxu1  ;;  %v9423_v42 = vpop.f32.mrf.mxu0  ;;  %v7554_v32 = vunpack.i.h.bf16 %v9451_v24 }
 0x413   : > { %2809 = vmax.xlane.f32.xlu1 %v9412_v14 }
 0x414   : > { %v9415_v8 = vpop.f32.mrf.mxu1  ;;  %v9443_v27 = vpop.f32.mrf.mxu0  ;;  %v9579_v10 = vpack.c.bf16 %v7554_v32, %v7549_v56 }
 0x415   : > { %6248 = vmatmul.mubr.msk.bf16.vlgmr.msra.gmra.mxu1 %vm1644_vm2, %v11665_v61  ;;  %6280 = vmatmul.mubr.msk.bf16.vlgmr.msra.gmra.mxu0 %vm1644_vm2, %v11666_v4  ;;  %v7442_v4 = vunpack.i.h.bf16 %v9182_v11 }
 0x416   : > { %6251 = vmatprep.mubr.msk.bf16.mxu1 %vm1644_vm2, %v11668_v12  ;;  %6283 = vmatprep.mubr.msk.bf16.mxu0 %vm1644_vm2, %v11669_v48  ;;  %v9429_v49 = vpop.f32.mrf.mxu1  ;;  %v11671_v12 = vld [vmem:[#allocation27_spill] sm:$0xff]  ;;  %v11672_v48 = vld [vmem:[#allocation28_spill] sm:$0xff]  ;;  %v9457_v31 = vpop.f32.mrf.mxu0  ;;  %11691 = vst [vmem:[#allocation58_spill] sm:$0xff] %v9579_v10 }
 0x417   : > { %2805 = vmax.xlane.f32.xlu0 %v9415_v8  ;;  %2841 = vmax.xlane.f32.xlu1 %v9423_v42 }
 0x418   : > { %6296 = vmatpush3.bf16.msra.mxu1 %v1587_v62  ;;  %6328 = vmatpush3.bf16.msra.mxu0 %v1595_v29  ;;  %v9445_v61 = vpop.f32.mrf.mxu1  ;;  %v7437_v62 = vunpack.i.h.bf16 %v9162_v43  ;;  %v1593_v29 = vpack.c.bf16 %v7452_v13, %v7447_v33  ;;  %v11673_v43 = vld [vmem:[#allocation31_spill] sm:$0xff]  ;;  %v7432_v13 = vunpack.i.h.bf16 %v9156_v58  ;;  %v7427_v33 = vunpack.i.h.bf16 %v9142_v15 }
 0x419   : > { %6297 = vmatprep.subr.bf16.mxu1 %v1586_v45  ;;  %6329 = vmatprep.subr.bf16.mxu0 %v1594_v34 }
 0x41a   : > { %v9459_v11 = vpop.f32.mrf.mxu1  ;;  %v1591_v58 = vpack.c.bf16 %v7432_v13, %v7427_v33  ;;  %v7412_v13 = vunpack.i.h.bf16 %v9118_v30  ;;  %v7407_v33 = vunpack.i.h.bf16 %v9114_v39 }
 0x41b   : > { %2837 = vmax.xlane.f32.xlu0 %v9443_v27  ;;  %2807 = vmax.xlane.f32.xlu1 %v9445_v61 }
 0x41c   : > { %6298 = vmatpush3.bf16.msra.mxu1 %v1586_v45  ;;  %6330 = vmatpush3.bf16.msra.mxu0 %v1594_v34  ;;  %v1584_v45 = vpack.c.bf16 %v7439_v59, %v7434_v55  ;;  %v1592_v34 = vpack.c.bf16 %v7442_v4, %v7437_v62  ;;  %v11675_v59 = vld [vmem:[#allocation35_spill] sm:$0xff]  ;;  %v11676_v55 = vld [vmem:[#allocation36_spill] sm:$0xff]  ;;  %v1583_v4 = vpack.c.bf16 %v7429_v53, %v7424_v26  ;;  %v7409_v53 = vunpack.i.l.bf16 %v9118_v30 }
 0x41d   : > { %6252 = vmatmul.mubr.msk.bf16.gmra.mxu1 %vm1644_vm2, %v11671_v12  ;;  %6284 = vmatmul.mubr.msk.bf16.gmra.mxu0 %vm1644_vm2, %v11672_v48  ;;  %v9471_v12 = vpop.f32.mrf.mxu0  ;;  %v7419_v48 = vunpack.i.l.bf16 %v9136_v41  ;;  %v7404_v26 = vunpack.i.l.bf16 %v9114_v39  ;;  %v11680_v39 = vld [vmem:[#allocation45_spill] sm:$0xff]  ;;  %v7399_v30 = vunpack.i.l.bf16 %v9108_v44 }
 0x41e   : > { %6255 = vmatprep.mubr.msk.bf16.mxu1 %vm1644_vm2, %v11673_v43  ;;  %6287 = vmatprep.mubr.msk.bf16.mxu0 %vm1644_vm2, %v11674_v6  ;;  %v9473_v6 = vpop.f32.mrf.mxu1  ;;  %v7414_v43 = vunpack.i.l.bf16 %v9124_v52 }
 0x41f   : > { %2811 = vmax.xlane.f32.xlu0 %v9429_v49  ;;  %2817 = vmax.xlane.f32.xlu1 %v9459_v11  ;;  %v9481_v62 = vpop.f32.mrf.mxu0 }
 0x420   : > { %6299 = vmatprep.subr.bf16.mxu1 %v1585_v63  ;;  %6331 = vmatprep.subr.bf16.mxu0 %v1593_v29  ;;  %v9483_v15 = vpop.f32.mrf.mxu1 }
 0x421   : > { %6300 = vmatpush3.bf16.msra.mxu1 %v1585_v63  ;;  %6332 = vmatpush3.bf16.msra.mxu0 %v1593_v29  ;;  %v11677_v63 = vld [vmem:[#allocation40_spill] sm:$0xff]  ;;  %v11678_v29 = vld [vmem:[#allocation41_spill] sm:$0xff] }
 0x422   : > { %6301 = vmatprep.subr.bf16.mxu1 %v1584_v45  ;;  %6333 = vmatprep.subr.bf16.mxu0 %v1592_v34 }
 0x423   : > { %2843 = vmax.xlane.f32.xlu0 %v9457_v31  ;;  %2813 = vmax.xlane.f32.xlu1 %v9473_v6 }
 0x425   : > { %6256 = vmatmul.mubr.msk.bf16.gmra.mxu1 %vm1644_vm2, %v11675_v59  ;;  %6288 = vmatmul.mubr.msk.bf16.gmra.mxu0 %vm1644_vm2, %v11676_v55  ;;  %v7422_v59 = vunpack.i.h.bf16 %v9136_v41  ;;  %v7417_v55 = vunpack.i.h.bf16 %v9124_v52  ;;  %v9501_v41 = vpop.f32.mrf.mxu1  ;;  %v1582_v52 = vpack.c.bf16 %v7419_v48, %v7414_v43  ;;  %v7402_v48 = vunpack.i.h.bf16 %v9108_v44 }
 0x426   : > { %6259 = vmatprep.mubr.msk.bf16.mxu1 %vm1644_vm2, %v11677_v63  ;;  %6291 = vmatprep.mubr.msk.bf16.mxu0 %vm1644_vm2, %v11678_v29  ;;  %v9499_v63 = vpop.f32.mrf.mxu0  ;;  %v7397_v43 = vunpack.i.h.bf16 %v9094_v2 }
 0x427   : > { %2839 = vmax.xlane.f32.xlu0 %v9471_v12  ;;  %2849 = vmax.xlane.f32.xlu1 %v9481_v62  ;;  %v1590_v29 = vpack.c.bf16 %v7422_v59, %v7417_v55 }
 0x428   : > { %6302 = vmatpush3.bf16.msra.mxu1 %v1584_v45  ;;  %6334 = vmatpush3.bf16.msra.mxu0 %v1592_v34  ;;  %v1581_v45 = vpack.c.bf16 %v7409_v53, %v7404_v26  ;;  %v1589_v34 = vpack.c.bf16 %v7412_v13, %v7407_v33  ;;  %v9513_v59 = vpop.f32.mrf.mxu0 }
 0x429   : > { %6303 = vmatprep.subr.bf16.mxu1 %v1583_v4  ;;  %6335 = vmatprep.subr.bf16.mxu0 %v1591_v58 }
 0x42a   : > { %v9519_v55 = vpop.f32.mrf.mxu0 }
 0x42b   : > { %2819 = vmax.xlane.f32.xlu0 %v9483_v15  ;;  %2845 = vmax.xlane.f32.xlu1 %v9499_v63 }
 0x42c   : > { %6304 = vmatpush3.bf16.msra.mxu1 %v1583_v4  ;;  %6336 = vmatpush3.bf16.msra.mxu0 %v1591_v58  ;;  %v9515_v4 = vpop.f32.mrf.mxu1  ;;  %v1588_v58 = vpack.c.bf16 %v7402_v48, %v7397_v43  ;;  %v9525_v2 = vpop.f32.mrf.mxu0 }
 0x42d   : > { %6260 = vmatmul.mubr.msk.bf16.gmra.mxu1 %vm1644_vm2, %v11679_v0  ;;  %6292 = vmatmul.mubr.msk.bf16.gmra.mxu0 %vm1644_vm2, %v11680_v39  ;;  %v1580_v0 = vpack.c.bf16 %v7399_v30, %v7394_v23 }
 0x42e   : > { %6305 = vmatprep.subr.bf16.mxu1 %v1582_v52  ;;  %6337 = vmatprep.subr.bf16.mxu0 %v1590_v29  ;;  %v9521_v44 = vpop.f32.mrf.mxu1  ;;  %v9531_v23 = vpop.f32.mrf.mxu0 }
 0x42f   : > { %2815 = vmax.xlane.f32.xlu0 %v9501_v41  ;;  %2825 = vmax.xlane.f32.xlu1 %v9515_v4 }
 0x430   : > { %6306 = vmatpush3.bf16.msra.mxu1 %v1582_v52  ;;  %6338 = vmatpush3.bf16.msra.mxu0 %v1590_v29  ;;  %v9527_v53 = vpop.f32.mrf.mxu1  ;;  %v9537_v13 = vpop.f32.mrf.mxu0 }
 0x431   : > { %6307 = vmatprep.subr.bf16.mxu1 %v1581_v45  ;;  %6339 = vmatprep.subr.bf16.mxu0 %v1589_v34 }
 0x432   : > { %v9533_v26 = vpop.f32.mrf.mxu1  ;;  %v9543_v52 = vpop.f32.mrf.mxu0 }
 0x433   : > { %2851 = vmax.xlane.f32.xlu0 %v9513_v59  ;;  %2821 = vmax.xlane.f32.xlu1 %v9521_v44 }
 0x434   : > { %6308 = vmatpush3.bf16.msra.mxu1 %v1581_v45  ;;  %6340 = vmatpush3.bf16.msra.mxu0 %v1589_v34  ;;  %v9539_v33 = vpop.f32.mrf.mxu1  ;;  %v9549_v45 = vpop.f32.mrf.mxu0 }
 0x435   : > { %6309 = vmatprep.subr.bf16.mxu1 %v1580_v0  ;;  %6341 = vmatprep.subr.bf16.mxu0 %v1588_v58  ;;  %11681 = vst [vmem:[#allocation69_spill] sm:$0xff] %v9539_v33  ;;  %11683 = vst [vmem:[#allocation67_spill] sm:$0xff] %v9549_v45 }
 0x436   : > { %v9545_v29 = vpop.f32.mrf.mxu1  ;;  %v9553_v34 = vpop.f32.mrf.mxu0 }
 0x437   : > { %2847 = vmax.xlane.f32.xlu0 %v9519_v55  ;;  %2857 = vmax.xlane.f32.xlu1 %v9525_v2  ;;  %11682 = vst [vmem:[#allocation66_spill] sm:$0xff] %v9545_v29  ;;  %11684 = vst [vmem:[#allocation50_spill] sm:$0xff] %v9553_v34 }
 0x438   : > { %6310 = vmatpush3.bf16.msra.mxu1 %v1580_v0  ;;  %6342 = vmatpush3.bf16.msra.mxu0 %v1588_v58  ;;  %v9555_v39 = vpop.f32.mrf.mxu1  ;;  %v9562_v48 = vpop.f32.mrf.mxu0  ;;  %v7551_v0 = vunpack.i.l.bf16 %v9451_v24  ;;  %v7546_v58 = vunpack.i.l.bf16 %v9435_v38 }
 0x439   : > { %11686 = vst [vmem:[#allocation49_spill] sm:$0xff] %v9562_v48  ;;  %6391 = vmatprep.subr.bf16.mxu0 %v9579_v10 }
 0x43a   : > { %v9559_v30 = vpop.f32.mrf.mxu1  ;;  %v9572_v21 = vpop.f32.mrf.mxu0  ;;  %v9577_v18 = vpack.c.bf16 %v7551_v0, %v7546_v58 }
 0x43b   : > { %2827 = vmax.xlane.f32.xlu0 %v9527_v53  ;;  %2853 = vmax.xlane.f32.xlu1 %v9531_v23  ;;  %11685 = vst [vmem:[#allocation54_spill] sm:$0xff] %v9559_v30  ;;  %11688 = vst [vmem:[#allocation57_spill] sm:$0xff] %v9572_v21 }
 0x43c   : > { %11690 = vst [vmem:[#allocation56_spill] sm:$0xff] %v9577_v18  ;;  %6359 = vmatprep.subr.bf16.mxu1 %v9577_v18 }
 0x43f   : > { %2823 = vmax.xlane.f32.xlu0 %v9533_v26  ;;  %2833 = vmax.xlane.f32.xlu1 %v9539_v33 }
 0x443   : > { %2859 = vmax.xlane.f32.xlu0 %v9537_v13  ;;  %2829 = vmax.xlane.f32.xlu1 %v9545_v29 }
 0x447   : > { %2855 = vmax.xlane.f32.xlu0 %v9543_v52  ;;  %2865 = vmax.xlane.f32.xlu1 %v9549_v45 }
 0x44b   : > { %2835 = vmax.xlane.f32.xlu0 %v9555_v39  ;;  %2861 = vmax.xlane.f32.xlu1 %v9553_v34 }
 0x44f   : > { %2831 = vmax.xlane.f32.xlu0 %v9559_v30 }
 0x453   : > { %2867 = vmax.xlane.f32.xlu0 %v9562_v48  ;;  %v9565_v43 = vpop.f32.mrf.mxu1  ;;  %v9584_v36 = vpop.f32.mrf.mxu0 }
 0x454   : > { %11687 = vst [vmem:[#allocation53_spill] sm:$0xff] %v9565_v43  ;;  %2873 = vmax.xlane.f32.xlu1 %v9565_v43  ;;  %11692 = vst [vmem:[#allocation60_spill] sm:$0xff] %v9584_v36 }
 0x455   : > { %v9574_v60 = vpop.f32.mrf.mxu1  ;;  %v9590_v38 = vpop.f32.mrf.mxu0 }
 0x456   : > { %11689 = vst [vmem:[#allocation59_spill] sm:$0xff] %v9574_v60  ;;  %11694 = vst [vmem:[#allocation63_spill] sm:$0xff] %v9590_v38 }
 0x457   : > { %2863 = vmax.xlane.f32.xlu0 %v9572_v21  ;;  %v9586_v24 = vpop.f32.mrf.mxu1  ;;  %v9596_v32 = vpop.f32.mrf.mxu0 }
 0x458   : > { %2869 = vmax.xlane.f32.xlu1 %v9574_v60  ;;  %11693 = vst [vmem:[#allocation61_spill] sm:$0xff] %v9586_v24  ;;  %11696 = vst [vmem:[#allocation65_spill] sm:$0xff] %v9596_v32 }
 0x459   : > { %v9592_v0 = vpop.f32.mrf.mxu1  ;;  %v9602_v58 = vpop.f32.mrf.mxu0 }
 0x45a   : > { %11695 = vst [vmem:[#allocation62_spill] sm:$0xff] %v9592_v0  ;;  %11698 = vst [vmem:[#allocation17_spill] sm:$0xff] %v9602_v58 }
 0x45b   : > { %2875 = vmax.xlane.f32.xlu0 %v9586_v24  ;;  %v9598_v56 = vpop.f32.mrf.mxu1  ;;  %v9608_v17 = vpop.f32.mrf.mxu0 }
 0x45c   : > { %2905 = vmax.xlane.f32.xlu1 %v9584_v36  ;;  %11697 = vst [vmem:[#allocation64_spill] sm:$0xff] %v9598_v56  ;;  %11700 = vst [vmem:[#allocation15_spill] sm:$0xff] %v9608_v17 }
 0x45d   : > { %v9604_v9 = vpop.f32.mrf.mxu1 }
 0x45e   : > { %11699 = vst [vmem:[#allocation18_spill] sm:$0xff] %v9604_v9 }
 0x45f   : > { %2871 = vmax.xlane.f32.xlu0 %v9592_v0  ;;  %v9610_v19 = vpop.f32.mrf.mxu1  ;;  %v9614_v0 = vpop.f32.mrf.mxu0 }
 0x460   : > { %2901 = vmax.xlane.f32.xlu1 %v9590_v38  ;;  %11701 = vst [vmem:[#allocation16_spill] sm:$0xff] %v9610_v19  ;;  %11702 = vst [vmem:[#allocation23_spill] sm:$0xff] %v9614_v0 }
 0x463   : > { %2907 = vmax.xlane.f32.xlu0 %v9596_v32  ;;  %v9616_v32 = vpop.f32.mrf.mxu1 }
 0x464   : > { %2881 = vmax.xlane.f32.xlu1 %v9598_v56  ;;  %11703 = vst [vmem:[#allocation24_spill] sm:$0xff] %v9616_v32  ;;  %v9620_v56 = vpop.f32.mrf.mxu0 }
 0x467   : > { %2903 = vmax.xlane.f32.xlu0 %v9602_v58  ;;  %v9622_v58 = vpop.f32.mrf.mxu1 }
 0x468   : > { %2877 = vmax.xlane.f32.xlu1 %v9604_v9  ;;  %11704 = vst [vmem:[#allocation27_spill] sm:$0xff] %v9622_v58  ;;  %v9626_v9 = vpop.f32.mrf.mxu0 }
 0x469   : > { %11705 = vst [vmem:[#allocation28_spill] sm:$0xff] %v9626_v9 }
 0x46b   : > { %2883 = vmax.xlane.f32.xlu0 %v9610_v19  ;;  %v9628_v19 = vpop.f32.mrf.mxu1 }
 0x46c   : > { %2913 = vmax.xlane.f32.xlu1 %v9608_v17  ;;  %11706 = vst [vmem:[#allocation31_spill] sm:$0xff] %v9628_v19  ;;  %v9632_v17 = vpop.f32.mrf.mxu0 }
 0x46d   : > { %11707 = vst [vmem:[#allocation32_spill] sm:$0xff] %v9632_v17 }
 0x46f   : > { %2879 = vmax.xlane.f32.xlu0 %v9616_v32  ;;  %v9634_v32 = vpop.f32.mrf.mxu1 }
 0x470   : > { %2909 = vmax.xlane.f32.xlu1 %v9614_v0  ;;  %v9638_v0 = vpop.f32.mrf.mxu0 }
 0x471   : > { %11708 = vst [vmem:[#allocation35_spill] sm:$0xff] %v9638_v0  ;;  %v9640_v24 = vpop.f32.mrf.mxu1 }
 0x473   : > { %2915 = vmax.xlane.f32.xlu0 %v9620_v56 }
 0x474   : > { %2889 = vmax.xlane.f32.xlu1 %v9622_v58  ;;  %v9644_v58 = vpop.f32.mrf.mxu0 }
 0x477   : > { %2911 = vmax.xlane.f32.xlu0 %v9626_v9  ;;  %v9646_v9 = vpop.f32.mrf.mxu1 }
 0x478   : > { %2885 = vmax.xlane.f32.xlu1 %v9628_v19  ;;  %v9650_v19 = vpop.f32.mrf.mxu0 }
 0x479   : > { %v9652_v51 = vpop.f32.mrf.mxu1 }
 0x47b   : > { %2891 = vmax.xlane.f32.xlu0 %v9634_v32  ;;  %v9658_v38 = vpop.f32.mrf.mxu1 }
 0x47c   : > { %2921 = vmax.xlane.f32.xlu1 %v9632_v17  ;;  %v9656_v17 = vpop.f32.mrf.mxu0 }
 0x47d   : > { %v9664_v16 = vpop.f32.mrf.mxu1 }
 0x47f   : > { %2887 = vmax.xlane.f32.xlu0 %v9640_v24 }
 0x480   : > { %2917 = vmax.xlane.f32.xlu1 %v9638_v0  ;;  %v9662_v0 = vpop.f32.mrf.mxu0 }
 0x482   : > { %v9668_v35 = vpop.f32.mrf.mxu0 }
 0x483   : > { %2923 = vmax.xlane.f32.xlu0 %v9644_v58 }
 0x484   : > { %2897 = vmax.xlane.f32.xlu1 %v9646_v9  ;;  %v9674_v36 = vpop.f32.mrf.mxu0 }
 0x485   : > { %11710 = vst [vmem:[#allocation40_spill] sm:$0xff] %v9674_v36 }
 0x487   : > { %2919 = vmax.xlane.f32.xlu0 %v9650_v19 }
 0x488   : > { %2893 = vmax.xlane.f32.xlu1 %v9652_v51 }
 0x48b   : > { %2899 = vmax.xlane.f32.xlu0 %v9658_v38 }
 0x48c   : > { %2929 = vmax.xlane.f32.xlu1 %v9656_v17 }
 0x48f   : > { %2895 = vmax.xlane.f32.xlu0 %v9664_v16 }
 0x490   : > { %2925 = vmax.xlane.f32.xlu1 %v9662_v0 }
 0x493   : > { %2931 = vmax.xlane.f32.xlu0 %v9668_v35 }
 0x494   : > { %v9671_v37 = vpop.f32.mrf.mxu1  ;;  %v9680_v46 = vpop.f32.mrf.mxu0 }
 0x495   : > { %11709 = vst [vmem:[#allocation36_spill] sm:$0xff] %v9671_v37  ;;  %2937 = vmax.xlane.f32.xlu1 %v9671_v37  ;;  %11712 = vst [vmem:[#allocation44_spill] sm:$0xff] %v9680_v46 }
 0x496   : > { %v9676_v54 = vpop.f32.mrf.mxu1  ;;  %v9688_v60 = vpop.f32.mrf.mxu0 }
 0x497   : > { %11711 = vst [vmem:[#allocation41_spill] sm:$0xff] %v9676_v54  ;;  %2927 = vmax.xlane.f32.xlu0 %v9674_v36  ;;  %11714 = vst [vmem:[#allocation79_spill] sm:$0xff] %v9688_v60 }
 0x498   : > { %v9682_v57 = vpop.f32.mrf.mxu1  ;;  %v9698_v22 = vpop.f32.mrf.mxu0 }
 0x499   : > { %2933 = vmax.xlane.f32.xlu1 %v9676_v54  ;;  %11713 = vst [vmem:[#allocation45_spill] sm:$0xff] %v9682_v57  ;;  %11716 = vst [vmem:[#allocation81_spill] sm:$0xff] %v9698_v22 }
 0x49a   : > { %v9690_v47 = vpop.f32.mrf.mxu1  ;;  %v9706_v20 = vpop.f32.mrf.mxu0 }
 0x49b   : > { %2939 = vmax.xlane.f32.xlu0 %v9682_v57  ;;  %11715 = vst [vmem:[#allocation80_spill] sm:$0xff] %v9690_v47  ;;  %11718 = vst [vmem:[#allocation83_spill] sm:$0xff] %v9706_v20 }
 0x49c   : > { %v9686_v7 = vpop.xlane.xlu1 %2809  ;;  %v9700_v1 = vpop.f32.mrf.mxu1 }
 0x49d   : > { %2969 = vmax.xlane.f32.xlu1 %v9680_v46  ;;  %11717 = vst [vmem:[#allocation82_spill] sm:$0xff] %v9700_v1 }
 0x49e   : > { %v9708_v18 = vpop.f32.mrf.mxu1 }
 0x49f   : > { %2935 = vmax.xlane.f32.xlu0 %v9690_v47  ;;  %11719 = vst [vmem:[#allocation84_spill] sm:$0xff] %v9708_v18 }
 0x4a0   : > { %v9693_v5 = vpop.xlane.xlu0 %2805  ;;  %v9696_v10 = vpop.xlane.xlu1 %2841 }
 0x4a1   : > { %2965 = vmax.xlane.f32.xlu1 %v9688_v60  ;;  %v9719_v47 = vpop.f32.mrf.mxu1 }
 0x4a2   : > { %11721 = vst [vmem:[#allocation86_spill] sm:$0xff] %v9719_v47 }
 0x4a3   : > { %2971 = vmax.xlane.f32.xlu0 %v9698_v22  ;;  %v9717_v22 = vpop.f32.mrf.mxu0 }
 0x4a4   : > { %v9703_v43 = vpop.xlane.xlu0 %2837  ;;  %v2808_v40 = vpop.xlane.xlu1 %2807  ;;  %11720 = vst [vmem:[#allocation85_spill] sm:$0xff] %v9717_v22 }
 0x4a5   : > { %2945 = vmax.xlane.f32.xlu1 %v9700_v1  ;;  %v3062_v25 = vsub.f32 %v9445_v61, %v2808_v40  ;;  %v9729_v61 = vpop.f32.mrf.mxu1 }
 0x4a6   : > { %11723 = vst [vmem:[#allocation88_spill] sm:$0xff] %v9729_v61 }
 0x4a7   : > { %2967 = vmax.xlane.f32.xlu0 %v9706_v20  ;;  %v3191_v50 = vmul.f32 1.442695, %v3062_v25  ;;  %v9727_v25 = vpop.f32.mrf.mxu0 }
 0x4a8   : > { %v9712_v28 = vpop.xlane.xlu0 %2811  ;;  %v9715_v3 = vpop.xlane.xlu1 %2817  ;;  %11722 = vst [vmem:[#allocation87_spill] sm:$0xff] %v9727_v25 }
 0x4a9   : > { %2941 = vmax.xlane.f32.xlu1 %v9708_v18  ;;  %7736 = vpow2.f32 %v3191_v50  ;;  %v9735_v50 = vpop.f32.mrf.mxu0 }
 0x4aa   : > { %11724 = vst [vmem:[#allocation89_spill] sm:$0xff] %v9735_v50 }
 0x4ab   : > { %2947 = vmax.xlane.f32.xlu0 %v9719_v47  ;;  %v9743_v48 = vpop.f32.mrf.mxu0 }
 0x4ac   : > { %v9722_v1 = vpop.xlane.xlu0 %2843  ;;  %v9725_v40 = vpop.xlane.xlu1 %2813  ;;  %11725 = vst [vmem:[#allocation90_spill] sm:$0xff] %v9743_v48 }
 0x4ad   : > { %2977 = vmax.xlane.f32.xlu1 %v9717_v22  ;;  %v9763_v54 = vpop.f32.mrf.mxu0 }
 0x4ae   : > { %11729 = vst [vmem:[#allocation94_spill] sm:$0xff] %v9763_v54 }
 0x4af   : > { %2943 = vmax.xlane.f32.xlu0 %v9729_v61 }
 0x4b0   : > { %v9732_v20 = vpop.xlane.xlu0 %2839  ;;  %v2850_v18 = vpop.xlane.xlu1 %2849 }
 0x4b1   : > { %2973 = vmax.xlane.f32.xlu1 %v9727_v25  ;;  %v3083_v47 = vsub.f32 %v9481_v62, %v2850_v18  ;;  %v9751_v18 = vpop.f32.mrf.mxu1 }
 0x4b2   : > { %11727 = vst [vmem:[#allocation92_spill] sm:$0xff] %v9751_v18 }
 0x4b3   : > { %2979 = vmax.xlane.f32.xlu0 %v9735_v50  ;;  %v3233_v22 = vmul.f32 1.442695, %v3083_v47 }
 0x4b4   : > { %v9739_v21 = vpop.xlane.xlu0 %2819  ;;  %v9741_v57 = vpop.xlane.xlu1 %2845 }
 0x4b5   : > { %7738 = vpow2.f32 %v3233_v22  ;;  %v9757_v22 = vpop.f32.mrf.mxu1 }
 0x4b6   : > { %v9745_v61 = vpop.eup %7736  ;;  %11728 = vst [vmem:[#allocation93_spill] sm:$0xff] %v9757_v22 }
 0x4b7   : > { %11726 = vst [vmem:[#allocation91_spill] sm:$0xff] %v9745_v61  ;;  %2975 = vmax.xlane.f32.xlu0 %v9743_v48  ;;  %3447 = vadd.xlane.f32.xlu1 %v9745_v61 }
 0x4b8   : > { %v9748_v25 = vpop.xlane.xlu0 %2815  ;;  %v2826_v60 = vpop.xlane.xlu1 %2825 }
 0x4b9   : > { %v3071_v47 = vsub.f32 %v9515_v4, %v2826_v60 }
 0x4bb   : > { %2953 = vmax.xlane.f32.xlu0 %v9751_v18  ;;  %v3209_v62 = vmul.f32 1.442695, %v3071_v47  ;;  %v9768_v47 = vpop.f32.mrf.mxu1 }
 0x4bc   : > { %v9755_v50 = vpop.xlane.xlu0 %2851  ;;  %v2822_v30 = vpop.xlane.xlu1 %2821  ;;  %11731 = vst [vmem:[#allocation96_spill] sm:$0xff] %v9768_v47 }
 0x4bd   : > { %7740 = vpow2.f32 %v3209_v62  ;;  %v3069_v48 = vsub.f32 %v9521_v44, %v2822_v30  ;;  %v9774_v30 = vpop.f32.mrf.mxu0 }
 0x4be   : > { %11732 = vst [vmem:[#allocation97_spill] sm:$0xff] %v9774_v30 }
 0x4bf   : > { %2949 = vmax.xlane.f32.xlu0 %v9757_v22  ;;  %v3205_v46 = vmul.f32 1.442695, %v3069_v48 }
 0x4c0   : > { %v9761_v61 = vpop.xlane.xlu0 %2847  ;;  %v2858_v34 = vpop.xlane.xlu1 %2857 }
 0x4c1   : > { %7742 = vpow2.f32 %v3205_v46  ;;  %v3087_v60 = vsub.f32 %v9525_v2, %v2858_v34  ;;  %v9777_v46 = vpop.f32.mrf.mxu1 }
 0x4c2   : > { %v9766_v4 = vpop.eup %7738  ;;  %11733 = vst [vmem:[#allocation98_spill] sm:$0xff] %v9777_v46 }
 0x4c3   : > { %11730 = vst [vmem:[#allocation95_spill] sm:$0xff] %v9766_v4  ;;  %2985 = vmax.xlane.f32.xlu0 %v9763_v54  ;;  %v3241_v62 = vmul.f32 1.442695, %v3087_v60  ;;  %3489 = vadd.xlane.f32.xlu1 %v9766_v4  ;;  %v9786_v54 = vpop.f32.mrf.mxu0  ;;  %v9788_v4 = vpop.f32.mrf.mxu1 }
 0x4c4   : > { %v9771_v18 = vpop.xlane.xlu0 %2827  ;;  %v2854_v44 = vpop.xlane.xlu1 %2853  ;;  %11736 = vst [vmem:[#allocation101_spill] sm:$0xff] %v9786_v54  ;;  %11737 = vst [vmem:[#allocation102_spill] sm:$0xff] %v9788_v4 }
 0x4c5   : > { %7744 = vpow2.f32 %v3241_v62  ;;  %v3085_v48 = vsub.f32 %v9531_v23, %v2854_v44 }
 0x4c7   : > { %2981 = vmax.xlane.f32.xlu0 %v9774_v30  ;;  %v3237_v2 = vmul.f32 1.442695, %v3085_v48  ;;  %v9798_v48 = vpop.f32.mrf.mxu0  ;;  %v9800_v30 = vpop.f32.mrf.mxu1 }
 0x4c8   : > { %v9780_v34 = vpop.xlane.xlu0 %2823  ;;  %v9782_v22 = vpop.xlane.xlu1 %2833  ;;  %11740 = vst [vmem:[#allocation105_spill] sm:$0xff] %v9798_v48  ;;  %11741 = vst [vmem:[#allocation106_spill] sm:$0xff] %v9800_v30 }
 0x4c9   : > { %11734 = vst [vmem:[#allocation99_spill] sm:$0xff] %v9782_v22  ;;  %7746 = vpow2.f32 %v3237_v2  ;;  %v9810_v37 = vpop.f32.mrf.mxu1 }
 0x4ca   : > { %v9784_v60 = vpop.eup %7740  ;;  %11744 = vst [vmem:[#allocation109_spill] sm:$0xff] %v9810_v37 }
 0x4cb   : > { %11735 = vst [vmem:[#allocation100_spill] sm:$0xff] %v9784_v60  ;;  %2955 = vmax.xlane.f32.xlu0 %v9768_v47  ;;  %3465 = vadd.xlane.f32.xlu1 %v9784_v60  ;;  %v9808_v47 = vpop.f32.mrf.mxu0  ;;  %v9822_v33 = vpop.f32.mrf.mxu1 }
 0x4cc   : > { %v9791_v62 = vpop.xlane.xlu0 %2859  ;;  %v9794_v23 = vpop.xlane.xlu1 %2829  ;;  %11743 = vst [vmem:[#allocation108_spill] sm:$0xff] %v9808_v47  ;;  %11748 = vst [vmem:[#allocation113_spill] sm:$0xff] %v9822_v33 }
 0x4cd   : > { %11738 = vst [vmem:[#allocation103_spill] sm:$0xff] %v9794_v23  ;;  %v9819_v36 = vpop.f32.mrf.mxu0 }
 0x4ce   : > { %v9796_v44 = vpop.eup %7742  ;;  %11747 = vst [vmem:[#allocation112_spill] sm:$0xff] %v9819_v36 }
 0x4cf   : > { %11739 = vst [vmem:[#allocation104_spill] sm:$0xff] %v9796_v44  ;;  %2951 = vmax.xlane.f32.xlu0 %v9777_v46  ;;  %3461 = vadd.xlane.f32.xlu1 %v9796_v44 }
 0x4d0   : > { %v9803_v2 = vpop.xlane.xlu0 %2855  ;;  %v9813_v60 = vpop.xlane.xlu1 %2865 }
 0x4d1   : > { %11745 = vst [vmem:[#allocation110_spill] sm:$0xff] %v9813_v60 }
 0x4d2   : > { %v9806_v45 = vpop.eup %7744 }
 0x4d3   : > { %11742 = vst [vmem:[#allocation107_spill] sm:$0xff] %v9806_v45  ;;  %2987 = vmax.xlane.f32.xlu0 %v9786_v54  ;;  %3497 = vadd.xlane.f32.xlu1 %v9806_v45  ;;  %v3063_v54 = vsub.f32 %v9412_v14, %v9686_v7  ;;  %v3061_v14 = vsub.f32 %v9415_v8, %v9693_v5 }
 0x4d4   : > { %v2836_v29 = vpop.xlane.xlu0 %2835  ;;  %v3079_v8 = vsub.f32 %v9423_v42, %v9696_v10 }
 0x4d5   : > { %v3076_v23 = vsub.f32 %v9555_v39, %v2836_v29  ;;  %v9829_v45 = vpop.f32.mrf.mxu1  ;;  %v9831_v29 = vpop.xlane.xlu1 %2861 }
 0x4d6   : > { %v9817_v46 = vpop.eup %7746  ;;  %11750 = vst [vmem:[#allocation115_spill] sm:$0xff] %v9829_v45  ;;  %v9833_v39 = vpop.f32.mrf.mxu0 }
 0x4d7   : > { %11746 = vst [vmem:[#allocation111_spill] sm:$0xff] %v9817_v46  ;;  %v3219_v44 = vmul.f32 1.442695, %v3076_v23  ;;  %2983 = vmax.xlane.f32.xlu0 %v9798_v48  ;;  %3493 = vadd.xlane.f32.xlu1 %v9817_v46  ;;  %11751 = vst [vmem:[#allocation116_spill] sm:$0xff] %v9833_v39  ;;  %v3193_v48 = vmul.f32 1.442695, %v3063_v54  ;;  %v9838_v60 = vpop.f32.mrf.mxu1 }
 0x4d8   : > { %v9824_v22 = vpop.xlane.xlu0 %2831  ;;  %11752 = vst [vmem:[#allocation117_spill] sm:$0xff] %v9838_v60  ;;  %v9842_v46 = vpop.f32.mrf.mxu0 }
 0x4d9   : > { %11749 = vst [vmem:[#allocation114_spill] sm:$0xff] %v9824_v22  ;;  %7748 = vpow2.f32 %v3219_v44  ;;  %11754 = vst [vmem:[#allocation119_spill] sm:$0xff] %v9842_v46 }
 0x4da   : > { %7750 = vpow2.f32 %v3193_v48  ;;  %v9849_v44 = vpop.f32.mrf.mxu0 }
 0x4db   : > { %2961 = vmax.xlane.f32.xlu0 %v9788_v4  ;;  %11756 = vst [vmem:[#allocation121_spill] sm:$0xff] %v9849_v44  ;;  %v9851_v4 = vpop.f32.mrf.mxu1 }
 0x4dc   : > { %v9836_v23 = vpop.xlane.xlu0 %2867  ;;  %11757 = vst [vmem:[#allocation122_spill] sm:$0xff] %v9851_v4  ;;  %v9858_v60 = vpop.f32.mrf.mxu0 }
 0x4dd   : > { %v9840_v22 = vpop.xlane.xlu1 %2873  ;;  %11759 = vst [vmem:[#allocation124_spill] sm:$0xff] %v9858_v60 }
 0x4de   : > { %11753 = vst [vmem:[#allocation118_spill] sm:$0xff] %v9840_v22  ;;  %v3189_v22 = vmul.f32 1.442695, %v3061_v14 }
 0x4df   : > { %2957 = vmax.xlane.f32.xlu0 %v9800_v30 }
 0x4e0   : > { %v9845_v7 = vpop.xlane.xlu0 %2863  ;;  %7752 = vpow2.f32 %v3189_v22 }
 0x4e1   : > { %11755 = vst [vmem:[#allocation120_spill] sm:$0xff] %v9845_v7  ;;  %v9853_v45 = vpop.xlane.xlu1 %2869  ;;  %v9862_v7 = vpop.f32.mrf.mxu1 }
 0x4e2   : > { %11761 = vst [vmem:[#allocation126_spill] sm:$0xff] %v9862_v7 }
 0x4e3   : > { %2993 = vmax.xlane.f32.xlu0 %v9808_v47  ;;  %v9872_v47 = vpop.f32.mrf.mxu0  ;;  %v9874_v14 = vpop.f32.mrf.mxu1 }
 0x4e4   : > { %v9856_v54 = vpop.xlane.xlu0 %2875  ;;  %11764 = vst [vmem:[#allocation129_spill] sm:$0xff] %v9872_v47  ;;  %11765 = vst [vmem:[#allocation130_spill] sm:$0xff] %v9874_v14 }
 0x4e5   : > { %11758 = vst [vmem:[#allocation123_spill] sm:$0xff] %v9856_v54  ;;  %v9864_v48 = vpop.xlane.xlu1 %2905  ;;  %v9886_v22 = vpop.f32.mrf.mxu1 }
 0x4e6   : > { %v9860_v30 = vpop.eup %7748  ;;  %11762 = vst [vmem:[#allocation127_spill] sm:$0xff] %v9864_v48  ;;  %11769 = vst [vmem:[#allocation134_spill] sm:$0xff] %v9886_v22 }
 0x4e7   : > { %11760 = vst [vmem:[#allocation125_spill] sm:$0xff] %v9860_v30  ;;  %3475 = vadd.xlane.f32.xlu1 %v9860_v30  ;;  %2989 = vmax.xlane.f32.xlu0 %v9819_v36  ;;  %v3225_v30 = vmul.f32 1.442695, %v3079_v8  ;;  %v9882_v36 = vpop.f32.mrf.mxu0 }
 0x4e8   : > { %v9868_v5 = vpop.xlane.xlu0 %2871  ;;  %11768 = vst [vmem:[#allocation133_spill] sm:$0xff] %v9882_v36 }
 0x4e9   : > { %11763 = vst [vmem:[#allocation128_spill] sm:$0xff] %v9868_v5  ;;  %v9876_v54 = vpop.xlane.xlu1 %2901  ;;  %v9884_v5 = vpop.eup %7750  ;;  %7754 = vpow2.f32 %v3225_v30 }
 0x4ea   : > { %11766 = vst [vmem:[#allocation131_spill] sm:$0xff] %v9876_v54 }
 0x4eb   : > { %3009 = vmax.xlane.f32.xlu1 %v9874_v14  ;;  %2963 = vmax.xlane.f32.xlu0 %v9810_v37  ;;  %v3077_v14 = vsub.f32 %v9443_v27, %v9703_v43  ;;  %v9896_v37 = vpop.f32.mrf.mxu0  ;;  %v3080_v27 = vsub.f32 %v9457_v31, %v9722_v1  ;;  %v3067_v1 = vsub.f32 %v9459_v11, %v9715_v3 }
 0x4ec   : > { %v9880_v48 = vpop.xlane.xlu0 %2907  ;;  %11772 = vst [vmem:[#allocation137_spill] sm:$0xff] %v9896_v37 }
 0x4ed   : > { %11767 = vst [vmem:[#allocation132_spill] sm:$0xff] %v9880_v48  ;;  %v9888_v10 = vpop.xlane.xlu1 %2881  ;;  %v9906_v54 = vpop.eup %7752 }
 0x4ee   : > { %11770 = vst [vmem:[#allocation135_spill] sm:$0xff] %v9888_v10  ;;  %v3221_v10 = vmul.f32 1.442695, %v3077_v14  ;;  %v9908_v30 = vpop.f32.mrf.mxu0 }
 0x4ef   : > { %3005 = vmax.xlane.f32.xlu1 %v9886_v22  ;;  %3449 = vadd.xlane.f32.xlu0 %v9884_v5  ;;  %v3064_v22 = vsub.f32 %v9429_v49, %v9712_v28  ;;  %11774 = vst [vmem:[#allocation139_spill] sm:$0xff] %v9908_v30  ;;  %v3227_v28 = vmul.f32 1.442695, %v3080_v27 }
 0x4f0   : > { %v9892_v42 = vpop.xlane.xlu0 %2903  ;;  %7756 = vpow2.f32 %v3221_v10 }
 0x4f1   : > { %11771 = vst [vmem:[#allocation136_spill] sm:$0xff] %v9892_v42  ;;  %v9898_v8 = vpop.xlane.xlu1 %2877  ;;  %v3195_v14 = vmul.f32 1.442695, %v3064_v22 }
 0x4f3   : > { %2959 = vmax.xlane.f32.xlu0 %v9822_v33  ;;  %3041 = vmax.xlane.f32.xlu1 %v9896_v37  ;;  %7758 = vpow2.f32 %v3195_v14  ;;  %v3078_v33 = vsub.f32 %v9471_v12, %v9732_v20  ;;  %v3201_v20 = vmul.f32 1.442695, %v3067_v1  ;;  %v3065_v12 = vsub.f32 %v9473_v6, %v9725_v40 }
 0x4f4   : > { %v9902_v48 = vpop.xlane.xlu0 %2883  ;;  %7760 = vpow2.f32 %v3227_v28  ;;  %v3081_v28 = vsub.f32 %v9499_v63, %v9741_v57  ;;  %v3068_v1 = vsub.f32 %v9483_v15, %v9739_v21  ;;  %v3066_v21 = vsub.f32 %v9501_v41, %v9748_v25 }
 0x4f5   : > { %11773 = vst [vmem:[#allocation138_spill] sm:$0xff] %v9902_v48  ;;  %v9910_v42 = vpop.xlane.xlu1 %2913  ;;  %v3223_v10 = vmul.f32 1.442695, %v3078_v33  ;;  %v3197_v33 = vmul.f32 1.442695, %v3065_v12 }
 0x4f6   : > { %11775 = vst [vmem:[#allocation140_spill] sm:$0xff] %v9910_v42 }
 0x4f7   : > { %3445 = vadd.xlane.f32.xlu0 %v9906_v54  ;;  %3037 = vmax.xlane.f32.xlu1 %v9908_v30  ;;  %v9924_v30 = vpop.eup %7754 }
 0x4f8   : > { %v9916_v43 = vpop.xlane.xlu0 %2879 }
 0x4f9   : > { %v9918_v37 = vpop.xlane.xlu1 %2909 }
 0x4fb   : > { %2995 = vmax.xlane.f32.xlu0 %v9833_v39  ;;  %v11823_v39 = vld [vmem:[#allocation115_spill] sm:$0xff] }
 0x4fc   : > { %v2916_v49 = vpop.xlane.xlu0 %2915 }
 0x4fd   : > { %v3116_v48 = vsub.f32 %v9620_v56, %v2916_v49  ;;  %v9926_v42 = vpop.xlane.xlu1 %2889  ;;  %v9939_v14 = vpop.eup %7756 }
 0x4ff   : > { %v3299_v31 = vmul.f32 1.442695, %v3116_v48  ;;  %3481 = vadd.xlane.f32.xlu0 %v9924_v30 }
 0x500   : > { %v9931_v22 = vpop.xlane.xlu0 %2911  ;;  %v9947_v40 = vpop.eup %7758 }
 0x501   : > { %7762 = vpow2.f32 %v3299_v31  ;;  %v9933_v27 = vpop.xlane.xlu1 %2885  ;;  %v9954_v12 = vpop.eup %7760 }
 0x502   : > { %7764 = vpow2.f32 %v3223_v10  ;;  %v3229_v10 = vmul.f32 1.442695, %v3081_v28 }
 0x503   : > { %2991 = vmax.xlane.f32.xlu0 %v9842_v46  ;;  %7766 = vpow2.f32 %v3201_v20 }
 0x504   : > { %v2892_v56 = vpop.xlane.xlu0 %2891 }
 0x505   : > { %v3104_v48 = vsub.f32 %v9634_v32, %v2892_v56  ;;  %v9941_v3 = vpop.xlane.xlu1 %2921 }
 0x507   : > { %v3275_v11 = vmul.f32 1.442695, %v3104_v48  ;;  %3477 = vadd.xlane.f32.xlu0 %v9939_v14  ;;  %v3203_v48 = vmul.f32 1.442695, %v3068_v1 }
 0x508   : > { %v2888_v49 = vpop.xlane.xlu0 %2887 }
 0x509   : > { %7768 = vpow2.f32 %v3275_v11  ;;  %v3102_v6 = vsub.f32 %v9640_v24, %v2888_v49  ;;  %v9949_v31 = vpop.xlane.xlu1 %2917 }
 0x50a   : > { %11776 = vst [vmem:[#allocation141_spill] sm:$0xff] %v9949_v31  ;;  %7770 = vpow2.f32 %v3197_v33  ;;  %v11826_v31 = vld [vmem:[#allocation117_spill] sm:$0xff] }
 0x50b   : > { %v3271_v32 = vmul.f32 1.442695, %v3102_v6  ;;  %3451 = vadd.xlane.f32.xlu0 %v9947_v40  ;;  %v3199_v6 = vmul.f32 1.442695, %v3066_v21 }
 0x50c   : > { %v2924_v20 = vpop.xlane.xlu0 %2923 }
 0x50d   : > { %7772 = vpow2.f32 %v3271_v32  ;;  %v3120_v57 = vsub.f32 %v9644_v58, %v2924_v20  ;;  %v2898_v24 = vpop.xlane.xlu1 %2897  ;;  %v3084_v32 = vsub.f32 %v9513_v59, %v9755_v50 }
 0x50e   : > { %v9957_v63 = vpop.eup %7762  ;;  %7774 = vpow2.f32 %v3229_v10  ;;  %v3107_v11 = vsub.f32 %v9646_v9, %v2898_v24 }
 0x50f   : > { %11777 = vst [vmem:[#allocation142_spill] sm:$0xff] %v9957_v63  ;;  %v3307_v56 = vmul.f32 1.442695, %v3120_v57  ;;  %3483 = vadd.xlane.f32.xlu0 %v9954_v12  ;;  %3555 = vadd.xlane.f32.xlu1 %v9957_v63  ;;  %v9965_v58 = vpop.eup %7764  ;;  %v3235_v20 = vmul.f32 1.442695, %v3084_v32  ;;  %v3082_v57 = vsub.f32 %v9519_v55, %v9761_v61 }
 0x510   : > { %v2920_v15 = vpop.xlane.xlu0 %2919  ;;  %v9970_v10 = vpop.eup %7766  ;;  %v3281_v41 = vmul.f32 1.442695, %v3107_v11 }
 0x511   : > { %7776 = vpow2.f32 %v3307_v56  ;;  %v3118_v33 = vsub.f32 %v9650_v19, %v2920_v15  ;;  %v2894_v28 = vpop.xlane.xlu1 %2893  ;;  %v3231_v21 = vmul.f32 1.442695, %v3082_v57  ;;  %v3072_v15 = vsub.f32 %v9527_v53, %v9771_v18 }
 0x512   : > { %7778 = vpow2.f32 %v3203_v48  ;;  %v3105_v9 = vsub.f32 %v9652_v51, %v2894_v28  ;;  %v3086_v57 = vsub.f32 %v9543_v52, %v9803_v2 }
 0x513   : > { %v3303_v49 = vmul.f32 1.442695, %v3118_v33  ;;  %3479 = vadd.xlane.f32.xlu0 %v9965_v58  ;;  %v3211_v28 = vmul.f32 1.442695, %v3072_v15 }
 0x514   : > { %v2900_v1 = vpop.xlane.xlu0 %2899  ;;  %v3277_v24 = vmul.f32 1.442695, %v3105_v9  ;;  %v3088_v9 = vsub.f32 %v9537_v13, %v9791_v62  ;;  %v3239_v52 = vmul.f32 1.442695, %v3086_v57 }
 0x515   : > { %7780 = vpow2.f32 %v3303_v49  ;;  %v2930_v19 = vpop.xlane.xlu1 %2929  ;;  %v3070_v49 = vsub.f32 %v9533_v26, %v9780_v34  ;;  %v3108_v18 = vsub.f32 %v9658_v38, %v2900_v1 }
 0x516   : > { %v9973_v25 = vpop.eup %7768  ;;  %7782 = vpow2.f32 %v3199_v6  ;;  %v3123_v56 = vsub.f32 %v9656_v17, %v2930_v19 }
 0x517   : > { %11778 = vst [vmem:[#allocation143_spill] sm:$0xff] %v9973_v25  ;;  %3457 = vadd.xlane.f32.xlu0 %v9970_v10  ;;  %3531 = vadd.xlane.f32.xlu1 %v9973_v25  ;;  %v9979_v50 = vpop.eup %7770  ;;  %7784 = vpow2.f32 %v3281_v41  ;;  %v3283_v34 = vmul.f32 1.442695, %v3108_v18 }
 0x518   : > { %v2896_v59 = vpop.xlane.xlu0 %2895  ;;  %7786 = vpow2.f32 %v3235_v20  ;;  %v3313_v11 = vmul.f32 1.442695, %v3123_v56  ;;  %v3243_v20 = vmul.f32 1.442695, %v3088_v9 }
 0x519   : > { %v2926_v48 = vpop.xlane.xlu1 %2925  ;;  %7788 = vpow2.f32 %v3277_v24  ;;  %v3106_v38 = vsub.f32 %v9664_v16, %v2896_v59 }
 0x51a   : > { %v9982_v51 = vpop.eup %7772  ;;  %v3121_v33 = vsub.f32 %v9662_v0, %v2926_v48  ;;  %7790 = vpow2.f32 %v3231_v21  ;;  %v3207_v0 = vmul.f32 1.442695, %v3070_v49  ;;  %v11784_v48 = vld [vmem:[#allocation99_spill] sm:$0xff]  ;;  %v11785_v21 = vld [vmem:[#allocation69_spill] sm:$0xff] }
 0x51b   : > { %11779 = vst [vmem:[#allocation144_spill] sm:$0xff] %v9982_v51  ;;  %3453 = vadd.xlane.f32.xlu0 %v9979_v50  ;;  %3527 = vadd.xlane.f32.xlu1 %v9982_v51  ;;  %v9988_v61 = vpop.eup %7774  ;;  %7792 = vpow2.f32 %v3313_v11  ;;  %v3279_v56 = vmul.f32 1.442695, %v3106_v38  ;;  %v3075_v15 = vsub.f32 %v11785_v21, %v11784_v48  ;;  %v11793_v48 = vld [vmem:[#allocation110_spill] sm:$0xff]  ;;  %v11794_v21 = vld [vmem:[#allocation67_spill] sm:$0xff] }
 0x51c   : > { %v2932_v55 = vpop.xlane.xlu0 %2931  ;;  %v3309_v32 = vmul.f32 1.442695, %v3121_v33  ;;  %7794 = vpow2.f32 %v3211_v28  ;;  %v11786_v28 = vld [vmem:[#allocation40_spill] sm:$0xff] }
 0x51d   : > { %v3124_v16 = vsub.f32 %v9668_v35, %v2932_v55  ;;  %v3217_v18 = vmul.f32 1.442695, %v3075_v15  ;;  %v3091_v15 = vsub.f32 %v11794_v21, %v11793_v48 }
 0x51e   : > { %v9991_v17 = vpop.eup %7776  ;;  %7796 = vpow2.f32 %v3309_v32  ;;  %v2938_v13 = vpop.xlane.xlu1 %2937  ;;  %v11788_v32 = vld [vmem:[#allocation103_spill] sm:$0xff] }
 0x51f   : > { %11780 = vst [vmem:[#allocation145_spill] sm:$0xff] %v9991_v17  ;;  %3485 = vadd.xlane.f32.xlu0 %v9988_v61  ;;  %3563 = vadd.xlane.f32.xlu1 %v9991_v17  ;;  %v9997_v53 = vpop.eup %7778  ;;  %7798 = vpow2.f32 %v3207_v0  ;;  %v3315_v33 = vmul.f32 1.442695, %v3124_v16  ;;  %v11789_v0 = vld [vmem:[#allocation66_spill] sm:$0xff] }
 0x520   : > { %v2928_v6 = vpop.xlane.xlu0 %2927  ;;  %7800 = vpow2.f32 %v3283_v34  ;;  %v3073_v9 = vsub.f32 %v11789_v0, %v11788_v32 }
 0x521   : > { %7802 = vpow2.f32 %v3243_v20  ;;  %v3122_v49 = vsub.f32 %v11786_v28, %v2928_v6  ;;  %v11791_v20 = vld [vmem:[#allocation36_spill] sm:$0xff] }
 0x522   : > { %v10000_v41 = vpop.eup %7780  ;;  %7804 = vpow2.f32 %v3279_v56  ;;  %v2934_v55 = vpop.xlane.xlu1 %2933  ;;  %v3127_v57 = vsub.f32 %v11791_v20, %v2938_v13  ;;  %v3213_v16 = vmul.f32 1.442695, %v3073_v9  ;;  %v11795_v13 = vld [vmem:[#allocation41_spill] sm:$0xff]  ;;  %v11797_v9 = vld [vmem:[#allocation50_spill] sm:$0xff] }
 0x523   : > { %11781 = vst [vmem:[#allocation146_spill] sm:$0xff] %v10000_v41  ;;  %3459 = vadd.xlane.f32.xlu0 %v9997_v53  ;;  %3559 = vadd.xlane.f32.xlu1 %v10000_v41  ;;  %v10008_v26 = vpop.eup %7782  ;;  %7806 = vpow2.f32 %v3239_v52  ;;  %v3311_v6 = vmul.f32 1.442695, %v3122_v49  ;;  %v3125_v49 = vsub.f32 %v11795_v13, %v2934_v55  ;;  %v3089_v20 = vsub.f32 %v11797_v9, %v9831_v29 }
 0x524   : > { %v10006_v19 = vpop.xlane.xlu0 %2939  ;;  %v10011_v1 = vpop.eup %7784  ;;  %7808 = vpow2.f32 %v3315_v33  ;;  %v3321_v33 = vmul.f32 1.442695, %v3127_v57 }
 0x525   : > { %11782 = vst [vmem:[#allocation147_spill] sm:$0xff] %v10011_v1  ;;  %v10019_v24 = vpop.eup %7786  ;;  %7810 = vpow2.f32 %v3217_v18  ;;  %v3249_v18 = vmul.f32 1.442695, %v3091_v15  ;;  %v3317_v57 = vmul.f32 1.442695, %v3125_v49  ;;  %v11800_v15 = vld [vmem:[#allocation114_spill] sm:$0xff] }
 0x526   : > { %v10022_v59 = vpop.eup %7788  ;;  %v2970_v52 = vpop.xlane.xlu1 %2969  ;;  %7812 = vpow2.f32 %v3311_v6  ;;  %v11798_v6 = vld [vmem:[#allocation44_spill] sm:$0xff]  ;;  %v11802_v49 = vld [vmem:[#allocation79_spill] sm:$0xff] }
 0x527   : > { %3455 = vadd.xlane.f32.xlu0 %v10008_v26  ;;  %3537 = vadd.xlane.f32.xlu1 %v10011_v1  ;;  %11783 = vst [vmem:[#allocation148_spill] sm:$0xff] %v10022_v59  ;;  %v10030_v11 = vpop.eup %7790  ;;  %7814 = vpow2.f32 %v3213_v16  ;;  %v3245_v16 = vmul.f32 1.442695, %v3089_v20  ;;  %v11804_v20 = vld [vmem:[#allocation49_spill] sm:$0xff] }
 0x528   : > { %v10017_v62 = vpop.xlane.xlu0 %2935  ;;  %v10033_v35 = vpop.eup %7792  ;;  %7816 = vpow2.f32 %v3321_v33  ;;  %v3092_v1 = vsub.f32 %v11804_v20, %v9836_v23 }
 0x529   : > { %11787 = vst [vmem:[#allocation99_spill] sm:$0xff] %v10033_v35  ;;  %v10041_v38 = vpop.eup %7794  ;;  %7818 = vpow2.f32 %v3249_v18 }
 0x52a   : > { %v2966_v13 = vpop.xlane.xlu1 %2965  ;;  %7820 = vpow2.f32 %v3317_v57  ;;  %v11805_v57 = vld [vmem:[#allocation45_spill] sm:$0xff] }
 0x52b   : > { %3491 = vadd.xlane.f32.xlu0 %v10019_v24  ;;  %3533 = vadd.xlane.f32.xlu1 %v10022_v59  ;;  %v10044_v56 = vpop.eup %7796  ;;  %7822 = vpow2.f32 %v3245_v16  ;;  %v3251_v16 = vmul.f32 1.442695, %v3092_v1 }
 0x52c   : > { %v10028_v2 = vpop.xlane.xlu0 %2971  ;;  %11792 = vst [vmem:[#allocation40_spill] sm:$0xff] %v10044_v56  ;;  %v10052_v32 = vpop.eup %7798 }
 0x52d   : > { %v10055_v0 = vpop.eup %7800 }
 0x52e   : > { %11796 = vst [vmem:[#allocation103_spill] sm:$0xff] %v10055_v0  ;;  %v10063_v21 = vpop.eup %7802  ;;  %v2946_v20 = vpop.xlane.xlu1 %2945 }
 0x52f   : > { %3487 = vadd.xlane.f32.xlu0 %v10030_v11  ;;  %3569 = vadd.xlane.f32.xlu1 %v10033_v35  ;;  %v3143_v35 = vsub.f32 %v11798_v6, %v2970_v52  ;;  %v10066_v55 = vpop.eup %7804  ;;  %v3141_v52 = vsub.f32 %v11802_v49, %v2966_v13 }
 0x530   : > { %v10039_v34 = vpop.xlane.xlu0 %2967  ;;  %11799 = vst [vmem:[#allocation66_spill] sm:$0xff] %v10066_v55  ;;  %v10074_v17 = vpop.eup %7806 }
 0x531   : > { %11790 = vst [vmem:[#allocation69_spill] sm:$0xff] %v10039_v34  ;;  %v3353_v33 = vmul.f32 1.442695, %v3143_v35  ;;  %v10077_v6 = vpop.eup %7808  ;;  %v3128_v35 = vsub.f32 %v11805_v57, %v10006_v19  ;;  %v3349_v13 = vmul.f32 1.442695, %v3141_v52  ;;  %v11809_v19 = vld [vmem:[#allocation80_spill] sm:$0xff] }
 0x532   : > { %11803 = vst [vmem:[#allocation36_spill] sm:$0xff] %v10077_v6 }
 0x533   : > { %3467 = vadd.xlane.f32.xlu0 %v10041_v38  ;;  %3565 = vadd.xlane.f32.xlu1 %v10044_v56  ;;  %v11801_v56 = vld [vmem:[#allocation54_spill] sm:$0xff]  ;;  %7824 = vpow2.f32 %v3353_v33  ;;  %v3323_v59 = vmul.f32 1.442695, %v3128_v35  ;;  %v3126_v33 = vsub.f32 %v11809_v19, %v10017_v62  ;;  %v11811_v35 = vld [vmem:[#allocation81_spill] sm:$0xff]  ;;  %v2942_v62 = vpop.xlane.xlu1 %2941 }
 0x534   : > { %v10050_v28 = vpop.xlane.xlu0 %2947  ;;  %v3074_v29 = vsub.f32 %v11801_v56, %v11800_v15  ;;  %v10085_v15 = vpop.eup %7810  ;;  %v11813_v19 = vld [vmem:[#allocation82_spill] sm:$0xff] }
 0x535   : > { %v10089_v49 = vpop.eup %7812  ;;  %v3319_v57 = vmul.f32 1.442695, %v3126_v33 }
 0x536   : > { %v3215_v18 = vmul.f32 1.442695, %v3074_v29  ;;  %11806 = vst [vmem:[#allocation110_spill] sm:$0xff] %v10089_v49  ;;  %v11807_v29 = vld [vmem:[#allocation120_spill] sm:$0xff] }
 0x537   : > { %3463 = vadd.xlane.f32.xlu0 %v10052_v32  ;;  %3539 = vadd.xlane.f32.xlu1 %v10055_v0  ;;  %v10097_v0 = vpop.eup %7814 }
 0x538   : > { %v10061_v48 = vpop.xlane.xlu0 %2943  ;;  %7826 = vpow2.f32 %v3215_v18  ;;  %v10101_v52 = vpop.eup %7816 }
 0x539   : > { %7828 = vpow2.f32 %v3349_v13  ;;  %11810 = vst [vmem:[#allocation67_spill] sm:$0xff] %v10101_v52 }
 0x53a   : > { %7830 = vpow2.f32 %v3251_v16 }
 0x53b   : > { %3499 = vadd.xlane.f32.xlu0 %v10063_v21  ;;  %3535 = vadd.xlane.f32.xlu1 %v10066_v55  ;;  %7832 = vpow2.f32 %v3323_v59  ;;  %v3131_v59 = vsub.f32 %v11813_v19, %v2946_v20  ;;  %v11817_v19 = vld [vmem:[#allocation85_spill] sm:$0xff] }
 0x53c   : > { %v10072_v9 = vpop.xlane.xlu0 %2979 }
 0x53f   : > { %3495 = vadd.xlane.f32.xlu0 %v10074_v17  ;;  %3571 = vadd.xlane.f32.xlu1 %v10077_v6  ;;  %v11808_v6 = vld [vmem:[#allocation57_spill] sm:$0xff] }
 0x540   : > { %v10083_v56 = vpop.xlane.xlu0 %2975  ;;  %v3090_v23 = vsub.f32 %v11808_v6, %v11807_v29  ;;  %v10107_v6 = vpop.eup %7818  ;;  %v3144_v29 = vsub.f32 %v11811_v35, %v10028_v2 }
 0x541   : > { %v2978_v2 = vpop.xlane.xlu1 %2977 }
 0x542   : > { %v3247_v1 = vmul.f32 1.442695, %v3090_v23  ;;  %v3355_v23 = vmul.f32 1.442695, %v3144_v29 }
 0x543   : > { %3473 = vadd.xlane.f32.xlu0 %v10085_v15  ;;  %3567 = vadd.xlane.f32.xlu1 %v10089_v49  ;;  %v10111_v49 = vpop.eup %7820 }
 0x544   : > { %v10095_v41 = vpop.xlane.xlu0 %2953  ;;  %11812 = vst [vmem:[#allocation41_spill] sm:$0xff] %v10111_v49  ;;  %7834 = vpow2.f32 %v3247_v1  ;;  %v10117_v16 = vpop.eup %7822  ;;  %v3329_v1 = vmul.f32 1.442695, %v3131_v59 }
 0x545   : > { %7836 = vpow2.f32 %v3319_v57  ;;  %v10120_v33 = vpop.eup %7824 }
 0x546   : > { %11814 = vst [vmem:[#allocation50_spill] sm:$0xff] %v10120_v33  ;;  %7838 = vpow2.f32 %v3355_v23  ;;  %v2974_v23 = vpop.xlane.xlu1 %2973 }
 0x547   : > { %3469 = vadd.xlane.f32.xlu0 %v10097_v0  ;;  %3577 = vadd.xlane.f32.xlu1 %v10101_v52  ;;  %v10126_v52 = vpop.eup %7826  ;;  %7840 = vpow2.f32 %v3329_v1 }
 0x548   : > { %v10105_v18 = vpop.xlane.xlu0 %2949  ;;  %v10129_v55 = vpop.eup %7828 }
 0x549   : > { %11816 = vst [vmem:[#allocation44_spill] sm:$0xff] %v10129_v55  ;;  %v10135_v57 = vpop.eup %7830 }
 0x54a   : > { %v10138_v51 = vpop.eup %7832  ;;  %v3448_v34 = vpop.xlane.xlu1 %3447 }
 0x54b   : > { %3505 = vadd.xlane.f32.xlu0 %v10107_v6  ;;  %3573 = vadd.xlane.f32.xlu1 %v10111_v49  ;;  %v11815_v49 = vld [vmem:[#allocation84_spill] sm:$0xff]  ;;  %11818 = vst [vmem:[#allocation114_spill] sm:$0xff] %v10138_v51 }
 0x54c   : > { %v10115_v13 = vpop.xlane.xlu0 %2985  ;;  %v3129_v25 = vsub.f32 %v11815_v49, %v2942_v62 }
 0x54e   : > { %v3325_v29 = vmul.f32 1.442695, %v3129_v25 }
 0x54f   : > { %3501 = vadd.xlane.f32.xlu0 %v10117_v16  ;;  %3609 = vadd.xlane.f32.xlu1 %v10120_v33  ;;  %v3147_v33 = vsub.f32 %v11817_v19, %v2978_v2  ;;  %v11821_v2 = vld [vmem:[#allocation86_spill] sm:$0xff] }
 0x550   : > { %v10124_v35 = vpop.xlane.xlu0 %2981  ;;  %7842 = vpow2.f32 %v3325_v29  ;;  %v3132_v1 = vsub.f32 %v11821_v2, %v10050_v28  ;;  %v11824_v29 = vld [vmem:[#allocation88_spill] sm:$0xff] }
 0x551   : > { %v10144_v62 = vpop.eup %7834  ;;  %v3361_v59 = vmul.f32 1.442695, %v3147_v33 }
 0x552   : > { %v10147_v46 = vpop.eup %7836  ;;  %v3331_v33 = vmul.f32 1.442695, %v3132_v1  ;;  %v10173_v1 = vpop.xlane.xlu1 %3489 }
 0x553   : > { %3471 = vadd.xlane.f32.xlu0 %v10126_v52  ;;  %3605 = vadd.xlane.f32.xlu1 %v10129_v55  ;;  %v11819_v55 = vld [vmem:[#allocation87_spill] sm:$0xff]  ;;  %11820 = vst [vmem:[#allocation54_spill] sm:$0xff] %v10147_v46  ;;  %7844 = vpow2.f32 %v3361_v59  ;;  %v11828_v59 = vld [vmem:[#allocation89_spill] sm:$0xff] }
 0x554   : > { %v10133_v20 = vpop.xlane.xlu0 %2955  ;;  %v3145_v63 = vsub.f32 %v11819_v55, %v2974_v23  ;;  %v3130_v23 = vsub.f32 %v11824_v29, %v10061_v48  ;;  %v3148_v2 = vsub.f32 %v11828_v59, %v10072_v9  ;;  %v11831_v29 = vld [vmem:[#allocation90_spill] sm:$0xff] }
 0x556   : > { %v3357_v19 = vmul.f32 1.442695, %v3145_v63  ;;  %v3327_v28 = vmul.f32 1.442695, %v3130_v23  ;;  %v10183_v23 = vpop.xlane.xlu1 %3465 }
 0x557   : > { %3507 = vadd.xlane.f32.xlu0 %v10135_v57  ;;  %3579 = vadd.xlane.f32.xlu1 %v10138_v51  ;;  %v10155_v51 = vpop.eup %7838 }
 0x558   : > { %v10142_v49 = vpop.xlane.xlu0 %2951  ;;  %11822 = vst [vmem:[#allocation79_spill] sm:$0xff] %v10155_v51  ;;  %7846 = vpow2.f32 %v3357_v19  ;;  %v3363_v19 = vmul.f32 1.442695, %v3148_v2 }
 0x559   : > { %7848 = vpow2.f32 %v3331_v33 }
 0x55a   : > { %7850 = vpow2.f32 %v3327_v28 }
 0x55b   : > { %3503 = vadd.xlane.f32.xlu0 %v10144_v62  ;;  %3575 = vadd.xlane.f32.xlu1 %v10147_v46  ;;  %v10163_v46 = vpop.eup %7840  ;;  %7852 = vpow2.f32 %v3363_v19 }
 0x55c   : > { %v10151_v25 = vpop.xlane.xlu0 %2987  ;;  %11825 = vst [vmem:[#allocation49_spill] sm:$0xff] %v10163_v46 }
 0x55f   : > { %3001 = vmax.xlane.f32.xlu0 %v11823_v39  ;;  %3611 = vadd.xlane.f32.xlu1 %v10155_v51  ;;  %v10171_v51 = vpop.eup %7842 }
 0x560   : > { %v10159_v55 = vpop.xlane.xlu0 %2983  ;;  %11829 = vst [vmem:[#allocation120_spill] sm:$0xff] %v10171_v51  ;;  %v10181_v33 = vpop.eup %7844 }
 0x561   : > { %11832 = vst [vmem:[#allocation80_spill] sm:$0xff] %v10181_v33 }
 0x563   : > { %2997 = vmax.xlane.f32.xlu0 %v11826_v31  ;;  %3585 = vadd.xlane.f32.xlu1 %v10163_v46  ;;  %v3146_v31 = vsub.f32 %v11831_v29, %v10083_v56  ;;  %v10195_v56 = vpop.xlane.xlu1 %3461 }
 0x564   : > { %v10167_v63 = vpop.xlane.xlu0 %2961 }
 0x565   : > { %11827 = vst [vmem:[#allocation45_spill] sm:$0xff] %v10167_v63  ;;  %v3359_v59 = vmul.f32 1.442695, %v3146_v31  ;;  %v10191_v28 = vpop.eup %7846  ;;  %v11889_v63 = vld [vmem:[#allocation53_spill] sm:$0xff] }
 0x566   : > { %11835 = vst [vmem:[#allocation82_spill] sm:$0xff] %v10191_v28  ;;  %v10201_v19 = vpop.eup %7848 }
 0x567   : > { %3033 = vmax.xlane.f32.xlu0 %v9849_v44  ;;  %3581 = vadd.xlane.f32.xlu1 %v10171_v51  ;;  %v11834_v44 = vld [vmem:[#allocation92_spill] sm:$0xff]  ;;  %7854 = vpow2.f32 %v3359_v59  ;;  %11838 = vst [vmem:[#allocation85_spill] sm:$0xff] %v10201_v19  ;;  %v10211_v59 = vpop.xlane.xlu1 %3497 }
 0x568   : > { %v10177_v48 = vpop.xlane.xlu0 %2957  ;;  %v3135_v39 = vsub.f32 %v11834_v44, %v10095_v41  ;;  %v11840_v41 = vld [vmem:[#allocation94_spill] sm:$0xff] }
 0x569   : > { %11830 = vst [vmem:[#allocation57_spill] sm:$0xff] %v10177_v48 }
 0x56a   : > { %v3337_v29 = vmul.f32 1.442695, %v3135_v39 }
 0x56b   : > { %3029 = vmax.xlane.f32.xlu0 %v9858_v60  ;;  %3617 = vadd.xlane.f32.xlu1 %v10181_v33  ;;  %v11837_v60 = vld [vmem:[#allocation93_spill] sm:$0xff] }
 0x56c   : > { %v10187_v9 = vpop.xlane.xlu0 %2993  ;;  %v3133_v33 = vsub.f32 %v11837_v60, %v10105_v18  ;;  %7856 = vpow2.f32 %v3337_v29  ;;  %v11842_v18 = vld [vmem:[#allocation97_spill] sm:$0xff] }
 0x56d   : > { %11833 = vst [vmem:[#allocation81_spill] sm:$0xff] %v10187_v9 }
 0x56e   : > { %v3333_v31 = vmul.f32 1.442695, %v3133_v33 }
 0x56f   : > { %3003 = vmax.xlane.f32.xlu0 %v9851_v4  ;;  %3613 = vadd.xlane.f32.xlu1 %v10191_v28  ;;  %v3151_v4 = vsub.f32 %v11840_v41, %v10115_v13  ;;  %v10209_v28 = vpop.eup %7850  ;;  %v10221_v13 = vpop.xlane.xlu1 %3493  ;;  %v11845_v41 = vld [vmem:[#allocation96_spill] sm:$0xff] }
 0x570   : > { %v10197_v2 = vpop.xlane.xlu0 %2989  ;;  %11841 = vst [vmem:[#allocation86_spill] sm:$0xff] %v10209_v28  ;;  %7858 = vpow2.f32 %v3333_v31 }
 0x571   : > { %11836 = vst [vmem:[#allocation84_spill] sm:$0xff] %v10197_v2  ;;  %v3369_v39 = vmul.f32 1.442695, %v3151_v4  ;;  %v10229_v4 = vpop.f32.mrf.mxu1 }
 0x572   : > { %11847 = vst [vmem:[#allocation92_spill] sm:$0xff] %v10229_v4 }
 0x573   : > { %2999 = vmax.xlane.f32.xlu0 %v9862_v7  ;;  %3587 = vadd.xlane.f32.xlu1 %v10201_v19  ;;  %v3149_v7 = vsub.f32 %v11842_v18, %v10124_v35  ;;  %7860 = vpow2.f32 %v3369_v39  ;;  %v10233_v35 = vpop.xlane.xlu1 %3475  ;;  %v11848_v39 = vld [vmem:[#allocation98_spill] sm:$0xff] }
 0x574   : > { %v10205_v44 = vpop.xlane.xlu0 %2963  ;;  %7862 = vrcp.f32 %v3448_v34 }
 0x575   : > { %11839 = vst [vmem:[#allocation87_spill] sm:$0xff] %v10205_v44  ;;  %v10217_v44 = vpop.eup %7852  ;;  %v3365_v29 = vmul.f32 1.442695, %v3149_v7  ;;  %v3134_v7 = vsub.f32 %v11848_v39, %v10142_v49 }
 0x576   : > { %11843 = vst [vmem:[#allocation88_spill] sm:$0xff] %v10217_v44  ;;  %v10227_v31 = vpop.eup %7854 }
 0x577   : > { %3035 = vmax.xlane.f32.xlu0 %v9872_v47  ;;  %3583 = vadd.xlane.f32.xlu1 %v10209_v28  ;;  %v3136_v47 = vsub.f32 %v11845_v41, %v10133_v20  ;;  %11846 = vst [vmem:[#allocation90_spill] sm:$0xff] %v10227_v31  ;;  %7864 = vpow2.f32 %v3365_v29  ;;  %v10239_v20 = vpop.f32.mrf.mxu1  ;;  %v3335_v34 = vmul.f32 1.442695, %v3134_v7  ;;  %v10251_v49 = vpop.xlane.xlu1 %3009 }
 0x578   : > { %v3450_v60 = vpop.xlane.xlu0 %3449  ;;  %11850 = vst [vmem:[#allocation94_spill] sm:$0xff] %v10239_v20 }
 0x57b   : > { %3031 = vmax.xlane.f32.xlu0 %v9882_v36  ;;  %3619 = vadd.xlane.f32.xlu1 %v10217_v44  ;;  %v3339_v36 = vmul.f32 1.442695, %v3136_v47 }
 0x57c   : > { %v10223_v33 = vpop.xlane.xlu0 %2959 }
 0x57d   : > { %11844 = vst [vmem:[#allocation89_spill] sm:$0xff] %v10223_v33  ;;  %v10237_v33 = vpop.eup %7856 }
 0x57e   : > { %11849 = vst [vmem:[#allocation93_spill] sm:$0xff] %v10237_v33  ;;  %v10247_v47 = vpop.eup %7858 }
 0x57f   : > { %3011 = vmax.xlane.f32.xlu0 %v10229_v4  ;;  %3615 = vadd.xlane.f32.xlu1 %v10227_v31  ;;  %v11852_v4 = vld [vmem:[#allocation101_spill] sm:$0xff]  ;;  %11853 = vst [vmem:[#allocation96_spill] sm:$0xff] %v10247_v47  ;;  %v10249_v31 = vpop.f32.mrf.mxu0 }
 0x580   : > { %v3446_v18 = vpop.xlane.xlu0 %3445  ;;  %v3152_v29 = vsub.f32 %v11852_v4, %v10151_v25  ;;  %11854 = vst [vmem:[#allocation98_spill] sm:$0xff] %v10249_v31  ;;  %11855 = vst [vmem:[#allocation101_spill] sm:$0xff] %v10251_v49  ;;  %v10257_v7 = vpop.eup %7860 }
 0x581   : > { %7866 = vrcp.f32 %v3446_v18  ;;  %v10263_v25 = vpop.xlane.xlu1 %3005  ;;  %v7863_v49 = vpop.eup %7862 }
 0x582   : > { %7868 = vpow2.f32 %v3339_v36  ;;  %v3371_v39 = vmul.f32 1.442695, %v3152_v29  ;;  %11859 = vst [vmem:[#allocation150_spill] sm:$0xff] %v10263_v25  ;;  %v10269_v29 = vpop.f32.mrf.mxu1 }
 0x583   : > { %3007 = vmax.xlane.f32.xlu0 %v10239_v20  ;;  %3593 = vadd.xlane.f32.xlu1 %v10237_v33  ;;  %7870 = vpow2.f32 %v3335_v34  ;;  %v11856_v20 = vld [vmem:[#allocation105_spill] sm:$0xff]  ;;  %v10259_v33 = vpop.f32.mrf.mxu0  ;;  %11862 = vst [vmem:[#allocation153_spill] sm:$0xff] %v10269_v29 }
 0x584   : > { %v10243_v41 = vpop.xlane.xlu0 %2995  ;;  %v3150_v36 = vsub.f32 %v11856_v20, %v10159_v55  ;;  %11857 = vst [vmem:[#allocation105_spill] sm:$0xff] %v10257_v7  ;;  %11858 = vst [vmem:[#allocation149_spill] sm:$0xff] %v10259_v33  ;;  %7872 = vpow2.f32 %v3371_v39  ;;  %v10267_v34 = vpop.eup %7864 }
 0x585   : > { %11851 = vst [vmem:[#allocation97_spill] sm:$0xff] %v10243_v41  ;;  %11861 = vst [vmem:[#allocation152_spill] sm:$0xff] %v10267_v34  ;;  %v10279_v39 = vpop.xlane.xlu1 %3041 }
 0x586   : > { %11866 = vst [vmem:[#allocation155_spill] sm:$0xff] %v10279_v39  ;;  %v11878_v39 = vld [vmem:[#allocation73_spill] sm:$0xff] }
 0x587   : > { %3589 = vadd.xlane.f32.xlu1 %v10247_v47  ;;  %3043 = vmax.xlane.f32.xlu0 %v10249_v31  ;;  %v3367_v31 = vmul.f32 1.442695, %v3150_v36 }
 0x588   : > { %v3482_v18 = vpop.xlane.xlu0 %3481 }
 0x589   : > { %7874 = vpow2.f32 %v3367_v31 }
 0x58a   : > { %7876 = vrcp.f32 %v3450_v60 }
 0x58b   : > { %3625 = vadd.xlane.f32.xlu1 %v10257_v7  ;;  %3039 = vmax.xlane.f32.xlu0 %v10259_v33  ;;  %v11863_v7 = vld [vmem:[#allocation91_spill] sm:$0xff] }
 0x58c   : > { %v10265_v4 = vpop.xlane.xlu0 %2991  ;;  %v3958_v25 = vmul.f32 %v7863_v49, %v11863_v7  ;;  %v10289_v49 = vpop.xlane.xlu1 %3037 }
 0x58d   : > { %11860 = vst [vmem:[#allocation151_spill] sm:$0xff] %v10265_v4  ;;  %v10277_v4 = vpop.f32.mrf.mxu1  ;;  %11869 = vst [vmem:[#allocation158_spill] sm:$0xff] %v10289_v49 }
 0x58e   : > { %v7867_v55 = vpop.eup %7866  ;;  %11865 = vst [vmem:[#allocation154_spill] sm:$0xff] %v10277_v4 }
 0x58f   : > { %3621 = vadd.xlane.f32.xlu1 %v10267_v34  ;;  %3017 = vmax.xlane.f32.xlu0 %v10269_v29  ;;  %v3957_v33 = vmul.f32 %v7867_v55, %v9906_v54  ;;  %v10275_v47 = vpop.eup %7868  ;;  %v10285_v54 = vpop.f32.mrf.mxu0  ;;  %v7536_v34 = vunpack.i.l.bf16 %v11878_v39 }
 0x590   : > { %v3478_v20 = vpop.xlane.xlu0 %3477  ;;  %11864 = vst [vmem:[#allocation91_spill] sm:$0xff] %v10275_v47  ;;  %v10283_v31 = vpop.eup %7870  ;;  %11868 = vst [vmem:[#allocation157_spill] sm:$0xff] %v10285_v54 }
 0x591   : > { %v4085_v36 = vpack.c.bf16 %v3958_v25, %v3957_v33  ;;  %11867 = vst [vmem:[#allocation156_spill] sm:$0xff] %v10283_v31  ;;  %v10291_v60 = vpop.eup %7872  ;;  %v10293_v33 = vpop.f32.mrf.mxu0 }
 0x592   : > { %11870 = vst [vmem:[#allocation159_spill] sm:$0xff] %v10291_v60  ;;  %11871 = vst [vmem:[#allocation160_spill] sm:$0xff] %v10293_v33 }
 0x593   : > { %3595 = vadd.xlane.f32.xlu1 %v10275_v47  ;;  %3013 = vmax.xlane.f32.xlu0 %v10277_v4 }
 0x594   : > { %v3452_v29 = vpop.xlane.xlu0 %3451  ;;  %6311 = vmatprep.mubr.bf16.mxu1 %v4085_v36  ;;  %v10301_v36 = vpop.f32.mrf.mxu1 }
 0x595   : > { %7878 = vrcp.f32 %v3452_v29  ;;  %11874 = vst [vmem:[#allocation163_spill] sm:$0xff] %v10301_v36 }
 0x596   : > { %v10299_v55 = vpop.eup %7874  ;;  %v10307_v49 = vpop.f32.mrf.mxu1 }
 0x597   : > { %3591 = vadd.xlane.f32.xlu1 %v10283_v31  ;;  %3049 = vmax.xlane.f32.xlu0 %v10285_v54  ;;  %11873 = vst [vmem:[#allocation162_spill] sm:$0xff] %v10299_v55  ;;  %v7877_v54 = vpop.eup %7876  ;;  %11876 = vst [vmem:[#allocation165_spill] sm:$0xff] %v10307_v49  ;;  %v10316_v31 = vpop.f32.mrf.mxu0 }
 0x598   : > { %v3484_v7 = vpop.xlane.xlu0 %3483  ;;  %v10297_v25 = vpop.xlane.xlu1 %3555  ;;  %11880 = vst [vmem:[#allocation73_spill] sm:$0xff] %v10316_v31 }
 0x599   : > { %7880 = vrcp.f32 %v3484_v7  ;;  %11872 = vst [vmem:[#allocation161_spill] sm:$0xff] %v10297_v25  ;;  %v11877_v25 = vld [vmem:[#allocation70_spill] sm:$0xff] }
 0x59a   : > { %7882 = vrcp.f32 %v3478_v20  ;;  %v7544_v46 = vunpack.i.h.bf16 %v11877_v25 }
 0x59b   : > { %3627 = vadd.xlane.f32.xlu1 %v10291_v60  ;;  %3045 = vmax.xlane.f32.xlu0 %v10293_v33  ;;  %7884 = vrcp.f32 %v3482_v18  ;;  %v3959_v18 = vmul.f32 %v7877_v54, %v9884_v5  ;;  %v7541_v33 = vunpack.i.l.bf16 %v11877_v25  ;;  %v11882_v5 = vld [vmem:[#allocation74_spill] sm:$0xff] }
 0x59c   : > { %v3480_v29 = vpop.xlane.xlu0 %3479  ;;  %v7526_v54 = vunpack.i.l.bf16 %v11882_v5 }
 0x59d   : > { %7886 = vrcp.f32 %v3480_v29  ;;  %v1602_v47 = vpack.c.bf16 %v7541_v33, %v7536_v34 }
 0x59f   : > { %3623 = vadd.xlane.f32.xlu1 %v10299_v55  ;;  %3019 = vmax.xlane.f32.xlu0 %v10301_v36 }
 0x5a0   : > { %v3458_v7 = vpop.xlane.xlu0 %3457  ;;  %v10305_v20 = vpop.xlane.xlu1 %3531 }
 0x5a1   : > { %11875 = vst [vmem:[#allocation164_spill] sm:$0xff] %v10305_v20 }
 0x5a2   : > { %v7879_v4 = vpop.eup %7878 }
 0x5a3   : > { %3015 = vmax.xlane.f32.xlu0 %v10307_v49  ;;  %v3960_v29 = vmul.f32 %v7879_v4, %v9947_v40  ;;  %v11881_v49 = vld [vmem:[#allocation39_spill] sm:$0xff]  ;;  %v11883_v4 = vld [vmem:[#allocation56_spill] sm:$0xff] }
 0x5a4   : > { %v3454_v55 = vpop.xlane.xlu0 %3453  ;;  %v10314_v60 = vpop.xlane.xlu1 %3527  ;;  %v7531_v41 = vunpack.i.l.bf16 %v11881_v49 }
 0x5a5   : > { %11879 = vst [vmem:[#allocation70_spill] sm:$0xff] %v10314_v60  ;;  %v4086_v36 = vpack.c.bf16 %v3960_v29, %v3959_v18  ;;  %v10324_v29 = vpop.f32.mrf.mxu0  ;;  %v11886_v60 = vld [vmem:[#allocation42_spill] sm:$0xff]  ;;  %7888 = vrcp.f32 %v3454_v55 }
 0x5a6   : > { %v7881_v20 = vpop.eup %7880  ;;  %11885 = vst [vmem:[#allocation74_spill] sm:$0xff] %v10324_v29  ;;  %v1601_v34 = vpack.c.bf16 %v7531_v41, %v7526_v54  ;;  %v11890_v54 = vld [vmem:[#allocation33_spill] sm:$0xff]  ;;  %v11893_v55 = vld [vmem:[#allocation58_spill] sm:$0xff] }
 0x5a7   : > { %6312 = vmatmul.mubr.bf16.vlgmr.msra.gmra.mxu1 %v4086_v36  ;;  %3051 = vmax.xlane.f32.xlu0 %v10316_v31  ;;  %v7883_v40 = vpop.eup %7882  ;;  %v3976_v36 = vmul.f32 %v7881_v20, %v9954_v12  ;;  %v7521_v31 = vunpack.i.l.bf16 %v11886_v60  ;;  %v7539_v12 = vunpack.i.h.bf16 %v11878_v39  ;;  %v11888_v20 = vld [vmem:[#allocation118_spill] sm:$0xff] }
 0x5a8   : > { %6360 = vmatpush3.bf16.msra.mxu1 %v11883_v4  ;;  %v3486_v2 = vpop.xlane.xlu0 %3485  ;;  %v10322_v44 = vpop.xlane.xlu1 %3563  ;;  %v3973_v33 = vmul.f32 %v7883_v40, %v9939_v14  ;;  %v11887_v4 = vld [vmem:[#allocation37_spill] sm:$0xff]  ;;  %v7534_v40 = vunpack.i.h.bf16 %v11881_v49 }
 0x5a9   : > { %11884 = vst [vmem:[#allocation39_spill] sm:$0xff] %v10322_v44  ;;  %v7885_v9 = vpop.eup %7884  ;;  %6361 = vmatprep.subr.bf16.mxu1 %v1602_v47  ;;  %v7516_v51 = vunpack.i.l.bf16 %v11887_v4  ;;  %v10339_v14 = vpop.f32.mrf.mxu1 }
 0x5aa   : > { %v7887_v18 = vpop.eup %7886  ;;  %v3975_v19 = vmul.f32 %v7885_v9, %v9924_v30  ;;  %v7511_v30 = vunpack.i.l.bf16 %v11890_v54  ;;  %v11891_v9 = vld [vmem:[#allocation76_spill] sm:$0xff] }
 0x5ab   : > { %3047 = vmax.xlane.f32.xlu0 %v10324_v29  ;;  %v3974_v28 = vmul.f32 %v7887_v18, %v9965_v58  ;;  %v3095_v29 = vsub.f32 %v11889_v63, %v11888_v20  ;;  %v7506_v25 = vunpack.i.l.bf16 %v11891_v9 }
 0x5ac   : > { %6362 = vmatpush3.bf16.msra.mxu1 %v1602_v47  ;;  %v3460_v44 = vpop.xlane.xlu0 %3459  ;;  %v10332_v48 = vpop.xlane.xlu1 %3559  ;;  %v4094_v58 = vpack.c.bf16 %v3976_v36, %v3975_v19  ;;  %v1600_v47 = vpack.c.bf16 %v7521_v31, %v7516_v51  ;;  %v7529_v19 = vunpack.i.h.bf16 %v11882_v5  ;;  %v11895_v36 = vld [vmem:[#allocation25_spill] sm:$0xff] }
 0x5ad   : > { %6363 = vmatprep.subr.bf16.mxu1 %v1601_v34  ;;  %v4093_v41 = vpack.c.bf16 %v3974_v28, %v3973_v33  ;;  %7890 = vrcp.f32 %v3460_v44  ;;  %v1610_v28 = vpack.c.bf16 %v7544_v46, %v7539_v12  ;;  %v3257_v44 = vmul.f32 1.442695, %v3095_v29  ;;  %v10349_v51 = vpop.f32.mrf.mxu1  ;;  %v11897_v12 = vld [vmem:[#allocation59_spill] sm:$0xff] }
 0x5ae   : > { %7892 = vrcp.f32 %v3458_v7  ;;  %v1599_v31 = vpack.c.bf16 %v7511_v30, %v7506_v25  ;;  %v11894_v7 = vld [vmem:[#allocation29_spill] sm:$0xff]  ;;  %v1609_v5 = vpack.c.bf16 %v7534_v40, %v7529_v19  ;;  %v7524_v29 = vunpack.i.h.bf16 %v11886_v60  ;;  %v11899_v25 = vld [vmem:[#allocation19_spill] sm:$0xff] }
 0x5af   : > { %6343 = vmatprep.mubr.bf16.mxu0 %v4093_v41  ;;  %3025 = vmax.xlane.f32.xlu0 %v10339_v14  ;;  %v7501_v18 = vunpack.i.l.bf16 %v11894_v7  ;;  %v7519_v33 = vunpack.i.h.bf16 %v11887_v4  ;;  %v3093_v20 = vsub.f32 %v11897_v12, %v9853_v45  ;;  %v10360_v41 = vpop.f32.mrf.mxu0  ;;  %v7486_v60 = vunpack.i.l.bf16 %v11899_v25 }
 0x5b0   : > { %6364 = vmatpush3.bf16.msra.mxu1 %v1601_v34  ;;  %6344 = vmatmul.mubr.bf16.vlgmr.msra.gmra.mxu0 %v4094_v58  ;;  %v3456_v39 = vpop.xlane.xlu0 %3455  ;;  %v10344_v63 = vpop.xlane.xlu1 %3537  ;;  %v7496_v34 = vunpack.i.l.bf16 %v11895_v36  ;;  %v7509_v40 = vunpack.i.h.bf16 %v11891_v9 }
 0x5b1   : > { %11892 = vst [vmem:[#allocation56_spill] sm:$0xff] %v10344_v63  ;;  %6365 = vmatprep.subr.bf16.mxu1 %v1600_v47  ;;  %6392 = vmatpush3.bf16.msra.mxu0 %v11893_v55  ;;  %7894 = vrcp.f32 %v3456_v39  ;;  %v1608_v45 = vpack.c.bf16 %v7524_v29, %v7519_v33  ;;  %v3253_v19 = vmul.f32 1.442695, %v3093_v20  ;;  %v7499_v33 = vunpack.i.h.bf16 %v11895_v36  ;;  %v11903_v20 = vld [vmem:[#allocation127_spill] sm:$0xff] }
 0x5b2   : > { %6393 = vmatprep.subr.bf16.mxu0 %v1610_v28  ;;  %7896 = vpow2.f32 %v3257_v44  ;;  %v1598_v58 = vpack.c.bf16 %v7501_v18, %v7496_v34  ;;  %v11901_v44 = vld [vmem:[#allocation47_spill] sm:$0xff] }
 0x5b3   : > { %3021 = vmax.xlane.f32.xlu0 %v10349_v51  ;;  %v7481_v55 = vunpack.i.l.bf16 %v11901_v44  ;;  %v11902_v18 = vld [vmem:[#allocation51_spill] sm:$0xff] }
 0x5b4   : > { %6366 = vmatpush3.bf16.msra.mxu1 %v1600_v47  ;;  %v3492_v46 = vpop.xlane.xlu0 %3491  ;;  %v10354_v49 = vpop.xlane.xlu1 %3533  ;;  %v11898_v47 = vld [vmem:[#allocation21_spill] sm:$0xff] }
 0x5b5   : > { %11896 = vst [vmem:[#allocation42_spill] sm:$0xff] %v10354_v49  ;;  %6367 = vmatprep.subr.bf16.mxu1 %v1599_v31  ;;  %6394 = vmatpush3.bf16.msra.mxu0 %v1610_v28  ;;  %7898 = vrcp.f32 %v3492_v46  ;;  %v7491_v30 = vunpack.i.l.bf16 %v11898_v47  ;;  %v7514_v28 = vunpack.i.h.bf16 %v11890_v54  ;;  %v10381_v49 = vpop.f32.mrf.mxu1 }
 0x5b6   : > { %6395 = vmatprep.subr.bf16.mxu0 %v1609_v5  ;;  %7900 = vrcp.f32 %v3486_v2  ;;  %v10370_v2 = vpop.f32.mrf.mxu0 }
 0x5b7   : > { %3057 = vmax.xlane.f32.xlu0 %v10360_v41  ;;  %7902 = vrcp.f32 %v10173_v1  ;;  %v7476_v1 = vunpack.i.l.bf16 %v11902_v18  ;;  %v1597_v34 = vpack.c.bf16 %v7491_v30, %v7486_v60  ;;  %v1607_v9 = vpack.c.bf16 %v7514_v28, %v7509_v40  ;;  %v11905_v30 = vld [vmem:[#allocation68_spill] sm:$0xff]  ;;  %v11906_v28 = vld [vmem:[#allocation71_spill] sm:$0xff] }
 0x5b8   : > { %6368 = vmatpush3.bf16.msra.mxu1 %v1599_v31  ;;  %v3488_v4 = vpop.xlane.xlu0 %3487  ;;  %v10366_v39 = vpop.xlane.xlu1 %3569  ;;  %v7633_v60 = vunpack.i.l.bf16 %v11905_v30  ;;  %v7628_v40 = vunpack.i.l.bf16 %v11906_v28 }
 0x5b9   : > { %11900 = vst [vmem:[#allocation37_spill] sm:$0xff] %v10366_v39  ;;  %6369 = vmatprep.subr.bf16.mxu1 %v1598_v58  ;;  %6396 = vmatpush3.bf16.msra.mxu0 %v1609_v5  ;;  %7904 = vrcp.f32 %v3488_v4  ;;  %v7889_v31 = vpop.eup %7888  ;;  %v7504_v5 = vunpack.i.h.bf16 %v11894_v7  ;;  %v11904_v4 = vld [vmem:[#allocation60_spill] sm:$0xff] }
 0x5ba   : > { %6397 = vmatprep.subr.bf16.mxu0 %v1608_v45  ;;  %v7891_v46 = vpop.eup %7890  ;;  %7906 = vpow2.f32 %v3253_v19  ;;  %v3111_v39 = vsub.f32 %v11904_v4, %v11903_v20  ;;  %v3961_v7 = vmul.f32 %v7889_v31, %v9979_v50  ;;  %v7489_v20 = vunpack.i.h.bf16 %v11899_v25  ;;  %v11909_v4 = vld [vmem:[#allocation63_spill] sm:$0xff] }
 0x5bb   : > { %3053 = vmax.xlane.f32.xlu0 %v10370_v2  ;;  %v7893_v12 = vpop.eup %7892  ;;  %v10401_v25 = vpack.c.bf16 %v7633_v60, %v7628_v40  ;;  %v10410_v60 = vpop.f32.mrf.mxu1 }
 0x5bc   : > { %6370 = vmatpush3.bf16.msra.mxu1 %v1598_v58  ;;  %v3468_v54 = vpop.xlane.xlu0 %3467  ;;  %v10375_v29 = vpop.xlane.xlu1 %3565  ;;  %v1596_v58 = vpack.c.bf16 %v7481_v55, %v7476_v1  ;;  %v1606_v55 = vpack.c.bf16 %v7504_v5, %v7499_v33  ;;  %v7494_v1 = vunpack.i.h.bf16 %v11898_v47  ;;  %v7479_v5 = vunpack.i.h.bf16 %v11902_v18 }
 0x5bd   : > { %6371 = vmatprep.subr.bf16.mxu1 %v1597_v34  ;;  %6398 = vmatpush3.bf16.msra.mxu0 %v1608_v45  ;;  %7908 = vrcp.f32 %v3468_v54  ;;  %v3964_v45 = vmul.f32 %v7891_v46, %v9997_v53  ;;  %v11907_v53 = vld [vmem:[#allocation78_spill] sm:$0xff] }
 0x5be   : > { %v7895_v63 = vpop.eup %7894  ;;  %6399 = vmatprep.subr.bf16.mxu0 %v1607_v9  ;;  %7910 = vrcp.f32 %v10195_v56  ;;  %v3289_v56 = vmul.f32 1.442695, %v3111_v39 }
 0x5bf   : > { %3027 = vmax.xlane.f32.xlu0 %v10381_v49  ;;  %v3962_v36 = vmul.f32 %v7895_v63, %v10008_v26  ;;  %7912 = vrcp.f32 %v10183_v23  ;;  %v3963_v26 = vmul.f32 %v7893_v12, %v9970_v10  ;;  %v10396_v63 = vpop.eup %7896  ;;  %v1299_v23 = vcombine.high %v11907_v53, %v11907_v53  ;;  %v11908_v12 = vld [vmem:[#allocation131_spill] sm:$0xff] }
 0x5c0   : > { %6372 = vmatpush3.bf16.msra.mxu1 %v1597_v34  ;;  %v3464_v19 = vpop.xlane.xlu0 %3463  ;;  %v10391_v54 = vpop.xlane.xlu1 %3539  ;;  %v7484_v10 = vunpack.i.h.bf16 %v11901_v44 }
 0x5c1   : > { %6373 = vmatprep.subr.bf16.mxu1 %v1596_v58  ;;  %6400 = vmatpush3.bf16.msra.mxu0 %v1607_v9  ;;  %7914 = vrcp.f32 %v3464_v19  ;;  %v4087_v50 = vpack.c.bf16 %v3962_v36, %v3961_v7  ;;  %v4088_v47 = vpack.c.bf16 %v3964_v45, %v3963_v26  ;;  %v1605_v9 = vpack.c.bf16 %v7494_v1, %v7489_v20  ;;  %v11910_v45 = vld [vmem:[#allocation14_spill] sm:$0xff]  ;;  %v11913_v26 = vld [vmem:[#allocation123_spill] sm:$0xff] }
 0x5c2   : > { %6401 = vmatprep.subr.bf16.mxu0 %v1606_v55  ;;  %v7899_v31 = vpop.eup %7898  ;;  %7916 = vpow2.f32 %v3289_v56  ;;  %v3109_v7 = vsub.f32 %v11909_v4, %v11908_v12  ;;  %v7636_v19 = vunpack.i.h.bf16 %v11905_v30  ;;  %v1604_v20 = vpack.c.bf16 %v7484_v10, %v7479_v5  ;;  %v11912_v56 = vld [vmem:[#allocation95_spill] sm:$0xff]  ;;  %v11915_v5 = vld [vmem:[#allocation128_spill] sm:$0xff] }
 0x5c3   : > { %6315 = vmatprep.mubr.bf16.mxu1 %v4087_v50  ;;  %3513 = vadd.xlane.f32.xlu0 %v10396_v63  ;;  %v7901_v34 = vpop.eup %7900  ;;  %v3980_v44 = vmul.f32 %v7899_v31, %v10019_v24  ;;  %v7631_v24 = vunpack.i.h.bf16 %v11906_v28 }
 0x5c4   : > { %6374 = vmatpush3.bf16.msra.mxu1 %v1596_v58  ;;  %v3500_v39 = vpop.xlane.xlu0 %3499  ;;  %v10403_v46 = vpop.xlane.xlu1 %3535  ;;  %v1313_v58 = vrot.slane %v1299_v23, %v11910_v45  ;;  %v3977_v18 = vmul.f32 %v7901_v34, %v9988_v61  ;;  %v3285_v23 = vmul.f32 1.442695, %v3109_v7  ;;  %v11959_v45 = vld [vmem:[#allocation57_spill] sm:$0xff] }
 0x5c5   : > { %v7903_v33 = vpop.eup %7902  ;;  %6316 = vmatmul.mubr.bf16.gmra.mxu1 %v4088_v47  ;;  %6402 = vmatpush3.bf16.msra.mxu0 %v1606_v55  ;;  %7918 = vrcp.f32 %v3500_v39  ;;  %v10431_v39 = vpack.c.bf16 %v7636_v19, %v7631_v24  ;;  %v10435_v7 = vpop.f32.mrf.mxu0 }
 0x5c6   : > { %v7905_v36 = vpop.eup %7904  ;;  %6423 = vmatprep.subr.bf16.mxu1 %v10401_v25  ;;  %6403 = vmatprep.subr.bf16.mxu0 %v1605_v9  ;;  %7920 = vrcp.f32 %v10221_v13  ;;  %v3979_v50 = vmul.f32 %v7903_v33, %v11912_v56  ;;  %v11914_v13 = vld [vmem:[#allocation61_spill] sm:$0xff]  ;;  %v1315_v47 = vcombine.high %v1313_v58, %v1313_v58  ;;  %v11916_v33 = vld [vmem:[#allocation62_spill] sm:$0xff] }
 0x5c7   : > { %3023 = vmax.xlane.f32.xlu0 %v10410_v60  ;;  %v3978_v40 = vmul.f32 %v7905_v36, %v10030_v11  ;;  %7922 = vrcp.f32 %v10211_v59  ;;  %v3096_v53 = vsub.f32 %v11914_v13, %v11913_v26  ;;  %v10426_v11 = vpop.eup %7906  ;;  %v3094_v12 = vsub.f32 %v11916_v33, %v11915_v5  ;;  %v11919_v56 = vld [vmem:[#allocation65_spill] sm:$0xff] }
 0x5c8   : > { %v3496_v55 = vpop.xlane.xlu0 %3495  ;;  %v10420_v1 = vpop.xlane.xlu1 %3571  ;;  %v4096_v30 = vpack.c.bf16 %v3980_v44, %v3979_v50  ;;  %v11917_v44 = vld [vmem:[#allocation104_spill] sm:$0xff]  ;;  %v7637_v19 = vpack.i.bf16 %v1315_v47, %v1313_v58 }
 0x5c9   : > { %11911 = vst [vmem:[#allocation118_spill] sm:$0xff] %v10420_v1  ;;  %6404 = vmatpush3.bf16.msra.mxu0 %v1605_v9  ;;  %7924 = vrcp.f32 %v3496_v55  ;;  %v4095_v61 = vpack.c.bf16 %v3978_v40, %v3977_v18  ;;  %v3259_v9 = vmul.f32 1.442695, %v3096_v53  ;;  %v11918_v55 = vld [vmem:[#allocation132_spill] sm:$0xff]  ;;  %v3255_v53 = vmul.f32 1.442695, %v3094_v12 }
 0x5ca   : > { %6405 = vmatprep.subr.bf16.mxu0 %v1604_v20  ;;  %v7909_v59 = vpop.eup %7908  ;;  %7926 = vpow2.f32 %v3285_v23  ;;  %v3112_v50 = vsub.f32 %v11919_v56, %v11918_v55  ;;  %v11922_v23 = vld [vmem:[#allocation136_spill] sm:$0xff] }
 0x5cb   : > { %6347 = vmatprep.mubr.bf16.mxu0 %v4095_v61  ;;  %3509 = vadd.xlane.f32.xlu0 %v10426_v11  ;;  %v7911_v31 = vpop.eup %7910  ;;  %v3968_v36 = vmul.f32 %v7909_v59, %v10041_v38  ;;  %7928 = vpow2.f32 %v3259_v9  ;;  %v11923_v61 = vld [vmem:[#allocation17_spill] sm:$0xff]  ;;  %v11927_v55 = vld [vmem:[#allocation64_spill] sm:$0xff] }
 0x5cc   : > { %6348 = vmatmul.mubr.bf16.gmra.mxu0 %v4096_v30  ;;  %v3474_v34 = vpop.xlane.xlu0 %3473  ;;  %v10429_v28 = vpop.xlane.xlu1 %3567  ;;  %v3965_v18 = vmul.f32 %v7911_v31, %v11917_v44  ;;  %v3110_v38 = vsub.f32 %v11923_v61, %v11922_v23  ;;  %v3291_v47 = vmul.f32 1.442695, %v3112_v50  ;;  %7930 = vpow2.f32 %v3255_v53  ;;  %v11930_v23 = vld [vmem:[#allocation18_spill] sm:$0xff] }
 0x5cd   : > { %v7913_v10 = vpop.eup %7912  ;;  %6406 = vmatpush3.bf16.msra.mxu0 %v1604_v20  ;;  %v11921_v20 = vld [vmem:[#allocation100_spill] sm:$0xff]  ;;  %v3097_v61 = vsub.f32 %v11930_v23, %v9898_v8  ;;  %v11938_v23 = vld [vmem:[#allocation138_spill] sm:$0xff] }
 0x5ce   : > { %v7915_v4 = vpop.eup %7914  ;;  %6455 = vmatprep.subr.bf16.mxu0 %v10431_v39  ;;  %v3967_v13 = vmul.f32 %v7913_v10, %v11921_v20  ;;  %v3287_v9 = vmul.f32 1.442695, %v3110_v38  ;;  %7932 = vpow2.f32 %v3291_v47 }
 0x5cf   : > { %3059 = vmax.xlane.f32.xlu0 %v10435_v7  ;;  %v3966_v40 = vmul.f32 %v7915_v4, %v10052_v32  ;;  %v10449_v59 = vpop.eup %7916  ;;  %v10454_v4 = vpop.f32.mrf.mxu0 }
 0x5d0   : > { %v3470_v24 = vpop.xlane.xlu0 %3469  ;;  %v10444_v26 = vpop.xlane.xlu1 %3577  ;;  %v4090_v31 = vpack.c.bf16 %v3968_v36, %v3967_v13  ;;  %v11925_v36 = vld [vmem:[#allocation111_spill] sm:$0xff]  ;;  %7934 = vpow2.f32 %v3287_v9 }
 0x5d1   : > { %11920 = vst [vmem:[#allocation53_spill] sm:$0xff] %v10444_v26  ;;  %v4089_v30 = vpack.c.bf16 %v3966_v40, %v3965_v18  ;;  %v11929_v13 = vld [vmem:[#allocation107_spill] sm:$0xff]  ;;  %7936 = vrcp.f32 %v3474_v34  ;;  %v11967_v26 = vld [vmem:[#allocation108_spill] sm:$0xff] }
 0x5d2   : > { %7638 = vxpose.xlu1.b32.start.end [1/1] (short) %v7637_v19, 128  ;;  %v7919_v32 = vpop.eup %7918  ;;  %v11926_v19 = vld [vmem:[#allocation135_spill] sm:$0xff]  ;;  %7938 = vrcp.f32 %v3470_v24  ;;  %v11933_v24 = vld [vmem:[#allocation140_spill] sm:$0xff] }
 0x5d3   : > { %6319 = vmatprep.mubr.bf16.mxu1 %v4089_v30  ;;  %3545 = vadd.xlane.f32.xlu0 %v10449_v59  ;;  %v7921_v58 = vpop.eup %7920  ;;  %v3984_v44 = vmul.f32 %v7919_v32, %v10063_v21  ;;  %v3099_v56 = vsub.f32 %v11927_v55, %v11926_v19  ;;  %7940 = vrcp.f32 %v10233_v35 }
 0x5d4   : > { %6320 = vmatmul.mubr.bf16.gmra.mxu1 %v4090_v31  ;;  %v3506_v5 = vpop.xlane.xlu0 %3505  ;;  %v10452_v33 = vpop.xlane.xlu1 %3573  ;;  %v3981_v18 = vmul.f32 %v7921_v58, %v11925_v36  ;;  %v3261_v58 = vmul.f32 1.442695, %v3097_v61  ;;  %v11939_v61 = vld [vmem:[#allocation16_spill] sm:$0xff] }
 0x5d5   : > { %11924 = vst [vmem:[#allocation33_spill] sm:$0xff] %v10452_v33  ;;  %v7923_v10 = vpop.eup %7922 }
 0x5d6   : > { %v7925_v12 = vpop.eup %7924  ;;  %v3983_v53 = vmul.f32 %v7923_v10, %v11929_v13  ;;  %v11934_v10 = vld [vmem:[#allocation15_spill] sm:$0xff] }
 0x5d7   : > { %3055 = vmax.xlane.f32.xlu0 %v10454_v4  ;;  %v3982_v40 = vmul.f32 %v7925_v12, %v10074_v17  ;;  %v10467_v38 = vpop.eup %7926  ;;  %v3265_v17 = vmul.f32 1.442695, %v3099_v56  ;;  %v3115_v9 = vsub.f32 %v11934_v10, %v11933_v24  ;;  %v11940_v10 = vld [vmem:[#allocation125_spill] sm:$0xff] }
 0x5d8   : > { %v3502_v50 = vpop.xlane.xlu0 %3501  ;;  %v10462_v20 = vpop.xlane.xlu1 %3609  ;;  %v4098_v30 = vpack.c.bf16 %v3984_v44, %v3983_v53 }
 0x5d9   : > { %11928 = vst [vmem:[#allocation76_spill] sm:$0xff] %v10462_v20  ;;  %v4097_v21 = vpack.c.bf16 %v3982_v40, %v3981_v18  ;;  %v10473_v47 = vpop.eup %7928  ;;  %v3297_v18 = vmul.f32 1.442695, %v3115_v9  ;;  %v11936_v40 = vld [vmem:[#allocation23_spill] sm:$0xff] }
 0x5da   : > { %v10480_v12 = vpop.eup %7930  ;;  %v3113_v19 = vsub.f32 %v11936_v40, %v9918_v37 }
 0x5db   : > { %6351 = vmatprep.mubr.bf16.mxu0 %v4097_v21  ;;  %3541 = vadd.xlane.f32.xlu0 %v10467_v38  ;;  %v10485_v36 = vpop.eup %7932  ;;  %v3100_v21 = vsub.f32 %v11939_v61, %v11938_v23 }
 0x5dc   : > { %6352 = vmatmul.mubr.bf16.gmra.mxu0 %v4098_v30  ;;  %v3472_v31 = vpop.xlane.xlu0 %3471  ;;  %v10471_v32 = vpop.xlane.xlu1 %3605  ;;  %v3293_v30 = vmul.f32 1.442695, %v3113_v19 }
 0x5dd   : > { %11931 = vst [vmem:[#allocation58_spill] sm:$0xff] %v10471_v32  ;;  %7942 = vrcp.f32 %v3472_v31  ;;  %v10489_v55 = vpop.eup %7934  ;;  %v3267_v40 = vmul.f32 1.442695, %v3100_v21 }
 0x5de   : > { %7944 = vpow2.f32 %v3265_v17  ;;  %v7937_v56 = vpop.eup %7936 }
 0x5df   : > { %3515 = vadd.xlane.f32.xlu0 %v10473_v47  ;;  %7946 = vpow2.f32 %v3261_v58  ;;  %v7939_v13 = vpop.eup %7938  ;;  %v3971_v37 = vmul.f32 %v7937_v56, %v10085_v15 }
 0x5e0   : > { %v3508_v8 = vpop.xlane.xlu0 %3507  ;;  %v10476_v34 = vpop.xlane.xlu1 %3579  ;;  %v3969_v31 = vmul.f32 %v7939_v13, %v10097_v0 }
 0x5e1   : > { %11932 = vst [vmem:[#allocation29_spill] sm:$0xff] %v10476_v34  ;;  %7948 = vrcp.f32 %v3508_v8 }
 0x5e2   : > { %7950 = vrcp.f32 %v3502_v50 }
 0x5e3   : > { %3511 = vadd.xlane.f32.xlu0 %v10480_v12  ;;  %7952 = vrcp.f32 %v3506_v5  ;;  %v7941_v5 = vpop.eup %7940 }
 0x5e4   : > { %v3504_v35 = vpop.xlane.xlu0 %3503  ;;  %v10483_v44 = vpop.xlane.xlu1 %3575  ;;  %v3972_v9 = vmul.f32 %v7941_v5, %v11940_v10 }
 0x5e5   : > { %11935 = vst [vmem:[#allocation25_spill] sm:$0xff] %v10483_v44  ;;  %7954 = vrcp.f32 %v3504_v35 }
 0x5e6   : > { %7956 = vpow2.f32 %v3297_v18  ;;  %v11941_v18 = vld [vmem:[#allocation24_spill] sm:$0xff]  ;;  %v4092_v56 = vpack.c.bf16 %v3972_v9, %v3971_v37 }
 0x5e7   : > { %3547 = vadd.xlane.f32.xlu0 %v10485_v36  ;;  %v3098_v19 = vsub.f32 %v11941_v18, %v9916_v43  ;;  %7958 = vpow2.f32 %v3293_v30 }
 0x5e8   : > { %v10492_v50 = vpop.xlane.xlu0 %3001  ;;  %v10494_v53 = vpop.xlane.xlu1 %3611  ;;  %7960 = vpow2.f32 %v3267_v40  ;;  %v11943_v40 = vld [vmem:[#allocation27_spill] sm:$0xff] }
 0x5e9   : > { %11937 = vst [vmem:[#allocation59_spill] sm:$0xff] %v10494_v53  ;;  %v3263_v21 = vmul.f32 1.442695, %v3098_v19  ;;  %v3103_v19 = vsub.f32 %v11943_v40, %v9926_v42 }
 0x5ea   : > { %v7943_v17 = vpop.eup %7942 }
 0x5eb   : > { %3543 = vadd.xlane.f32.xlu0 %v10489_v55  ;;  %v3970_v58 = vmul.f32 %v7943_v17, %v10126_v52  ;;  %v10505_v35 = vpop.eup %7944  ;;  %v11942_v17 = vld [vmem:[#allocation28_spill] sm:$0xff]  ;;  %7962 = vpow2.f32 %v3263_v21 }
 0x5ec   : > { %v10502_v8 = vpop.xlane.xlu0 %2997  ;;  %v3586_v24 = vpop.xlane.xlu1 %3585  ;;  %v3114_v43 = vsub.f32 %v11942_v17, %v9931_v22 }
 0x5ed   : > { %v4091_v23 = vpack.c.bf16 %v3970_v58, %v3969_v31  ;;  %v10509_v15 = vpop.eup %7946 }
 0x5ee   : > { %v7949_v61 = vpop.eup %7948 }
 0x5ef   : > { %6323 = vmatprep.mubr.bf16.mxu1 %v4091_v23  ;;  %3521 = vadd.xlane.f32.xlu0 %v10505_v35  ;;  %v7951_v0 = vpop.eup %7950  ;;  %v3988_v31 = vmul.f32 %v7949_v61, %v10135_v57  ;;  %v3295_v23 = vmul.f32 1.442695, %v3114_v43  ;;  %v3273_v61 = vmul.f32 1.442695, %v3103_v19  ;;  %v11946_v43 = vld [vmem:[#allocation32_spill] sm:$0xff] }
 0x5f0   : > { %6324 = vmatmul.mubr.bf16.gmra.mxu1 %v4092_v56  ;;  %v10512_v52 = vpop.xlane.xlu0 %3033  ;;  %v3582_v13 = vpop.xlane.xlu1 %3581  ;;  %v3985_v37 = vmul.f32 %v7951_v0, %v10117_v16 }
 0x5f1   : > { %v7953_v5 = vpop.eup %7952  ;;  %7964 = vpow2.f32 %v3295_v23 }
 0x5f2   : > { %v7955_v30 = vpop.eup %7954  ;;  %v3987_v18 = vmul.f32 %v7953_v5, %v10107_v6  ;;  %v11944_v6 = vld [vmem:[#allocation31_spill] sm:$0xff]  ;;  %7966 = vrcp.f32 %v3586_v24  ;;  %v11947_v24 = vld [vmem:[#allocation141_spill] sm:$0xff] }
 0x5f3   : > { %3517 = vadd.xlane.f32.xlu0 %v10509_v15  ;;  %v3986_v58 = vmul.f32 %v7955_v30, %v10144_v62  ;;  %v10525_v56 = vpop.eup %7956  ;;  %v3101_v0 = vsub.f32 %v11944_v6, %v9933_v27  ;;  %7968 = vpow2.f32 %v3273_v61  ;;  %v3119_v30 = vsub.f32 %v11946_v43, %v9941_v3  ;;  %v11952_v43 = vld [vmem:[#allocation45_spill] sm:$0xff] }
 0x5f4   : > { %v10520_v10 = vpop.xlane.xlu0 %3029  ;;  %v3618_v9 = vpop.xlane.xlu1 %3617  ;;  %v4100_v57 = vpack.c.bf16 %v3988_v31, %v3987_v18  ;;  %v11948_v18 = vld [vmem:[#allocation35_spill] sm:$0xff] }
 0x5f5   : > { %v4099_v22 = vpack.c.bf16 %v3986_v58, %v3985_v37  ;;  %v10532_v5 = vpop.eup %7958  ;;  %v3269_v17 = vmul.f32 1.442695, %v3101_v0  ;;  %v3305_v58 = vmul.f32 1.442695, %v3119_v30  ;;  %v3117_v40 = vsub.f32 %v11948_v18, %v11947_v24  ;;  %v11953_v30 = vld [vmem:[#allocation102_spill] sm:$0xff] }
 0x5f6   : > { %11945 = vst [vmem:[#allocation21_spill] sm:$0xff] %v10532_v5  ;;  %v10539_v31 = vpop.eup %7960 }
 0x5f7   : > { %6355 = vmatprep.mubr.bf16.mxu0 %v4099_v22  ;;  %3553 = vadd.xlane.f32.xlu0 %v10525_v56  ;;  %v3301_v22 = vmul.f32 1.442695, %v3117_v40 }
 0x5f8   : > { %6356 = vmatmul.mubr.bf16.gmra.mxu0 %v4100_v57  ;;  %v10528_v16 = vpop.xlane.xlu0 %3003  ;;  %v3614_v62 = vpop.xlane.xlu1 %3613  ;;  %v11950_v57 = vld [vmem:[#allocation83_spill] sm:$0xff] }
 0x5f9   : > { %v10546_v19 = vpop.eup %7962 }
 0x5fb   : > { %3549 = vadd.xlane.f32.xlu0 %v10532_v5 }
 0x5fc   : > { %v10535_v42 = vpop.xlane.xlu0 %2999  ;;  %v3588_v21 = vpop.xlane.xlu1 %3587 }
 0x5fd   : > { %7970 = vrcp.f32 %v3588_v21 }
 0x5fe   : > { %7972 = vrcp.f32 %v3582_v13  ;;  %v11949_v13 = vld [vmem:[#allocation69_spill] sm:$0xff]  ;;  %v10553_v6 = vpop.eup %7964 }
 0x5ff   : > { %3523 = vadd.xlane.f32.xlu0 %v10539_v31  ;;  %7974 = vpow2.f32 %v3269_v17  ;;  %v3142_v61 = vsub.f32 %v11950_v57, %v11949_v13  ;;  %11951 = vst [vmem:[#allocation19_spill] sm:$0xff] %v10553_v6  ;;  %v7967_v17 = vpop.eup %7966  ;;  %v11957_v13 = vld [vmem:[#allocation85_spill] sm:$0xff] }
 0x600   : > { %v10542_v27 = vpop.xlane.xlu0 %3035  ;;  %v3584_v37 = vpop.xlane.xlu1 %3583 }
 0x601   : > { %7976 = vrcp.f32 %v3584_v37  ;;  %v3139_v37 = vsub.f32 %v11953_v30, %v11952_v43  ;;  %v11960_v43 = vld [vmem:[#allocation106_spill] sm:$0xff] }
 0x602   : > { %7978 = vrcp.f32 %v3618_v9  ;;  %v3351_v9 = vmul.f32 1.442695, %v3142_v61  ;;  %v3137_v30 = vsub.f32 %v11960_v43, %v11959_v45  ;;  %v11966_v43 = vld [vmem:[#allocation81_spill] sm:$0xff] }
 0x603   : > { %3519 = vadd.xlane.f32.xlu0 %v10546_v19  ;;  %7980 = vpow2.f32 %v3305_v58  ;;  %v10560_v58 = vpop.eup %7968  ;;  %v3345_v61 = vmul.f32 1.442695, %v3139_v37 }
 0x604   : > { %v10549_v3 = vpop.xlane.xlu0 %3031  ;;  %v3620_v23 = vpop.xlane.xlu1 %3619  ;;  %11954 = vst [vmem:[#allocation47_spill] sm:$0xff] %v10560_v58  ;;  %v3341_v45 = vmul.f32 1.442695, %v3137_v30 }
 0x605   : > { %7982 = vrcp.f32 %v3620_v23  ;;  %v11955_v23 = vld [vmem:[#allocation49_spill] sm:$0xff] }
 0x606   : > { %7984 = vrcp.f32 %v3614_v62  ;;  %v10566_v62 = vmul.f32 %v7967_v17, %v11955_v23  ;;  %v11962_v23 = vld [vmem:[#allocation120_spill] sm:$0xff] }
 0x607   : > { %3551 = vadd.xlane.f32.xlu0 %v10553_v6  ;;  %7986 = vpow2.f32 %v3301_v22 }
 0x608   : > { %v10556_v0 = vpop.xlane.xlu0 %3011  ;;  %v3616_v21 = vpop.xlane.xlu1 %3615  ;;  %11956 = vst [vmem:[#allocation51_spill] sm:$0xff] %v10566_v62 }
 0x609   : > { %7988 = vrcp.f32 %v3616_v21 }
 0x60a   : > { %v7971_v24 = vpop.eup %7970  ;;  %7990 = vpow2.f32 %v3351_v9 }
 0x60b   : > { %3529 = vadd.xlane.f32.xlu0 %v10560_v58  ;;  %v10569_v57 = vmul.f32 %v7971_v24, %v11957_v13  ;;  %v7973_v22 = vpop.eup %7972  ;;  %v11964_v13 = vld [vmem:[#allocation86_spill] sm:$0xff]  ;;  %7992 = vpow2.f32 %v3345_v61  ;;  %v3155_v58 = vsub.f32 %v11967_v26, %v11966_v43  ;;  %v11973_v43 = vld [vmem:[#allocation84_spill] sm:$0xff] }
 0x60c   : > { %v10563_v18 = vpop.xlane.xlu0 %3007  ;;  %v3594_v40 = vpop.xlane.xlu1 %3593  ;;  %v10581_v24 = vmul.f32 %v7973_v22, %v11962_v23  ;;  %v11969_v23 = vld [vmem:[#allocation80_spill] sm:$0xff]  ;;  %7994 = vpow2.f32 %v3341_v45 }
 0x60d   : > { %11958 = vst [vmem:[#allocation127_spill] sm:$0xff] %v10569_v57  ;;  %v10573_v20 = vpop.eup %7974  ;;  %v3377_v26 = vmul.f32 1.442695, %v3155_v58 }
 0x60e   : > { %11961 = vst [vmem:[#allocation60_spill] sm:$0xff] %v10573_v20  ;;  %v7977_v53 = vpop.eup %7976  ;;  %11963 = vst [vmem:[#allocation68_spill] sm:$0xff] %v10581_v24 }
 0x60f   : > { %3525 = vadd.xlane.f32.xlu0 %v10573_v20  ;;  %v10584_v9 = vmul.f32 %v7977_v53, %v11964_v13  ;;  %v7979_v37 = vpop.eup %7978  ;;  %v11971_v13 = vld [vmem:[#allocation88_spill] sm:$0xff]  ;;  %7996 = vpow2.f32 %v3377_v26 }
 0x610   : > { %v3590_v32 = vpop.xlane.xlu1 %3589  ;;  %v10578_v17 = vpop.xlane.xlu0 %3043  ;;  %v10596_v53 = vmul.f32 %v7979_v37, %v11969_v23  ;;  %v11974_v20 = vld [vmem:[#allocation112_spill] sm:$0xff]  ;;  %v11976_v23 = vld [vmem:[#allocation82_spill] sm:$0xff]  ;;  %7998 = vrcp.f32 %v3594_v40 }
 0x611   : > { %11965 = vst [vmem:[#allocation71_spill] sm:$0xff] %v10584_v9  ;;  %v10588_v34 = vpop.eup %7980  ;;  %v3153_v1 = vsub.f32 %v11974_v20, %v11973_v43  ;;  %v11980_v20 = vld [vmem:[#allocation87_spill] sm:$0xff]  ;;  %v11981_v43 = vld [vmem:[#allocation109_spill] sm:$0xff] }
 0x612   : > { %11968 = vst [vmem:[#allocation78_spill] sm:$0xff] %v10588_v34  ;;  %v7983_v62 = vpop.eup %7982  ;;  %11970 = vst [vmem:[#allocation131_spill] sm:$0xff] %v10596_v53 }
 0x613   : > { %3561 = vadd.xlane.f32.xlu0 %v10588_v34  ;;  %v10599_v61 = vmul.f32 %v7983_v62, %v11971_v13  ;;  %v7985_v30 = vpop.eup %7984  ;;  %v11978_v13 = vld [vmem:[#allocation90_spill] sm:$0xff]  ;;  %v3373_v58 = vmul.f32 1.442695, %v3153_v1  ;;  %v3140_v34 = vsub.f32 %v11981_v43, %v11980_v20  ;;  %v11987_v20 = vld [vmem:[#allocation116_spill] sm:$0xff] }
 0x614   : > { %v3626_v57 = vpop.xlane.xlu1 %3625  ;;  %v10593_v22 = vpop.xlane.xlu0 %3039  ;;  %v10611_v62 = vmul.f32 %v7985_v30, %v11976_v23  ;;  %v11984_v23 = vld [vmem:[#allocation113_spill] sm:$0xff] }
 0x615   : > { %11972 = vst [vmem:[#allocation63_spill] sm:$0xff] %v10599_v61  ;;  %v10603_v33 = vpop.eup %7986  ;;  %8000 = vpow2.f32 %v3373_v58  ;;  %v3347_v30 = vmul.f32 1.442695, %v3140_v34  ;;  %v11989_v58 = vld [vmem:[#allocation119_spill] sm:$0xff] }
 0x616   : > { %11975 = vst [vmem:[#allocation95_spill] sm:$0xff] %v10603_v33  ;;  %v7989_v24 = vpop.eup %7988  ;;  %11977 = vst [vmem:[#allocation123_spill] sm:$0xff] %v10611_v62 }
 0x617   : > { %3557 = vadd.xlane.f32.xlu0 %v10603_v33  ;;  %v10614_v45 = vmul.f32 %v7989_v24, %v11978_v13  ;;  %v10618_v6 = vpop.eup %7990  ;;  %v11983_v24 = vld [vmem:[#allocation89_spill] sm:$0xff] }
 0x618   : > { %v3622_v9 = vpop.xlane.xlu1 %3621  ;;  %v10608_v37 = vpop.xlane.xlu0 %3017  ;;  %11982 = vst [vmem:[#allocation128_spill] sm:$0xff] %v10618_v6  ;;  %v3138_v26 = vsub.f32 %v11984_v23, %v11983_v24  ;;  %v11986_v13 = vld [vmem:[#allocation97_spill] sm:$0xff] }
 0x619   : > { %11979 = vst [vmem:[#allocation61_spill] sm:$0xff] %v10614_v45  ;;  %v10627_v1 = vpop.eup %7992  ;;  %v3156_v43 = vsub.f32 %v11987_v20, %v11986_v13  ;;  %v11988_v45 = vld [vmem:[#allocation151_spill] sm:$0xff] }
 0x61a   : > { %11985 = vst [vmem:[#allocation62_spill] sm:$0xff] %v10627_v1  ;;  %v3343_v40 = vmul.f32 1.442695, %v3138_v26  ;;  %v3154_v34 = vsub.f32 %v11989_v58, %v11988_v45  ;;  %v11991_v13 = vld [vmem:[#allocation115_spill] sm:$0xff] }
 0x61b   : > { %3607 = vadd.xlane.f32.xlu0 %v10618_v6  ;;  %v10636_v6 = vpop.eup %7994  ;;  %v3379_v24 = vmul.f32 1.442695, %v3156_v43  ;;  %v3159_v20 = vsub.f32 %v11991_v13, %v10492_v50  ;;  %v11993_v43 = vld [vmem:[#allocation117_spill] sm:$0xff] }
 0x61c   : > { %v3596_v53 = vpop.xlane.xlu1 %3595  ;;  %v10623_v61 = vpop.xlane.xlu0 %3013  ;;  %11990 = vst [vmem:[#allocation104_spill] sm:$0xff] %v10636_v6 }
 0x61d   : > { %8002 = vrcp.f32 %v3596_v53 }
 0x61e   : > { %8004 = vrcp.f32 %v3590_v32  ;;  %v3375_v32 = vmul.f32 1.442695, %v3154_v34 }
 0x61f   : > { %3601 = vadd.xlane.f32.xlu0 %v10627_v1  ;;  %8006 = vpow2.f32 %v3347_v30  ;;  %v10643_v30 = vpop.eup %7996 }
 0x620   : > { %v3592_v21 = vpop.xlane.xlu1 %3591  ;;  %v10632_v62 = vpop.xlane.xlu0 %3049  ;;  %11992 = vst [vmem:[#allocation132_spill] sm:$0xff] %v10643_v30 }
 0x621   : > { %8008 = vrcp.f32 %v3592_v21  ;;  %v7999_v26 = vpop.eup %7998 }
 0x622   : > { %8010 = vrcp.f32 %v3626_v57  ;;  %v3385_v57 = vmul.f32 1.442695, %v3159_v20  ;;  %v10650_v58 = vpop.eup %8000  ;;  %v11999_v20 = vld [vmem:[#allocation121_spill] sm:$0xff] }
 0x623   : > { %3597 = vadd.xlane.f32.xlu0 %v10636_v6  ;;  %8012 = vpow2.f32 %v3343_v40  ;;  %v3157_v40 = vsub.f32 %v11993_v43, %v10502_v8  ;;  %11994 = vst [vmem:[#allocation65_spill] sm:$0xff] %v10650_v58  ;;  %v3175_v8 = vsub.f32 %v11999_v20, %v10512_v52  ;;  %v12005_v52 = vld [vmem:[#allocation124_spill] sm:$0xff] }
 0x624   : > { %v3628_v53 = vpop.xlane.xlu1 %3627  ;;  %v10639_v23 = vpop.xlane.xlu0 %3045  ;;  %v3173_v20 = vsub.f32 %v12005_v52, %v10520_v10  ;;  %v12012_v52 = vld [vmem:[#allocation122_spill] sm:$0xff] }
 0x625   : > { %8014 = vrcp.f32 %v3628_v53 }
 0x626   : > { %8016 = vpow2.f32 %v3379_v24  ;;  %v11995_v24 = vld [vmem:[#allocation93_spill] sm:$0xff]  ;;  %v3413_v10 = vmul.f32 1.442695, %v3173_v20 }
 0x627   : > { %3633 = vadd.xlane.f32.xlu0 %v10643_v30  ;;  %8018 = vrcp.f32 %v3622_v9  ;;  %v10656_v53 = vmul.f32 %v7999_v26, %v11995_v24  ;;  %v11997_v9 = vld [vmem:[#allocation91_spill] sm:$0xff]  ;;  %v12001_v26 = vld [vmem:[#allocation96_spill] sm:$0xff] }
 0x628   : > { %v3624_v21 = vpop.xlane.xlu1 %3623  ;;  %v10646_v45 = vpop.xlane.xlu0 %3019  ;;  %8020 = vpow2.f32 %v3375_v32  ;;  %v3381_v32 = vmul.f32 1.442695, %v3157_v40  ;;  %v3417_v40 = vmul.f32 1.442695, %v3175_v8 }
 0x629   : > { %8022 = vrcp.f32 %v3624_v21  ;;  %11996 = vst [vmem:[#allocation100_spill] sm:$0xff] %v10656_v53 }
 0x62a   : > { %v8003_v50 = vpop.eup %8002  ;;  %8024 = vpow2.f32 %v3385_v57 }
 0x62b   : > { %3629 = vadd.xlane.f32.xlu0 %v10650_v58  ;;  %v10659_v13 = vmul.f32 %v8003_v50, %v11997_v9  ;;  %v8005_v30 = vpop.eup %8004  ;;  %v12003_v50 = vld [vmem:[#allocation156_spill] sm:$0xff]  ;;  %8026 = vpow2.f32 %v3381_v32  ;;  %v12010_v32 = vld [vmem:[#allocation159_spill] sm:$0xff] }
 0x62c   : > { %v10653_v34 = vpop.xlane.xlu0 %3015  ;;  %v10663_v43 = vpop.eup %8006  ;;  %v10671_v24 = vmul.f32 %v8005_v30, %v12001_v26  ;;  %8028 = vpow2.f32 %v3417_v40  ;;  %v12016_v40 = vld [vmem:[#allocation162_spill] sm:$0xff] }
 0x62d   : > { %11998 = vst [vmem:[#allocation136_spill] sm:$0xff] %v10659_v13  ;;  %12000 = vst [vmem:[#allocation17_spill] sm:$0xff] %v10663_v43  ;;  %v3160_v13 = vsub.f32 %v12012_v52, %v10528_v16  ;;  %8030 = vpow2.f32 %v3413_v10  ;;  %v12022_v10 = vld [vmem:[#allocation133_spill] sm:$0xff] }
 0x62e   : > { %v8009_v58 = vpop.eup %8008  ;;  %12002 = vst [vmem:[#allocation111_spill] sm:$0xff] %v10671_v24 }
 0x62f   : > { %3603 = vadd.xlane.f32.xlu0 %v10663_v43  ;;  %v10674_v9 = vmul.f32 %v8009_v58, %v12003_v50  ;;  %v8011_v57 = vpop.eup %8010  ;;  %v12008_v58 = vld [vmem:[#allocation105_spill] sm:$0xff]  ;;  %v3387_v16 = vmul.f32 1.442695, %v3160_v13 }
 0x630   : > { %v10668_v1 = vpop.xlane.xlu0 %3051  ;;  %v10678_v6 = vpop.eup %8012  ;;  %v10688_v26 = vmul.f32 %v8011_v57, %v12008_v58 }
 0x631   : > { %12004 = vst [vmem:[#allocation135_spill] sm:$0xff] %v10674_v9  ;;  %12006 = vst [vmem:[#allocation64_spill] sm:$0xff] %v10678_v6  ;;  %8032 = vpow2.f32 %v3387_v16 }
 0x632   : > { %v8015_v43 = vpop.eup %8014  ;;  %12009 = vst [vmem:[#allocation18_spill] sm:$0xff] %v10688_v26 }
 0x633   : > { %3599 = vadd.xlane.f32.xlu0 %v10678_v6  ;;  %v10683_v53 = vpop.eup %8016  ;;  %v10691_v8 = vmul.f32 %v8015_v43, %v12010_v32  ;;  %v12014_v43 = vld [vmem:[#allocation152_spill] sm:$0xff]  ;;  %v12018_v32 = vld [vmem:[#allocation126_spill] sm:$0xff] }
 0x634   : > { %12007 = vst [vmem:[#allocation107_spill] sm:$0xff] %v10683_v53  ;;  %v10685_v30 = vpop.xlane.xlu0 %3047  ;;  %v8019_v50 = vpop.eup %8018  ;;  %v3158_v52 = vsub.f32 %v12018_v32, %v10535_v42  ;;  %v3174_v32 = vsub.f32 %v12022_v10, %v10549_v3  ;;  %v12028_v3 = vld [vmem:[#allocation134_spill] sm:$0xff] }
 0x635   : > { %12011 = vst [vmem:[#allocation140_spill] sm:$0xff] %v10691_v8  ;;  %3635 = vadd.xlane.f32.xlu1 %v10683_v53  ;;  %v10696_v21 = vpop.eup %8020  ;;  %v10704_v58 = vmul.f32 %v8019_v50, %v12014_v43  ;;  %v12020_v43 = vld [vmem:[#allocation129_spill] sm:$0xff] }
 0x636   : > { %12013 = vst [vmem:[#allocation15_spill] sm:$0xff] %v10696_v21  ;;  %v8023_v24 = vpop.eup %8022  ;;  %v3383_v50 = vmul.f32 1.442695, %v3158_v52  ;;  %v12024_v52 = vld [vmem:[#allocation101_spill] sm:$0xff] }
 0x637   : > { %3631 = vadd.xlane.f32.xlu0 %v10696_v21  ;;  %12015 = vst [vmem:[#allocation23_spill] sm:$0xff] %v10704_v58  ;;  %v10707_v20 = vmul.f32 %v8023_v24, %v12016_v40  ;;  %v10711_v53 = vpop.eup %8024  ;;  %v3176_v24 = vsub.f32 %v12020_v43, %v10542_v27  ;;  %v3415_v43 = vmul.f32 1.442695, %v3174_v32  ;;  %v12031_v58 = vld [vmem:[#allocation137_spill] sm:$0xff] }
 0x638   : > { %v10701_v57 = vpop.xlane.xlu0 %3025  ;;  %12019 = vst [vmem:[#allocation16_spill] sm:$0xff] %v10711_v53  ;;  %v10720_v40 = vpop.eup %8026  ;;  %8034 = vpow2.f32 %v3383_v50 }
 0x639   : > { %12017 = vst [vmem:[#allocation138_spill] sm:$0xff] %v10707_v20  ;;  %12021 = vst [vmem:[#allocation125_spill] sm:$0xff] %v10720_v40  ;;  %v3419_v42 = vmul.f32 1.442695, %v3176_v24  ;;  %v10727_v6 = vpop.eup %8028 }
 0x63a   : > { %12023 = vst [vmem:[#allocation24_spill] sm:$0xff] %v10727_v6  ;;  %v10734_v8 = vpop.eup %8030 }
 0x63b   : > { %3641 = vadd.xlane.f32.xlu0 %v10711_v53  ;;  %v12025_v53 = vld [vmem:[#allocation130_spill] sm:$0xff]  ;;  %8036 = vpow2.f32 %v3419_v42  ;;  %12026 = vst [vmem:[#allocation28_spill] sm:$0xff] %v10734_v8 }
 0x63c   : > { %v10716_v26 = vpop.xlane.xlu0 %3021  ;;  %v3163_v27 = vsub.f32 %v12025_v53, %v12024_v52  ;;  %8038 = vpow2.f32 %v3415_v43  ;;  %v12034_v43 = vld [vmem:[#allocation139_spill] sm:$0xff] }
 0x63e   : > { %v3393_v24 = vmul.f32 1.442695, %v3163_v27  ;;  %v10741_v21 = vpop.eup %8032 }
 0x63f   : > { %3637 = vadd.xlane.f32.xlu0 %v10720_v40  ;;  %v12027_v40 = vld [vmem:[#allocation150_spill] sm:$0xff]  ;;  %12029 = vst [vmem:[#allocation27_spill] sm:$0xff] %v10741_v21 }
 0x640   : > { %v10723_v13 = vpop.xlane.xlu0 %3057  ;;  %v3161_v10 = vsub.f32 %v12028_v3, %v12027_v40  ;;  %8040 = vpow2.f32 %v3393_v24  ;;  %v12033_v40 = vld [vmem:[#allocation158_spill] sm:$0xff] }
 0x641   : > { %v3177_v3 = vsub.f32 %v12034_v43, %v12033_v40  ;;  %v12040_v43 = vld [vmem:[#allocation94_spill] sm:$0xff] }
 0x642   : > { %v3389_v32 = vmul.f32 1.442695, %v3161_v10 }
 0x643   : > { %3673 = vadd.xlane.f32.xlu0 %v10727_v6  ;;  %v12030_v6 = vld [vmem:[#allocation155_spill] sm:$0xff] }
 0x644   : > { %v10730_v16 = vpop.xlane.xlu0 %3053  ;;  %v3179_v53 = vsub.f32 %v12031_v58, %v12030_v6  ;;  %8042 = vpow2.f32 %v3389_v32  ;;  %v12036_v32 = vld [vmem:[#allocation92_spill] sm:$0xff] }
 0x645   : > { %v10748_v52 = vpop.eup %8034  ;;  %v3164_v44 = vsub.f32 %v12036_v32, %v10556_v0  ;;  %v12042_v0 = vld [vmem:[#allocation98_spill] sm:$0xff] }
 0x646   : > { %12032 = vst [vmem:[#allocation31_spill] sm:$0xff] %v10748_v52  ;;  %v3425_v27 = vmul.f32 1.442695, %v3179_v53 }
 0x647   : > { %3669 = vadd.xlane.f32.xlu0 %v10734_v8 }
 0x648   : > { %v10737_v50 = vpop.xlane.xlu0 %3027  ;;  %v10754_v33 = vpop.eup %8036  ;;  %8044 = vpow2.f32 %v3425_v27  ;;  %v3395_v27 = vmul.f32 1.442695, %v3164_v44 }
 0x649   : > { %12035 = vst [vmem:[#allocation32_spill] sm:$0xff] %v10754_v33 }
 0x64b   : > { %3643 = vadd.xlane.f32.xlu0 %v10741_v21 }
 0x64c   : > { %v10746_v42 = vpop.xlane.xlu0 %3513 }
 0x64e   : > { %v7639_v8 = vpop.trf.xlu1 }
 0x64f   : > { %3639 = vadd.xlane.f32.xlu0 %v10748_v52  ;;  %v7643_v9 = vunpack.i.h.bf16 %v7639_v8  ;;  %v7640_v6 = vunpack.i.l.bf16 %v7639_v8  ;;  %v3421_v52 = vmul.f32 1.442695, %v3177_v3 }
 0x650   : > { %v3024_v20 = vpop.xlane.xlu0 %3023 }
 0x651   : > { %v3170_v21 = vsub.f32 %v10410_v60, %v3024_v20  ;;  %v10763_v60 = vpop.eup %8038 }
 0x652   : > { %v7644_v58 = vpop.trf.xlu1  ;;  %12038 = vst [vmem:[#allocation35_spill] sm:$0xff] %v10763_v60 }
 0x653   : > { %v3407_v24 = vmul.f32 1.442695, %v3170_v21  ;;  %3675 = vadd.xlane.f32.xlu0 %v10754_v33  ;;  %v7648_v10 = vunpack.i.h.bf16 %v7644_v58  ;;  %v7645_v53 = vunpack.i.l.bf16 %v7644_v58  ;;  %v3162_v58 = vsub.f32 %v12040_v43, %v10563_v18  ;;  %v10770_v33 = vpop.eup %8040 }
 0x654   : > { %v10757_v5 = vpop.xlane.xlu0 %3509  ;;  %12041 = vst [vmem:[#allocation83_spill] sm:$0xff] %v10770_v33  ;;  %v10781_v43 = vpop.eup %8042 }
 0x655   : > { %8046 = vpow2.f32 %v3407_v24  ;;  %v10761_v40 = vpack.c.bf16 %v7648_v10, %v7643_v9  ;;  %v10765_v8 = vpack.c.bf16 %v7645_v53, %v7640_v6  ;;  %v3180_v9 = vsub.f32 %v12042_v0, %v10578_v17  ;;  %v12043_v53 = vld [vmem:[#allocation149_spill] sm:$0xff]  ;;  %12045 = vst [vmem:[#allocation102_spill] sm:$0xff] %v10781_v43 }
 0x656   : > { %v7649_v20 = vpop.trf.xlu1  ;;  %8048 = vpow2.f32 %v3421_v52  ;;  %v3178_v32 = vsub.f32 %v12043_v53, %v10593_v22  ;;  %v3391_v52 = vmul.f32 1.442695, %v3162_v58  ;;  %v12046_v17 = vld [vmem:[#allocation153_spill] sm:$0xff]  ;;  %v3172_v0 = vsub.f32 %v10381_v49, %v10737_v50 }
 0x657   : > { %12037 = vst [vmem:[#allocation141_spill] sm:$0xff] %v10761_v40  ;;  %12039 = vst [vmem:[#allocation69_spill] sm:$0xff] %v10765_v8  ;;  %3671 = vadd.xlane.f32.xlu0 %v10763_v60  ;;  %v7653_v3 = vunpack.i.h.bf16 %v7649_v20  ;;  %v7650_v24 = vunpack.i.l.bf16 %v7649_v20  ;;  %8050 = vpow2.f32 %v3395_v27  ;;  %v3427_v40 = vmul.f32 1.442695, %v3180_v9  ;;  %v10790_v27 = vpop.eup %8044 }
 0x658   : > { %v3060_v21 = vpop.xlane.xlu0 %3059  ;;  %v3167_v20 = vsub.f32 %v12046_v17, %v10608_v37  ;;  %v3423_v22 = vmul.f32 1.442695, %v3178_v32  ;;  %12047 = vst [vmem:[#allocation49_spill] sm:$0xff] %v10790_v27  ;;  %8052 = vpow2.f32 %v3391_v52 }
 0x659   : > { %8054 = vpow2.f32 %v3427_v40  ;;  %v3188_v32 = vsub.f32 %v10435_v7, %v3060_v21 }
 0x65a   : > { %v7654_v10 = vpop.trf.xlu1  ;;  %v3401_v37 = vmul.f32 1.442695, %v3167_v20  ;;  %8056 = vpow2.f32 %v3423_v22  ;;  %v12052_v22 = vld [vmem:[#allocation160_spill] sm:$0xff] }
 0x65b   : > { %3649 = vadd.xlane.f32.xlu0 %v10770_v33  ;;  %v7658_v6 = vunpack.i.h.bf16 %v7654_v10  ;;  %v7655_v44 = vunpack.i.l.bf16 %v7654_v10  ;;  %v3181_v7 = vsub.f32 %v12052_v22, %v10639_v23  ;;  %v3443_v21 = vmul.f32 1.442695, %v3188_v32 }
 0x65c   : > { %v10777_v60 = vpop.xlane.xlu0 %3545 }
 0x65d   : > { %v10779_v18 = vpack.c.bf16 %v7658_v6, %v7653_v3  ;;  %v10787_v8 = vpack.c.bf16 %v7655_v44, %v7650_v24  ;;  %v3411_v6 = vmul.f32 1.442695, %v3172_v0 }
 0x65e   : > { %v7659_v33 = vpop.trf.xlu1 }
 0x65f   : > { %12044 = vst [vmem:[#allocation45_spill] sm:$0xff] %v10779_v18  ;;  %3645 = vadd.xlane.f32.xlu0 %v10781_v43  ;;  %v7663_v3 = vunpack.i.h.bf16 %v7659_v33  ;;  %v7660_v53 = vunpack.i.l.bf16 %v7659_v33  ;;  %v12051_v33 = vld [vmem:[#allocation154_spill] sm:$0xff]  ;;  %v12070_v43 = vld [vmem:[#allocation75_spill] sm:$0xff] }
 0x660   : > { %v3056_v10 = vpop.xlane.xlu0 %3055  ;;  %v3165_v40 = vsub.f32 %v12051_v33, %v10623_v61  ;;  %v12057_v33 = vld [vmem:[#allocation163_spill] sm:$0xff]  ;;  %v12071_v18 = vld [vmem:[#allocation46_spill] sm:$0xff] }
 0x661   : > { %v3186_v58 = vsub.f32 %v10454_v4, %v3056_v10 }
 0x662   : > { %v10793_v9 = vpop.eup %8046  ;;  %v7664_v49 = vpop.trf.xlu1  ;;  %v3397_v61 = vmul.f32 1.442695, %v3165_v40  ;;  %v3168_v40 = vsub.f32 %v12057_v33, %v10646_v45 }
 0x663   : > { %12048 = vst [vmem:[#allocation85_spill] sm:$0xff] %v10793_v9  ;;  %v3439_v50 = vmul.f32 1.442695, %v3186_v58  ;;  %3663 = vadd.xlane.f32.xlu1 %v10793_v9  ;;  %3681 = vadd.xlane.f32.xlu0 %v10790_v27  ;;  %v7668_v24 = vunpack.i.h.bf16 %v7664_v49  ;;  %v7665_v52 = vunpack.i.l.bf16 %v7664_v49  ;;  %v10800_v17 = vpop.eup %8048 }
 0x664   : > { %v3542_v44 = vpop.xlane.xlu0 %3541  ;;  %12050 = vst [vmem:[#allocation106_spill] sm:$0xff] %v10800_v17  ;;  %v3403_v45 = vmul.f32 1.442695, %v3168_v40 }
 0x665   : > { %8058 = vpow2.f32 %v3439_v50  ;;  %v10798_v4 = vpack.c.bf16 %v7668_v24, %v7663_v3  ;;  %v10804_v0 = vpack.c.bf16 %v7665_v52, %v7660_v53  ;;  %v3429_v50 = vmul.f32 1.442695, %v3181_v7 }
 0x666   : > { %8060 = vpow2.f32 %v3401_v37  ;;  %v7669_v20 = vpop.trf.xlu1  ;;  %v10811_v37 = vpop.eup %8050 }
 0x667   : > { %12049 = vst [vmem:[#allocation57_spill] sm:$0xff] %v10798_v4  ;;  %8062 = vpow2.f32 %v3411_v6  ;;  %3677 = vadd.xlane.f32.xlu0 %v10800_v17  ;;  %v7673_v58 = vunpack.i.h.bf16 %v7669_v20  ;;  %v7670_v3 = vunpack.i.l.bf16 %v7669_v20  ;;  %12053 = vst [vmem:[#allocation120_spill] sm:$0xff] %v10811_v37 }
 0x668   : > { %8064 = vrcp.f32 %v10746_v42  ;;  %v3516_v10 = vpop.xlane.xlu0 %3515 }
 0x669   : > { %8066 = vrcp.f32 %v10757_v5  ;;  %v10818_v5 = vpop.eup %8052 }
 0x66a   : > { %8068 = vrcp.f32 %v3516_v10  ;;  %v7674_v53 = vpop.trf.xlu1  ;;  %12055 = vst [vmem:[#allocation81_spill] sm:$0xff] %v10818_v5  ;;  %v10820_v52 = vpop.eup %8054 }
 0x66b   : > { %3651 = vadd.xlane.f32.xlu0 %v10811_v37  ;;  %v7678_v6 = vunpack.i.h.bf16 %v7674_v53  ;;  %v7675_v49 = vunpack.i.l.bf16 %v7674_v53  ;;  %8070 = vpow2.f32 %v3443_v21  ;;  %12056 = vst [vmem:[#allocation108_spill] sm:$0xff] %v10820_v52  ;;  %v10825_v22 = vpop.eup %8056  ;;  %v7613_v37 = vunpack.i.l.bf16 %v12070_v43 }
 0x66c   : > { %v3512_v23 = vpop.xlane.xlu0 %3511  ;;  %12058 = vst [vmem:[#allocation80_spill] sm:$0xff] %v10825_v22 }
 0x66d   : > { %8072 = vrcp.f32 %v3512_v23  ;;  %v10814_v42 = vpack.c.bf16 %v7675_v49, %v7670_v3  ;;  %v10816_v24 = vpack.c.bf16 %v7678_v6, %v7673_v58 }
 0x66e   : > { %v7679_v32 = vpop.trf.xlu1  ;;  %8074 = vpow2.f32 %v3397_v61 }
 0x66f   : > { %12054 = vst [vmem:[#allocation86_spill] sm:$0xff] %v10816_v24  ;;  %3647 = vadd.xlane.f32.xlu0 %v10818_v5  ;;  %8076 = vpow2.f32 %v3429_v50  ;;  %v7683_v7 = vunpack.i.h.bf16 %v7679_v32  ;;  %v7680_v21 = vunpack.i.l.bf16 %v7679_v32  ;;  %v12062_v50 = vld [vmem:[#allocation165_spill] sm:$0xff] }
 0x670   : > { %v3548_v20 = vpop.xlane.xlu0 %3547  ;;  %8078 = vrcp.f32 %v3542_v44  ;;  %v3166_v23 = vsub.f32 %v12062_v50, %v10653_v34  ;;  %v12064_v34 = vld [vmem:[#allocation74_spill] sm:$0xff]  ;;  %v12065_v50 = vld [vmem:[#allocation72_spill] sm:$0xff] }
 0x671   : > { %8080 = vrcp.f32 %v3548_v20  ;;  %v7623_v27 = vunpack.i.l.bf16 %v12065_v50 }
 0x672   : > { %v10827_v10 = vpop.eup %8058  ;;  %v7684_v58 = vpop.trf.xlu1  ;;  %8082 = vrcp.f32 %v10777_v60 }
 0x673   : > { %12059 = vst [vmem:[#allocation88_spill] sm:$0xff] %v10827_v10  ;;  %v10829_v3 = vpop.eup %8060  ;;  %3683 = vadd.xlane.f32.xlu0 %v10820_v52  ;;  %3695 = vadd.xlane.f32.xlu1 %v10827_v10  ;;  %v7688_v61 = vunpack.i.h.bf16 %v7684_v58  ;;  %v7685_v53 = vunpack.i.l.bf16 %v7684_v58  ;;  %v3399_v58 = vmul.f32 1.442695, %v3166_v23 }
 0x674   : > { %12060 = vst [vmem:[#allocation84_spill] sm:$0xff] %v10829_v3  ;;  %v10833_v6 = vpop.eup %8062  ;;  %v3544_v44 = vpop.xlane.xlu0 %3543 }
 0x675   : > { %12061 = vst [vmem:[#allocation112_spill] sm:$0xff] %v10833_v6  ;;  %v8065_v49 = vpop.eup %8064  ;;  %8084 = vrcp.f32 %v3544_v44  ;;  %v10838_v32 = vpack.c.bf16 %v7685_v53, %v7680_v21  ;;  %v10840_v33 = vpack.c.bf16 %v7688_v61, %v7683_v7  ;;  %v3182_v44 = vsub.f32 %v12064_v34, %v10685_v30  ;;  %v12067_v30 = vld [vmem:[#allocation157_spill] sm:$0xff] }
 0x676   : > { %v8067_v20 = vpop.eup %8066  ;;  %v7689_v9 = vpop.trf.xlu1  ;;  %8086 = vpow2.f32 %v3403_v45  ;;  %v3183_v34 = vsub.f32 %v12067_v30, %v10632_v62  ;;  %v7608_v62 = vunpack.i.l.bf16 %v12071_v18 }
 0x677   : > { %v8069_v10 = vpop.eup %8068  ;;  %3679 = vadd.xlane.f32.xlu0 %v10825_v22  ;;  %3667 = vadd.xlane.f32.xlu1 %v10833_v6  ;;  %v7693_v21 = vunpack.i.h.bf16 %v7689_v9  ;;  %v3989_v7 = vmul.f32 %v8067_v20, %v10426_v11  ;;  %v7690_v22 = vunpack.i.l.bf16 %v7689_v9  ;;  %v3991_v11 = vmul.f32 %v8065_v49, %v10396_v63 }
 0x678   : > { %v10844_v40 = vpop.xlane.xlu0 %3521  ;;  %v10846_v60 = vpop.eup %8070  ;;  %v3992_v61 = vmul.f32 %v8069_v10, %v10473_v47  ;;  %v12068_v47 = vld [vmem:[#allocation43_spill] sm:$0xff]  ;;  %8088 = vpow2.f32 %v3399_v58  ;;  %v12073_v58 = vld [vmem:[#allocation73_spill] sm:$0xff] }
 0x679   : > { %12063 = vst [vmem:[#allocation82_spill] sm:$0xff] %v10846_v60  ;;  %v7618_v10 = vunpack.i.l.bf16 %v12068_v47 }
 0x67a   : > { %v8073_v53 = vpop.eup %8072  ;;  %v7694_v17 = vpop.trf.xlu1 }
 0x67b   : > { %3657 = vadd.xlane.f32.xlu0 %v10829_v3  ;;  %3699 = vadd.xlane.f32.xlu1 %v10846_v60  ;;  %v3990_v45 = vmul.f32 %v8073_v53, %v10480_v12  ;;  %v7698_v23 = vunpack.i.h.bf16 %v7694_v17  ;;  %v10856_v6 = vpop.eup %8074  ;;  %v7695_v9 = vunpack.i.l.bf16 %v7694_v17  ;;  %v3431_v3 = vmul.f32 1.442695, %v3182_v44  ;;  %v12072_v17 = vld [vmem:[#allocation77_spill] sm:$0xff] }
 0x67c   : > { %12066 = vst [vmem:[#allocation90_spill] sm:$0xff] %v10856_v6  ;;  %v10860_v52 = vpop.xlane.xlu0 %3517  ;;  %v10864_v20 = vpop.eup %8076  ;;  %v4102_v53 = vpack.c.bf16 %v3992_v61, %v3991_v11  ;;  %v7593_v49 = vunpack.i.l.bf16 %v12072_v17  ;;  %v3184_v44 = vsub.f32 %v12073_v58, %v10668_v1  ;;  %v12074_v61 = vld [vmem:[#allocation38_spill] sm:$0xff]  ;;  %v1617_v1 = vpack.c.bf16 %v7613_v37, %v7608_v62 }
 0x67d   : > { %12069 = vst [vmem:[#allocation87_spill] sm:$0xff] %v10864_v20  ;;  %v4101_v60 = vpack.c.bf16 %v3990_v45, %v3989_v7  ;;  %v10866_v5 = vpack.c.bf16 %v7698_v23, %v7693_v21  ;;  %v8079_v12 = vpop.eup %8078  ;;  %v10872_v4 = vpack.c.bf16 %v7695_v9, %v7690_v22  ;;  %v1618_v7 = vpack.c.bf16 %v7623_v27, %v7618_v10  ;;  %v12075_v23 = vld [vmem:[#allocation34_spill] sm:$0xff] }
 0x67e   : > { %v10870_v30 = vpop.trf.xlu1  ;;  %v8081_v63 = vpop.eup %8080  ;;  %v7603_v45 = vunpack.i.l.bf16 %v12074_v61  ;;  %v7598_v11 = vunpack.i.l.bf16 %v12075_v23  ;;  %v3433_v22 = vmul.f32 1.442695, %v3183_v34  ;;  %8090 = vpow2.f32 %v3431_v3 }
 0x67f   : > { %3653 = vadd.xlane.f32.xlu0 %v10856_v6  ;;  %6375 = vmatprep.mubr.bf16.mxu1 %v4101_v60  ;;  %v8083_v24 = vpop.eup %8082  ;;  %v3169_v9 = vsub.f32 %v10349_v51, %v10716_v26  ;;  %v7703_v60 = vunpack.i.h.bf16 %v10870_v30  ;;  %v4008_v27 = vmul.f32 %v8081_v63, %v10485_v36  ;;  %v7626_v10 = vunpack.i.h.bf16 %v12065_v50  ;;  %v12077_v63 = vld [vmem:[#allocation164_spill] sm:$0xff] }
 0x680   : > { %6376 = vmatmul.mubr.bf16.vlgmr.msra.gmra.mxu1 %v4102_v53  ;;  %v10878_v21 = vpop.xlane.xlu0 %3553  ;;  %v4005_v53 = vmul.f32 %v8079_v12, %v10467_v38  ;;  %v3435_v26 = vmul.f32 1.442695, %v3184_v44  ;;  %v4007_v37 = vmul.f32 %v8083_v24, %v10449_v59  ;;  %v7621_v38 = vunpack.i.h.bf16 %v12068_v47  ;;  %v12079_v59 = vld [vmem:[#allocation70_spill] sm:$0xff] }
 0x681   : > { %6424 = vmatpush3.bf16.msra.mxu1 %v10401_v25  ;;  %v12076_v25 = vld [vmem:[#allocation161_spill] sm:$0xff]  ;;  %v3405_v36 = vmul.f32 1.442695, %v3169_v9  ;;  %v7616_v24 = vunpack.i.h.bf16 %v12070_v43  ;;  %v3185_v47 = vsub.f32 %v10370_v2, %v10730_v16  ;;  %v12080_v43 = vld [vmem:[#allocation26_spill] sm:$0xff]  ;;  %v7606_v16 = vunpack.i.h.bf16 %v12074_v61 }
 0x682   : > { %v8085_v6 = vpop.eup %8084  ;;  %6425 = vmatprep.subr.bf16.mxu1 %v1618_v7  ;;  %v10889_v58 = vpop.trf.xlu1  ;;  %8092 = vrcp.f32 %v12076_v25  ;;  %v12078_v25 = vld [vmem:[#allocation30_spill] sm:$0xff] }
 0x683   : > { %3685 = vadd.xlane.f32.xlu0 %v10864_v20  ;;  %v4006_v3 = vmul.f32 %v8085_v6, %v10489_v55  ;;  %v7708_v51 = vunpack.i.h.bf16 %v10889_v58  ;;  %8094 = vpow2.f32 %v3433_v22  ;;  %v10899_v62 = vpop.eup %8086  ;;  %v4110_v55 = vpack.c.bf16 %v4008_v27, %v4007_v37 }
 0x684   : > { %v3550_v34 = vpop.xlane.xlu0 %3549  ;;  %8096 = vrcp.f32 %v12077_v63  ;;  %v1616_v6 = vpack.c.bf16 %v7603_v45, %v7598_v11  ;;  %v7588_v44 = vunpack.i.l.bf16 %v12078_v25  ;;  %v1626_v22 = vpack.c.bf16 %v7626_v10, %v7621_v38 }
 0x685   : > { %6426 = vmatpush3.bf16.msra.mxu1 %v1618_v7  ;;  %v4109_v50 = vpack.c.bf16 %v4006_v3, %v4005_v53  ;;  %v10897_v12 = vpack.c.bf16 %v7708_v51, %v7703_v60  ;;  %8098 = vrcp.f32 %v12079_v59  ;;  %v7611_v45 = vunpack.i.h.bf16 %v12071_v18  ;;  %v10912_v11 = vpop.eup %8088  ;;  %v12081_v53 = vld [vmem:[#allocation22_spill] sm:$0xff]  ;;  %v12083_v51 = vld [vmem:[#allocation48_spill] sm:$0xff] }
 0x686   : > { %6427 = vmatprep.subr.bf16.mxu1 %v1617_v1  ;;  %v10903_v20 = vpop.trf.xlu1  ;;  %8100 = vpow2.f32 %v3435_v26  ;;  %v1615_v9 = vpack.c.bf16 %v7593_v49, %v7588_v44  ;;  %v7583_v60 = vunpack.i.l.bf16 %v12080_v43  ;;  %v7578_v27 = vunpack.i.l.bf16 %v12081_v53  ;;  %v12087_v59 = vld [vmem:[#allocation42_spill] sm:$0xff] }
 0x687   : > { %3659 = vadd.xlane.f32.xlu0 %v10899_v62  ;;  %6407 = vmatprep.mubr.bf16.mxu0 %v4109_v50  ;;  %8102 = vpow2.f32 %v3405_v36  ;;  %v3437_v18 = vmul.f32 1.442695, %v3185_v47  ;;  %v7601_v10 = vunpack.i.h.bf16 %v12075_v23  ;;  %v3171_v49 = vsub.f32 %v10339_v14, %v10701_v57  ;;  %v12084_v50 = vld [vmem:[#allocation39_spill] sm:$0xff] }
 0x688   : > { %6408 = vmatmul.mubr.bf16.vlgmr.msra.gmra.mxu0 %v4110_v55  ;;  %v3524_v7 = vpop.xlane.xlu0 %3523  ;;  %v7568_v23 = vunpack.i.l.bf16 %v12083_v51  ;;  %v7596_v26 = vunpack.i.h.bf16 %v12072_v17  ;;  %v3187_v14 = vsub.f32 %v10360_v41, %v10723_v13  ;;  %v12085_v17 = vld [vmem:[#allocation52_spill] sm:$0xff]  ;;  %v12086_v55 = vld [vmem:[#allocation55_spill] sm:$0xff] }
 0x689   : > { %6428 = vmatpush3.bf16.msra.mxu1 %v1617_v1  ;;  %6456 = vmatpush3.bf16.msra.mxu0 %v10431_v39  ;;  %8104 = vrcp.f32 %v3524_v7  ;;  %v1625_v1 = vpack.c.bf16 %v7616_v24, %v7611_v45  ;;  %v1624_v37 = vpack.c.bf16 %v7606_v16, %v7601_v10  ;;  %v3409_v36 = vmul.f32 1.442695, %v3171_v49 }
 0x68a   : > { %6429 = vmatprep.subr.bf16.mxu1 %v1616_v6  ;;  %6457 = vmatprep.subr.bf16.mxu0 %v1626_v22  ;;  %v10916_v2 = vpop.trf.xlu1  ;;  %8106 = vrcp.f32 %v10860_v52  ;;  %v12082_v52 = vld [vmem:[#allocation20_spill] sm:$0xff]  ;;  %v7563_v63 = vunpack.i.l.bf16 %v12085_v17  ;;  %v3441_v24 = vmul.f32 1.442695, %v3187_v14 }
 0x68b   : > { %3655 = vadd.xlane.f32.xlu0 %v10912_v11  ;;  %8108 = vrcp.f32 %v10844_v40  ;;  %v10925_v3 = vpop.eup %8090  ;;  %v7573_v61 = vunpack.i.l.bf16 %v12082_v52  ;;  %v1614_v40 = vpack.c.bf16 %v7583_v60, %v7578_v27 }
 0x68c   : > { %v3520_v39 = vpop.xlane.xlu0 %3519 }
 0x68d   : > { %6430 = vmatpush3.bf16.msra.mxu1 %v1616_v6  ;;  %6458 = vmatpush3.bf16.msra.mxu0 %v1626_v22  ;;  %8110 = vrcp.f32 %v3520_v39  ;;  %v1613_v13 = vpack.c.bf16 %v7573_v61, %v7568_v23  ;;  %v7558_v6 = vunpack.i.l.bf16 %v12086_v55  ;;  %v7581_v22 = vunpack.i.h.bf16 %v12081_v53  ;;  %v12088_v61 = vld [vmem:[#allocation56_spill] sm:$0xff] }
 0x68e   : > { %8112 = vrcp.f32 %v10878_v21  ;;  %6431 = vmatprep.subr.bf16.mxu1 %v1615_v9  ;;  %6459 = vmatprep.subr.bf16.mxu0 %v1625_v1  ;;  %v7591_v21 = vunpack.i.h.bf16 %v12078_v25  ;;  %v7586_v25 = vunpack.i.h.bf16 %v12080_v43  ;;  %v7715_v43 = vunpack.i.l.bf16 %v10916_v2 }
 0x68f   : > { %8114 = vrcp.f32 %v3550_v34  ;;  %3687 = vadd.xlane.f32.xlu0 %v10925_v3  ;;  %v10935_v38 = vpop.eup %8092  ;;  %v1612_v53 = vpack.c.bf16 %v7563_v63, %v7558_v6  ;;  %v7576_v39 = vunpack.i.h.bf16 %v12082_v52  ;;  %v12089_v63 = vld [vmem:[#allocation25_spill] sm:$0xff] }
 0x690   : > { %8116 = vpow2.f32 %v3437_v18  ;;  %v3552_v57 = vpop.xlane.xlu0 %3551  ;;  %v10937_v34 = vpop.eup %8094  ;;  %v1623_v7 = vpack.c.bf16 %v7596_v26, %v7591_v21  ;;  %v1622_v18 = vpack.c.bf16 %v7586_v25, %v7581_v22  ;;  %v7566_v26 = vunpack.i.h.bf16 %v12085_v17  ;;  %v12092_v25 = vld [vmem:[#allocation33_spill] sm:$0xff] }
 0x691   : > { %6432 = vmatpush3.bf16.msra.mxu1 %v1615_v9  ;;  %6460 = vmatpush3.bf16.msra.mxu0 %v1625_v1  ;;  %8118 = vrcp.f32 %v3552_v57  ;;  %v10941_v41 = vpop.eup %8096  ;;  %v7710_v9 = vunpack.i.l.bf16 %v10903_v20  ;;  %v7571_v1 = vunpack.i.h.bf16 %v12083_v51  ;;  %v7561_v21 = vunpack.i.h.bf16 %v12086_v55 }
 0x692   : > { %8120 = vrcp.f32 %v12084_v50  ;;  %6433 = vmatprep.subr.bf16.mxu1 %v1614_v40  ;;  %6461 = vmatprep.subr.bf16.mxu0 %v1624_v37  ;;  %v10947_v44 = vpop.eup %8098  ;;  %v7718_v17 = vunpack.i.h.bf16 %v10916_v2  ;;  %v12093_v2 = vld [vmem:[#allocation142_spill] sm:$0xff] }
 0x693   : > { %8122 = vrcp.f32 %v10332_v48  ;;  %3689 = vadd.xlane.f32.xlu0 %v10937_v34  ;;  %v10951_v45 = vpop.eup %8100 }
 0x694   : > { %8124 = vrcp.f32 %v12087_v59  ;;  %v3530_v47 = vpop.xlane.xlu0 %3529  ;;  %v10953_v48 = vpop.eup %8102  ;;  %v1620_v59 = vpack.c.bf16 %v7566_v26, %v7561_v21  ;;  %v12100_v26 = vld [vmem:[#allocation144_spill] sm:$0xff] }
 0x695   : > { %8126 = vpow2.f32 %v3409_v36  ;;  %6434 = vmatpush3.bf16.msra.mxu1 %v1614_v40  ;;  %6462 = vmatpush3.bf16.msra.mxu0 %v1624_v37  ;;  %v10963_v40 = vpack.c.bf16 %v7715_v43, %v7710_v9  ;;  %v1621_v37 = vpack.c.bf16 %v7576_v39, %v7571_v1  ;;  %v10998_v39 = vpop.f32.mrf.mxu0 }
 0x696   : > { %8128 = vrcp.f32 %v3530_v47  ;;  %6435 = vmatprep.subr.bf16.mxu1 %v1613_v13  ;;  %6463 = vmatprep.subr.bf16.mxu0 %v1623_v7  ;;  %v8105_v60 = vpop.eup %8104 }
 0x697   : > { %8130 = vrcp.f32 %v10403_v46  ;;  %3691 = vadd.xlane.f32.xlu0 %v10951_v45  ;;  %v8107_v27 = vpop.eup %8106  ;;  %v3996_v46 = vmul.f32 %v8105_v60, %v10539_v31 }
 0x698   : > { %8132 = vpow2.f32 %v3441_v24  ;;  %v3526_v16 = vpop.xlane.xlu0 %3525  ;;  %v8109_v10 = vpop.eup %8108  ;;  %v3993_v52 = vmul.f32 %v8107_v27, %v10509_v15  ;;  %v7713_v15 = vunpack.i.h.bf16 %v10903_v20  ;;  %v12091_v20 = vld [vmem:[#allocation19_spill] sm:$0xff]  ;;  %v4012_v24 = vmul.f32 %v10935_v38, %v12093_v2  ;;  %v12094_v27 = vld [vmem:[#allocation37_spill] sm:$0xff] }
 0x699   : > { %6436 = vmatpush3.bf16.msra.mxu1 %v1613_v13  ;;  %6464 = vmatpush3.bf16.msra.mxu0 %v1623_v7  ;;  %8134 = vrcp.f32 %v3526_v16  ;;  %v3995_v31 = vmul.f32 %v8109_v10, %v10505_v35  ;;  %v12096_v10 = vld [vmem:[#allocation29_spill] sm:$0xff] }
 0x69a   : > { %v8111_v49 = vpop.eup %8110  ;;  %8136 = vrcp.f32 %v12088_v61  ;;  %6437 = vmatprep.subr.bf16.mxu1 %v1612_v53  ;;  %6465 = vmatprep.subr.bf16.mxu0 %v1622_v18  ;;  %v10991_v43 = vpack.c.bf16 %v7718_v17, %v7713_v15  ;;  %v12103_v17 = vld [vmem:[#allocation148_spill] sm:$0xff] }
 0x69b   : > { %v8113_v23 = vpop.eup %8112  ;;  %8138 = vrcp.f32 %v10375_v29  ;;  %3661 = vadd.xlane.f32.xlu0 %v10953_v48  ;;  %v3994_v51 = vmul.f32 %v8111_v49, %v10546_v19  ;;  %v4104_v50 = vpack.c.bf16 %v3996_v46, %v3995_v31  ;;  %v12097_v49 = vld [vmem:[#allocation47_spill] sm:$0xff] }
 0x69c   : > { %v8115_v14 = vpop.eup %8114  ;;  %8140 = vrcp.f32 %v10391_v54  ;;  %v3562_v57 = vpop.xlane.xlu0 %3561  ;;  %v4011_v54 = vmul.f32 %v8113_v23, %v10525_v56  ;;  %v12098_v23 = vld [vmem:[#allocation53_spill] sm:$0xff] }
 0x69d   : > { %v10973_v36 = vpop.eup %8116  ;;  %8142 = vrcp.f32 %v10429_v28  ;;  %6438 = vmatpush3.bf16.msra.mxu1 %v1612_v53  ;;  %6466 = vmatpush3.bf16.msra.mxu0 %v1622_v18  ;;  %v4103_v29 = vpack.c.bf16 %v3994_v51, %v3993_v52  ;;  %v12090_v28 = vld [vmem:[#allocation21_spill] sm:$0xff]  ;;  %v12095_v18 = vld [vmem:[#allocation118_spill] sm:$0xff]  ;;  %v12099_v52 = vld [vmem:[#allocation60_spill] sm:$0xff] }
 0x69e   : > { %v8119_v19 = vpop.eup %8118  ;;  %8144 = vrcp.f32 %v3562_v57  ;;  %6467 = vmatprep.subr.bf16.mxu0 %v1621_v37  ;;  %6487 = vmatprep.subr.bf16.mxu1 %v10963_v40  ;;  %v4009_v13 = vmul.f32 %v8115_v14, %v12090_v28  ;;  %v4112_v9 = vpack.c.bf16 %v4012_v24, %v4011_v54  ;;  %v3998_v14 = vmul.f32 %v10947_v44, %v12100_v26  ;;  %v12101_v57 = vld [vmem:[#allocation66_spill] sm:$0xff] }
 0x69f   : > { %v10980_v35 = vpop.eup %8120  ;;  %8146 = vrcp.f32 %v12089_v63  ;;  %3693 = vadd.xlane.f32.xlu0 %v10973_v36  ;;  %6379 = vmatprep.mubr.bf16.mxu1 %v4103_v29  ;;  %v4010_v55 = vmul.f32 %v8119_v19, %v12091_v20  ;;  %v12102_v29 = vld [vmem:[#allocation143_spill] sm:$0xff] }
 0x6a0   : > { %v8123_v6 = vpop.eup %8122  ;;  %8148 = vrcp.f32 %v12092_v25  ;;  %6380 = vmatmul.mubr.bf16.gmra.mxu1 %v4104_v50  ;;  %v3558_v56 = vpop.xlane.xlu0 %3557  ;;  %v4000_v15 = vmul.f32 %v10941_v41, %v12102_v29  ;;  %v12105_v41 = vld [vmem:[#allocation59_spill] sm:$0xff] }
 0x6a1   : > { %v8125_v47 = vpop.eup %8124  ;;  %6468 = vmatpush3.bf16.msra.mxu0 %v1621_v37  ;;  %8150 = vrcp.f32 %v3558_v56  ;;  %v4111_v7 = vpack.c.bf16 %v4010_v55, %v4009_v13  ;;  %v4280_v50 = vpop.f32.mrf.mxu0  ;;  %v12104_v13 = vld [vmem:[#allocation58_spill] sm:$0xff] }
 0x6a2   : > { %v10989_v22 = vpop.eup %8126  ;;  %6469 = vmatprep.subr.bf16.mxu0 %v1620_v59  ;;  %8152 = vrcp.f32 %v12094_v27  ;;  %v4001_v63 = vmul.f32 %v8125_v47, %v12103_v17  ;;  %v12107_v47 = vld [vmem:[#allocation78_spill] sm:$0xff] }
 0x6a3   : > { %v8129_v60 = vpop.eup %8128  ;;  %3665 = vadd.xlane.f32.xlu0 %v10989_v22  ;;  %6411 = vmatprep.mubr.bf16.mxu0 %v4111_v7  ;;  %8154 = vrcp.f32 %v12095_v18  ;;  %v6346_v2 = vpop.f32.mrf.mxu0  ;;  %v12106_v7 = vld [vmem:[#allocation103_spill] sm:$0xff] }
 0x6a4   : > { %v8131_v53 = vpop.eup %8130  ;;  %6412 = vmatmul.mubr.bf16.gmra.mxu0 %v4112_v9  ;;  %v3608_v16 = vpop.xlane.xlu0 %3607  ;;  %8156 = vrcp.f32 %v12096_v10  ;;  %v3999_v61 = vmul.f32 %v8129_v60, %v12097_v49  ;;  %v12111_v49 = vld [vmem:[#allocation54_spill] sm:$0xff] }
 0x6a5   : > { %v10995_v38 = vpop.eup %8132  ;;  %6470 = vmatpush3.bf16.msra.mxu0 %v1620_v59  ;;  %8158 = vrcp.f32 %v12098_v23  ;;  %v4002_v37 = vmul.f32 %v8131_v53, %v12101_v57  ;;  %v12108_v53 = vld [vmem:[#allocation95_spill] sm:$0xff]  ;;  %v12112_v23 = vld [vmem:[#allocation76_spill] sm:$0xff]  ;;  %v4283_v29 = vpop.f32.mrf.mxu0 }
 0x6a6   : > { %v8135_v1 = vpop.eup %8134  ;;  %6519 = vmatprep.subr.bf16.mxu0 %v10991_v43  ;;  %8160 = vrcp.f32 %v3608_v16  ;;  %v4106_v20 = vpack.c.bf16 %v4000_v15, %v3999_v61  ;;  %v12109_v16 = vld [vmem:[#allocation146_spill] sm:$0xff] }
 0x6a7   : > { %v8137_v46 = vpop.eup %8136  ;;  %3697 = vadd.xlane.f32.xlu0 %v10995_v38  ;;  %v3997_v51 = vmul.f32 %v8135_v1, %v12099_v52  ;;  %8162 = vrcp.f32 %v12104_v13  ;;  %v4107_v44 = vpack.c.bf16 %v4002_v37, %v4001_v63  ;;  %v4014_v18 = vmul.f32 %v8123_v6, %v12109_v16  ;;  %v12110_v1 = vld [vmem:[#allocation110_spill] sm:$0xff]  ;;  %v12120_v16 = vld [vmem:[#allocation67_spill] sm:$0xff] }
 0x6a8   : > { %v8139_v31 = vpop.eup %8138  ;;  %v11009_v21 = vpop.xlane.xlu0 %3601  ;;  %8164 = vrcp.f32 %v12105_v41 }
 0x6a9   : > { %v8141_v19 = vpop.eup %8140  ;;  %v4105_v54 = vpack.c.bf16 %v3998_v14, %v3997_v51  ;;  %8166 = vrcp.f32 %v12112_v23  ;;  %v12113_v51 = vld [vmem:[#allocation147_spill] sm:$0xff]  ;;  %v12114_v14 = vld [vmem:[#allocation145_spill] sm:$0xff]  ;;  %v12122_v23 = vld [vmem:[#allocation44_spill] sm:$0xff] }
 0x6aa   : > { %v8143_v28 = vpop.eup %8142  ;;  %v4004_v9 = vmul.f32 %v8141_v19, %v12106_v7  ;;  %v4003_v26 = vmul.f32 %v8137_v46, %v12113_v51  ;;  %v4016_v57 = vmul.f32 %v10980_v35, %v12114_v14  ;;  %v12115_v19 = vld [vmem:[#allocation40_spill] sm:$0xff] }
 0x6ab   : > { %v8145_v55 = vpop.eup %8144  ;;  %6383 = vmatprep.mubr.bf16.mxu1 %v4105_v54  ;;  %v4018_v10 = vmul.f32 %v8143_v28, %v12110_v1  ;;  %v12116_v54 = vld [vmem:[#allocation41_spill] sm:$0xff]  ;;  %v12121_v1 = vld [vmem:[#allocation128_spill] sm:$0xff] }
 0x6ac   : > { %v8147_v25 = vpop.eup %8146  ;;  %6384 = vmatmul.mubr.bf16.gmra.mxu1 %v4106_v20  ;;  %v3598_v56 = vpop.xlane.xlu0 %3597  ;;  %v4015_v60 = vmul.f32 %v8145_v55, %v12107_v47  ;;  %v4108_v63 = vpack.c.bf16 %v4004_v9, %v4003_v26  ;;  %v7700_v9 = vunpack.i.l.bf16 %v10870_v30  ;;  %v7705_v47 = vunpack.i.l.bf16 %v10889_v58 }
 0x6ad   : > { %v8149_v59 = vpop.eup %8148  ;;  %6387 = vmatprep.mubr.bf16.mxu1 %v4107_v44  ;;  %v4022_v61 = vmul.f32 %v8147_v25, %v12111_v49  ;;  %v6349_v25 = vpop.f32.mrf.mxu0  ;;  %8168 = vrcp.f32 %v3598_v56 }
 0x6ae   : > { %v8151_v24 = vpop.eup %8150  ;;  %4957 = vxpose.xlu1.b32.start [1/16] (narrow) %v4280_v50, 8  ;;  %v4017_v50 = vmul.f32 %v8139_v31, %v12115_v19  ;;  %v4021_v6 = vmul.f32 %v8149_v59, %v12116_v54  ;;  %v4114_v28 = vpack.c.bf16 %v4016_v57, %v4015_v60  ;;  %v12117_v31 = vld [vmem:[#allocation36_spill] sm:$0xff]  ;;  %v1634_v14 = vpack.c.bf16 %v7705_v47, %v7700_v9  ;;  %v12127_v54 = vld [vmem:[#allocation50_spill] sm:$0xff] }
 0x6af   : > { %v4013_v27 = vmul.f32 %v8151_v24, %v12108_v53  ;;  %v8153_v37 = vpop.eup %8152  ;;  %v12118_v24 = vld [vmem:[#allocation114_spill] sm:$0xff]  ;;  %v12119_v53 = vld [vmem:[#allocation99_spill] sm:$0xff]  ;;  %v4296_v49 = vpop.f32.mrf.mxu0  ;;  %v12137_v47 = vld [vmem:[#allocation104_spill] sm:$0xff] }
 0x6b0   : > { %v11023_v52 = vpop.xlane.xlu0 %3633  ;;  %v8155_v17 = vpop.eup %8154  ;;  %v4115_v20 = vpack.c.bf16 %v4018_v10, %v4017_v50  ;;  %v4117_v55 = vpack.c.bf16 %v4022_v61, %v4021_v6 }
 0x6b1   : > { %v4113_v15 = vpack.c.bf16 %v4014_v18, %v4013_v27  ;;  %v8157_v13 = vpop.eup %8156  ;;  %v4020_v59 = vmul.f32 %v8155_v17, %v12117_v31  ;;  %v4019_v27 = vmul.f32 %v8153_v37, %v12119_v53  ;;  %v12123_v37 = vld [vmem:[#allocation71_spill] sm:$0xff]  ;;  %v12134_v31 = vld [vmem:[#allocation61_spill] sm:$0xff]  ;;  %v12138_v53 = vld [vmem:[#allocation64_spill] sm:$0xff] }
 0x6b2   : > { %4958 = vxpose.xlu1.b32.cont [2/16] (narrow) %v4283_v29, 8  ;;  %v8159_v44 = vpop.eup %8158  ;;  %v4024_v41 = vmul.f32 %v8157_v13, %v12118_v24  ;;  %v6350_v29 = vpop.f32.mrf.mxu0  ;;  %v12129_v13 = vld [vmem:[#allocation51_spill] sm:$0xff] }
 0x6b3   : > { %6415 = vmatprep.mubr.bf16.mxu0 %v4113_v15  ;;  %v8161_v35 = vpop.eup %8160  ;;  %v4023_v18 = vmul.f32 %v8159_v44, %v12120_v16  ;;  %v4116_v61 = vpack.c.bf16 %v4020_v59, %v4019_v27  ;;  %v12124_v15 = vld [vmem:[#allocation68_spill] sm:$0xff]  ;;  %v12131_v44 = vld [vmem:[#allocation135_spill] sm:$0xff] }
 0x6b4   : > { %6388 = vmatmul.mubr.bf16.gmra.mxu1 %v4108_v63  ;;  %6416 = vmatmul.mubr.bf16.gmra.mxu0 %v4114_v28  ;;  %v3630_v46 = vpop.xlane.xlu0 %3629  ;;  %v8163_v7 = vpop.eup %8162  ;;  %v4038_v10 = vmul.f32 %v8161_v35, %v12121_v1  ;;  %v12125_v19 = vpack.c.bf16 %v12123_v37, %v12124_v15  ;;  %v12128_v28 = vld [vmem:[#allocation127_spill] sm:$0xff]  ;;  %v12139_v16 = vld [vmem:[#allocation136_spill] sm:$0xff]  ;;  %v12149_v37 = vld [vmem:[#allocation62_spill] sm:$0xff] }
 0x6b5   : > { %6419 = vmatprep.mubr.bf16.mxu0 %v4115_v20  ;;  %6439 = vmatprep.mubr.bf16.mxu1 %v4117_v55  ;;  %v4037_v51 = vmul.f32 %v8163_v7, %v12122_v23  ;;  %v8165_v26 = vpop.eup %8164  ;;  %v4299_v17 = vpop.f32.mrf.mxu0  ;;  %v12130_v20 = vpack.c.bf16 %v12128_v28, %v12129_v13  ;;  %v12135_v59 = vld [vmem:[#allocation123_spill] sm:$0xff]  ;;  %v12153_v13 = vld [vmem:[#allocation140_spill] sm:$0xff] }
 0x6b6   : > { %4959 = vxpose.xlu1.b32.cont [3/16] (narrow) %v10998_v39, 8  ;;  %v4118_v39 = vpack.c.bf16 %v4024_v41, %v4023_v18  ;;  %v8167_v57 = vpop.eup %8166  ;;  %v12136_v24 = vpack.c.bf16 %v12134_v31, %v12135_v59  ;;  %v12150_v15 = vld [vmem:[#allocation15_spill] sm:$0xff]  ;;  %v12157_v31 = vld [vmem:[#allocation57_spill] sm:$0xff] }
 0x6b7   : > { %v4125_v58 = vpack.c.bf16 %v4038_v10, %v4037_v51  ;;  %v4039_v6 = vmul.f32 %v8167_v57, %v12127_v54  ;;  %v12145_v51 = vld [vmem:[#allocation138_spill] sm:$0xff]  ;;  %v12152_v54 = vld [vmem:[#allocation65_spill] sm:$0xff]  ;;  %v12158_v59 = vld [vmem:[#allocation107_spill] sm:$0xff] }
 0x6b8   : > { %v3604_v60 = vpop.xlane.xlu0 %3603 }
 0x6ba   : > { %4960 = vxpose.xlu1.b32.cont [4/16] (narrow) %v6346_v2, 8  ;;  %v12126_v2 = vld [vmem:[#allocation79_spill] sm:$0xff]  ;;  %v8169_v41 = vpop.eup %8168 }
 0x6bb   : > { %v4040_v50 = vmul.f32 %v8165_v26, %v12126_v2  ;;  %v12146_v26 = vld [vmem:[#allocation23_spill] sm:$0xff] }
 0x6bc   : > { %6420 = vmatmul.mubr.bf16.gmra.mxu0 %v4116_v61  ;;  %6440 = vmatmul.mubr.bf16.vlgmr.msra.gmra.mxu1 %v4118_v39  ;;  %v3600_v30 = vpop.xlane.xlu0 %3599 }
 0x6bd   : > { %6488 = vmatpush3.bf16.msra.mxu1 %v10963_v40  ;;  %8170 = vrcp.f32 %v3600_v30  ;;  %6443 = vmatprep.mubr.bf16.mxu1 %v12125_v19  ;;  %v4126_v40 = vpack.c.bf16 %v4040_v50, %v4039_v6  ;;  %v12148_v30 = vld [vmem:[#allocation17_spill] sm:$0xff]  ;;  %v12151_v50 = vld [vmem:[#allocation86_spill] sm:$0xff] }
 0x6be   : > { %8172 = vrcp.f32 %v3604_v60  ;;  %6471 = vmatprep.mubr.bf16.mxu0 %v4125_v58  ;;  %4961 = vxpose.xlu1.b32.cont [5/16] (narrow) %v4296_v49, 8  ;;  %v3636_v63 = vpop.xlane.xlu1 %3635  ;;  %v4033_v60 = vmul.f32 %v8169_v41, %v12137_v47  ;;  %v12159_v41 = vld [vmem:[#allocation132_spill] sm:$0xff]  ;;  %v12161_v47 = vld [vmem:[#allocation45_spill] sm:$0xff] }
 0x6bf   : > { %6489 = vmatprep.subr.bf16.mxu1 %v1634_v14  ;;  %8174 = vrcp.f32 %v11009_v21  ;;  %v11054_v21 = vpop.f32.mrf.mxu0 }
 0x6c0   : > { %v3632_v56 = vpop.xlane.xlu0 %3631 }
 0x6c1   : > { %6490 = vmatpush3.bf16.msra.mxu1 %v1634_v14  ;;  %8176 = vrcp.f32 %v3632_v56  ;;  %v4312_v7 = vpop.f32.mrf.mxu0  ;;  %v12147_v14 = vpack.c.bf16 %v12145_v51, %v12146_v26  ;;  %v12165_v26 = vld [vmem:[#allocation31_spill] sm:$0xff] }
 0x6c2   : > { %8178 = vrcp.f32 %v3630_v46  ;;  %4962 = vxpose.xlu1.b32.cont [6/16] (narrow) %v4299_v17, 8  ;;  %6491 = vmatprep.subr.bf16.mxu1 %v10872_v4  ;;  %v12132_v46 = vld [vmem:[#allocation111_spill] sm:$0xff] }
 0x6c3   : > { %v12133_v35 = vpack.c.bf16 %v12131_v44, %v12132_v46  ;;  %8180 = vrcp.f32 %v3636_v63  ;;  %v6354_v23 = vpop.f32.mrf.mxu0 }
 0x6c4   : > { %6444 = vmatmul.mubr.bf16.gmra.mxu1 %v12130_v20  ;;  %6472 = vmatmul.mubr.bf16.vlgmr.msra.gmra.mxu0 %v4126_v40  ;;  %v11050_v55 = vpop.xlane.xlu0 %3641  ;;  %8182 = vrcp.f32 %v11023_v52  ;;  %v12140_v52 = vld [vmem:[#allocation100_spill] sm:$0xff]  ;;  %v12154_v20 = vld [vmem:[#allocation18_spill] sm:$0xff] }
 0x6c5   : > { %6492 = vmatpush3.bf16.msra.mxu1 %v10872_v4  ;;  %6520 = vmatpush3.bf16.msra.mxu0 %v10991_v43  ;;  %v12141_v18 = vpack.c.bf16 %v12139_v16, %v12140_v52  ;;  %v4315_v2 = vpop.f32.mrf.mxu0 }
 0x6c6   : > { %6447 = vmatprep.mubr.bf16.mxu1 %v12133_v35  ;;  %6475 = vmatprep.mubr.bf16.mxu0 %v12136_v24  ;;  %v12156_v35 = vld [vmem:[#allocation69_spill] sm:$0xff] }
 0x6c7   : > { %4963 = vxpose.xlu1.b32.cont [7/16] (narrow) %v6349_v25, 8  ;;  %6493 = vmatprep.subr.bf16.mxu1 %v10838_v32  ;;  %v11069_v25 = vpop.f32.mrf.mxu1  ;;  %v6357_v46 = vpop.f32.mrf.mxu0 }
 0x6c8   : > { %6521 = vmatprep.subr.bf16.mxu0 %v10897_v12  ;;  %v3638_v4 = vpop.xlane.xlu0 %3637 }
 0x6c9   : > { %6494 = vmatpush3.bf16.msra.mxu1 %v10838_v32  ;;  %6522 = vmatpush3.bf16.msra.mxu0 %v10897_v12  ;;  %v12142_v32 = vld [vmem:[#allocation63_spill] sm:$0xff]  ;;  %8184 = vrcp.f32 %v3638_v4 }
 0x6ca   : > { %v8171_v43 = vpop.eup %8170  ;;  %6495 = vmatprep.subr.bf16.mxu1 %v10814_v42  ;;  %6523 = vmatprep.subr.bf16.mxu0 %v10866_v5  ;;  %v12143_v12 = vld [vmem:[#allocation131_spill] sm:$0xff] }
 0x6cb   : > { %v8173_v9 = vpop.eup %8172  ;;  %4964 = vxpose.xlu1.b32.cont [8/16] (narrow) %v6350_v29, 8  ;;  %v4034_v27 = vmul.f32 %v8171_v43, %v12138_v53  ;;  %v12144_v1 = vpack.c.bf16 %v12142_v32, %v12143_v12  ;;  %v4183_v29 = vpop.f32.mrf.mxu1  ;;  %v12160_v43 = vmov 0.0  }
 0x6cc   : > { %6448 = vmatmul.mubr.bf16.gmra.mxu1 %v12141_v18  ;;  %v11079_v10 = vpop.xlane.xlu0 %3673  ;;  %v8175_v49 = vpop.eup %8174  ;;  %v4036_v58 = vmul.f32 %v8173_v9, %v12148_v30 }
 0x6cd   : > { %6476 = vmatmul.mubr.bf16.gmra.mxu0 %v12144_v1  ;;  %6496 = vmatpush3.bf16.msra.mxu1 %v10814_v42  ;;  %v4123_v61 = vpack.c.bf16 %v4034_v27, %v4033_v60  ;;  %v6314_v17 = vpop.f32.mrf.mxu1  ;;  %v4328_v9 = vpop.f32.mrf.mxu0  ;;  %v12162_v27 = vld [vmem:[#allocation141_spill] sm:$0xff] }
 0x6ce   : > { %6524 = vmatpush3.bf16.msra.mxu0 %v10866_v5  ;;  %v8177_v39 = vpop.eup %8176  ;;  %6479 = vmatprep.mubr.bf16.mxu0 %v12147_v14  ;;  %v4035_v5 = vmul.f32 %v8175_v49, %v12149_v37 }
 0x6cf   : > { %6497 = vmatprep.subr.bf16.mxu1 %v10804_v0  ;;  %v8179_v57 = vpop.eup %8178  ;;  %4965 = vxpose.xlu1.b32.cont [9/16] (narrow) %v4312_v7, 8  ;;  %v4050_v19 = vmul.f32 %v8177_v39, %v12150_v15  ;;  %v4186_v44 = vpop.f32.mrf.mxu1  ;;  %v12163_v39 = vld [vmem:[#allocation27_spill] sm:$0xff] }
 0x6d0   : > { %6451 = vmatprep.mubr.bf16.mxu1 %v4123_v61  ;;  %6525 = vmatprep.subr.bf16.mxu0 %v10840_v33  ;;  %v3670_v42 = vpop.xlane.xlu0 %3669  ;;  %v4124_v56 = vpack.c.bf16 %v4036_v58, %v4035_v5  ;;  %v4049_v6 = vmul.f32 %v8179_v57, %v12152_v54  ;;  %v8181_v40 = vpop.eup %8180  ;;  %v12166_v58 = vld [vmem:[#allocation16_spill] sm:$0xff] }
 0x6d1   : > { %6498 = vmatpush3.bf16.msra.mxu1 %v10804_v0  ;;  %v12155_v0 = vpack.c.bf16 %v12153_v13, %v12154_v20  ;;  %v4052_v24 = vmul.f32 %v8181_v40, %v12158_v59  ;;  %v6317_v7 = vpop.f32.mrf.mxu1  ;;  %v6358_v53 = vpop.f32.mrf.mxu0  ;;  %v12170_v13 = vld [vmem:[#allocation24_spill] sm:$0xff] }
 0x6d2   : > { %6526 = vmatpush3.bf16.msra.mxu0 %v10840_v33  ;;  %6499 = vmatprep.subr.bf16.mxu1 %v10787_v8  ;;  %v4131_v28 = vpack.c.bf16 %v4050_v19, %v4049_v6  ;;  %v8183_v33 = vpop.eup %8182 }
 0x6d3   : > { %6527 = vmatprep.subr.bf16.mxu0 %v12151_v50  ;;  %4966 = vxpose.xlu1.b32.cont [10/16] (narrow) %v4315_v2, 8  ;;  %v4051_v4 = vmul.f32 %v8183_v33, %v12159_v41  ;;  %v4331_v18 = vpop.f32.mrf.mxu0 }
 0x6d4   : > { %4925 = vxpose.xlu0.b32.start [1/16] (narrow) %v4183_v29, 8  ;;  %6452 = vmatmul.mubr.bf16.gmra.mxu1 %v4124_v56  ;;  %v3644_v63 = vpop.xlane.xlu0 %3643  ;;  %v12167_v56 = vld [vmem:[#allocation32_spill] sm:$0xff] }
 0x6d5   : > { %6480 = vmatmul.mubr.bf16.gmra.mxu0 %v12155_v0  ;;  %6500 = vmatpush3.bf16.msra.mxu1 %v10787_v8  ;;  %8186 = vrcp.f32 %v3644_v63  ;;  %v4132_v60 = vpack.c.bf16 %v4052_v24, %v4051_v4  ;;  %v12169_v63 = vld [vmem:[#allocation35_spill] sm:$0xff] }
 0x6d6   : > { %6528 = vmatpush3.bf16.msra.mxu0 %v12151_v50  ;;  %6483 = vmatprep.mubr.bf16.mxu0 %v4131_v28  ;;  %8188 = vrcp.f32 %v11050_v55  ;;  %v8185_v52 = vpop.eup %8184 }
 0x6d7   : > { %6501 = vmatprep.subr.bf16.mxu1 %v12156_v35  ;;  %6529 = vmatprep.subr.bf16.mxu0 %v12157_v31 }
 0x6d8   : > { %4967 = vxpose.xlu1.b32.cont [11/16] (narrow) %v11054_v21, 8  ;;  %4926 = vxpose.xlu0.b32.cont [2/16] (narrow) %v4186_v44, 8  ;;  %v3640_v8 = vpop.xlane.xlu0 %3639  ;;  %v4199_v21 = vpop.f32.mrf.mxu1 }
 0x6d9   : > { %6502 = vmatpush3.bf16.msra.mxu1 %v12156_v35  ;;  %8190 = vrcp.f32 %v3640_v8 }
 0x6da   : > { %6530 = vmatpush3.bf16.msra.mxu0 %v12157_v31  ;;  %6551 = vmatprep.subr.bf16.mxu1 %v12160_v43 }
 0x6db   : > { %6531 = vmatprep.subr.bf16.mxu0 %v12161_v47 }
 0x6dc   : > { %4968 = vxpose.xlu1.b32.cont [12/16] (narrow) %v6354_v23, 8  ;;  %4927 = vxpose.xlu0.b32.cont [3/16] (narrow) %v11069_v25, 8  ;;  %v3676_v55 = vpop.xlane.xlu0 %3675  ;;  %v6318_v25 = vpop.f32.mrf.mxu1  ;;  %v12164_v23 = vld [vmem:[#allocation125_spill] sm:$0xff] }
 0x6dd   : > { %6484 = vmatmul.mubr.bf16.gmra.mxu0 %v4132_v60  ;;  %8192 = vrcp.f32 %v3676_v55  ;;  %v4053_v51 = vmul.f32 %v8185_v52, %v12164_v23  ;;  %v12172_v52 = vld [vmem:[#allocation102_spill] sm:$0xff] }
 0x6de   : > { %6532 = vmatpush3.bf16.msra.mxu0 %v12161_v47  ;;  %8194 = vrcp.f32 %v3670_v42  ;;  %v4202_v61 = vpop.f32.mrf.mxu1 }
 0x6df   : > { %6533 = vmatprep.subr.bf16.mxu0 %v12162_v27  ;;  %8196 = vrcp.f32 %v11079_v10 }
 0x6e0   : > { %4969 = vxpose.xlu1.b32.cont [13/16] (narrow) %v4328_v9, 8  ;;  %4928 = vxpose.xlu0.b32.cont [4/16] (narrow) %v6314_v17, 8  ;;  %v3672_v16 = vpop.xlane.xlu0 %3671  ;;  %v6321_v37 = vpop.f32.mrf.mxu1  ;;  %v12168_v17 = vld [vmem:[#allocation28_spill] sm:$0xff] }
 0x6e1   : > { %8198 = vrcp.f32 %v3672_v16 }
 0x6e2   : > { %6534 = vmatpush3.bf16.msra.mxu0 %v12162_v27  ;;  %v8187_v32 = vpop.eup %8186  ;;  %v4215_v6 = vpop.f32.mrf.mxu1 }
 0x6e3   : > { %6557 = vmatprep.subr.bf16.mxu0 %v12160_v43  ;;  %v8189_v1 = vpop.eup %8188  ;;  %v4056_v10 = vmul.f32 %v8187_v32, %v12163_v39 }
 0x6e4   : > { %4970 = vxpose.xlu1.b32.cont [14/16] (narrow) %v4331_v18, 8  ;;  %4929 = vxpose.xlu0.b32.cont [5/16] (narrow) %v4199_v21, 8  ;;  %v3650_v12 = vpop.xlane.xlu0 %3649  ;;  %v4055_v57 = vmul.f32 %v8189_v1, %v12166_v58  ;;  %v12173_v18 = vld [vmem:[#allocation81_spill] sm:$0xff]  ;;  %v12174_v1 = vld [vmem:[#allocation83_spill] sm:$0xff] }
 0x6e6   : > { %v8191_v49 = vpop.eup %8190  ;;  %v4134_v5 = vpack.c.bf16 %v4056_v10, %v4055_v57 }
 0x6e7   : > { %v4054_v14 = vmul.f32 %v8191_v49, %v12165_v26 }
 0x6e8   : > { %4971 = vxpose.xlu1.b32.cont [15/16] (narrow) %v6357_v46, 8  ;;  %4930 = vxpose.xlu0.b32.cont [6/16] (narrow) %v4202_v61, 8  ;;  %v3646_v30 = vpop.xlane.xlu0 %3645  ;;  %v6322_v46 = vpop.f32.mrf.mxu1 }
 0x6e9   : > { %v4133_v29 = vpack.c.bf16 %v4054_v14, %v4053_v51 }
 0x6ea   : > { %v8193_v42 = vpop.eup %8192  ;;  %v4218_v31 = vpop.f32.mrf.mxu1 }
 0x6eb   : > { %6503 = vmatprep.mubr.bf16.mxu1 %v4133_v29  ;;  %v8195_v15 = vpop.eup %8194  ;;  %v4072_v54 = vmul.f32 %v8193_v42, %v12167_v56  ;;  %v12176_v29 = vld [vmem:[#allocation106_spill] sm:$0xff] }
 0x6ec   : > { %4972 = vxpose.xlu1.b32.end [16/16] (narrow) %v6358_v53, 8  ;;  %4931 = vxpose.xlu0.b32.cont [7/16] (narrow) %v6317_v7, 8  ;;  %v3682_v19 = vpop.xlane.xlu0 %3681  ;;  %v8197_v2 = vpop.eup %8196  ;;  %v4069_v40 = vmul.f32 %v8195_v15, %v12168_v17  ;;  %v12171_v53 = vld [vmem:[#allocation120_spill] sm:$0xff]  ;;  %v12178_v15 = vld [vmem:[#allocation49_spill] sm:$0xff] }
 0x6ed   : > { %6504 = vmatmul.mubr.bf16.vlgmr.msra.gmra.mxu1 %v4134_v5  ;;  %v4071_v20 = vmul.f32 %v8197_v2, %v12170_v13  ;;  %v6325_v24 = vpop.f32.mrf.mxu1 }
 0x6ee   : > { %v8199_v50 = vpop.eup %8198 }
 0x6ef   : > { %v4070_v28 = vmul.f32 %v8199_v50, %v12169_v63  ;;  %v4142_v44 = vpack.c.bf16 %v4072_v54, %v4071_v20  ;;  %v4231_v41 = vpop.f32.mrf.mxu1 }
 0x6f0   : > { %4932 = vxpose.xlu0.b32.cont [8/16] (narrow) %v6318_v25, 8  ;;  %v3678_v0 = vpop.xlane.xlu0 %3677 }
 0x6f1   : > { %v4141_v33 = vpack.c.bf16 %v4070_v28, %v4069_v40  ;;  %v6326_v9 = vpop.f32.mrf.mxu1 }
 0x6f3   : > { %6535 = vmatprep.mubr.bf16.mxu0 %v4141_v33  ;;  %v4234_v16 = vpop.f32.mrf.mxu1 }
 0x6f4   : > { %4933 = vxpose.xlu0.b32.cont [9/16] (narrow) %v4215_v6, 8  ;;  %6536 = vmatmul.mubr.bf16.vlgmr.msra.gmra.mxu0 %v4142_v44  ;;  %v3652_v35 = vpop.xlane.xlu0 %3651  ;;  %v3664_v6 = vpop.xlane.xlu1 %3663  ;;  %v12179_v44 = vld [vmem:[#allocation90_spill] sm:$0xff] }
 0x6f5   : > { %8200 = vrcp.f32 %v3652_v35 }
 0x6f6   : > { %8202 = vrcp.f32 %v3646_v30  ;;  %v12175_v30 = vld [vmem:[#allocation108_spill] sm:$0xff] }
 0x6f7   : > { %8204 = vrcp.f32 %v3650_v12 }
 0x6f8   : > { %4934 = vxpose.xlu0.b32.cont [10/16] (narrow) %v4218_v31, 8  ;;  %v3648_v59 = vpop.xlane.xlu0 %3647 }
 0x6f9   : > { %8206 = vrcp.f32 %v3648_v59 }
 0x6fc   : > { %4935 = vxpose.xlu0.b32.cont [11/16] (narrow) %v6321_v37, 8  ;;  %v3684_v8 = vpop.xlane.xlu0 %3683  ;;  %v12177_v37 = vld [vmem:[#allocation80_spill] sm:$0xff]  ;;  %v3696_v28 = vpop.xlane.xlu1 %3695 }
 0x6fd   : > { %8208 = vrcp.f32 %v3684_v8 }
 0x6fe   : > { %8210 = vrcp.f32 %v3678_v0 }
 0x6ff   : > { %8212 = vrcp.f32 %v3682_v19 }
 0x700   : > { %4936 = vxpose.xlu0.b32.cont [12/16] (narrow) %v6322_v46, 8  ;;  %v3680_v4 = vpop.xlane.xlu0 %3679 }
 0x701   : > { %8214 = vrcp.f32 %v3680_v4 }
 0x702   : > { %v8201_v7 = vpop.eup %8200 }
 0x703   : > { %v8203_v47 = vpop.eup %8202  ;;  %v4060_v27 = vmul.f32 %v8201_v7, %v12171_v53  ;;  %v3668_v7 = vpop.xlane.xlu1 %3667 }
 0x704   : > { %4937 = vxpose.xlu0.b32.cont [13/16] (narrow) %v4231_v41, 8  ;;  %v3658_v60 = vpop.xlane.xlu0 %3657  ;;  %v8205_v55 = vpop.eup %8204  ;;  %v4057_v25 = vmul.f32 %v8203_v47, %v12172_v52  ;;  %v12181_v47 = vld [vmem:[#allocation87_spill] sm:$0xff] }
 0x705   : > { %v4059_v49 = vmul.f32 %v8205_v55, %v12174_v1 }
 0x706   : > { %v8207_v21 = vpop.eup %8206 }
 0x707   : > { %v4058_v32 = vmul.f32 %v8207_v21, %v12173_v18  ;;  %v4136_v39 = vpack.c.bf16 %v4060_v27, %v4059_v49  ;;  %v3700_v53 = vpop.xlane.xlu1 %3699  ;;  %v12182_v49 = vld [vmem:[#allocation85_spill] sm:$0xff] }
 0x708   : > { %4938 = vxpose.xlu0.b32.cont [14/16] (narrow) %v4234_v16, 8  ;;  %v3654_v12 = vpop.xlane.xlu0 %3653 }
 0x709   : > { %v4135_v61 = vpack.c.bf16 %v4058_v32, %v4057_v25 }
 0x70a   : > { %v8209_v10 = vpop.eup %8208 }
 0x70b   : > { %6507 = vmatprep.mubr.bf16.mxu1 %v4135_v61  ;;  %v8211_v51 = vpop.eup %8210  ;;  %v4076_v58 = vmul.f32 %v8209_v10, %v12175_v30 }
 0x70c   : > { %4939 = vxpose.xlu0.b32.cont [15/16] (narrow) %v6325_v24, 8  ;;  %6508 = vmatmul.mubr.bf16.gmra.mxu1 %v4136_v39  ;;  %v3686_v23 = vpop.xlane.xlu0 %3685  ;;  %v8213_v26 = vpop.eup %8212  ;;  %v4073_v42 = vmul.f32 %v8211_v51, %v12176_v29  ;;  %v12180_v24 = vld [vmem:[#allocation84_spill] sm:$0xff] }
 0x70d   : > { %v4075_v19 = vmul.f32 %v8213_v26, %v12178_v15  ;;  %v12183_v26 = vld [vmem:[#allocation88_spill] sm:$0xff]  ;;  %v12185_v15 = vld [vmem:[#allocation82_spill] sm:$0xff] }
 0x70e   : > { %v8215_v14 = vpop.eup %8214 }
 0x70f   : > { %v4074_v5 = vmul.f32 %v8215_v14, %v12177_v37  ;;  %v4144_v50 = vpack.c.bf16 %v4076_v58, %v4075_v19 }
 0x710   : > { %4940 = vxpose.xlu0.b32.end [16/16] (narrow) %v6326_v9, 8  ;;  %v3660_v57 = vpop.xlane.xlu0 %3659 }
 0x711   : > { %8216 = vrcp.f32 %v3660_v57  ;;  %v4143_v2 = vpack.c.bf16 %v4074_v5, %v4073_v42  ;;  %v12184_v57 = vld [vmem:[#allocation112_spill] sm:$0xff] }
 0x712   : > { %8218 = vrcp.f32 %v3654_v12 }
 0x713   : > { %8220 = vrcp.f32 %v3658_v60  ;;  %6539 = vmatprep.mubr.bf16.mxu0 %v4143_v2 }
 0x714   : > { %v3656_v56 = vpop.xlane.xlu0 %3655  ;;  %6540 = vmatmul.mubr.bf16.gmra.mxu0 %v4144_v50 }
 0x715   : > { %8222 = vrcp.f32 %v3656_v56 }
 0x716   : > { %8224 = vrcp.f32 %v3686_v23 }
 0x718   : > { %v3688_v54 = vpop.xlane.xlu0 %3687 }
 0x719   : > { %8226 = vrcp.f32 %v3688_v54 }
 0x71c   : > { %v3690_v17 = vpop.xlane.xlu0 %3689 }
 0x71d   : > { %8228 = vrcp.f32 %v3690_v17 }
 0x71e   : > { %v8217_v40 = vpop.eup %8216 }
 0x71f   : > { %v8219_v63 = vpop.eup %8218  ;;  %v4064_v33 = vmul.f32 %v8217_v40, %v10899_v62 }
 0x720   : > { %v3692_v13 = vpop.xlane.xlu0 %3691  ;;  %v8221_v20 = vpop.eup %8220  ;;  %v4061_v46 = vmul.f32 %v8219_v63, %v12179_v44 }
 0x721   : > { %8230 = vrcp.f32 %v3692_v13  ;;  %v4063_v8 = vmul.f32 %v8221_v20, %v12180_v24 }
 0x722   : > { %v8223_v0 = vpop.eup %8222  ;;  %8232 = vrcp.f32 %v3664_v6 }
 0x723   : > { %v4062_v35 = vmul.f32 %v8223_v0, %v10912_v11  ;;  %v8225_v31 = vpop.eup %8224  ;;  %v4138_v9 = vpack.c.bf16 %v4064_v33, %v4063_v8 }
 0x724   : > { %v3662_v59 = vpop.xlane.xlu0 %3661  ;;  %v4077_v60 = vmul.f32 %v8225_v31, %v12181_v47 }
 0x725   : > { %8234 = vrcp.f32 %v3662_v59  ;;  %v4137_v41 = vpack.c.bf16 %v4062_v35, %v4061_v46 }
 0x726   : > { %v8227_v4 = vpop.eup %8226  ;;  %8236 = vrcp.f32 %v3696_v28 }
 0x727   : > { %6511 = vmatprep.mubr.bf16.mxu1 %v4137_v41  ;;  %v4078_v62 = vmul.f32 %v8227_v4, %v10925_v3 }
 0x728   : > { %6512 = vmatmul.mubr.bf16.gmra.mxu1 %v4138_v9  ;;  %v3694_v55 = vpop.xlane.xlu0 %3693 }
 0x729   : > { %8238 = vrcp.f32 %v3694_v55  ;;  %v4145_v21 = vpack.c.bf16 %v4078_v62, %v4077_v60 }
 0x72a   : > { %8240 = vrcp.f32 %v3668_v7  ;;  %v8229_v11 = vpop.eup %8228 }
 0x72b   : > { %6543 = vmatprep.mubr.bf16.mxu0 %v4145_v21  ;;  %v4079_v52 = vmul.f32 %v8229_v11, %v10937_v34 }
 0x72c   : > { %v3666_v27 = vpop.xlane.xlu0 %3665 }
 0x72d   : > { %8242 = vrcp.f32 %v3666_v27 }
 0x72e   : > { %v8231_v16 = vpop.eup %8230  ;;  %8244 = vrcp.f32 %v3700_v53 }
 0x72f   : > { %v4080_v25 = vmul.f32 %v8231_v16, %v10951_v45  ;;  %v8233_v18 = vpop.eup %8232 }
 0x730   : > { %v3698_v32 = vpop.xlane.xlu0 %3697  ;;  %v4066_v61 = vmul.f32 %v8233_v18, %v12182_v49 }
 0x731   : > { %8246 = vrcp.f32 %v3698_v32  ;;  %v4146_v3 = vpack.c.bf16 %v4080_v25, %v4079_v52 }
 0x732   : > { %v8235_v12 = vpop.eup %8234 }
 0x733   : > { %6544 = vmatmul.mubr.bf16.gmra.mxu0 %v4146_v3  ;;  %v4065_v1 = vmul.f32 %v8235_v12, %v10953_v48  ;;  %v8237_v39 = vpop.eup %8236 }
 0x734   : > { %v4082_v34 = vmul.f32 %v8237_v39, %v12183_v26 }
 0x735   : > { %v4139_v10 = vpack.c.bf16 %v4066_v61, %v4065_v1 }
 0x736   : > { %v8239_v23 = vpop.eup %8238 }
 0x737   : > { %6515 = vmatprep.mubr.bf16.mxu1 %v4139_v10  ;;  %v4081_v51 = vmul.f32 %v8239_v23, %v10973_v36  ;;  %v8241_v14 = vpop.eup %8240 }
 0x738   : > { %v4068_v29 = vmul.f32 %v8241_v14, %v12184_v57 }
 0x739   : > { %v4147_v45 = vpack.c.bf16 %v4082_v34, %v4081_v51 }
 0x73a   : > { %v8243_v30 = vpop.eup %8242 }
 0x73b   : > { %6547 = vmatprep.mubr.bf16.mxu0 %v4147_v45  ;;  %v4067_v58 = vmul.f32 %v8243_v30, %v10989_v22  ;;  %v8245_v42 = vpop.eup %8244 }
 0x73c   : > { %v4084_v19 = vmul.f32 %v8245_v42, %v12185_v15 }
 0x73d   : > { %v4140_v48 = vpack.c.bf16 %v4068_v29, %v4067_v58 }
 0x73e   : > { %v8247_v37 = vpop.eup %8246 }
 0x73f   : > { %6516 = vmatmul.mubr.bf16.gmra.mxu1 %v4140_v48  ;;  %v4083_v5 = vmul.f32 %v8247_v37, %v10995_v38 }
 0x740   : > { %v6377_v2 = vpop.f32.mrf.mxu1  ;;  %6553 = vmatprep.mubr.msk.bf16.mxu1 %vm8432_vm0, %v12160_v43 }
 0x741   : > { %v4148_v36 = vpack.c.bf16 %v4084_v19, %v4083_v5 }
 0x742   : > { %v4377_v50 = vpop.f32.mrf.mxu1 }
 0x743   : > { %4989 = vxpose.xlu0.b32.start [1/16] (narrow) %v4377_v50, 8  ;;  %6548 = vmatmul.mubr.bf16.gmra.mxu0 %v4148_v36 }
 0x744   : > { %v6378_v56 = vpop.f32.mrf.mxu1  ;;  %6559 = vmatprep.mubr.msk.bf16.mxu0 %vm8432_vm0, %v12160_v43 }
 0x746   : > { %v4380_v22 = vpop.f32.mrf.mxu1 }
 0x747   : > { %4990 = vxpose.xlu0.b32.cont [2/16] (narrow) %v4380_v22, 8 }
 0x748   : > { %v6409_v54 = vpop.f32.mrf.mxu0 }
 0x74a   : > { %v4474_v6 = vpop.f32.mrf.mxu0 }
 0x74b   : > { %4991 = vxpose.xlu0.b32.cont [3/16] (narrow) %v6377_v2, 8  ;;  %5021 = vxpose.xlu1.b32.start [1/16] (narrow) %v4474_v6, 8 }
 0x74c   : > { %v6410_v38 = vpop.f32.mrf.mxu0 }
 0x74e   : > { %v4477_v17 = vpop.f32.mrf.mxu0 }
 0x74f   : > { %4992 = vxpose.xlu0.b32.cont [4/16] (narrow) %v6378_v56, 8  ;;  %5022 = vxpose.xlu1.b32.cont [2/16] (narrow) %v4477_v17, 8 }
 0x753   : > { %5023 = vxpose.xlu1.b32.cont [3/16] (narrow) %v6409_v54, 8 }
 0x757   : > { %5024 = vxpose.xlu1.b32.cont [4/16] (narrow) %v6410_v38, 8 }
 0x760   : > { %v6381_v40 = vpop.f32.mrf.mxu1 }
 0x762   : > { %v4393_v63 = vpop.f32.mrf.mxu1 }
 0x763   : > { %4993 = vxpose.xlu0.b32.cont [5/16] (narrow) %v4393_v63, 8 }
 0x764   : > { %v6382_v28 = vpop.f32.mrf.mxu1  ;;  %v6413_v13 = vpop.f32.mrf.mxu0 }
 0x766   : > { %v4396_v20 = vpop.f32.mrf.mxu1  ;;  %v4490_v0 = vpop.f32.mrf.mxu0 }
 0x767   : > { %4994 = vxpose.xlu0.b32.cont [6/16] (narrow) %v4396_v20, 8  ;;  %5025 = vxpose.xlu1.b32.cont [5/16] (narrow) %v4490_v0, 8 }
 0x768   : > { %v6414_v33 = vpop.f32.mrf.mxu0 }
 0x76a   : > { %v4493_v44 = vpop.f32.mrf.mxu0 }
 0x76b   : > { %4995 = vxpose.xlu0.b32.cont [7/16] (narrow) %v6381_v40, 8  ;;  %5026 = vxpose.xlu1.b32.cont [6/16] (narrow) %v4493_v44, 8 }
 0x76c   : > { %v6385_v46 = vpop.f32.mrf.mxu1 }
 0x76e   : > { %v4409_v35 = vpop.f32.mrf.mxu1 }
 0x76f   : > { %4996 = vxpose.xlu0.b32.cont [8/16] (narrow) %v6382_v28, 8  ;;  %5027 = vxpose.xlu1.b32.cont [7/16] (narrow) %v6413_v13, 8 }
 0x770   : > { %v6386_v31 = vpop.f32.mrf.mxu1 }
 0x772   : > { %v4412_v24 = vpop.f32.mrf.mxu1 }
 0x773   : > { %4997 = vxpose.xlu0.b32.cont [9/16] (narrow) %v4409_v35, 8  ;;  %5028 = vxpose.xlu1.b32.cont [8/16] (narrow) %v6414_v33, 8 }
 0x774   : > { %v6417_v59 = vpop.f32.mrf.mxu0  ;;  %v6389_v4 = vpop.f32.mrf.mxu1 }
 0x776   : > { %v4506_v8 = vpop.f32.mrf.mxu0  ;;  %v4425_v9 = vpop.f32.mrf.mxu1 }
 0x777   : > { %4998 = vxpose.xlu0.b32.cont [10/16] (narrow) %v4412_v24, 8  ;;  %5029 = vxpose.xlu1.b32.cont [9/16] (narrow) %v4506_v8, 8 }
 0x778   : > { %v6418_v41 = vpop.f32.mrf.mxu0  ;;  %v6390_v60 = vpop.f32.mrf.mxu1 }
 0x77a   : > { %v4509_v7 = vpop.f32.mrf.mxu0  ;;  %v4428_v55 = vpop.f32.mrf.mxu1 }
 0x77b   : > { %4999 = vxpose.xlu0.b32.cont [11/16] (narrow) %v6385_v46, 8  ;;  %5030 = vxpose.xlu1.b32.cont [10/16] (narrow) %v4509_v7, 8 }
 0x77c   : > { %v6421_v47 = vpop.f32.mrf.mxu0  ;;  %v6441_v11 = vpop.f32.mrf.mxu1 }
 0x77e   : > { %v4522_v62 = vpop.f32.mrf.mxu0  ;;  %v4571_v27 = vpop.f32.mrf.mxu1 }
 0x77f   : > { %5000 = vxpose.xlu0.b32.cont [12/16] (narrow) %v6386_v31, 8  ;;  %5031 = vxpose.xlu1.b32.cont [11/16] (narrow) %v6417_v59, 8 }
 0x780   : > { %v6422_v21 = vpop.f32.mrf.mxu0  ;;  %v6442_v52 = vpop.f32.mrf.mxu1 }
 0x782   : > { %v4525_v53 = vpop.f32.mrf.mxu0  ;;  %v4574_v18 = vpop.f32.mrf.mxu1 }
 0x783   : > { %5001 = vxpose.xlu0.b32.cont [13/16] (narrow) %v4425_v9, 8  ;;  %5032 = vxpose.xlu1.b32.cont [12/16] (narrow) %v6418_v41, 8 }
 0x784   : > { %v6473_v16 = vpop.f32.mrf.mxu0  ;;  %v6445_v3 = vpop.f32.mrf.mxu1 }
 0x786   : > { %v4668_v25 = vpop.f32.mrf.mxu0  ;;  %v4587_v1 = vpop.f32.mrf.mxu1 }
 0x787   : > { %5002 = vxpose.xlu0.b32.cont [14/16] (narrow) %v4428_v55, 8  ;;  %5033 = vxpose.xlu1.b32.cont [13/16] (narrow) %v4522_v62, 8 }
 0x788   : > { %v6474_v32 = vpop.f32.mrf.mxu0  ;;  %v6446_v61 = vpop.f32.mrf.mxu1 }
 0x78a   : > { %v4671_v12 = vpop.f32.mrf.mxu0  ;;  %v4590_v10 = vpop.f32.mrf.mxu1 }
 0x78b   : > { %5003 = vxpose.xlu0.b32.cont [15/16] (narrow) %v6389_v4, 8  ;;  %5034 = vxpose.xlu1.b32.cont [14/16] (narrow) %v4525_v53, 8 }
 0x78c   : > { %v6449_v51 = vpop.f32.mrf.mxu1 }
 0x78d   : > { %v6477_v49 = vpop.f32.mrf.mxu0 }
 0x78e   : > { %v4603_v34 = vpop.f32.mrf.mxu1 }
 0x78f   : > { %5004 = vxpose.xlu0.b32.end [16/16] (narrow) %v6390_v60, 8  ;;  %5035 = vxpose.xlu1.b32.cont [15/16] (narrow) %v6421_v47, 8  ;;  %v4684_v39 = vpop.f32.mrf.mxu0 }
 0x790   : > { %v6450_v45 = vpop.f32.mrf.mxu1 }
 0x791   : > { %v6478_v23 = vpop.f32.mrf.mxu0 }
 0x792   : > { %v4606_v58 = vpop.f32.mrf.mxu1 }
 0x793   : > { %5053 = vxpose.xlu0.b32.start [1/16] (narrow) %v4571_v27, 8  ;;  %5036 = vxpose.xlu1.b32.end [16/16] (narrow) %v6422_v21, 8  ;;  %v4687_v26 = vpop.f32.mrf.mxu0  ;;  %v8434_v27 = vmov 2  }
 0x794   : > { %v6453_v29 = vpop.f32.mrf.mxu1 }
 0x795   : > { %v6481_v14 = vpop.f32.mrf.mxu0 }
 0x796   : > { %v4619_v48 = vpop.f32.mrf.mxu1 }
 0x797   : > { %5054 = vxpose.xlu0.b32.cont [2/16] (narrow) %v4574_v18, 8  ;;  %5085 = vxpose.xlu1.b32.start [1/16] (narrow) %v4668_v25, 8  ;;  %v4700_v30 = vpop.f32.mrf.mxu0  ;;  %v11162_v25 = vld [vmem:[%s11255_s6] sm:$0xff]  ;;  %v8436_v18 = vmov 4  }
 0x798   : > { %v6454_v5 = vpop.f32.mrf.mxu1 }
 0x799   : > { %v6482_v57 = vpop.f32.mrf.mxu0 }
 0x79a   : > { %v4622_v19 = vpop.f32.mrf.mxu1 }
 0x79b   : > { %5055 = vxpose.xlu0.b32.cont [3/16] (narrow) %v6441_v11, 8  ;;  %5086 = vxpose.xlu1.b32.cont [2/16] (narrow) %v4671_v12, 8  ;;  %v4703_v42 = vpop.f32.mrf.mxu0 }
 0x79d   : > { %v6485_v37 = vpop.f32.mrf.mxu0 }
 0x79f   : > { %5056 = vxpose.xlu0.b32.cont [4/16] (narrow) %v6442_v52, 8  ;;  %5087 = vxpose.xlu1.b32.cont [3/16] (narrow) %v6473_v16, 8  ;;  %v4716_v15 = vpop.f32.mrf.mxu0  ;;  %v11156_v16 = vld [vmem:[%s11255_s6 + $0x8] sm:$0xff]  ;;  %v8435_v52 = vmov 3  }
 0x7a1   : > { %v6486_v2 = vpop.f32.mrf.mxu0 }
 0x7a3   : > { %5057 = vxpose.xlu0.b32.cont [5/16] (narrow) %v4587_v1, 8  ;;  %5088 = vxpose.xlu1.b32.cont [4/16] (narrow) %v6474_v32, 8  ;;  %v4719_v36 = vpop.f32.mrf.mxu0  ;;  %v4941_v32 = vpop.trf.xlu0 }
 0x7a7   : > { %5058 = vxpose.xlu0.b32.cont [6/16] (narrow) %v4590_v10, 8  ;;  %5089 = vxpose.xlu1.b32.cont [5/16] (narrow) %v4684_v39, 8 }
 0x7ab   : > { %5059 = vxpose.xlu0.b32.cont [7/16] (narrow) %v6445_v3, 8  ;;  %5090 = vxpose.xlu1.b32.cont [6/16] (narrow) %v4687_v26, 8  ;;  %v4973_v3 = vpop.trf.xlu1 }
 0x7ac   : > { %v5191_v39 = vcombine.low %v4941_v32, %v4973_v3 }
 0x7ad   : > { %v6505_v50 = vpop.f32.mrf.mxu1 }
 0x7af   : > { %5060 = vxpose.xlu0.b32.cont [8/16] (narrow) %v6446_v61, 8  ;;  %5091 = vxpose.xlu1.b32.cont [7/16] (narrow) %v6477_v49, 8  ;;  %v4765_v56 = vpop.f32.mrf.mxu1 }
 0x7b1   : > { %v6506_v54 = vpop.f32.mrf.mxu1 }
 0x7b3   : > { %5061 = vxpose.xlu0.b32.cont [9/16] (narrow) %v4603_v34, 8  ;;  %5092 = vxpose.xlu1.b32.cont [8/16] (narrow) %v6478_v23, 8  ;;  %v4768_v38 = vpop.f32.mrf.mxu1  ;;  %v12186_v34 = vld [vmem:[#allocation14_spill] sm:$0xff] }
 0x7b4   : > { %v6537_v22 = vpop.f32.mrf.mxu0 }
 0x7b6   : > { %v4862_v6 = vpop.f32.mrf.mxu0 }
 0x7b7   : > { %5062 = vxpose.xlu0.b32.cont [10/16] (narrow) %v4606_v58, 8  ;;  %5093 = vxpose.xlu1.b32.cont [9/16] (narrow) %v4700_v30, 8 }
 0x7b8   : > { %v6538_v17 = vpop.f32.mrf.mxu0 }
 0x7ba   : > { %v4865_v40 = vpop.f32.mrf.mxu0 }
 0x7bb   : > { %5063 = vxpose.xlu0.b32.cont [11/16] (narrow) %v6449_v51, 8  ;;  %5094 = vxpose.xlu1.b32.cont [10/16] (narrow) %v4703_v42, 8 }
 0x7bf   : > { %5064 = vxpose.xlu0.b32.cont [12/16] (narrow) %v6450_v45, 8  ;;  %5095 = vxpose.xlu1.b32.cont [11/16] (narrow) %v6481_v14, 8  ;;  %v5199_v14 = vrot.slane %v5191_v39, %v12186_v34  ;;  %v8438_v39 = vmov 6  }
 0x7c3   : > { %5065 = vxpose.xlu0.b32.cont [13/16] (narrow) %v4619_v48, 8  ;;  %5096 = vxpose.xlu1.b32.cont [12/16] (narrow) %v6482_v57, 8 }
 0x7c7   : > { %5066 = vxpose.xlu0.b32.cont [14/16] (narrow) %v4622_v19, 8  ;;  %5097 = vxpose.xlu1.b32.cont [13/16] (narrow) %v4716_v15, 8 }
 0x7cb   : > { %5067 = vxpose.xlu0.b32.cont [15/16] (narrow) %v6453_v29, 8  ;;  %5098 = vxpose.xlu1.b32.cont [14/16] (narrow) %v4719_v36, 8 }
 0x7cc   : > { %v6509_v63 = vpop.f32.mrf.mxu1 }
 0x7ce   : > { %v4781_v28 = vpop.f32.mrf.mxu1 }
 0x7cf   : > { %5068 = vxpose.xlu0.b32.end [16/16] (narrow) %v6454_v5, 8  ;;  %5099 = vxpose.xlu1.b32.cont [15/16] (narrow) %v6485_v37, 8  ;;  %v5005_v12 = vpop.trf.xlu0  ;;  %v7731_v37 = vld [vmem:[#allocation2] sm:$0xff]   ;;  %v8437_v5 = vmov 5  }
 0x7d0   : > { %v6510_v20 = vpop.f32.mrf.mxu1 }
 0x7d2   : > { %v4784_v33 = vpop.f32.mrf.mxu1 }
 0x7d3   : > { %5117 = vxpose.xlu0.b32.start [1/16] (narrow) %v4765_v56, 8  ;;  %5100 = vxpose.xlu1.b32.end [16/16] (narrow) %v6486_v2, 8  ;;  %v5037_v1 = vpop.trf.xlu1 }
 0x7d4   : > { %v6541_v13 = vpop.f32.mrf.mxu0  ;;  %v5192_v10 = vcombine.low %v5005_v12, %v5037_v1 }
 0x7d6   : > { %v4878_v0 = vpop.f32.mrf.mxu0  ;;  %v5206_v45 = vrot.slane %v5192_v10, %v12186_v34 }
 0x7d7   : > { %5118 = vxpose.xlu0.b32.cont [2/16] (narrow) %v4768_v38, 8  ;;  %5149 = vxpose.xlu1.b32.start [1/16] (narrow) %v4862_v6, 8  ;;  %v12187_v6 = vld [vmem:[#allocation12_spill] sm:$0xff] }
 0x7d8   : > { %v6542_v44 = vpop.f32.mrf.mxu0  ;;  %v5207_v29 = vcombine.low %v5199_v14, %v5206_v45 }
 0x7da   : > { %v4881_v46 = vpop.f32.mrf.mxu0 }
 0x7db   : > { %5119 = vxpose.xlu0.b32.cont [3/16] (narrow) %v6505_v50, 8  ;;  %5150 = vxpose.xlu1.b32.cont [2/16] (narrow) %v4865_v40, 8 }
 0x7df   : > { %5120 = vxpose.xlu0.b32.cont [4/16] (narrow) %v6506_v54, 8  ;;  %5151 = vxpose.xlu1.b32.cont [3/16] (narrow) %v6537_v22, 8 }
 0x7e3   : > { %5121 = vxpose.xlu0.b32.cont [5/16] (narrow) %v4781_v28, 8  ;;  %5152 = vxpose.xlu1.b32.cont [4/16] (narrow) %v6538_v17, 8  ;;  %v12188_v17 = vld [vmem:[#allocation13_spill] sm:$0xff] }
 0x7e7   : > { %5122 = vxpose.xlu0.b32.cont [6/16] (narrow) %v4784_v33, 8  ;;  %5153 = vxpose.xlu1.b32.cont [5/16] (narrow) %v4878_v0, 8 }
 0x7e8   : > { %v6513_v35 = vpop.f32.mrf.mxu1 }
 0x7ea   : > { %v4797_v31 = vpop.f32.mrf.mxu1 }
 0x7eb   : > { %5123 = vxpose.xlu0.b32.cont [7/16] (narrow) %v6509_v63, 8  ;;  %5154 = vxpose.xlu1.b32.cont [6/16] (narrow) %v4881_v46, 8 }
 0x7ec   : > { %v6514_v59 = vpop.f32.mrf.mxu1 }
 0x7ee   : > { %v4800_v41 = vpop.f32.mrf.mxu1 }
 0x7ef   : > { %5124 = vxpose.xlu0.b32.cont [8/16] (narrow) %v6510_v20, 8  ;;  %5155 = vxpose.xlu1.b32.cont [7/16] (narrow) %v6541_v13, 8 }
 0x7f3   : > { %5125 = vxpose.xlu0.b32.cont [9/16] (narrow) %v4797_v31, 8  ;;  %5156 = vxpose.xlu1.b32.cont [8/16] (narrow) %v6542_v44, 8  ;;  %v6545_v24 = vpop.f32.mrf.mxu0 }
 0x7f5   : > { %v4894_v8 = vpop.f32.mrf.mxu0 }
 0x7f7   : > { %5126 = vxpose.xlu0.b32.cont [10/16] (narrow) %v4800_v41, 8  ;;  %5157 = vxpose.xlu1.b32.cont [9/16] (narrow) %v4894_v8, 8  ;;  %v6546_v4 = vpop.f32.mrf.mxu0 }
 0x7f9   : > { %v4897_v7 = vpop.f32.mrf.mxu0 }
 0x7fb   : > { %5127 = vxpose.xlu0.b32.cont [11/16] (narrow) %v6513_v35, 8  ;;  %5158 = vxpose.xlu1.b32.cont [10/16] (narrow) %v4897_v7, 8 }
 0x7ff   : > { %5128 = vxpose.xlu0.b32.cont [12/16] (narrow) %v6514_v59, 8  ;;  %v6517_v9 = vpop.f32.mrf.mxu1  ;;  %5159 = vxpose.xlu1.b32.cont [11/16] (narrow) %v6545_v24, 8 }
 0x801   : > { %v4813_v47 = vpop.f32.mrf.mxu1 }
 0x803   : > { %5129 = vxpose.xlu0.b32.cont [13/16] (narrow) %v4813_v47, 8  ;;  %v6518_v60 = vpop.f32.mrf.mxu1  ;;  %5160 = vxpose.xlu1.b32.cont [12/16] (narrow) %v6546_v4, 8  ;;  %v6549_v62 = vpop.f32.mrf.mxu0 }
 0x805   : > { %v4816_v55 = vpop.f32.mrf.mxu1  ;;  %v4910_v21 = vpop.f32.mrf.mxu0 }
 0x807   : > { %5130 = vxpose.xlu0.b32.cont [14/16] (narrow) %v4816_v55, 8  ;;  %5161 = vxpose.xlu1.b32.cont [13/16] (narrow) %v4910_v21, 8  ;;  %v6550_v11 = vpop.f32.mrf.mxu0 }
 0x809   : > { %v4913_v53 = vpop.f32.mrf.mxu0 }
 0x80b   : > { %5131 = vxpose.xlu0.b32.cont [15/16] (narrow) %v6517_v9, 8  ;;  %5162 = vxpose.xlu1.b32.cont [14/16] (narrow) %v4913_v53, 8 }
 0x80f   : > { %5132 = vxpose.xlu0.b32.end [16/16] (narrow) %v6518_v60, 8  ;;  %5163 = vxpose.xlu1.b32.cont [15/16] (narrow) %v6549_v62, 8  ;;  %v5069_v49 = vpop.trf.xlu0 }
 0x813   : > { %5164 = vxpose.xlu1.b32.end [16/16] (narrow) %v6550_v11, 8  ;;  %v5101_v61 = vpop.trf.xlu1 }
 0x814   : > { %v5208_v51 = vcombine.low %v5069_v49, %v5101_v61  ;;  %v7732_v61 = vld [vmem:[#allocation5] sm:$0xff]  }
 0x816   : > { %v5216_v58 = vrot.slane %v5208_v51, %v12186_v34 }
 0x831   : > { %7720 = vset.pattern.permute.xlu1 %v8434_v27 }
 0x832   : > { %5233 = vperm.xlu1 %7720, %v11156_v16  }
 0x836   : > { %7721 = vset.pattern.permute.xlu1 %v8435_v52 }
 0x837   : > { %5312 = vperm.xlu1 %7721, %v11162_v25  }
 0x838   : > { %7719 = vset.pattern.permute.xlu0 %v8434_v27 }
 0x839   : > { %5229 = vperm.xlu0 %7719, %v11162_v25  }
 0x83b   : > { %7723 = vset.pattern.permute.xlu1 %v8436_v18 }
 0x83c   : > { %5322 = vperm.xlu1 %7723, %v11162_v25  }
 0x83d   : > { %7722 = vset.pattern.permute.xlu0 %v8435_v52 }
 0x83e   : > { %5316 = vperm.xlu0 %7722, %v11156_v16  }
 0x840   : > { %5326 = vperm.xlu1 %7723, %v11156_v16  }
 0x842   : > { %7724 = vset.pattern.permute.xlu0 %v8437_v5 }
 0x843   : > { %5335 = vperm.xlu0 %7724, %v11162_v25  }
 0x844   : > { %7725 = vset.pattern.permute.xlu1 %v8437_v5 }
 0x845   : > { %5339 = vperm.xlu1 %7725, %v11156_v16  }
 0x847   : > { %7727 = vset.pattern.permute.xlu0 %v8438_v39 }
 0x848   : > { %5453 = vperm.xlu0 %7727, %v11156_v16  }
 0x849   : > { %7726 = vset.pattern.permute.xlu1 %v8438_v39 }
 0x84a   : > { %5449 = vperm.xlu1 %7726, %v11162_v25  }
 0x84f   : > { %v5133_v23 = vpop.trf.xlu0 }
 0x853   : > { %v5165_v26 = vpop.trf.xlu1 }
 0x854   : > { %v5209_v30 = vcombine.low %v5133_v23, %v5165_v26 }
 0x856   : > { %v5223_v57 = vrot.slane %v5209_v30, %v12186_v34 }
 0x858   : > { %v5224_v42 = vcombine.low %v5216_v58, %v5223_v57 }
 0x85a   : > { %v5227_v48 = vpack.c.bf16 %v5224_v42, %v5207_v29 }
 0x85c   : > { %6552 = vmatpush3.bf16.msra.mxu1 %v5227_v48 }
 0x85d   : > { %6563 = vmatprep.subr.bf16.mxu1 %v12160_v43 }
 0x85f   : > { %6554 = vmatmul.mubr.msk.bf16.vlgmr.msra.gmra.mxu1 %vm483_vm1, %v7731_v37 }
 0x860   : > { %6565 = vmatprep.mubr.msk.bf16.mxu1 %vm8432_vm0, %v12160_v43 }
 0x8ad   : > { %v5234_v36 = vpop.permute.xlu1 %5233 }
 0x8b2   : > { %v5313_v55 = vpop.permute.xlu1 %5312 }
 0x8b4   : > { %v5230_v15 = vpop.permute.xlu0 %5229 }
 0x8b7   : > { %v5323_v21 = vpop.permute.xlu1 %5322 }
 0x8b9   : > { %v5317_v53 = vpop.permute.xlu0 %5316 }
 0x8bb   : > { %v5327_v3 = vpop.permute.xlu1 %5326 }
 0x8be   : > { %v5336_v10 = vpop.permute.xlu0 %5335 }
 0x8c0   : > { %v5340_v34 = vpop.permute.xlu1 %5339 }
 0x91f   : > { %v5278_v19 = vpop.f32.mrf.mxu1 }
 0x920   : > { %v5279_v50 = vadd.f32 %v5278_v19, %v5230_v15 }
 0x921   : > { %v6555_v2 = vpop.f32.mrf.mxu1 }
 0x922   : > { %v11180_v38 = vadd.f32 %v5279_v50, %v12187_v6 }
 0x923   : > { %v5281_v56 = vpop.f32.mrf.mxu1 }
 0x924   : > { %v5282_v22 = vadd.f32 %v5281_v56, %v5234_v36 }
 0x925   : > { %v6556_v54 = vpop.f32.mrf.mxu1 }
 0x926   : > { %v11183_v43 = vadd.f32 %v5282_v22, %v12188_v17 }
 0x928   : > { %v5287_v40 = vadd.f32 %v11183_v43, %v11180_v38 }
 0x92a   : > { %v5288_v63 = vrot.slane %v5287_v40, 4 }
 0x92c   : > { %v5289_v28 = vadd.f32 %v5288_v63, %v5287_v40 }
 0x92e   : > { %v5290_v13 = vrot.slane %v5289_v28, 2 }
 0x930   : > { %v5291_v20 = vadd.f32 %v5290_v13, %v5289_v28 }
 0x932   : > { %v5292_v0 = vrot.slane %v5291_v20, 1 }
 0x934   : > { %v5293_v33 = vadd.f32 %v5292_v0, %v5291_v20 }
 0x936   : > { %v5294_v44 = vmul.f32 0.0625, %v5293_v33 }
 0x938   : > { %v5295_v46 = vsub.f32 %v11180_v38, %v5294_v44  ;;  %v5296_v35 = vsub.f32 %v11183_v43, %v5294_v44 }
 0x93a   : > { %v5297_v31 = vmul.f32 %v5295_v46, %v5295_v46  ;;  %v5298_v59 = vmul.f32 %v5296_v35, %v5296_v35 }
 0x93c   : > { %v5299_v24 = vadd.f32 %v5298_v59, %v5297_v31 }
 0x93e   : > { %v5300_v8 = vrot.slane %v5299_v24, 4 }
 0x940   : > { %v5301_v41 = vadd.f32 %v5300_v8, %v5299_v24 }
 0x942   : > { %v5302_v4 = vrot.slane %v5301_v41, 2 }
 0x944   : > { %v5303_v7 = vadd.f32 %v5302_v4, %v5301_v41 }
 0x946   : > { %v5304_v9 = vrot.slane %v5303_v7, 1 }
 0x948   : > { %v5305_v47 = vadd.f32 %v5304_v9, %v5303_v7 }
 0x94a   : > { %v5306_v60 = vmul.f32 0.0625, %v5305_v47 }
 0x94c   : > { %v5307_v62 = vadd.f32 1e-05, %v5306_v60 }
 0x94e   : > { %8248 = vrsqrt.f32 %v5307_v62 }
 0x95b   : > { %v8249_v11 = vpop.eup %8248 }
 0x95c   : > { %v5309_v27 = vmul.f32 %v8249_v11, %v5295_v46  ;;  %v5310_v52 = vmul.f32 %v8249_v11, %v5296_v35 }
 0x95e   : > { %v5319_v18 = vmul.f32 %v5313_v55, %v5309_v27  ;;  %v5320_v32 = vmul.f32 %v5317_v53, %v5310_v52 }
 0x960   : > { %v5329_v12 = vadd.f32 %v5323_v21, %v5319_v18  ;;  %v5330_v1 = vadd.f32 %v5327_v3, %v5320_v32 }
 0x962   : > { %v5333_v49 = vpack.c.bf16 %v5330_v1, %v5329_v12 }
 0x964   : > { %6558 = vmatpush3.bf16.msra.mxu0 %v5333_v49  ;;  %v7733_v49 = vld [vmem:[#allocation7] sm:$0xff]  }
 0x967   : > { %6560 = vmatmul.mubr.msk.bf16.vlgmr.msra.gmra.mxu0 %vm483_vm1, %v7732_v61  ;;  %v5450_v61 = vpop.permute.xlu1 %5449 }
 0xa27   : > { %v5384_v23 = vpop.f32.mrf.mxu0 }
 0xa28   : > { %v5385_v51 = vadd.f32 %v5384_v23, %v5336_v10 }
 0xa29   : > { %v6561_v26 = vpop.f32.mrf.mxu0 }
 0xa2a   : > { %v5393_v14 = vmul.f32 0.70710677, %v5385_v51  ;;  %v5391_v52 = vmul.f32 0.5, %v5385_v51  ;;  %v5454_v26 = vpop.permute.xlu0 %5453 }
 0xa2b   : > { %v5387_v45 = vpop.f32.mrf.mxu0 }
 0xa2c   : > { %v5395_v30 = vand.u32 2147483647, %v5393_v14  ;;  %v5388_v58 = vadd.f32 %v5387_v45, %v5340_v34  ;;  %vm5435_vm3 = vcmp.ge.f32.partialorder %v5393_v14, 0.0 }
 0xa2d   : > { %v6562_v57 = vpop.f32.mrf.mxu0 }
 0xa2e   : > { %v5397_v29 = vmul.f32 0.3275911, %v5395_v30  ;;  %v5394_v42 = vmul.f32 0.70710677, %v5388_v58  ;;  %v5423_v25 = vsub.f32 0.0, %v5395_v30  ;;  %v5392_v18 = vmul.f32 0.5, %v5388_v58 }
 0xa30   : > { %v5399_v48 = vadd.f32 1.0, %v5397_v29  ;;  %v5396_v37 = vand.u32 2147483647, %v5394_v42  ;;  %v5425_v16 = vmul.f32 %v5423_v25, %v5395_v30  ;;  %vm5436_vm4 = vcmp.ge.f32.partialorder %v5394_v42, 0.0 }
 0xa32   : > { %8250 = vrcp.f32 %v5399_v48  ;;  %v5398_v5 = vmul.f32 0.3275911, %v5396_v37  ;;  %v5424_v19 = vsub.f32 0.0, %v5396_v37  ;;  %v5427_v50 = vmul.f32 1.442695, %v5425_v16 }
 0xa34   : > { %v5400_v15 = vadd.f32 1.0, %v5398_v5  ;;  %v5426_v56 = vmul.f32 %v5424_v19, %v5396_v37 }
 0xa36   : > { %8252 = vrcp.f32 %v5400_v15  ;;  %v5429_v40 = vmul.f32 1.442695, %v5426_v56 }
 0xa37   : > { %8254 = vpow2.f32 %v5427_v50 }
 0xa38   : > { %8256 = vpow2.f32 %v5429_v40 }
 0xa3f   : > { %v8251_v2 = vpop.eup %8250 }
 0xa40   : > { %v5405_v36 = vmul.f32 1.0614054, %v8251_v2 }
 0xa42   : > { %v5407_v22 = vadd.f32 -1.4531521, %v5405_v36 }
 0xa43   : > { %v8253_v54 = vpop.eup %8252 }
 0xa44   : > { %v5409_v6 = vmul.f32 %v8251_v2, %v5407_v22  ;;  %v5406_v17 = vmul.f32 1.0614054, %v8253_v54  ;;  %v8255_v8 = vpop.eup %8254 }
 0xa45   : > { %v8257_v47 = vpop.eup %8256 }
 0xa46   : > { %v5411_v63 = vadd.f32 1.4214138, %v5409_v6  ;;  %v5408_v28 = vadd.f32 -1.4531521, %v5406_v17 }
 0xa48   : > { %v5413_v13 = vmul.f32 %v8251_v2, %v5411_v63  ;;  %v5410_v20 = vmul.f32 %v8253_v54, %v5408_v28 }
 0xa4a   : > { %v5415_v0 = vadd.f32 -0.28449672, %v5413_v13  ;;  %v5412_v33 = vadd.f32 1.4214138, %v5410_v20 }
 0xa4c   : > { %v5417_v44 = vmul.f32 %v8251_v2, %v5415_v0  ;;  %v5414_v46 = vmul.f32 %v8253_v54, %v5412_v33 }
 0xa4e   : > { %v5419_v35 = vadd.f32 0.2548296, %v5417_v44  ;;  %v5416_v31 = vadd.f32 -0.28449672, %v5414_v46 }
 0xa50   : > { %v5421_v59 = vmul.f32 %v8251_v2, %v5419_v35  ;;  %v5418_v24 = vmul.f32 %v8253_v54, %v5416_v31 }
 0xa52   : > { %v5431_v41 = vmul.f32 %v8255_v8, %v5421_v59  ;;  %v5420_v4 = vadd.f32 0.2548296, %v5418_v24 }
 0xa54   : > { %v5433_v7 = vsub.f32 1.0, %v5431_v41  ;;  %v5422_v9 = vmul.f32 %v8253_v54, %v5420_v4 }
 0xa56   : > { %v5437_v60 = vsub.f32 0.0, %v5433_v7  ;;  %v5432_v62 = vmul.f32 %v8257_v47, %v5422_v9 }
 0xa58   : > { %v5439_v55 = vsel %vm5435_vm3, %v5433_v7, %v5437_v60  ;;  %v5434_v21 = vsub.f32 1.0, %v5432_v62 }
 0xa59   : > { %v5441_v53 = vadd.f32 1.0, %v5439_v55 }
 0xa5a   : > { %v5438_v11 = vsub.f32 0.0, %v5434_v21 }
 0xa5b   : > { %v5443_v3 = vmul.f32 %v5441_v53, %v5391_v52 }
 0xa5c   : > { %v5440_v27 = vsel %vm5436_vm4, %v5434_v21, %v5438_v11 }
 0xa5d   : > { %v5442_v32 = vadd.f32 1.0, %v5440_v27 }
 0xa5f   : > { %v5444_v12 = vmul.f32 %v5442_v32, %v5392_v18 }
 0xa61   : > { %v5447_v1 = vpack.c.bf16 %v5444_v12, %v5443_v3 }
 0xa63   : > { %6564 = vmatpush3.bf16.msra.mxu1 %v5447_v1 }
 0xa66   : > { %6566 = vmatmul.mubr.msk.bf16.vlgmr.msra.gmra.mxu1 %vm483_vm1, %v7733_v49 }
 0xb26   : > { %v5498_v39 = vpop.f32.mrf.mxu1 }
 0xb27   : > { %v5499_v10 = vadd.f32 %v5498_v39, %v5450_v61 }
 0xb28   : > { %v6567_v23 = vpop.f32.mrf.mxu1 }
 0xb29   : > { %v5505_v51 = vadd.f32 %v5499_v10, %v11180_v38 }
 0xb2a   : > { %v5501_v34 = vpop.f32.mrf.mxu1 }
 0xb2b   : > { %5507 = vst [vmem:[%s381_s15] sm:$0xff] %v5505_v51  ;;  %v5502_v14 = vadd.f32 %v5501_v34, %v5454_v26 }
 0xb2c   : > { %v6568_v45 = vpop.f32.mrf.mxu1 }
 0xb2d   : > { %v5506_v30 = vadd.f32 %v5502_v14, %v11183_v43 }
 0xb2f   : > { %5508 = vst [vmem:[%s381_s15 + $0x8] sm:$0xff] %v5506_v30 }
 0xb30   : > { %8351 = shalt.err (!%p8348_p9)
}
 0xb31   : > { %s8352_s22 = scalar_lea.hbm %s11199_s16, 256  ;;  %s8356_s12 = scalar_lea.hbm %s11256_s7, 512 }
 0xb32   : > { %p8353_p12 = scmp.ne.s32.totalorder %s11199_s16, %s8352_s22  ;;  %p8357_p2 = scmp.lt.s32.totalorder %s11199_s16, %s11256_s7 }
 0xb33   : > { %p8358_p5 = scmp.lt.s32.totalorder %s8356_s12, %s8352_s22 }
 0xb34   : > { %p8354_p1 = pnand %p8353_p12, %p8522_p4 }
 0xb35   : > { %p8359_p10 = por %p8358_p5, %p8357_p2 }
 0xb36   : > { %p8355_p8 = pneg %p8354_p1 }
 0xb38   : > { %p8360_p11 = pnand %p8359_p10, %p8355_p8 }
 0xb3a   : > { %8363 = shalt.err (!%p8360_p11)
}
 0xb3b   : > { %s8440_s23 = smov 128   ;;  %s8441_s30 = smov 8  }
 0xb3c   : > { %6645 = dma.vmem_to_hbm [thread:$0]  (%p8522_p4), %s11201_s19, 256, %s11199_s16, %s11204_s27, %s8440_s23, %s8440_s23, %s8441_s30  }
 0xb3d PF: > { %p6667_p13 = scmp.ge.s32.totalorder %s8422_s29, 2  ;;  %s5538_s17 = sand.u32 1, %s8402_s24  }
 0xb3e   : > { %p12189_p0 = scmp.ne.s32.totalorder %s11517_s13, 0  ;;  %s5539_s20 = scalar_lea.sflag [#allocation4], %s5538_s17 }
 0xb40   : > { %p6658_p3 = pnand %p6667_p13, %p12189_p0 }
 0xb42   : > { %p6659_p6 = pneg %p6658_p3 }
 0xb44   : > { %8397 = dma.done.wait (%p6659_p6), %s5539_s20, 256  }
 0xb45   : > { %8399 = vsyncadd (%p6659_p6), %s5539_s20, 4294967040  ;;  %s22_s29 = sadd.s32 1, %s8422_s29   ;;  %s12190_s24 = smov %s8406_s25 }
 0xb46   : > { %p19_p7 = scmp.ge.s32.totalorder %s22_s29, 4   ;;  %s12191_s25 = smov %s8410_s26 }
 0xb47   : > { %s12192_s26 = smov %s8535_s14  ;;  %s12193_s27 = smov %s8418_s28 }
 0xb48   : > { %s12194_s28 = smov %s12196_s9  ;;  %21 = sbr.rel (!%p19_p7) target bundleno = 6 (0x6), region = 109 }
 0xb4d   :  { %5544 = vsyncpa [#allocation3], 1 }
 0xb4e   :  { %5546 = vsyncpa [#allocation3 + $0x1], 1 }
 0xb4f   :  { %5547 = vsyncpa [#allocation6], 1 }
 0xb50   :  { %5548 = vsyncpa [#allocation4], 1 }
 0xb51   :  { %5550 = vsyncpa [#allocation4 + $0x1], 1 }

</bundles_post_ra>
